<compile_context>
chip_gen: v7x
topology: tpu7x:2x2x1
jax: 0.10.0
libtpu: 0.0.40
codegen_flags: <defaults>
</compile_context>

<pallas_src>
import functools
import math

import jax
import jax.numpy as jnp
from jax import lax
from jax.experimental import pallas as pl
from jax.experimental.pallas import tpu as pltpu

EPS = 1e-5  # nn.LayerNorm default eps


def _softplus(x):
    # numerically stable softplus built only from exp/log/abs (Mosaic-lowerable)
    return jnp.maximum(x, 0.0) + jnp.log(1.0 + jnp.exp(-jnp.abs(x)))


def _layer_norm(v, g, b):
    mu = jnp.mean(v, axis=-1, keepdims=True)
    var = jnp.mean((v - mu) ** 2, axis=-1, keepdims=True)
    return (v - mu) * jax.lax.rsqrt(var + EPS) * g + b


def _silu_ref(x):
    # pure-jnp SiLU for the reference path (outside Pallas)
    return x / (1.0 + jnp.exp(-x))


def _silu_k(x):
    # kernel SiLU: divide goes to the EUP via approx reciprocal (VALU is the busy unit)
    return x * pl.reciprocal(1.0 + jnp.exp(-x), approx=True)


# ---------------------------------------------------------------------------
# Fused PVMLayer kernel: one grid step per batch element.
# ---------------------------------------------------------------------------
def _pvm_kernel(x_ref, g_ref, b_ref, w_in_x_ref, w_in_z_ref, cw_ref, cb_ref,
                w_b_ref, w_c_ref, w_dtf_ref, bdt_ref, a_ref, d_ref,
                w_out_ref, w_proj_ref, bp_ref, rdt_ref, rb_ref, rred_ref,
                skip_ref, o_ref, dA_ref, dBx_ref, cy_ref,
                *, Lp, nc, di, ds, K, U):
    f32 = jnp.float32
    NCDI = nc * di          # all chunks' d_inner lanes, side by side
    NDS = nc * di * ds      # all chunks' flattened (i, s) state lanes

    g = g_ref[...]
    bb = b_ref[...]
    xl = x_ref[0]                                                    # (Lp, C)

    # ---- LayerNorm #1 over channels --------------------------------------
    xn = _layer_norm(xl, g, bb)                                      # (Lp, C)

    # ---- in_proj for all nc chunks at once (block-diagonal weights) ------
    xin = jnp.dot(xn, w_in_x_ref[...], preferred_element_type=f32)   # (Lp, NCDI)
    z = jnp.dot(xn, w_in_z_ref[...], preferred_element_type=f32)     # (Lp, NCDI)

    # ---- causal depthwise conv1d (kernel K) via XLU rolls + causal mask --
    cw = cw_ref[...]                                                 # (K, NCDI)
    row = lax.broadcasted_iota(jnp.int32, (Lp, NCDI), 0)
    xc = xin * cw[K - 1:K, :]                                        # tap with shift 0
    for k in range(K - 1):                                           # unrolled, K=4
        s = K - 1 - k                                                # static shift
        tap = pltpu.roll(xin, shift=s, axis=0)                       # xin[t - s]
        tap = jnp.where(row >= s, tap, 0.0)                          # causal zero-fill
        xc = xc + tap * cw[k:k + 1, :]
    xc = _silu_k(xc + cb_ref[...])                                   # (Lp, NCDI)

    # ---- input-dependent SSM parameters, all chunks batched --------------
    # dt_proj folded into the dt columns of x_proj (one matmul).
    dt_all = _softplus(jnp.dot(xc, w_dtf_ref[...],
                               preferred_element_type=f32) + bdt_ref[...])  # (Lp, NCDI)
    b_all = jnp.dot(xc, w_b_ref[...], preferred_element_type=f32)    # (Lp, nc*ds)
    c_all = jnp.dot(xc, w_c_ref[...], preferred_element_type=f32)    # (Lp, nc*ds)

    # Expand onto the flattened (chunk, i, s) lanes with 0/1 block-diagonal
    # matrices: everything for the scan is computed in single big ops.
    dt_exp = jnp.dot(dt_all, rdt_ref[...], preferred_element_type=f32)       # (Lp, NDS)
    dA_ref[...] = jnp.exp(dt_exp * a_ref[...])                               # exp(dt*A)
    dBx_ref[...] = (jnp.dot(dt_all * xc, rdt_ref[...], preferred_element_type=f32) *
                    jnp.dot(b_all, rb_ref[...], preferred_element_type=f32))  # dt*x*B
    cy_ref[...] = jnp.dot(c_all, rb_ref[...], preferred_element_type=f32)     # C_t

    # ---- single fused selective scan over all chunks ----------------------
    # (U, NDS) block loads / one block store per fori iteration; the 8 dependent
    # steps run on in-register row slices.  cy is consumed in place: cy[t] <- h_t*C_t.
    def scan_block(blk, h):
        base = pl.multiple_of(blk * U, U)
        da = dA_ref[pl.ds(base, U), :]                               # (U, NDS)
        dbx = dBx_ref[pl.ds(base, U), :]
        cy = cy_ref[pl.ds(base, U), :]
        rows = []
        for u in range(U):                                           # unrolled, U=8
            h = da[u:u + 1, :] * h + dbx[u:u + 1, :]
            rows.append(h * cy[u:u + 1, :])
        cy_ref[pl.ds(base, U), :] = jnp.concatenate(rows, axis=0)
        return h

    lax.fori_loop(0, Lp // U, scan_block, jnp.zeros((1, NDS), jnp.float32))

    # y[t, c*di+i] = sum_s h_t[c,i,s] * C_t[c,s]  -> one block-diagonal reduction
    y = jnp.dot(cy_ref[...], rred_ref[...], preferred_element_type=f32)  # (Lp, NCDI)
    y = y + xc * d_ref[...]                                          # D skip
    y = y * _silu_k(z)                                               # gate
    out_m = jnp.dot(y, w_out_ref[...], preferred_element_type=f32)   # (Lp, C)
    x_mamba = out_m + skip_ref[0] * xn                               # mamba + skip*x

    # ---- LayerNorm #2 (same gamma/beta) + projection, emitted channel-major
    xn2 = _layer_norm(x_mamba, g, bb)                                # (Lp, C)
    # (Co, C) x (Lp, C) contracting the last dims -> (Co, Lp): lane-dense output.
    out_cl = lax.dot_general(w_proj_ref[...], xn2,
                             dimension_numbers=(((1,), (1,)), ((), ())),
                             preferred_element_type=f32)             # (Co, Lp)
    o_ref[0] = out_cl + bp_ref[...]


# ---------------------------------------------------------------------------
# Wrapper: builds block-diagonal / tiled shared weights and calls the kernel.
# ---------------------------------------------------------------------------
def pvm_layer_forward(x, params, *, num_divided_chan=4):
    x = x.astype(jnp.float32)                       # matches the fp16 -> fp32 cast
    B, C, H, W = x.shape
    L = H * W
    nc = num_divided_chan
    assert C % nc == 0
    f32 = jnp.float32

    w_in = params["W_inT"]                          # (dm, 2*di)
    w_x = params["W_xT"]                            # (di, dtr + 2*ds)
    di = w_in.shape[1] // 2
    ds = params["A"].shape[1]
    dtr = params["W_dtT"].shape[0]
    K = params["conv_wT"].shape[0]
    DS = di * ds
    NCDI = nc * di
    NDS = nc * DS
    Co = params["W_projT"].shape[1]

    U = 8
    Lp = ((L + U - 1) // U) * U                     # pad seq to a multiple of 8

    # shared-weight chunk batching: block-diagonal / lane-tiled weights
    eye_nc = jnp.eye(nc, dtype=f32)
    w_in_x_big = jnp.kron(eye_nc, w_in[:, :di])                     # (C, NCDI)
    w_in_z_big = jnp.kron(eye_nc, w_in[:, di:])                     # (C, NCDI)
    w_b_big = jnp.kron(eye_nc, w_x[:, dtr:dtr + ds])                # (NCDI, nc*ds)
    w_c_big = jnp.kron(eye_nc, w_x[:, dtr + ds:])                   # (NCDI, nc*ds)
    w_dt_fold = w_x[:, :dtr] @ params["W_dtT"]                      # (di, di) folded dt
    w_dtf_big = jnp.kron(eye_nc, w_dt_fold)                         # (NCDI, NCDI)
    b_dt_big = jnp.tile(params["b_dt"], (1, nc))                    # (1, NCDI)
    conv_w_big = jnp.tile(params["conv_wT"], (1, nc))               # (K, NCDI)
    conv_b_big = jnp.tile(params["conv_b"], (1, nc))                # (1, NCDI)
    d_big = jnp.tile(params["D"], (1, nc))                          # (1, NCDI)
    w_out_big = jnp.kron(eye_nc, params["W_outT"])                  # (NCDI, C)
    a_big = jnp.tile(params["A"].reshape(1, DS), (1, nc))           # (1, NDS)

    # constant 0/1 lane-expansion / reduction matrices, block-diagonal over chunks
    r_dt = jnp.kron(jnp.eye(di, dtype=f32), jnp.ones((1, ds), f32))  # (di, DS)
    r_b = jnp.tile(jnp.eye(ds, dtype=f32), (1, di))                  # (ds, DS)
    rdt_big = jnp.kron(eye_nc, r_dt)                                 # (NCDI, NDS)
    rb_big = jnp.kron(eye_nc, r_b)                                   # (nc*ds, NDS)
    rred_big = rdt_big.T                                             # (NDS, NCDI)

    w_proj_cl = params["W_projT"].T                                  # (Co, C)
    b_proj_cl = params["b_proj"].reshape(Co, 1)                      # (Co, 1)
    skip = params["skip"].reshape(1).astype(f32)                     # SMEM scalar

    x_seq = jnp.transpose(x.reshape(B, C, L), (0, 2, 1))             # (B, L, C)
    if Lp != L:
        x_seq = jnp.concatenate([x_seq, jnp.zeros((B, Lp - L, C), f32)], axis=1)

    kernel = functools.partial(_pvm_kernel, Lp=Lp, nc=nc, di=di, ds=ds, K=K, U=U)

    def full(a):
        n = a.ndim
        return pl.BlockSpec(a.shape, lambda i, n=n: (0,) * n)

    weights = (params["ln_g"], params["ln_b"], w_in_x_big, w_in_z_big,
               conv_w_big, conv_b_big, w_b_big, w_c_big, w_dtf_big, b_dt_big,
               a_big, d_big, w_out_big, w_proj_cl, b_proj_cl,
               rdt_big, rb_big, rred_big)

    # explicit, generation-aware VMEM budget
    bp = 4
    vmem_est = (3 * Lp * NDS * bp                               # scan scratches
                + 2 * 2 * Lp * (C + Co) * bp                    # double-buffered in/out
                + 10 * Lp * max(2 * NCDI, NDS) * bp             # fused intermediates
                + 2 * sum(int(a.size) * bp for a in weights))   # resident weights
    try:
        vmem_phys = int(pltpu.get_tpu_info().vmem_capacity_bytes)
    except Exception:
        vmem_phys = 64 * 1024 * 1024
    vmem_cap = int(0.75 * vmem_phys)            # ~48 MiB on v7x, ~96 MiB on v5e/v6e
    vmem_limit = int(min(vmem_cap, max(32 * 1024 * 1024, int(1.5 * vmem_est))))

    out = pl.pallas_call(
        kernel,
        out_shape=jax.ShapeDtypeStruct((B, Co, Lp), f32),
        grid=(B,),
        in_specs=[pl.BlockSpec((1, Lp, C), lambda i: (i, 0, 0))] +
                 [full(a) for a in weights] +
                 [pl.BlockSpec(memory_space=pltpu.MemorySpace.SMEM)],
        out_specs=pl.BlockSpec((1, Co, Lp), lambda i: (i, 0, 0)),
        scratch_shapes=[pltpu.VMEM((Lp, NDS), f32),    # dA  = exp(dt*A)
                        pltpu.VMEM((Lp, NDS), f32),    # dBx = dt*x*B
                        pltpu.VMEM((Lp, NDS), f32)],   # C_t, overwritten with h_t*C_t
        compiler_params=pltpu.CompilerParams(
            dimension_semantics=("parallel",),         # batch rows -> v7x megacore
            vmem_limit_bytes=vmem_limit),
    )(x_seq, *weights, skip)

    if Lp != L:
        out = out[:, :, :L]
    return out.reshape(B, Co, H, W)                    # already channel-major


# ---------------------------------------------------------------------------
# Pure-JAX reference of the same forward pass (validation only).
# ---------------------------------------------------------------------------
def pvm_layer_reference(x, p, *, num_divided_chan=4):
    x = x.astype(jnp.float32)
    B, C, H, W = x.shape
    L = H * W
    nc = num_divided_chan
    dm = C // nc
    di = p["W_inT"].shape[1] // 2
    ds = p["A"].shape[1]
    dtr = p["W_dtT"].shape[0]
    K = p["conv_wT"].shape[0]

    xf = jnp.transpose(x.reshape(B, C, L), (0, 2, 1))                # (B, L, C)
    xn = _layer_norm(xf, p["ln_g"], p["ln_b"])

    outs = []
    for c in range(nc):
        xch = xn[..., c * dm:(c + 1) * dm]                           # (B, L, dm)
        xz = xch @ p["W_inT"]
        xin, z = xz[..., :di], xz[..., di:]
        xpad = jnp.pad(xin, ((0, 0), (K - 1, 0), (0, 0)))
        xc = sum(xpad[:, k:k + L, :] * p["conv_wT"][k] for k in range(K))
        xc = _silu_ref(xc + p["conv_b"])
        xdbl = xc @ p["W_xT"]
        dt = _softplus(xdbl[..., :dtr] @ p["W_dtT"] + p["b_dt"])     # (B, L, di)
        bm = xdbl[..., dtr:dtr + ds]
        cm = xdbl[..., dtr + ds:]
        dA = jnp.exp(dt[..., None] * p["A"])                         # (B, L, di, ds)
        dBx = (dt * xc)[..., None] * bm[..., None, :]

        def step(h, ab):
            a, bx = ab
            h = a * h + bx
            return h, h

        hs = jax.lax.scan(step, jnp.zeros((B, di, ds), jnp.float32),
                          (jnp.moveaxis(dA, 1, 0), jnp.moveaxis(dBx, 1, 0)))[1]
        hs = jnp.moveaxis(hs, 0, 1)                                  # (B, L, di, ds)
        y = jnp.einsum("blis,bls->bli", hs, cm)
        y = y + xc * p["D"]
        y = y * _silu_ref(z)
        outs.append(y @ p["W_outT"] + p["skip"][0, 0] * xch)

    xm = jnp.concatenate(outs, axis=-1)                              # (B, L, C)
    xm = _layer_norm(xm, p["ln_g"], p["ln_b"])
    out = xm @ p["W_projT"] + p["b_proj"]
    Co = p["W_projT"].shape[1]
    return jnp.transpose(out, (0, 2, 1)).reshape(B, Co, H, W)


# ---------------------------------------------------------------------------
# Deterministic parameter init (shapes follow PVMLayer.__init__ / Mamba);
# matrices are stored pre-transposed so kernels compute x @ W directly.
# ---------------------------------------------------------------------------
def init_params(key, input_dim, output_dim, *, d_state=16, d_conv=4,
                expand=2, num_divided_chan=4):
    dm = input_dim // num_divided_chan          # Mamba d_model
    di = expand * dm                            # d_inner
    dtr = math.ceil(dm / 16)                    # dt_rank ("auto")
    ks = jax.random.split(key, 9)
    nrm = lambda k, shape, s=0.1: s * jax.random.normal(k, shape, jnp.float32)
    a_log = jnp.log(jnp.broadcast_to(
        jnp.arange(1, d_state + 1, dtype=jnp.float32), (di, d_state)))
    return {
        "ln_g": jnp.ones((1, input_dim), jnp.float32),      # LayerNorm weight
        "ln_b": jnp.zeros((1, input_dim), jnp.float32),     # LayerNorm bias
        "W_inT": nrm(ks[0], (dm, 2 * di)),                  # in_proj (dm -> 2*di), no bias
        "conv_wT": nrm(ks[1], (d_conv, di)),                # depthwise conv weight (K, di)
        "conv_b": nrm(ks[2], (1, di)),                      # conv bias
        "W_xT": nrm(ks[3], (di, dtr + 2 * d_state)),        # x_proj, no bias
        "W_dtT": nrm(ks[4], (dtr, di)),                     # dt_proj weight
        "b_dt": nrm(ks[5], (1, di)),                        # dt_proj bias
        "A": -jnp.exp(a_log),                               # A = -exp(A_log), (di, d_state)
        "D": jnp.ones((1, di), jnp.float32),                # D skip
        "W_outT": nrm(ks[6], (di, dm)),                     # out_proj, no bias
        "skip": jnp.ones((1, 1), jnp.float32),              # skip_scale
        "W_projT": nrm(ks[7], (input_dim, output_dim)),     # self.proj weight
        "b_proj": nrm(ks[8], (1, output_dim)),              # self.proj bias
    }


if __name__ == "__main__":
    B, C, H, W = 2, 16, 16, 16        # input_dim = output_dim = 16, L = 256
    key = jax.random.PRNGKey(0)
    kx, kp = jax.random.split(key)
    x = jax.random.normal(kx, (B, C, H, W), jnp.float32)
    params = init_params(kp, input_dim=C, output_dim=C)

    fwd = jax.jit(functools.partial(pvm_layer_forward, num_divided_chan=4))
    out = fwd(x, params)
    jax.block_until_ready(out)
    assert out.shape == (B, C, H, W) and out.dtype == jnp.float32

    # validate against a pure-JAX reference of the same math (loose tolerance to
    # allow for MXU default-precision / approx-reciprocal differences)
    ref = pvm_layer_reference(x, params, num_divided_chan=4)
    scale = max(1.0, float(jnp.max(jnp.abs(ref))))
    assert float(jnp.max(jnp.abs(out - ref))) < 5e-2 * scale

    print("KERNEL_OK")
</pallas_src>

<mosaic_0001>
module attributes {stable_mosaic.version = 11 : i64} {
  func.func @_pvm_kernel(%arg0: i32, %arg1: memref<1x256x16xf32, #tpu.memory_space<vmem>>, %arg2: memref<1x16xf32, #tpu.memory_space<vmem>>, %arg3: memref<1x16xf32, #tpu.memory_space<vmem>>, %arg4: memref<16x32xf32, #tpu.memory_space<vmem>>, %arg5: memref<16x32xf32, #tpu.memory_space<vmem>>, %arg6: memref<4x32xf32, #tpu.memory_space<vmem>>, %arg7: memref<1x32xf32, #tpu.memory_space<vmem>>, %arg8: memref<32x64xf32, #tpu.memory_space<vmem>>, %arg9: memref<32x64xf32, #tpu.memory_space<vmem>>, %arg10: memref<32x32xf32, #tpu.memory_space<vmem>>, %arg11: memref<1x32xf32, #tpu.memory_space<vmem>>, %arg12: memref<1x512xf32, #tpu.memory_space<vmem>>, %arg13: memref<1x32xf32, #tpu.memory_space<vmem>>, %arg14: memref<32x16xf32, #tpu.memory_space<vmem>>, %arg15: memref<16x16xf32, #tpu.memory_space<vmem>>, %arg16: memref<16x1xf32, #tpu.memory_space<vmem>>, %arg17: memref<32x512xf32, #tpu.memory_space<vmem>>, %arg18: memref<64x512xf32, #tpu.memory_space<vmem>>, %arg19: memref<512x32xf32, #tpu.memory_space<vmem>>, %arg20: memref<1xf32, #tpu.memory_space<smem>>, %arg21: memref<1x16x256xf32, #tpu.memory_space<vmem>>, %arg22: memref<256x512xf32, #tpu.memory_space<vmem>>, %arg23: memref<256x512xf32, #tpu.memory_space<vmem>>, %arg24: memref<256x512xf32, #tpu.memory_space<vmem>>) attributes {dimension_semantics = [#tpu.dimension_semantics<parallel>], iteration_bounds = array<i64: 2>, scalar_prefetch = 0 : i64, scratch_operands = 3 : i64, tpu.core_type = #tpu.core_type<tc>, window_params = [{transform_indices = @transform_0, window_bounds = array<i64: 1, 256, 16>}, {pipeline_mode = #tpu.pipeline_mode<synchronous>, transform_indices = @transform_1, window_bounds = array<i64: 1, 16>}, {pipeline_mode = #tpu.pipeline_mode<synchronous>, transform_indices = @transform_2, window_bounds = array<i64: 1, 16>}, {pipeline_mode = #tpu.pipeline_mode<synchronous>, transform_indices = @transform_3, window_bounds = array<i64: 16, 32>}, {pipeline_mode = #tpu.pipeline_mode<synchronous>, transform_indices = @transform_4, window_bounds = array<i64: 16, 32>}, {pipeline_mode = #tpu.pipeline_mode<synchronous>, transform_indices = @transform_5, window_bounds = array<i64: 4, 32>}, {pipeline_mode = #tpu.pipeline_mode<synchronous>, transform_indices = @transform_6, window_bounds = array<i64: 1, 32>}, {pipeline_mode = #tpu.pipeline_mode<synchronous>, transform_indices = @transform_7, window_bounds = array<i64: 32, 64>}, {pipeline_mode = #tpu.pipeline_mode<synchronous>, transform_indices = @transform_8, window_bounds = array<i64: 32, 64>}, {pipeline_mode = #tpu.pipeline_mode<synchronous>, transform_indices = @transform_9, window_bounds = array<i64: 32, 32>}, {pipeline_mode = #tpu.pipeline_mode<synchronous>, transform_indices = @transform_10, window_bounds = array<i64: 1, 32>}, {pipeline_mode = #tpu.pipeline_mode<synchronous>, transform_indices = @transform_11, window_bounds = array<i64: 1, 512>}, {pipeline_mode = #tpu.pipeline_mode<synchronous>, transform_indices = @transform_12, window_bounds = array<i64: 1, 32>}, {pipeline_mode = #tpu.pipeline_mode<synchronous>, transform_indices = @transform_13, window_bounds = array<i64: 32, 16>}, {pipeline_mode = #tpu.pipeline_mode<synchronous>, transform_indices = @transform_14, window_bounds = array<i64: 16, 16>}, {pipeline_mode = #tpu.pipeline_mode<synchronous>, transform_indices = @transform_15, window_bounds = array<i64: 16, 1>}, {pipeline_mode = #tpu.pipeline_mode<synchronous>, transform_indices = @transform_16, window_bounds = array<i64: 32, 512>}, {pipeline_mode = #tpu.pipeline_mode<synchronous>, transform_indices = @transform_17, window_bounds = array<i64: 64, 512>}, {pipeline_mode = #tpu.pipeline_mode<synchronous>, transform_indices = @transform_18, window_bounds = array<i64: 512, 32>}, {transform_indices = @transform_19, window_bounds = array<i64: 1>}, {transform_indices = @transform_20, window_bounds = array<i64: 1, 16, 256>}]} {
    %c0 = arith.constant 0 : index
    %c0_0 = arith.constant 0 : index
    %0 = vector.load %arg2[%c0, %c0_0] : memref<1x16xf32, #tpu.memory_space<vmem>>, vector<1x16xf32>
    %c0_1 = arith.constant 0 : index
    %c0_2 = arith.constant 0 : index
    %1 = vector.load %arg3[%c0_1, %c0_2] : memref<1x16xf32, #tpu.memory_space<vmem>>, vector<1x16xf32>
    %c0_3 = arith.constant 0 : index
    %c0_4 = arith.constant 0 : index
    %c0_5 = arith.constant 0 : index
    %2 = vector.load %arg1[%c0_3, %c0_4, %c0_5] : memref<1x256x16xf32, #tpu.memory_space<vmem>>, vector<1x256x16xf32>
    %3 = vector.shape_cast %2 : vector<1x256x16xf32> to vector<256x16xf32>
    %cst = arith.constant dense<0.000000e+00> : vector<256xf32>
    %4 = vector.multi_reduction <add>, %3, %cst [1] : vector<256x16xf32> to vector<256xf32>
    %5 = vector.shape_cast %4 : vector<256xf32> to vector<256x1xf32>
    %cst_6 = arith.constant 1.600000e+01 : f32
    %6 = vector.broadcast %cst_6 : f32 to vector<256x1xf32>
    %7 = arith.divf %5, %6 : vector<256x1xf32>
    %8 = vector.broadcast %7 : vector<256x1xf32> to vector<256x16xf32>
    %9 = arith.subf %3, %8 : vector<256x16xf32>
    %10 = arith.mulf %9, %9 : vector<256x16xf32>
    %cst_7 = arith.constant dense<0.000000e+00> : vector<256xf32>
    %11 = vector.multi_reduction <add>, %10, %cst_7 [1] : vector<256x16xf32> to vector<256xf32>
    %12 = vector.shape_cast %11 : vector<256xf32> to vector<256x1xf32>
    %cst_8 = arith.constant 1.600000e+01 : f32
    %13 = vector.broadcast %cst_8 : f32 to vector<256x1xf32>
    %14 = arith.divf %12, %13 : vector<256x1xf32>
    %15 = vector.broadcast %7 : vector<256x1xf32> to vector<256x16xf32>
    %16 = arith.subf %3, %15 : vector<256x16xf32>
    %cst_9 = arith.constant 9.99999974E-6 : f32
    %17 = vector.broadcast %cst_9 : f32 to vector<256x1xf32>
    %18 = arith.addf %14, %17 : vector<256x1xf32>
    %19 = math.rsqrt %18 : vector<256x1xf32>
    %20 = vector.broadcast %19 : vector<256x1xf32> to vector<256x16xf32>
    %21 = arith.mulf %16, %20 : vector<256x16xf32>
    %22 = vector.broadcast %0 : vector<1x16xf32> to vector<256x16xf32>
    %23 = arith.mulf %21, %22 : vector<256x16xf32>
    %24 = vector.broadcast %1 : vector<1x16xf32> to vector<256x16xf32>
    %25 = arith.addf %23, %24 : vector<256x16xf32>
    %c0_10 = arith.constant 0 : index
    %c0_11 = arith.constant 0 : index
    %26 = vector.load %arg4[%c0_10, %c0_11] : memref<16x32xf32, #tpu.memory_space<vmem>>, vector<16x32xf32>
    %cst_12 = arith.constant dense<0.000000e+00> : vector<256x32xf32>
    %27 = tpu.matmul %25, %26, %cst_12 {dimension_numbers = #tpu.dot_dimension_numbers<[1], [0], [0], [1], [0, 0, 1, 1], [], []>} : vector<256x16xf32>, vector<16x32xf32>, vector<256x32xf32> -> vector<256x32xf32>
    %c0_13 = arith.constant 0 : index
    %c0_14 = arith.constant 0 : index
    %28 = vector.load %arg5[%c0_13, %c0_14] : memref<16x32xf32, #tpu.memory_space<vmem>>, vector<16x32xf32>
    %cst_15 = arith.constant dense<0.000000e+00> : vector<256x32xf32>
    %29 = tpu.matmul %25, %28, %cst_15 {dimension_numbers = #tpu.dot_dimension_numbers<[1], [0], [0], [1], [0, 0, 1, 1], [], []>} : vector<256x16xf32>, vector<16x32xf32>, vector<256x32xf32> -> vector<256x32xf32>
    %c0_16 = arith.constant 0 : index
    %c0_17 = arith.constant 0 : index
    %30 = vector.load %arg6[%c0_16, %c0_17] : memref<4x32xf32, #tpu.memory_space<vmem>>, vector<4x32xf32>
    %31 = tpu.iota {dimensions = array<i32: 0>} : vector<256x32xi32>
    %32 = vector.extract_strided_slice %30 {offsets = [3, 0], sizes = [1, 32], strides = [1, 1]} : vector<4x32xf32> to vector<1x32xf32>
    %33 = vector.broadcast %32 : vector<1x32xf32> to vector<256x32xf32>
    %34 = arith.mulf %27, %33 : vector<256x32xf32>
    %c3_i32 = arith.constant 3 : i32
    %35 = tpu.dynamic_rotate %27 by %c3_i32 dim 0 : vector<256x32xf32>, i32 -> vector<256x32xf32>
    %c3_i32_18 = arith.constant 3 : i32
    %36 = vector.broadcast %c3_i32_18 : i32 to vector<256x32xi32>
    %37 = arith.cmpi sge, %31, %36 : vector<256x32xi32>
    %cst_19 = arith.constant 0.000000e+00 : f32
    %38 = vector.broadcast %cst_19 : f32 to vector<256x32xf32>
    %39 = arith.select %37, %35, %38 : vector<256x32xi1>, vector<256x32xf32>
    %40 = vector.extract_strided_slice %30 {offsets = [0, 0], sizes = [1, 32], strides = [1, 1]} : vector<4x32xf32> to vector<1x32xf32>
    %41 = vector.broadcast %40 : vector<1x32xf32> to vector<256x32xf32>
    %42 = arith.mulf %39, %41 : vector<256x32xf32>
    %43 = arith.addf %34, %42 : vector<256x32xf32>
    %c2_i32 = arith.constant 2 : i32
    %44 = tpu.dynamic_rotate %27 by %c2_i32 dim 0 : vector<256x32xf32>, i32 -> vector<256x32xf32>
    %c2_i32_20 = arith.constant 2 : i32
    %45 = vector.broadcast %c2_i32_20 : i32 to vector<256x32xi32>
    %46 = arith.cmpi sge, %31, %45 : vector<256x32xi32>
    %cst_21 = arith.constant 0.000000e+00 : f32
    %47 = vector.broadcast %cst_21 : f32 to vector<256x32xf32>
    %48 = arith.select %46, %44, %47 : vector<256x32xi1>, vector<256x32xf32>
    %49 = vector.extract_strided_slice %30 {offsets = [1, 0], sizes = [1, 32], strides = [1, 1]} : vector<4x32xf32> to vector<1x32xf32>
    %50 = vector.broadcast %49 : vector<1x32xf32> to vector<256x32xf32>
    %51 = arith.mulf %48, %50 : vector<256x32xf32>
    %52 = arith.addf %43, %51 : vector<256x32xf32>
    %c1_i32 = arith.constant 1 : i32
    %53 = tpu.dynamic_rotate %27 by %c1_i32 dim 0 : vector<256x32xf32>, i32 -> vector<256x32xf32>
    %c1_i32_22 = arith.constant 1 : i32
    %54 = vector.broadcast %c1_i32_22 : i32 to vector<256x32xi32>
    %55 = arith.cmpi sge, %31, %54 : vector<256x32xi32>
    %cst_23 = arith.constant 0.000000e+00 : f32
    %56 = vector.broadcast %cst_23 : f32 to vector<256x32xf32>
    %57 = arith.select %55, %53, %56 : vector<256x32xi1>, vector<256x32xf32>
    %58 = vector.extract_strided_slice %30 {offsets = [2, 0], sizes = [1, 32], strides = [1, 1]} : vector<4x32xf32> to vector<1x32xf32>
    %59 = vector.broadcast %58 : vector<1x32xf32> to vector<256x32xf32>
    %60 = arith.mulf %57, %59 : vector<256x32xf32>
    %61 = arith.addf %52, %60 : vector<256x32xf32>
    %c0_24 = arith.constant 0 : index
    %c0_25 = arith.constant 0 : index
    %62 = vector.load %arg7[%c0_24, %c0_25] : memref<1x32xf32, #tpu.memory_space<vmem>>, vector<1x32xf32>
    %63 = vector.broadcast %62 : vector<1x32xf32> to vector<256x32xf32>
    %64 = arith.addf %61, %63 : vector<256x32xf32>
    %cst_26 = arith.constant 0.000000e+00 : f32
    %65 = vector.broadcast %cst_26 : f32 to vector<256x32xf32>
    %66 = arith.subf %65, %64 : vector<256x32xf32>
    %67 = math.exp %66 : vector<256x32xf32>
    %cst_27 = arith.constant 1.000000e+00 : f32
    %68 = vector.broadcast %cst_27 : f32 to vector<256x32xf32>
    %69 = arith.addf %68, %67 : vector<256x32xf32>
    %70 = tpu.reciprocal %69 {approx = true} : vector<256x32xf32> -> vector<256x32xf32>
    %71 = arith.mulf %64, %70 : vector<256x32xf32>
    %c0_28 = arith.constant 0 : index
    %c0_29 = arith.constant 0 : index
    %72 = vector.load %arg10[%c0_28, %c0_29] : memref<32x32xf32, #tpu.memory_space<vmem>>, vector<32x32xf32>
    %cst_30 = arith.constant dense<0.000000e+00> : vector<256x32xf32>
    %73 = tpu.matmul %71, %72, %cst_30 {dimension_numbers = #tpu.dot_dimension_numbers<[1], [0], [0], [1], [0, 0, 1, 1], [], []>} : vector<256x32xf32>, vector<32x32xf32>, vector<256x32xf32> -> vector<256x32xf32>
    %c0_31 = arith.constant 0 : index
    %c0_32 = arith.constant 0 : index
    %74 = vector.load %arg11[%c0_31, %c0_32] : memref<1x32xf32, #tpu.memory_space<vmem>>, vector<1x32xf32>
    %75 = vector.broadcast %74 : vector<1x32xf32> to vector<256x32xf32>
    %76 = arith.addf %73, %75 : vector<256x32xf32>
    %cst_33 = arith.constant 0.000000e+00 : f32
    %77 = vector.broadcast %cst_33 : f32 to vector<256x32xf32>
    %78 = arith.maximumf %76, %77 : vector<256x32xf32>
    %79 = math.absf %76 : vector<256x32xf32>
    %cst_34 = arith.constant 0.000000e+00 : f32
    %80 = vector.broadcast %cst_34 : f32 to vector<256x32xf32>
    %81 = arith.subf %80, %79 : vector<256x32xf32>
    %82 = math.exp %81 : vector<256x32xf32>
    %cst_35 = arith.constant 1.000000e+00 : f32
    %83 = vector.broadcast %cst_35 : f32 to vector<256x32xf32>
    %84 = arith.addf %83, %82 : vector<256x32xf32>
    %85 = math.log %84 : vector<256x32xf32>
    %86 = arith.addf %78, %85 : vector<256x32xf32>
    %c0_36 = arith.constant 0 : index
    %c0_37 = arith.constant 0 : index
    %87 = vector.load %arg8[%c0_36, %c0_37] : memref<32x64xf32, #tpu.memory_space<vmem>>, vector<32x64xf32>
    %cst_38 = arith.constant dense<0.000000e+00> : vector<256x64xf32>
    %88 = tpu.matmul %71, %87, %cst_38 {dimension_numbers = #tpu.dot_dimension_numbers<[1], [0], [0], [1], [0, 0, 1, 1], [], []>} : vector<256x32xf32>, vector<32x64xf32>, vector<256x64xf32> -> vector<256x64xf32>
    %c0_39 = arith.constant 0 : index
    %c0_40 = arith.constant 0 : index
    %89 = vector.load %arg9[%c0_39, %c0_40] : memref<32x64xf32, #tpu.memory_space<vmem>>, vector<32x64xf32>
    %cst_41 = arith.constant dense<0.000000e+00> : vector<256x64xf32>
    %90 = tpu.matmul %71, %89, %cst_41 {dimension_numbers = #tpu.dot_dimension_numbers<[1], [0], [0], [1], [0, 0, 1, 1], [], []>} : vector<256x32xf32>, vector<32x64xf32>, vector<256x64xf32> -> vector<256x64xf32>
    %c0_42 = arith.constant 0 : index
    %c0_43 = arith.constant 0 : index
    %91 = vector.load %arg17[%c0_42, %c0_43] : memref<32x512xf32, #tpu.memory_space<vmem>>, vector<32x512xf32>
    %cst_44 = arith.constant dense<0.000000e+00> : vector<256x512xf32>
    %92 = tpu.matmul %86, %91, %cst_44 {dimension_numbers = #tpu.dot_dimension_numbers<[1], [0], [0], [1], [0, 0, 1, 1], [], []>} : vector<256x32xf32>, vector<32x512xf32>, vector<256x512xf32> -> vector<256x512xf32>
    %c0_45 = arith.constant 0 : index
    %c0_46 = arith.constant 0 : index
    %93 = vector.load %arg12[%c0_45, %c0_46] : memref<1x512xf32, #tpu.memory_space<vmem>>, vector<1x512xf32>
    %94 = vector.broadcast %93 : vector<1x512xf32> to vector<256x512xf32>
    %95 = arith.mulf %92, %94 : vector<256x512xf32>
    %96 = math.exp %95 : vector<256x512xf32>
    %c0_47 = arith.constant 0 : index
    %c0_48 = arith.constant 0 : index
    %97 = vector.load %arg22[%c0_47, %c0_48] : memref<256x512xf32, #tpu.memory_space<vmem>>, vector<256x512xf32>
    tpu.vector_store %arg22[%c0_47, %c0_48], %96 {strides = array<i32>} : memref<256x512xf32, #tpu.memory_space<vmem>>, vector<256x512xf32>,
    %98 = arith.mulf %86, %71 : vector<256x32xf32>
    %c0_49 = arith.constant 0 : index
    %c0_50 = arith.constant 0 : index
    %99 = vector.load %arg17[%c0_49, %c0_50] : memref<32x512xf32, #tpu.memory_space<vmem>>, vector<32x512xf32>
    %cst_51 = arith.constant dense<0.000000e+00> : vector<256x512xf32>
    %100 = tpu.matmul %98, %99, %cst_51 {dimension_numbers = #tpu.dot_dimension_numbers<[1], [0], [0], [1], [0, 0, 1, 1], [], []>} : vector<256x32xf32>, vector<32x512xf32>, vector<256x512xf32> -> vector<256x512xf32>
    %c0_52 = arith.constant 0 : index
    %c0_53 = arith.constant 0 : index
    %101 = vector.load %arg18[%c0_52, %c0_53] : memref<64x512xf32, #tpu.memory_space<vmem>>, vector<64x512xf32>
    %cst_54 = arith.constant dense<0.000000e+00> : vector<256x512xf32>
    %102 = tpu.matmul %88, %101, %cst_54 {dimension_numbers = #tpu.dot_dimension_numbers<[1], [0], [0], [1], [0, 0, 1, 1], [], []>} : vector<256x64xf32>, vector<64x512xf32>, vector<256x512xf32> -> vector<256x512xf32>
    %103 = arith.mulf %100, %102 : vector<256x512xf32>
    %c0_55 = arith.constant 0 : index
    %c0_56 = arith.constant 0 : index
    %104 = vector.load %arg23[%c0_55, %c0_56] : memref<256x512xf32, #tpu.memory_space<vmem>>, vector<256x512xf32>
    tpu.vector_store %arg23[%c0_55, %c0_56], %103 {strides = array<i32>} : memref<256x512xf32, #tpu.memory_space<vmem>>, vector<256x512xf32>,
    %c0_57 = arith.constant 0 : index
    %c0_58 = arith.constant 0 : index
    %105 = vector.load %arg18[%c0_57, %c0_58] : memref<64x512xf32, #tpu.memory_space<vmem>>, vector<64x512xf32>
    %cst_59 = arith.constant dense<0.000000e+00> : vector<256x512xf32>
    %106 = tpu.matmul %90, %105, %cst_59 {dimension_numbers = #tpu.dot_dimension_numbers<[1], [0], [0], [1], [0, 0, 1, 1], [], []>} : vector<256x64xf32>, vector<64x512xf32>, vector<256x512xf32> -> vector<256x512xf32>
    %c0_60 = arith.constant 0 : index
    %c0_61 = arith.constant 0 : index
    %107 = vector.load %arg24[%c0_60, %c0_61] : memref<256x512xf32, #tpu.memory_space<vmem>>, vector<256x512xf32>
    tpu.vector_store %arg24[%c0_60, %c0_61], %106 {strides = array<i32>} : memref<256x512xf32, #tpu.memory_space<vmem>>, vector<256x512xf32>,
    %cst_62 = arith.constant 0.000000e+00 : f32
    %108 = vector.broadcast %cst_62 : f32 to vector<1x512xf32>
    %c0_i32 = arith.constant 0 : i32
    %c32_i32 = arith.constant 32 : i32
    %109 = arith.addi %c0_i32, %c32_i32 : i32
    %c1_i32_63 = arith.constant 1 : i32
    %110 = scf.for %arg25 = %c0_i32 to %109 step %c1_i32_63 iter_args(%arg26 = %108) -> (vector<1x512xf32>)  : i32 {
      %c8_i32 = arith.constant 8 : i32
      %162 = arith.muli %arg25, %c8_i32 : i32
      %163 = tpu.assume_multiple %162, 8 : i32
      %164 = arith.index_cast %163 : i32 to index
      %c0_91 = arith.constant 0 : index
      %165 = vector.load %arg22[%164, %c0_91] : memref<256x512xf32, #tpu.memory_space<vmem>>, vector<8x512xf32>
      %166 = arith.index_cast %163 : i32 to index
      %c0_92 = arith.constant 0 : index
      %167 = vector.load %arg23[%166, %c0_92] : memref<256x512xf32, #tpu.memory_space<vmem>>, vector<8x512xf32>
      %168 = arith.index_cast %163 : i32 to index
      %c0_93 = arith.constant 0 : index
      %169 = vector.load %arg24[%168, %c0_93] : memref<256x512xf32, #tpu.memory_space<vmem>>, vector<8x512xf32>
      %170 = vector.extract_strided_slice %165 {offsets = [0, 0], sizes = [1, 512], strides = [1, 1]} : vector<8x512xf32> to vector<1x512xf32>
      %171 = arith.mulf %170, %arg26 : vector<1x512xf32>
      %172 = vector.extract_strided_slice %167 {offsets = [0, 0], sizes = [1, 512], strides = [1, 1]} : vector<8x512xf32> to vector<1x512xf32>
      %173 = arith.addf %171, %172 : vector<1x512xf32>
      %174 = vector.extract_strided_slice %169 {offsets = [0, 0], sizes = [1, 512], strides = [1, 1]} : vector<8x512xf32> to vector<1x512xf32>
      %175 = arith.mulf %173, %174 : vector<1x512xf32>
      %176 = vector.extract_strided_slice %165 {offsets = [1, 0], sizes = [1, 512], strides = [1, 1]} : vector<8x512xf32> to vector<1x512xf32>
      %177 = arith.mulf %176, %173 : vector<1x512xf32>
      %178 = vector.extract_strided_slice %167 {offsets = [1, 0], sizes = [1, 512], strides = [1, 1]} : vector<8x512xf32> to vector<1x512xf32>
      %179 = arith.addf %177, %178 : vector<1x512xf32>
      %180 = vector.extract_strided_slice %169 {offsets = [1, 0], sizes = [1, 512], strides = [1, 1]} : vector<8x512xf32> to vector<1x512xf32>
      %181 = arith.mulf %179, %180 : vector<1x512xf32>
      %182 = vector.extract_strided_slice %165 {offsets = [2, 0], sizes = [1, 512], strides = [1, 1]} : vector<8x512xf32> to vector<1x512xf32>
      %183 = arith.mulf %182, %179 : vector<1x512xf32>
      %184 = vector.extract_strided_slice %167 {offsets = [2, 0], sizes = [1, 512], strides = [1, 1]} : vector<8x512xf32> to vector<1x512xf32>
      %185 = arith.addf %183, %184 : vector<1x512xf32>
      %186 = vector.extract_strided_slice %169 {offsets = [2, 0], sizes = [1, 512], strides = [1, 1]} : vector<8x512xf32> to vector<1x512xf32>
      %187 = arith.mulf %185, %186 : vector<1x512xf32>
      %188 = vector.extract_strided_slice %165 {offsets = [3, 0], sizes = [1, 512], strides = [1, 1]} : vector<8x512xf32> to vector<1x512xf32>
      %189 = arith.mulf %188, %185 : vector<1x512xf32>
      %190 = vector.extract_strided_slice %167 {offsets = [3, 0], sizes = [1, 512], strides = [1, 1]} : vector<8x512xf32> to vector<1x512xf32>
      %191 = arith.addf %189, %190 : vector<1x512xf32>
      %192 = vector.extract_strided_slice %169 {offsets = [3, 0], sizes = [1, 512], strides = [1, 1]} : vector<8x512xf32> to vector<1x512xf32>
      %193 = arith.mulf %191, %192 : vector<1x512xf32>
      %194 = vector.extract_strided_slice %165 {offsets = [4, 0], sizes = [1, 512], strides = [1, 1]} : vector<8x512xf32> to vector<1x512xf32>
      %195 = arith.mulf %194, %191 : vector<1x512xf32>
      %196 = vector.extract_strided_slice %167 {offsets = [4, 0], sizes = [1, 512], strides = [1, 1]} : vector<8x512xf32> to vector<1x512xf32>
      %197 = arith.addf %195, %196 : vector<1x512xf32>
      %198 = vector.extract_strided_slice %169 {offsets = [4, 0], sizes = [1, 512], strides = [1, 1]} : vector<8x512xf32> to vector<1x512xf32>
      %199 = arith.mulf %197, %198 : vector<1x512xf32>
      %200 = vector.extract_strided_slice %165 {offsets = [5, 0], sizes = [1, 512], strides = [1, 1]} : vector<8x512xf32> to vector<1x512xf32>
      %201 = arith.mulf %200, %197 : vector<1x512xf32>
      %202 = vector.extract_strided_slice %167 {offsets = [5, 0], sizes = [1, 512], strides = [1, 1]} : vector<8x512xf32> to vector<1x512xf32>
      %203 = arith.addf %201, %202 : vector<1x512xf32>
      %204 = vector.extract_strided_slice %169 {offsets = [5, 0], sizes = [1, 512], strides = [1, 1]} : vector<8x512xf32> to vector<1x512xf32>
      %205 = arith.mulf %203, %204 : vector<1x512xf32>
      %206 = vector.extract_strided_slice %165 {offsets = [6, 0], sizes = [1, 512], strides = [1, 1]} : vector<8x512xf32> to vector<1x512xf32>
      %207 = arith.mulf %206, %203 : vector<1x512xf32>
      %208 = vector.extract_strided_slice %167 {offsets = [6, 0], sizes = [1, 512], strides = [1, 1]} : vector<8x512xf32> to vector<1x512xf32>
      %209 = arith.addf %207, %208 : vector<1x512xf32>
      %210 = vector.extract_strided_slice %169 {offsets = [6, 0], sizes = [1, 512], strides = [1, 1]} : vector<8x512xf32> to vector<1x512xf32>
      %211 = arith.mulf %209, %210 : vector<1x512xf32>
      %212 = vector.extract_strided_slice %165 {offsets = [7, 0], sizes = [1, 512], strides = [1, 1]} : vector<8x512xf32> to vector<1x512xf32>
      %213 = arith.mulf %212, %209 : vector<1x512xf32>
      %214 = vector.extract_strided_slice %167 {offsets = [7, 0], sizes = [1, 512], strides = [1, 1]} : vector<8x512xf32> to vector<1x512xf32>
      %215 = arith.addf %213, %214 : vector<1x512xf32>
      %216 = vector.extract_strided_slice %169 {offsets = [7, 0], sizes = [1, 512], strides = [1, 1]} : vector<8x512xf32> to vector<1x512xf32>
      %217 = arith.mulf %215, %216 : vector<1x512xf32>
      %218 = tpu.concatenate %175, %181, %187, %193, %199, %205, %211, %217 in 0 : vector<1x512xf32>, vector<1x512xf32>, vector<1x512xf32>, vector<1x512xf32>, vector<1x512xf32>, vector<1x512xf32>, vector<1x512xf32>, vector<1x512xf32> -> vector<8x512xf32>
      %219 = arith.index_cast %163 : i32 to index
      %c0_94 = arith.constant 0 : index
      %220 = vector.load %arg24[%219, %c0_94] : memref<256x512xf32, #tpu.memory_space<vmem>>, vector<8x512xf32>
      tpu.vector_store %arg24[%219, %c0_94], %218 {strides = array<i32>} : memref<256x512xf32, #tpu.memory_space<vmem>>, vector<8x512xf32>,
      scf.yield %215 : vector<1x512xf32>
    }
    %c32_i32_64 = arith.constant 32 : i32
    %c0_65 = arith.constant 0 : index
    %c0_66 = arith.constant 0 : index
    %111 = vector.load %arg24[%c0_65, %c0_66] : memref<256x512xf32, #tpu.memory_space<vmem>>, vector<256x512xf32>
    %c0_67 = arith.constant 0 : index
    %c0_68 = arith.constant 0 : index
    %112 = vector.load %arg19[%c0_67, %c0_68] : memref<512x32xf32, #tpu.memory_space<vmem>>, vector<512x32xf32>
    %cst_69 = arith.constant dense<0.000000e+00> : vector<256x32xf32>
    %113 = tpu.matmul %111, %112, %cst_69 {dimension_numbers = #tpu.dot_dimension_numbers<[1], [0], [0], [1], [0, 0, 1, 1], [], []>} : vector<256x512xf32>, vector<512x32xf32>, vector<256x32xf32> -> vector<256x32xf32>
    %c0_70 = arith.constant 0 : index
    %c0_71 = arith.constant 0 : index
    %114 = vector.load %arg13[%c0_70, %c0_71] : memref<1x32xf32, #tpu.memory_space<vmem>>, vector<1x32xf32>
    %115 = vector.broadcast %114 : vector<1x32xf32> to vector<256x32xf32>
    %116 = arith.mulf %71, %115 : vector<256x32xf32>
    %117 = arith.addf %113, %116 : vector<256x32xf32>
    %cst_72 = arith.constant 0.000000e+00 : f32
    %118 = vector.broadcast %cst_72 : f32 to vector<256x32xf32>
    %119 = arith.subf %118, %29 : vector<256x32xf32>
    %120 = math.exp %119 : vector<256x32xf32>
    %cst_73 = arith.constant 1.000000e+00 : f32
    %121 = vector.broadcast %cst_73 : f32 to vector<256x32xf32>
    %122 = arith.addf %121, %120 : vector<256x32xf32>
    %123 = tpu.reciprocal %122 {approx = true} : vector<256x32xf32> -> vector<256x32xf32>
    %124 = arith.mulf %29, %123 : vector<256x32xf32>
    %125 = arith.mulf %117, %124 : vector<256x32xf32>
    %c0_74 = arith.constant 0 : index
    %c0_75 = arith.constant 0 : index
    %126 = vector.load %arg14[%c0_74, %c0_75] : memref<32x16xf32, #tpu.memory_space<vmem>>, vector<32x16xf32>
    %cst_76 = arith.constant dense<0.000000e+00> : vector<256x16xf32>
    %127 = tpu.matmul %125, %126, %cst_76 {dimension_numbers = #tpu.dot_dimension_numbers<[1], [0], [0], [1], [0, 0, 1, 1], [], []>} : vector<256x32xf32>, vector<32x16xf32>, vector<256x16xf32> -> vector<256x16xf32>
    %c0_77 = arith.constant 0 : index
    %128 = memref.load %arg20[%c0_77] : memref<1xf32, #tpu.memory_space<smem>>
    %129 = vector.broadcast %128 : f32 to vector<256x16xf32>
    %130 = arith.mulf %129, %25 : vector<256x16xf32>
    %131 = arith.addf %127, %130 : vector<256x16xf32>
    %cst_78 = arith.constant dense<0.000000e+00> : vector<256xf32>
    %132 = vector.multi_reduction <add>, %131, %cst_78 [1] : vector<256x16xf32> to vector<256xf32>
    %133 = vector.shape_cast %132 : vector<256xf32> to vector<256x1xf32>
    %cst_79 = arith.constant 1.600000e+01 : f32
    %134 = vector.broadcast %cst_79 : f32 to vector<256x1xf32>
    %135 = arith.divf %133, %134 : vector<256x1xf32>
    %136 = vector.broadcast %135 : vector<256x1xf32> to vector<256x16xf32>
    %137 = arith.subf %131, %136 : vector<256x16xf32>
    %138 = arith.mulf %137, %137 : vector<256x16xf32>
    %cst_80 = arith.constant dense<0.000000e+00> : vector<256xf32>
    %139 = vector.multi_reduction <add>, %138, %cst_80 [1] : vector<256x16xf32> to vector<256xf32>
    %140 = vector.shape_cast %139 : vector<256xf32> to vector<256x1xf32>
    %cst_81 = arith.constant 1.600000e+01 : f32
    %141 = vector.broadcast %cst_81 : f32 to vector<256x1xf32>
    %142 = arith.divf %140, %141 : vector<256x1xf32>
    %143 = vector.broadcast %135 : vector<256x1xf32> to vector<256x16xf32>
    %144 = arith.subf %131, %143 : vector<256x16xf32>
    %cst_82 = arith.constant 9.99999974E-6 : f32
    %145 = vector.broadcast %cst_82 : f32 to vector<256x1xf32>
    %146 = arith.addf %142, %145 : vector<256x1xf32>
    %147 = math.rsqrt %146 : vector<256x1xf32>
    %148 = vector.broadcast %147 : vector<256x1xf32> to vector<256x16xf32>
    %149 = arith.mulf %144, %148 : vector<256x16xf32>
    %150 = vector.broadcast %0 : vector<1x16xf32> to vector<256x16xf32>
    %151 = arith.mulf %149, %150 : vector<256x16xf32>
    %152 = vector.broadcast %1 : vector<1x16xf32> to vector<256x16xf32>
    %153 = arith.addf %151, %152 : vector<256x16xf32>
    %c0_83 = arith.constant 0 : index
    %c0_84 = arith.constant 0 : index
    %154 = vector.load %arg15[%c0_83, %c0_84] : memref<16x16xf32, #tpu.memory_space<vmem>>, vector<16x16xf32>
    %cst_85 = arith.constant dense<0.000000e+00> : vector<16x256xf32>
    %155 = tpu.matmul %154, %153, %cst_85 {dimension_numbers = #tpu.dot_dimension_numbers<[1], [1], [0], [0], [0, 0, 1, 0], [], []>} : vector<16x16xf32>, vector<256x16xf32>, vector<16x256xf32> -> vector<16x256xf32>
    %c0_86 = arith.constant 0 : index
    %c0_87 = arith.constant 0 : index
    %156 = vector.load %arg16[%c0_86, %c0_87] : memref<16x1xf32, #tpu.memory_space<vmem>>, vector<16x1xf32>
    %157 = vector.broadcast %156 : vector<16x1xf32> to vector<16x256xf32>
    %158 = arith.addf %155, %157 : vector<16x256xf32>
    %c0_88 = arith.constant 0 : index
    %c0_89 = arith.constant 0 : index
    %c0_90 = arith.constant 0 : index
    %159 = vector.load %arg21[%c0_88, %c0_89, %c0_90] : memref<1x16x256xf32, #tpu.memory_space<vmem>>, vector<1x16x256xf32>
    %160 = vector.shape_cast %159 : vector<1x16x256xf32> to vector<16x256xf32>
    %161 = vector.shape_cast %158 : vector<16x256xf32> to vector<1x16x256xf32>
    tpu.vector_store %arg21[%c0_88, %c0_89, %c0_90], %161 {strides = array<i32>} : memref<1x16x256xf32, #tpu.memory_space<vmem>>, vector<1x16x256xf32>,
    return
  }
  func.func @transform_0(%arg0: i32) -> (i32, i32, i32) {
    %c0_i32 = arith.constant 0 : i32
    %c0_i32_0 = arith.constant 0 : i32
    %c0_i32_1 = arith.constant 0 : i32
    return %arg0, %c0_i32, %c0_i32_0 : i32, i32, i32
  }
  func.func @transform_1(%arg0: i32) -> (i32, i32) {
    %c0_i32 = arith.constant 0 : i32
    %c0_i32_0 = arith.constant 0 : i32
    %c0_i32_1 = arith.constant 0 : i32
    return %c0_i32, %c0_i32_0 : i32, i32
  }
  func.func @transform_2(%arg0: i32) -> (i32, i32) {
    %c0_i32 = arith.constant 0 : i32
    %c0_i32_0 = arith.constant 0 : i32
    %c0_i32_1 = arith.constant 0 : i32
    return %c0_i32, %c0_i32_0 : i32, i32
  }
  func.func @transform_3(%arg0: i32) -> (i32, i32) {
    %c0_i32 = arith.constant 0 : i32
    %c0_i32_0 = arith.constant 0 : i32
    %c0_i32_1 = arith.constant 0 : i32
    return %c0_i32, %c0_i32_0 : i32, i32
  }
  func.func @transform_4(%arg0: i32) -> (i32, i32) {
    %c0_i32 = arith.constant 0 : i32
    %c0_i32_0 = arith.constant 0 : i32
    %c0_i32_1 = arith.constant 0 : i32
    return %c0_i32, %c0_i32_0 : i32, i32
  }
  func.func @transform_5(%arg0: i32) -> (i32, i32) {
    %c0_i32 = arith.constant 0 : i32
    %c0_i32_0 = arith.constant 0 : i32
    %c0_i32_1 = arith.constant 0 : i32
    return %c0_i32, %c0_i32_0 : i32, i32
  }
  func.func @transform_6(%arg0: i32) -> (i32, i32) {
    %c0_i32 = arith.constant 0 : i32
    %c0_i32_0 = arith.constant 0 : i32
    %c0_i32_1 = arith.constant 0 : i32
    return %c0_i32, %c0_i32_0 : i32, i32
  }
  func.func @transform_7(%arg0: i32) -> (i32, i32) {
    %c0_i32 = arith.constant 0 : i32
    %c0_i32_0 = arith.constant 0 : i32
    %c0_i32_1 = arith.constant 0 : i32
    return %c0_i32, %c0_i32_0 : i32, i32
  }
  func.func @transform_8(%arg0: i32) -> (i32, i32) {
    %c0_i32 = arith.constant 0 : i32
    %c0_i32_0 = arith.constant 0 : i32
    %c0_i32_1 = arith.constant 0 : i32
    return %c0_i32, %c0_i32_0 : i32, i32
  }
  func.func @transform_9(%arg0: i32) -> (i32, i32) {
    %c0_i32 = arith.constant 0 : i32
    %c0_i32_0 = arith.constant 0 : i32
    %c0_i32_1 = arith.constant 0 : i32
    return %c0_i32, %c0_i32_0 : i32, i32
  }
  func.func @transform_10(%arg0: i32) -> (i32, i32) {
    %c0_i32 = arith.constant 0 : i32
    %c0_i32_0 = arith.constant 0 : i32
    %c0_i32_1 = arith.constant 0 : i32
    return %c0_i32, %c0_i32_0 : i32, i32
  }
  func.func @transform_11(%arg0: i32) -> (i32, i32) {
    %c0_i32 = arith.constant 0 : i32
    %c0_i32_0 = arith.constant 0 : i32
    %c0_i32_1 = arith.constant 0 : i32
    return %c0_i32, %c0_i32_0 : i32, i32
  }
  func.func @transform_12(%arg0: i32) -> (i32, i32) {
    %c0_i32 = arith.constant 0 : i32
    %c0_i32_0 = arith.constant 0 : i32
    %c0_i32_1 = arith.constant 0 : i32
    return %c0_i32, %c0_i32_0 : i32, i32
  }
  func.func @transform_13(%arg0: i32) -> (i32, i32) {
    %c0_i32 = arith.constant 0 : i32
    %c0_i32_0 = arith.constant 0 : i32
    %c0_i32_1 = arith.constant 0 : i32
    return %c0_i32, %c0_i32_0 : i32, i32
  }
  func.func @transform_14(%arg0: i32) -> (i32, i32) {
    %c0_i32 = arith.constant 0 : i32
    %c0_i32_0 = arith.constant 0 : i32
    %c0_i32_1 = arith.constant 0 : i32
    return %c0_i32, %c0_i32_0 : i32, i32
  }
  func.func @transform_15(%arg0: i32) -> (i32, i32) {
    %c0_i32 = arith.constant 0 : i32
    %c0_i32_0 = arith.constant 0 : i32
    %c0_i32_1 = arith.constant 0 : i32
    return %c0_i32, %c0_i32_0 : i32, i32
  }
  func.func @transform_16(%arg0: i32) -> (i32, i32) {
    %c0_i32 = arith.constant 0 : i32
    %c0_i32_0 = arith.constant 0 : i32
    %c0_i32_1 = arith.constant 0 : i32
    return %c0_i32, %c0_i32_0 : i32, i32
  }
  func.func @transform_17(%arg0: i32) -> (i32, i32) {
    %c0_i32 = arith.constant 0 : i32
    %c0_i32_0 = arith.constant 0 : i32
    %c0_i32_1 = arith.constant 0 : i32
    return %c0_i32, %c0_i32_0 : i32, i32
  }
  func.func @transform_18(%arg0: i32) -> (i32, i32) {
    %c0_i32 = arith.constant 0 : i32
    %c0_i32_0 = arith.constant 0 : i32
    %c0_i32_1 = arith.constant 0 : i32
    return %c0_i32, %c0_i32_0 : i32, i32
  }
  func.func @transform_19(%arg0: i32) -> i32 {
    %c0_i32 = arith.constant 0 : i32
    %c0_i32_0 = arith.constant 0 : i32
    return %c0_i32 : i32
  }
  func.func @transform_20(%arg0: i32) -> (i32, i32, i32) {
    %c0_i32 = arith.constant 0 : i32
    %c0_i32_0 = arith.constant 0 : i32
    %c0_i32_1 = arith.constant 0 : i32
    return %arg0, %c0_i32, %c0_i32_0 : i32, i32, i32
  }
}

</mosaic_0001>

<bundles_post_ra>
// kernel: tile.38
= control target key start
LH: loop header
LB: loop body
LE: loop exit
PB: predicated region body
PF: predicated region fallthrough
CT: control target
= control target key end

     0   :  { %vm21_vm0 = vcmask 64512   ;;  %s56_s14 = smov 8   ;;  %s57_s15 = smov 16   ;;  %vm27_vm1 = vcmask 261312   ;;  %vm33_vm2 = vcmask 195712   ;;  %vm39_vm3 = vcmask 130112   ;;  %s83_s0 = inlined_call_operand.vmem [shape: f32[4,4,8], index: 0, kind: input, shape index: {}]   ;;  %s84_s1 = inlined_call_operand.vmem [shape: f32[4,32], index: 1, kind: output, shape index: {}]  }
   0x1   :  { %v49_v0 = vld [vmem:[%s83_s0 + $0xc] sm:$0xf]  ;;  %v50_v1 = vld [vmem:[%s83_s0 + $0x8] sm:$0xf]  ;;  %v51_v2 = vld [vmem:[%s83_s0 + $0x4] sm:$0xf] }
   0x2   :  { %8 = vst [vmem:[#allocation1 + $0x18] sm:$0xf] %v49_v0  ;;  %13 = vst [vmem:[#allocation1 + $0x10] sm:$0xf] %v50_v1  ;;  %v18_v3 = vld [vmem:[%s83_s0] sm:$0xf] }
   0x3   :  { %17 = vst [vmem:[#allocation1 + $0x8] sm:$0xf] %v51_v2  ;;  %19 = vst [vmem:[#allocation1] sm:$0xf] %v18_v3  ;;  %s55_s0 = smov 24  }
   0xa   :  { %v24_v4 = vld [vmem:[#allocation1 + $0x3] ss:$8 sm:$0xf]   ;;  %v36_v5 = vld [vmem:[#allocation1 + $0x1] ss:$8 sm:$0xf]  }
   0xb   :  { %25 = vrot.lane.b32.xlu0 %v24_v4, %s55_s0  ;;  %v20_v6 = vld [vmem:[#allocation1] ss:$8 sm:$0xf]   ;;  %v30_v7 = vld [vmem:[#allocation1 + $0x2] ss:$8 sm:$0xf]   ;;  %37 = vrot.lane.b32.xlu1 %v36_v5, %s56_s14 }
   0xc   :  { %22 = vst.msk [vmem:[#allocation0] sm:$0xf] %vm21_vm0, %v20_v6  }
   0xf   :  { %31 = vrot.lane.b32.xlu0 %v30_v7, %s57_s15 }
  0x7d   :  { %v26_v8 = vpop.permute.xlu0 %25   ;;  %v38_v9 = vpop.permute.xlu1 %37  }
  0x7e   :  { %28 = vst.msk [vmem:[#allocation0] sm:$0xf] %vm27_vm1, %v26_v8  }
  0x81   :  { %v32_v10 = vpop.permute.xlu0 %31  }
  0x82   :  { %34 = vst.msk [vmem:[#allocation0] sm:$0xf] %vm33_vm2, %v32_v10  }
  0x83   :  { %40 = vst.msk [vmem:[#allocation0] sm:$0xf] %vm39_vm3, %v38_v9  }
  0x8a   :  { %v44_v11 = vld [vmem:[#allocation0] sm:$0xf] }
  0x8b   :  { %46 = vst [vmem:[%s84_s1] sm:$0xf] %v44_v11 }

// kernel: pvm_layer_forward.1
= control target key start
LH: loop header
LB: loop body
LE: loop exit
PB: predicated region body
PF: predicated region fallthrough
CT: control target
= control target key end

     0   :  { %s11894_s23 = smov 0   ;;  %s17255_s0 = inlined_call_operand.vmem [shape: f32[2,256,16], index: 0, kind: input, shape index: {}]   ;;  %s17256_s1 = inlined_call_operand.vmem [shape: f32[1,16], index: 1, kind: input, shape index: {}]   ;;  %s17257_s2 = inlined_call_operand.vmem [shape: f32[1,16], index: 2, kind: input, shape index: {}]   ;;  %s17258_s3 = inlined_call_operand.vmem [shape: f32[16,32], index: 3, kind: input, shape index: {}]   ;;  %s17259_s4 = inlined_call_operand.vmem [shape: f32[16,32], index: 4, kind: input, shape index: {}]   ;;  %s17260_s5 = inlined_call_operand.vmem [shape: f32[4,32], index: 5, kind: input, shape index: {}]   ;;  %s17261_s6 = inlined_call_operand.vmem [shape: f32[1,32], index: 6, kind: input, shape index: {}]   ;;  %s17262_s7 = inlined_call_operand.vmem [shape: f32[32,64], index: 7, kind: input, shape index: {}]   ;;  %s17263_s8 = inlined_call_operand.vmem [shape: f32[32,64], index: 8, kind: input, shape index: {}]   ;;  %s17264_s9 = inlined_call_operand.vmem [shape: f32[32,32], index: 9, kind: input, shape index: {}]   ;;  %s17265_s10 = inlined_call_operand.vmem [shape: f32[1,32], index: 10, kind: input, shape index: {}]   ;;  %s17266_s11 = inlined_call_operand.vmem [shape: f32[1,512], index: 11, kind: input, shape index: {}]   ;;  %s17267_s12 = inlined_call_operand.vmem [shape: f32[1,32], index: 12, kind: input, shape index: {}]   ;;  %s17268_s13 = inlined_call_operand.vmem [shape: f32[32,16], index: 13, kind: input, shape index: {}]   ;;  %s17269_s14 = inlined_call_operand.vmem [shape: f32[16,16], index: 14, kind: input, shape index: {}]   ;;  %s17270_s15 = inlined_call_operand.vmem [shape: f32[16,1], index: 15, kind: input, shape index: {}]   ;;  %s17271_s16 = inlined_call_operand.vmem [shape: f32[32,512], index: 16, kind: input, shape index: {}]   ;;  %s17272_s17 = inlined_call_operand.vmem [shape: f32[64,512], index: 17, kind: input, shape index: {}]   ;;  %s17273_s18 = inlined_call_operand.vmem [shape: f32[512,32], index: 18, kind: input, shape index: {}]   ;;  %s17274_s19 = inlined_call_operand.<no memory space> [shape: f32[1], index: 19, kind: input, shape index: {}]   ;;  %s17275_s20 = inlined_call_operand.vmem [shape: f32[2,16,256], index: 20, kind: output, shape index: {}]  }
   0x1   :  { %17477 = sst [smem:[#allocation169_spill]] %s17255_s0 }
   0x2   :  { %17478 = sst [smem:[#allocation170_spill]] %s17256_s1 }
   0x3   :  { %17479 = sst [smem:[#allocation171_spill]] %s17257_s2 }
   0x4   :  { %17480 = sst [smem:[#allocation172_spill]] %s17258_s3 }
   0x5   :  { %17481 = sst [smem:[#allocation173_spill]] %s17259_s4 }
   0x6   :  { %25 = sst [smem:[#allocation5]] %s17274_s19 }
   0x7 LB: > { %s9449_s24 = sadd.s32 4294967295, %s11761_s23   ;;  %p9453_p0 = scmp.ge.s32.totalorder %s11761_s23, 1  ;;  %s11761_s23 = sphi %s11894_s23, %s31_s23  }
   0x8   : > { %p563_p1 = scmp.lt.s32.totalorder %s11761_s23, 3 }
   0xa   : > { %p564_p2 = pnand %p9453_p0, %p563_p1 }
   0xc   : > { %567 = sbr.rel (%p564_p2) target bundleno = 3060 (0xbf4), region = 100 }
  0x13   : > { %p621_p3 = scmp.lt.s32.totalorder %s9449_s24, 1  ;;  %vm665_vm0 = vcmask 130048   ;;  %s17482_s26 = sld [smem:[#allocation169_spill]]  ;;  %vm2612_vm7 = vcmask 261120   ;;  %vm5530_vm8 = vcmask 523264  }
  0x14   : > { %s17483_s21 = sld [smem:[#allocation172_spill]]  ;;  %s17485_s28 = sld [smem:[#allocation170_spill]] }
  0x15   : > { %s18128_s24 = smov (!%p621_p3, %s9449_s24), 1  ;;  %s17487_s0 = sld [smem:[#allocation171_spill]] }
  0x16   : > { %s9952_s2 = sshll.u32 %s18128_s24, 8  ;;  %s9953_s25 = sshll.u32 %s18128_s24, 5 }
  0x17   : > { %s11910_s29 = scalar_lea.vmem %s17275_s20, %s9953_s25  ;;  %s17484_s25 = sld [smem:[#allocation173_spill]] }
  0x18   : > { %s16093_s30 = smov 0  }
  0x19   : > { %s11905_s27 = scalar_lea.vmem %s17482_s26, %s9952_s2 }
  0x1a   : > { %v11913_v0 = vld [vmem:[%s11905_s27] sm:$0xff]  ;;  %v11916_v1 = vld [vmem:[%s11905_s27 + $0x10] sm:$0xff]  ;;  %v11919_v2 = vld [vmem:[%s11905_s27 + $0x8] sm:$0xff] }
  0x1b   : > { %v666_v3 = vsel %vm665_vm0, %v11913_v0, 0.0  ;;  %v672_v4 = vsel %vm665_vm0, %v11916_v1, 0.0  ;;  %v11926_v5 = vld [vmem:[%s11905_s27 + $0x18] sm:$0xff]  ;;  %v669_v6 = vsel %vm665_vm0, %v11919_v2, 0.0  ;;  %v11933_v8 = vld [vmem:[%s11905_s27 + $0x20] sm:$0xff]  ;;  %v11936_v9 = vld [vmem:[%s11905_s27 + $0x28] sm:$0xff] }
  0x1c   : > { %667 = vadd.xlane.f32.xlu0 %v666_v3  ;;  %673 = vadd.xlane.f32.xlu1 %v672_v4  ;;  %v675_v7 = vsel %vm665_vm0, %v11926_v5, 0.0  ;;  %v678_v10 = vsel %vm665_vm0, %v11933_v8, 0.0  ;;  %v681_v11 = vsel %vm665_vm0, %v11936_v9, 0.0  ;;  %v11943_v12 = vld [vmem:[%s11905_s27 + $0x30] sm:$0xff]  ;;  %v11946_v13 = vld [vmem:[%s11905_s27 + $0x38] sm:$0xff]  ;;  %v11953_v16 = vld [vmem:[%s11905_s27 + $0x40] sm:$0xff] }
  0x1d   : > { %v684_v14 = vsel %vm665_vm0, %v11943_v12, 0.0  ;;  %v687_v15 = vsel %vm665_vm0, %v11946_v13, 0.0  ;;  %v11956_v17 = vld [vmem:[%s11905_s27 + $0x48] sm:$0xff]  ;;  %v690_v18 = vsel %vm665_vm0, %v11953_v16, 0.0  ;;  %v11963_v20 = vld [vmem:[%s11905_s27 + $0x50] sm:$0xff]  ;;  %v11966_v21 = vld [vmem:[%s11905_s27 + $0x58] sm:$0xff] }
  0x1e   : > { %v693_v19 = vsel %vm665_vm0, %v11956_v17, 0.0  ;;  %v696_v22 = vsel %vm665_vm0, %v11963_v20, 0.0  ;;  %v699_v23 = vsel %vm665_vm0, %v11966_v21, 0.0  ;;  %v11973_v24 = vld [vmem:[%s11905_s27 + $0x60] sm:$0xff]  ;;  %v11976_v25 = vld [vmem:[%s11905_s27 + $0x68] sm:$0xff]  ;;  %v11983_v28 = vld [vmem:[%s11905_s27 + $0x70] sm:$0xff] }
  0x1f   : > { %v702_v26 = vsel %vm665_vm0, %v11973_v24, 0.0  ;;  %v705_v27 = vsel %vm665_vm0, %v11976_v25, 0.0  ;;  %v11986_v29 = vld [vmem:[%s11905_s27 + $0x78] sm:$0xff]  ;;  %v708_v30 = vsel %vm665_vm0, %v11983_v28, 0.0  ;;  %v11993_v32 = vld [vmem:[%s11905_s27 + $0x80] sm:$0xff]  ;;  %v11996_v33 = vld [vmem:[%s11905_s27 + $0x88] sm:$0xff] }
  0x20   : > { %670 = vadd.xlane.f32.xlu0 %v669_v6  ;;  %676 = vadd.xlane.f32.xlu1 %v675_v7  ;;  %v711_v31 = vsel %vm665_vm0, %v11986_v29, 0.0  ;;  %v714_v34 = vsel %vm665_vm0, %v11993_v32, 0.0  ;;  %v717_v35 = vsel %vm665_vm0, %v11996_v33, 0.0  ;;  %v12003_v36 = vld [vmem:[%s11905_s27 + $0x90] sm:$0xff]  ;;  %v12006_v37 = vld [vmem:[%s11905_s27 + $0x98] sm:$0xff]  ;;  %v12013_v40 = vld [vmem:[%s11905_s27 + $0xa0] sm:$0xff] }
  0x21   : > { %v720_v38 = vsel %vm665_vm0, %v12003_v36, 0.0  ;;  %v723_v39 = vsel %vm665_vm0, %v12006_v37, 0.0  ;;  %v12016_v41 = vld [vmem:[%s11905_s27 + $0xa8] sm:$0xff]  ;;  %v726_v42 = vsel %vm665_vm0, %v12013_v40, 0.0  ;;  %v12023_v44 = vld [vmem:[%s11905_s27 + $0xb0] sm:$0xff]  ;;  %v12026_v45 = vld [vmem:[%s11905_s27 + $0xb8] sm:$0xff] }
  0x22   : > { %v729_v43 = vsel %vm665_vm0, %v12016_v41, 0.0  ;;  %v732_v46 = vsel %vm665_vm0, %v12023_v44, 0.0  ;;  %v735_v47 = vsel %vm665_vm0, %v12026_v45, 0.0  ;;  %v12033_v48 = vld [vmem:[%s11905_s27 + $0xc0] sm:$0xff]  ;;  %v12036_v49 = vld [vmem:[%s11905_s27 + $0xc8] sm:$0xff]  ;;  %v12043_v52 = vld [vmem:[%s11905_s27 + $0xd0] sm:$0xff] }
  0x23   : > { %v738_v50 = vsel %vm665_vm0, %v12033_v48, 0.0  ;;  %v741_v51 = vsel %vm665_vm0, %v12036_v49, 0.0  ;;  %v12046_v53 = vld [vmem:[%s11905_s27 + $0xd8] sm:$0xff]  ;;  %v744_v54 = vsel %vm665_vm0, %v12043_v52, 0.0  ;;  %v12053_v56 = vld [vmem:[%s11905_s27 + $0xe0] sm:$0xff]  ;;  %v12056_v57 = vld [vmem:[%s11905_s27 + $0xe8] sm:$0xff] }
  0x24   : > { %679 = vadd.xlane.f32.xlu0 %v678_v10  ;;  %682 = vadd.xlane.f32.xlu1 %v681_v11  ;;  %v747_v55 = vsel %vm665_vm0, %v12046_v53, 0.0  ;;  %v750_v58 = vsel %vm665_vm0, %v12053_v56, 0.0  ;;  %v753_v59 = vsel %vm665_vm0, %v12056_v57, 0.0  ;;  %v12063_v60 = vld [vmem:[%s11905_s27 + $0xf0] sm:$0xff]  ;;  %v12066_v61 = vld [vmem:[%s11905_s27 + $0xf8] sm:$0xff] }
  0x25   : > { %v756_v62 = vsel %vm665_vm0, %v12063_v60, 0.0  ;;  %v759_v63 = vsel %vm665_vm0, %v12066_v61, 0.0 }
  0x28   : > { %685 = vadd.xlane.f32.xlu0 %v684_v14  ;;  %688 = vadd.xlane.f32.xlu1 %v687_v15 }
  0x2c   : > { %691 = vadd.xlane.f32.xlu0 %v690_v18  ;;  %694 = vadd.xlane.f32.xlu1 %v693_v19 }
  0x30   : > { %697 = vadd.xlane.f32.xlu0 %v696_v22  ;;  %700 = vadd.xlane.f32.xlu1 %v699_v23 }
  0x34   : > { %703 = vadd.xlane.f32.xlu0 %v702_v26  ;;  %706 = vadd.xlane.f32.xlu1 %v705_v27 }
  0x38   : > { %709 = vadd.xlane.f32.xlu0 %v708_v30  ;;  %712 = vadd.xlane.f32.xlu1 %v711_v31 }
  0x3c   : > { %715 = vadd.xlane.f32.xlu0 %v714_v34  ;;  %718 = vadd.xlane.f32.xlu1 %v717_v35 }
  0x40   : > { %721 = vadd.xlane.f32.xlu0 %v720_v38  ;;  %724 = vadd.xlane.f32.xlu1 %v723_v39 }
  0x44   : > { %727 = vadd.xlane.f32.xlu0 %v726_v42  ;;  %730 = vadd.xlane.f32.xlu1 %v729_v43 }
  0x48   : > { %733 = vadd.xlane.f32.xlu0 %v732_v46  ;;  %736 = vadd.xlane.f32.xlu1 %v735_v47 }
  0x4c   : > { %739 = vadd.xlane.f32.xlu0 %v738_v50  ;;  %742 = vadd.xlane.f32.xlu1 %v741_v51 }
  0x50   : > { %745 = vadd.xlane.f32.xlu0 %v744_v54  ;;  %748 = vadd.xlane.f32.xlu1 %v747_v55 }
  0x54   : > { %751 = vadd.xlane.f32.xlu0 %v750_v58  ;;  %754 = vadd.xlane.f32.xlu1 %v753_v59 }
  0x58   : > { %757 = vadd.xlane.f32.xlu0 %v756_v62  ;;  %760 = vadd.xlane.f32.xlu1 %v759_v63 }
  0xa9   : > { %v668_v3 = vpop.xlane.xlu0 %667  ;;  %v674_v4 = vpop.xlane.xlu1 %673 }
  0xaa   : > { %v763_v6 = vmul.f32 0.0625, %v668_v3  ;;  %v765_v7 = vmul.f32 0.0625, %v674_v4 }
  0xac   : > { %v12073_v10 = vsub.f32 %v11913_v0, %v763_v6  ;;  %v12076_v11 = vsub.f32 %v11916_v1, %v765_v7 }
  0xad   : > { %v671_v14 = vpop.xlane.xlu0 %670  ;;  %v677_v15 = vpop.xlane.xlu1 %676 }
  0xae   : > { %v764_v18 = vmul.f32 0.0625, %v671_v14  ;;  %v766_v19 = vmul.f32 0.0625, %v677_v15  ;;  %v827_v22 = vmul.f32 %v12073_v10, %v12073_v10  ;;  %v829_v23 = vmul.f32 %v12076_v11, %v12076_v11 }
  0xb0   : > { %v12083_v26 = vsub.f32 %v11919_v2, %v764_v18  ;;  %v12086_v27 = vsub.f32 %v11926_v5, %v766_v19  ;;  %v859_v0 = vsel %vm665_vm0, %v827_v22, 0.0  ;;  %v865_v31 = vsel %vm665_vm0, %v829_v23, 0.0 }
  0xb1   : > { %860 = vadd.xlane.f32.xlu0 %v859_v0  ;;  %v680_v1 = vpop.xlane.xlu0 %679  ;;  %v683_v30 = vpop.xlane.xlu1 %682 }
  0xb2   : > { %v767_v34 = vmul.f32 0.0625, %v680_v1  ;;  %v768_v35 = vmul.f32 0.0625, %v683_v30  ;;  %v828_v38 = vmul.f32 %v12083_v26, %v12083_v26  ;;  %v830_v39 = vmul.f32 %v12086_v27, %v12086_v27 }
  0xb4   : > { %v12095_v2 = vsub.f32 %v11933_v8, %v767_v34  ;;  %v12098_v5 = vsub.f32 %v11936_v9, %v768_v35  ;;  %v862_v42 = vsel %vm665_vm0, %v828_v38, 0.0  ;;  %v868_v47 = vsel %vm665_vm0, %v830_v39, 0.0 }
  0xb5   : > { %866 = vadd.xlane.f32.xlu0 %v865_v31  ;;  %863 = vadd.xlane.f32.xlu1 %v862_v42  ;;  %v686_v43 = vpop.xlane.xlu0 %685  ;;  %v689_v46 = vpop.xlane.xlu1 %688 }
  0xb6   : > { %v769_v50 = vmul.f32 0.0625, %v686_v43  ;;  %v770_v51 = vmul.f32 0.0625, %v689_v46  ;;  %v831_v54 = vmul.f32 %v12095_v2, %v12095_v2  ;;  %v832_v8 = vmul.f32 %v12098_v5, %v12098_v5 }
  0xb8   : > { %v12107_v55 = vsub.f32 %v11943_v12, %v769_v50  ;;  %v12110_v9 = vsub.f32 %v11946_v13, %v770_v51  ;;  %v871_v58 = vsel %vm665_vm0, %v831_v54, 0.0  ;;  %v874_v63 = vsel %vm665_vm0, %v832_v8, 0.0 }
  0xb9   : > { %869 = vadd.xlane.f32.xlu1 %v868_v47  ;;  %872 = vadd.xlane.f32.xlu0 %v871_v58  ;;  %v692_v59 = vpop.xlane.xlu0 %691  ;;  %v695_v62 = vpop.xlane.xlu1 %694 }
  0xba   : > { %v771_v3 = vmul.f32 0.0625, %v692_v59  ;;  %v772_v4 = vmul.f32 0.0625, %v695_v62  ;;  %v833_v6 = vmul.f32 %v12107_v55, %v12107_v55  ;;  %v834_v12 = vmul.f32 %v12110_v9, %v12110_v9 }
  0xbc   : > { %v12119_v7 = vsub.f32 %v11953_v16, %v771_v3  ;;  %v12122_v13 = vsub.f32 %v11956_v17, %v772_v4  ;;  %v877_v14 = vsel %vm665_vm0, %v833_v6, 0.0  ;;  %v880_v19 = vsel %vm665_vm0, %v834_v12, 0.0 }
  0xbd   : > { %875 = vadd.xlane.f32.xlu1 %v874_v63  ;;  %878 = vadd.xlane.f32.xlu0 %v877_v14  ;;  %v698_v15 = vpop.xlane.xlu0 %697  ;;  %v701_v18 = vpop.xlane.xlu1 %700 }
  0xbe   : > { %v773_v22 = vmul.f32 0.0625, %v698_v15  ;;  %v774_v23 = vmul.f32 0.0625, %v701_v18  ;;  %v835_v0 = vmul.f32 %v12119_v7, %v12119_v7  ;;  %v836_v16 = vmul.f32 %v12122_v13, %v12122_v13 }
  0xc0   : > { %v12131_v1 = vsub.f32 %v11963_v20, %v773_v22  ;;  %v12134_v17 = vsub.f32 %v11966_v21, %v774_v23  ;;  %v883_v30 = vsel %vm665_vm0, %v835_v0, 0.0  ;;  %v886_v35 = vsel %vm665_vm0, %v836_v16, 0.0 }
  0xc1   : > { %881 = vadd.xlane.f32.xlu1 %v880_v19  ;;  %884 = vadd.xlane.f32.xlu0 %v883_v30  ;;  %v704_v31 = vpop.xlane.xlu0 %703  ;;  %v707_v34 = vpop.xlane.xlu1 %706 }
  0xc2   : > { %v775_v38 = vmul.f32 0.0625, %v704_v31  ;;  %v776_v39 = vmul.f32 0.0625, %v707_v34  ;;  %v837_v42 = vmul.f32 %v12131_v1, %v12131_v1  ;;  %v838_v20 = vmul.f32 %v12134_v17, %v12134_v17 }
  0xc4   : > { %v12143_v43 = vsub.f32 %v11973_v24, %v775_v38  ;;  %v12146_v21 = vsub.f32 %v11976_v25, %v776_v39  ;;  %v889_v46 = vsel %vm665_vm0, %v837_v42, 0.0  ;;  %v892_v51 = vsel %vm665_vm0, %v838_v20, 0.0 }
  0xc5   : > { %887 = vadd.xlane.f32.xlu1 %v886_v35  ;;  %890 = vadd.xlane.f32.xlu0 %v889_v46  ;;  %v710_v47 = vpop.xlane.xlu0 %709  ;;  %v713_v50 = vpop.xlane.xlu1 %712 }
  0xc6   : > { %v777_v54 = vmul.f32 0.0625, %v710_v47  ;;  %v778_v8 = vmul.f32 0.0625, %v713_v50  ;;  %v839_v58 = vmul.f32 %v12143_v43, %v12143_v43  ;;  %v840_v24 = vmul.f32 %v12146_v21, %v12146_v21  ;;  %v1160_v47 = vld [vmem:[%s17483_s21 + $0x8] sm:$0xff] }
  0xc8   : > { %v12155_v59 = vsub.f32 %v11983_v28, %v777_v54  ;;  %v12158_v25 = vsub.f32 %v11986_v29, %v778_v8  ;;  %v895_v62 = vsel %vm665_vm0, %v839_v58, 0.0  ;;  %v898_v4 = vsel %vm665_vm0, %v840_v24, 0.0  ;;  %v1483_v54 = vld [vmem:[%s17484_s25 + $0x8] sm:$0xff] }
  0xc9   : > { %893 = vadd.xlane.f32.xlu1 %v892_v51  ;;  %896 = vadd.xlane.f32.xlu0 %v895_v62  ;;  %v716_v63 = vpop.xlane.xlu0 %715  ;;  %v719_v3 = vpop.xlane.xlu1 %718  ;;  %v1482_v51 = vld [vmem:[%s17484_s25] sm:$0xff] }
  0xca   : > { %v779_v6 = vmul.f32 0.0625, %v716_v63  ;;  %v780_v12 = vmul.f32 0.0625, %v719_v3  ;;  %v841_v14 = vmul.f32 %v12155_v59, %v12155_v59  ;;  %v842_v28 = vmul.f32 %v12158_v25, %v12158_v25 }
  0xcc   : > { %v12167_v15 = vsub.f32 %v11993_v32, %v779_v6  ;;  %v12170_v29 = vsub.f32 %v11996_v33, %v780_v12  ;;  %v901_v18 = vsel %vm665_vm0, %v841_v14, 0.0  ;;  %v904_v23 = vsel %vm665_vm0, %v842_v28, 0.0 }
  0xcd   : > { %899 = vadd.xlane.f32.xlu1 %v898_v4  ;;  %902 = vadd.xlane.f32.xlu0 %v901_v18  ;;  %v722_v19 = vpop.xlane.xlu0 %721  ;;  %v725_v22 = vpop.xlane.xlu1 %724  ;;  %v10537_v4 = vpack.c.bf16 %v1483_v54, %v1482_v51 }
  0xce   : > { %v781_v0 = vmul.f32 0.0625, %v722_v19  ;;  %v782_v16 = vmul.f32 0.0625, %v725_v22  ;;  %v843_v30 = vmul.f32 %v12167_v15, %v12167_v15  ;;  %v844_v32 = vmul.f32 %v12170_v29, %v12170_v29 }
  0xcf   : > { %10538 = vmatprep.subr.bf16.mxu1 %v10537_v4 }
  0xd0   : > { %v12179_v31 = vsub.f32 %v12003_v36, %v781_v0  ;;  %v12182_v33 = vsub.f32 %v12006_v37, %v782_v16  ;;  %v907_v34 = vsel %vm665_vm0, %v843_v30, 0.0  ;;  %v910_v39 = vsel %vm665_vm0, %v844_v32, 0.0  ;;  %v1159_v37 = vld [vmem:[%s17483_s21] sm:$0xff]  ;;  %10540 = vmatpush3.bf16.msra.mxu1 %v10537_v4 }
  0xd1   : > { %905 = vadd.xlane.f32.xlu1 %v904_v23  ;;  %908 = vadd.xlane.f32.xlu0 %v907_v34  ;;  %v728_v35 = vpop.xlane.xlu0 %727  ;;  %v731_v38 = vpop.xlane.xlu1 %730  ;;  %v10533_v50 = vpack.c.bf16 %v1160_v47, %v1159_v37 }
  0xd2   : > { %v783_v42 = vmul.f32 0.0625, %v728_v35  ;;  %v784_v20 = vmul.f32 0.0625, %v731_v38  ;;  %v845_v46 = vmul.f32 %v12179_v31, %v12179_v31  ;;  %v846_v36 = vmul.f32 %v12182_v33, %v12182_v33 }
  0xd3   : > { %10534 = vmatprep.subr.bf16.mxu0 %v10533_v50 }
  0xd4   : > { %v12203_v8 = vsub.f32 %v12013_v40, %v783_v42  ;;  %v12206_v58 = vsub.f32 %v12016_v41, %v784_v20  ;;  %v913_v24 = vsel %vm665_vm0, %v845_v46, 0.0  ;;  %v916_v3 = vsel %vm665_vm0, %v846_v36, 0.0  ;;  %10536 = vmatpush3.bf16.msra.mxu0 %v10533_v50 }
  0xd5   : > { %911 = vadd.xlane.f32.xlu1 %v910_v39  ;;  %914 = vadd.xlane.f32.xlu0 %v913_v24  ;;  %v734_v62 = vpop.xlane.xlu0 %733  ;;  %v737_v63 = vpop.xlane.xlu1 %736 }
  0xd6   : > { %v785_v6 = vmul.f32 0.0625, %v734_v62  ;;  %v786_v12 = vmul.f32 0.0625, %v737_v63  ;;  %v847_v14 = vmul.f32 %v12203_v8, %v12203_v8  ;;  %v848_v40 = vmul.f32 %v12206_v58, %v12206_v58 }
  0xd8   : > { %v12215_v41 = vsub.f32 %v12023_v44, %v785_v6  ;;  %v12218_v28 = vsub.f32 %v12026_v45, %v786_v12  ;;  %v919_v18 = vsel %vm665_vm0, %v847_v14, 0.0  ;;  %v922_v23 = vsel %vm665_vm0, %v848_v40, 0.0 }
  0xd9   : > { %917 = vadd.xlane.f32.xlu1 %v916_v3  ;;  %920 = vadd.xlane.f32.xlu0 %v919_v18  ;;  %v740_v19 = vpop.xlane.xlu0 %739  ;;  %v743_v22 = vpop.xlane.xlu1 %742 }
  0xda   : > { %v787_v0 = vmul.f32 0.0625, %v740_v19  ;;  %v788_v16 = vmul.f32 0.0625, %v743_v22  ;;  %v849_v30 = vmul.f32 %v12215_v41, %v12215_v41  ;;  %v850_v44 = vmul.f32 %v12218_v28, %v12218_v28 }
  0xdc   : > { %v12227_v45 = vsub.f32 %v12033_v48, %v787_v0  ;;  %v12230_v32 = vsub.f32 %v12036_v49, %v788_v16  ;;  %v925_v34 = vsel %vm665_vm0, %v849_v30, 0.0  ;;  %v928_v39 = vsel %vm665_vm0, %v850_v44, 0.0 }
  0xdd   : > { %923 = vadd.xlane.f32.xlu1 %v922_v23  ;;  %926 = vadd.xlane.f32.xlu0 %v925_v34  ;;  %v746_v35 = vpop.xlane.xlu0 %745  ;;  %v749_v38 = vpop.xlane.xlu1 %748 }
  0xde   : > { %v789_v42 = vmul.f32 0.0625, %v746_v35  ;;  %v790_v20 = vmul.f32 0.0625, %v749_v38  ;;  %v851_v46 = vmul.f32 %v12227_v45, %v12227_v45  ;;  %v852_v48 = vmul.f32 %v12230_v32, %v12230_v32 }
  0xe0   : > { %v12239_v36 = vsub.f32 %v12043_v52, %v789_v42  ;;  %v12242_v49 = vsub.f32 %v12046_v53, %v790_v20  ;;  %v931_v37 = vsel %vm665_vm0, %v851_v46, 0.0  ;;  %v934_v51 = vsel %vm665_vm0, %v852_v48, 0.0 }
  0xe1   : > { %929 = vadd.xlane.f32.xlu1 %v928_v39  ;;  %932 = vadd.xlane.f32.xlu0 %v931_v37  ;;  %v752_v47 = vpop.xlane.xlu0 %751  ;;  %v755_v50 = vpop.xlane.xlu1 %754 }
  0xe2   : > { %v791_v54 = vmul.f32 0.0625, %v752_v47  ;;  %v792_v24 = vmul.f32 0.0625, %v755_v50  ;;  %v853_v62 = vmul.f32 %v12239_v36, %v12239_v36  ;;  %v854_v52 = vmul.f32 %v12242_v49, %v12242_v49 }
  0xe4   : > { %v12251_v63 = vsub.f32 %v12053_v56, %v791_v54  ;;  %v12254_v53 = vsub.f32 %v12056_v57, %v792_v24  ;;  %v937_v3 = vsel %vm665_vm0, %v853_v62, 0.0  ;;  %v940_v12 = vsel %vm665_vm0, %v854_v52, 0.0 }
  0xe5   : > { %935 = vadd.xlane.f32.xlu1 %v934_v51  ;;  %938 = vadd.xlane.f32.xlu0 %v937_v3  ;;  %v758_v4 = vpop.xlane.xlu0 %757  ;;  %v761_v6 = vpop.xlane.xlu1 %760 }
  0xe6   : > { %v793_v14 = vmul.f32 0.0625, %v758_v4  ;;  %v794_v40 = vmul.f32 0.0625, %v761_v6  ;;  %v855_v18 = vmul.f32 %v12251_v63, %v12251_v63  ;;  %v856_v56 = vmul.f32 %v12254_v53, %v12254_v53 }
  0xe8   : > { %v12263_v19 = vsub.f32 %v12063_v60, %v793_v14  ;;  %v12266_v57 = vsub.f32 %v12066_v61, %v794_v40  ;;  %v943_v22 = vsel %vm665_vm0, %v855_v18, 0.0  ;;  %v946_v23 = vsel %vm665_vm0, %v856_v56, 0.0  ;;  %v12279_v14 = vld [vmem:[%s17485_s28] ss:$0 sm:$0xff] }
  0xe9   : > { %941 = vadd.xlane.f32.xlu1 %v940_v12  ;;  %944 = vadd.xlane.f32.xlu0 %v943_v22  ;;  %17486 = vst [vmem:[#allocation6_spill] sm:$0xff] %v12279_v14 }
  0xea   : > { %v857_v0 = vmul.f32 %v12263_v19, %v12263_v19  ;;  %v858_v16 = vmul.f32 %v12266_v57, %v12266_v57 }
  0xec   : > { %v949_v30 = vsel %vm665_vm0, %v857_v0, 0.0  ;;  %v952_v60 = vsel %vm665_vm0, %v858_v16, 0.0  ;;  %v12285_v0 = vld [vmem:[%s17487_s0] ss:$0 sm:$0xff] }
  0xed   : > { %947 = vadd.xlane.f32.xlu1 %v946_v23  ;;  %950 = vadd.xlane.f32.xlu0 %v949_v30  ;;  %17488 = vst [vmem:[#allocation7_spill] sm:$0xff] %v12285_v0 }
  0xf1   : > { %953 = vadd.xlane.f32.xlu1 %v952_v60 }
 0x13e   : > { %v861_v61 = vpop.xlane.xlu0 %860 }
 0x13f   : > { %v955_v44 = vmul.f32 0.0625, %v861_v61 }
 0x141   : > { %v987_v34 = vadd.f32 1e-05, %v955_v44 }
 0x142   : > { %v864_v35 = vpop.xlane.xlu1 %863  ;;  %v867_v38 = vpop.xlane.xlu0 %866 }
 0x143   : > { %10964 = vrsqrt.f32 %v987_v34  ;;  %v956_v39 = vmul.f32 0.0625, %v864_v35  ;;  %v957_v42 = vmul.f32 0.0625, %v867_v38 }
 0x145   : > { %v988_v20 = vadd.f32 1e-05, %v956_v39  ;;  %v989_v46 = vadd.f32 1e-05, %v957_v42 }
 0x146   : > { %v870_v48 = vpop.xlane.xlu1 %869  ;;  %v873_v37 = vpop.xlane.xlu0 %872 }
 0x147   : > { %10966 = vrsqrt.f32 %v988_v20  ;;  %v958_v47 = vmul.f32 0.0625, %v870_v48  ;;  %v959_v50 = vmul.f32 0.0625, %v873_v37 }
 0x148   : > { %10968 = vrsqrt.f32 %v989_v46 }
 0x149   : > { %v990_v51 = vadd.f32 1e-05, %v958_v47  ;;  %v991_v54 = vadd.f32 1e-05, %v959_v50 }
 0x14a   : > { %v876_v24 = vpop.xlane.xlu1 %875  ;;  %v879_v62 = vpop.xlane.xlu0 %878 }
 0x14b   : > { %10970 = vrsqrt.f32 %v990_v51  ;;  %v960_v52 = vmul.f32 0.0625, %v876_v24  ;;  %v961_v3 = vmul.f32 0.0625, %v879_v62 }
 0x14c   : > { %10972 = vrsqrt.f32 %v991_v54 }
 0x14d   : > { %v10965_v4 = vpop.eup %10964  ;;  %v992_v6 = vadd.f32 1e-05, %v960_v52  ;;  %v993_v12 = vadd.f32 1e-05, %v961_v3 }
 0x14e   : > { %v882_v40 = vpop.xlane.xlu1 %881  ;;  %v885_v18 = vpop.xlane.xlu0 %884  ;;  %v1051_v56 = vmul.f32 %v10965_v4, %v12073_v10 }
 0x14f   : > { %10974 = vrsqrt.f32 %v992_v6  ;;  %v962_v22 = vmul.f32 0.0625, %v882_v40  ;;  %v963_v23 = vmul.f32 0.0625, %v885_v18 }
 0x150   : > { %10976 = vrsqrt.f32 %v993_v12  ;;  %v1089_v16 = vmul.f32 %v12279_v14, %v1051_v56 }
 0x151   : > { %v10967_v30 = vpop.eup %10966  ;;  %v994_v60 = vadd.f32 1e-05, %v962_v22  ;;  %v995_v61 = vadd.f32 1e-05, %v963_v23 }
 0x152   : > { %v10969_v44 = vpop.eup %10968  ;;  %v888_v34 = vpop.xlane.xlu1 %887  ;;  %v12289_v38 = vadd.f32 %v12285_v0, %v1089_v16  ;;  %v1052_v10 = vmul.f32 %v10967_v30, %v12083_v26 }
 0x153   : > { %v891_v35 = vpop.xlane.xlu0 %890  ;;  %10978 = vrsqrt.f32 %v994_v60  ;;  %v964_v39 = vmul.f32 0.0625, %v888_v34  ;;  %v1053_v20 = vmul.f32 %v10969_v44, %v12076_v11 }
 0x154   : > { %17489 = vst [vmem:[#allocation8_spill] sm:$0xff] %v12289_v38  ;;  %v965_v42 = vmul.f32 0.0625, %v891_v35  ;;  %10980 = vrsqrt.f32 %v995_v61  ;;  %10209 = vmatprep.mubr.msk.f32.mxu0 %vm665_vm0, %v12289_v38  ;;  %10261 = vmatprep.mubr.msk.f32.mxu1 %vm665_vm0, %v12289_v38  ;;  %v1090_v46 = vmul.f32 %v12279_v14, %v1052_v10 }
 0x155   : > { %v10971_v48 = vpop.eup %10970  ;;  %v996_v37 = vadd.f32 1e-05, %v964_v39  ;;  %v1091_v50 = vmul.f32 %v12279_v14, %v1053_v20 }
 0x156   : > { %v997_v47 = vadd.f32 1e-05, %v965_v42  ;;  %v10973_v26 = vpop.eup %10972  ;;  %v894_v51 = vpop.xlane.xlu1 %893  ;;  %v12300_v24 = vadd.f32 %v12285_v0, %v1090_v46  ;;  %v1054_v11 = vmul.f32 %v10971_v48, %v12086_v27 }
 0x157   : > { %v897_v54 = vpop.xlane.xlu0 %896  ;;  %10982 = vrsqrt.f32 %v996_v37  ;;  %v966_v62 = vmul.f32 0.0625, %v894_v51  ;;  %v12304_v3 = vadd.f32 %v12285_v0, %v1091_v50  ;;  %v1055_v6 = vmul.f32 %v10973_v26, %v12095_v2 }
 0x158   : > { %17490 = vst [vmem:[#allocation9_spill] sm:$0xff] %v12300_v24  ;;  %v967_v52 = vmul.f32 0.0625, %v897_v54  ;;  %10984 = vrsqrt.f32 %v997_v47  ;;  %10210 = vmatmul.mubr.msk.f32.vlgmr.msra.gmra.mrb[0].mxu0 %vm665_vm0, %v12300_v24  ;;  %10262 = vmatmul.mubr.msk.f32.vlgmr.msra.gmra.mrb[0].mxu1 %vm665_vm0, %v12300_v24  ;;  %v1092_v4 = vmul.f32 %v12279_v14, %v1054_v11 }
 0x159   : > { %17491 = vst [vmem:[#allocation10_spill] sm:$0xff] %v12304_v3  ;;  %v10975_v12 = vpop.eup %10974  ;;  %v998_v40 = vadd.f32 1e-05, %v966_v62  ;;  %10212 = vmatprep.mubr.msk.f32.mxu0 %vm665_vm0, %v12304_v3  ;;  %10264 = vmatprep.mubr.msk.f32.mxu1 %vm665_vm0, %v12304_v3  ;;  %v1093_v16 = vmul.f32 %v12279_v14, %v1055_v6 }
 0x15a   : > { %v999_v27 = vadd.f32 1e-05, %v967_v52  ;;  %v10977_v18 = vpop.eup %10976  ;;  %v900_v56 = vpop.xlane.xlu1 %899  ;;  %v12317_v23 = vadd.f32 %v12285_v0, %v1092_v4  ;;  %v1056_v30 = vmul.f32 %v10975_v12, %v12098_v5 }
 0x15b   : > { %v903_v22 = vpop.xlane.xlu0 %902  ;;  %10986 = vrsqrt.f32 %v998_v40  ;;  %v968_v2 = vmul.f32 0.0625, %v900_v56  ;;  %v1057_v61 = vmul.f32 %v10977_v18, %v12107_v55  ;;  %v12327_v44 = vadd.f32 %v12285_v0, %v1093_v16 }
 0x15c   : > { %17492 = vst [vmem:[#allocation11_spill] sm:$0xff] %v12317_v23  ;;  %v969_v60 = vmul.f32 0.0625, %v903_v22  ;;  %10988 = vrsqrt.f32 %v999_v27  ;;  %10213 = vmatmul.mubr.msk.f32.gmra.mrb[2].mxu0 %vm665_vm0, %v12317_v23  ;;  %10265 = vmatmul.mubr.msk.f32.gmra.mrb[2].mxu1 %vm665_vm0, %v12317_v23  ;;  %v1094_v34 = vmul.f32 %v12279_v14, %v1056_v30 }
 0x15d   : > { %17493 = vst [vmem:[#allocation12_spill] sm:$0xff] %v12327_v44  ;;  %v10979_v35 = vpop.eup %10978  ;;  %v1000_v10 = vadd.f32 1e-05, %v968_v2  ;;  %v1095_v39 = vmul.f32 %v12279_v14, %v1057_v61  ;;  %10215 = vmatprep.mubr.msk.f32.mxu0 %vm665_vm0, %v12327_v44  ;;  %10267 = vmatprep.mubr.msk.f32.mxu1 %vm665_vm0, %v12327_v44 }
 0x15e   : > { %v1001_v5 = vadd.f32 1e-05, %v969_v60  ;;  %v10981_v42 = vpop.eup %10980  ;;  %v906_v55 = vpop.xlane.xlu1 %905  ;;  %v12336_v46 = vadd.f32 %v12285_v0, %v1094_v34  ;;  %v1058_v48 = vmul.f32 %v10979_v35, %v12110_v9 }
 0x15f   : > { %v909_v20 = vpop.xlane.xlu0 %908  ;;  %10990 = vrsqrt.f32 %v1000_v10  ;;  %v970_v37 = vmul.f32 0.0625, %v906_v55  ;;  %v12340_v50 = vadd.f32 %v12285_v0, %v1095_v39  ;;  %v1059_v51 = vmul.f32 %v10981_v42, %v12119_v7 }
 0x160   : > { %17494 = vst [vmem:[#allocation13_spill] sm:$0xff] %v12336_v46  ;;  %v971_v47 = vmul.f32 0.0625, %v909_v20  ;;  %10992 = vrsqrt.f32 %v1001_v5  ;;  %10216 = vmatmul.mubr.msk.f32.gmra.mrb[4].mxu0 %vm665_vm0, %v12336_v46  ;;  %10268 = vmatmul.mubr.msk.f32.gmra.mrb[4].mxu1 %vm665_vm0, %v12336_v46  ;;  %v1096_v26 = vmul.f32 %v12279_v14, %v1058_v48 }
 0x161   : > { %17495 = vst [vmem:[#allocation14_spill] sm:$0xff] %v12340_v50  ;;  %v10983_v54 = vpop.eup %10982  ;;  %v1002_v11 = vadd.f32 1e-05, %v970_v37  ;;  %10218 = vmatprep.mubr.msk.f32.mxu0 %vm665_vm0, %v12340_v50  ;;  %10270 = vmatprep.mubr.msk.f32.mxu1 %vm665_vm0, %v12340_v50  ;;  %v1097_v12 = vmul.f32 %v12279_v14, %v1059_v51 }
 0x162   : > { %v1003_v9 = vadd.f32 1e-05, %v971_v47  ;;  %v10985_v62 = vpop.eup %10984  ;;  %v912_v52 = vpop.xlane.xlu1 %911  ;;  %v12353_v6 = vadd.f32 %v12285_v0, %v1096_v26  ;;  %v1060_v40 = vmul.f32 %v10983_v54, %v12122_v13 }
 0x163   : > { %v915_v4 = vpop.xlane.xlu0 %914  ;;  %10994 = vrsqrt.f32 %v1002_v11  ;;  %v972_v7 = vmul.f32 0.0625, %v912_v52  ;;  %v1061_v18 = vmul.f32 %v10985_v62, %v12131_v1  ;;  %v12363_v56 = vadd.f32 %v12285_v0, %v1097_v12 }
 0x164   : > { %17496 = vst [vmem:[#allocation15_spill] sm:$0xff] %v12353_v6  ;;  %v973_v27 = vmul.f32 0.0625, %v915_v4  ;;  %10996 = vrsqrt.f32 %v1003_v9  ;;  %10219 = vmatmul.mubr.msk.f32.gmra.mrb[6].mxu0 %vm665_vm0, %v12353_v6  ;;  %10271 = vmatmul.mubr.msk.f32.gmra.mrb[6].mxu1 %vm665_vm0, %v12353_v6  ;;  %v1098_v22 = vmul.f32 %v12279_v14, %v1060_v40 }
 0x165   : > { %17497 = vst [vmem:[#allocation16_spill] sm:$0xff] %v12363_v56  ;;  %v10987_v16 = vpop.eup %10986  ;;  %v1004_v30 = vadd.f32 1e-05, %v972_v7  ;;  %v1099_v2 = vmul.f32 %v12279_v14, %v1061_v18  ;;  %10221 = vmatprep.mubr.msk.f32.mxu0 %vm665_vm0, %v12363_v56  ;;  %10273 = vmatprep.mubr.msk.f32.mxu1 %vm665_vm0, %v12363_v56 }
 0x166   : > { %v1005_v13 = vadd.f32 1e-05, %v973_v27  ;;  %v10989_v60 = vpop.eup %10988  ;;  %v918_v1 = vpop.xlane.xlu1 %917  ;;  %v12372_v34 = vadd.f32 %v12285_v0, %v1098_v22  ;;  %v1062_v35 = vmul.f32 %v10987_v16, %v12134_v17 }
 0x167   : > { %v921_v61 = vpop.xlane.xlu0 %920  ;;  %10998 = vrsqrt.f32 %v1004_v30  ;;  %v974_v10 = vmul.f32 0.0625, %v918_v1  ;;  %v12376_v39 = vadd.f32 %v12285_v0, %v1099_v2  ;;  %v1063_v55 = vmul.f32 %v10989_v60, %v12143_v43 }
 0x168   : > { %17498 = vst [vmem:[#allocation17_spill] sm:$0xff] %v12372_v34  ;;  %v975_v5 = vmul.f32 0.0625, %v921_v61  ;;  %11000 = vrsqrt.f32 %v1005_v13  ;;  %10222 = vmatmul.mubr.msk.f32.gmra.mrb[8].mxu0 %vm665_vm0, %v12372_v34  ;;  %10274 = vmatmul.mubr.msk.f32.gmra.mrb[8].mxu1 %vm665_vm0, %v12372_v34  ;;  %v1100_v42 = vmul.f32 %v12279_v14, %v1062_v35 }
 0x169   : > { %17499 = vst [vmem:[#allocation18_spill] sm:$0xff] %v12376_v39  ;;  %v10991_v20 = vpop.eup %10990  ;;  %v1006_v48 = vadd.f32 1e-05, %v974_v10  ;;  %10224 = vmatprep.mubr.msk.f32.mxu0 %vm665_vm0, %v12376_v39  ;;  %10276 = vmatprep.mubr.msk.f32.mxu1 %vm665_vm0, %v12376_v39  ;;  %v1101_v54 = vmul.f32 %v12279_v14, %v1063_v55 }
 0x16a   : > { %v1007_v17 = vadd.f32 1e-05, %v975_v5  ;;  %v10993_v37 = vpop.eup %10992  ;;  %v924_v47 = vpop.xlane.xlu1 %923  ;;  %v12389_v51 = vadd.f32 %v12285_v0, %v1100_v42  ;;  %v1064_v11 = vmul.f32 %v10991_v20, %v12146_v21 }
 0x16b   : > { %v927_v26 = vpop.xlane.xlu0 %926  ;;  %11002 = vrsqrt.f32 %v1006_v48  ;;  %v976_v43 = vmul.f32 0.0625, %v924_v47  ;;  %v1065_v62 = vmul.f32 %v10993_v37, %v12155_v59  ;;  %v12399_v52 = vadd.f32 %v12285_v0, %v1101_v54 }
 0x16c   : > { %17500 = vst [vmem:[#allocation19_spill] sm:$0xff] %v12389_v51  ;;  %v977_v9 = vmul.f32 0.0625, %v927_v26  ;;  %11004 = vrsqrt.f32 %v1007_v17  ;;  %10225 = vmatmul.mubr.msk.f32.gmra.mrb[10].mxu0 %vm665_vm0, %v12389_v51  ;;  %10277 = vmatmul.mubr.msk.f32.gmra.mrb[10].mxu1 %vm665_vm0, %v12389_v51  ;;  %v1102_v4 = vmul.f32 %v12279_v14, %v1064_v11 }
 0x16d   : > { %17501 = vst [vmem:[#allocation20_spill] sm:$0xff] %v12399_v52  ;;  %v10995_v12 = vpop.eup %10994  ;;  %v1008_v40 = vadd.f32 1e-05, %v976_v43  ;;  %v1103_v7 = vmul.f32 %v12279_v14, %v1065_v62  ;;  %10227 = vmatprep.mubr.msk.f32.mxu0 %vm665_vm0, %v12399_v52  ;;  %10279 = vmatprep.mubr.msk.f32.mxu1 %vm665_vm0, %v12399_v52 }
 0x16e   : > { %v1009_v21 = vadd.f32 1e-05, %v977_v9  ;;  %v10997_v27 = vpop.eup %10996  ;;  %v930_v59 = vpop.xlane.xlu1 %929  ;;  %v12408_v22 = vadd.f32 %v12285_v0, %v1102_v4  ;;  %v1066_v16 = vmul.f32 %v10995_v12, %v12158_v25 }
 0x16f   : > { %v933_v18 = vpop.xlane.xlu0 %932  ;;  %11006 = vrsqrt.f32 %v1008_v40  ;;  %v978_v30 = vmul.f32 0.0625, %v930_v59  ;;  %v12412_v2 = vadd.f32 %v12285_v0, %v1103_v7  ;;  %v1067_v1 = vmul.f32 %v10997_v27, %v12167_v15 }
 0x170   : > { %17502 = vst [vmem:[#allocation21_spill] sm:$0xff] %v12408_v22  ;;  %v979_v13 = vmul.f32 0.0625, %v933_v18  ;;  %11008 = vrsqrt.f32 %v1009_v21  ;;  %10228 = vmatmul.mubr.msk.f32.gmra.mrb[12].mxu0 %vm665_vm0, %v12408_v22  ;;  %10280 = vmatmul.mubr.msk.f32.gmra.mrb[12].mxu1 %vm665_vm0, %v12408_v22  ;;  %v1104_v60 = vmul.f32 %v12279_v14, %v1066_v16 }
 0x171   : > { %17503 = vst [vmem:[#allocation22_spill] sm:$0xff] %v12412_v2  ;;  %v10999_v61 = vpop.eup %10998  ;;  %v1010_v35 = vadd.f32 1e-05, %v978_v30  ;;  %10230 = vmatprep.mubr.msk.f32.mxu0 %vm665_vm0, %v12412_v2  ;;  %10282 = vmatprep.mubr.msk.f32.mxu1 %vm665_vm0, %v12412_v2  ;;  %v1105_v20 = vmul.f32 %v12279_v14, %v1067_v1 }
 0x172   : > { %v1011_v25 = vadd.f32 1e-05, %v979_v13  ;;  %v11001_v10 = vpop.eup %11000  ;;  %v936_v5 = vpop.xlane.xlu1 %935  ;;  %v12425_v55 = vadd.f32 %v12285_v0, %v1104_v60  ;;  %v1068_v48 = vmul.f32 %v10999_v61, %v12170_v29 }
 0x173   : > { %v939_v42 = vpop.xlane.xlu0 %938  ;;  %11010 = vrsqrt.f32 %v1010_v35  ;;  %v980_v15 = vmul.f32 0.0625, %v936_v5  ;;  %v1069_v37 = vmul.f32 %v11001_v10, %v12179_v31  ;;  %v12435_v47 = vadd.f32 %v12285_v0, %v1105_v20 }
 0x174   : > { %17504 = vst [vmem:[#allocation23_spill] sm:$0xff] %v12425_v55  ;;  %v981_v17 = vmul.f32 0.0625, %v939_v42  ;;  %11012 = vrsqrt.f32 %v1011_v25  ;;  %10231 = vmatmul.mubr.msk.f32.gmra.mrb[14].mxu0 %vm665_vm0, %v12425_v55  ;;  %10283 = vmatmul.mubr.msk.f32.gmra.mrb[14].mxu1 %vm665_vm0, %v12425_v55  ;;  %v1106_v26 = vmul.f32 %v12279_v14, %v1068_v48 }
 0x175   : > { %17505 = vst [vmem:[#allocation24_spill] sm:$0xff] %v12435_v47  ;;  %v11003_v54 = vpop.eup %11002  ;;  %v1012_v11 = vadd.f32 1e-05, %v980_v15  ;;  %v1107_v43 = vmul.f32 %v12279_v14, %v1069_v37  ;;  %10233 = vmatprep.mubr.msk.f32.mxu0 %vm665_vm0, %v12435_v47  ;;  %10285 = vmatprep.mubr.msk.f32.mxu1 %vm665_vm0, %v12435_v47 }
 0x176   : > { %v1013_v29 = vadd.f32 1e-05, %v981_v17  ;;  %v11005_v9 = vpop.eup %11004  ;;  %v942_v31 = vpop.xlane.xlu1 %941  ;;  %v12444_v4 = vadd.f32 %v12285_v0, %v1106_v26  ;;  %v1070_v12 = vmul.f32 %v11003_v54, %v12182_v33 }
 0x177   : > { %v945_v62 = vpop.xlane.xlu0 %944  ;;  %11014 = vrsqrt.f32 %v1012_v11  ;;  %v982_v40 = vmul.f32 0.0625, %v942_v31  ;;  %v12448_v7 = vadd.f32 %v12285_v0, %v1107_v43  ;;  %v1071_v59 = vmul.f32 %v11005_v9, %v12203_v8 }
 0x178   : > { %17506 = vst [vmem:[#allocation25_spill] sm:$0xff] %v12444_v4  ;;  %v983_v21 = vmul.f32 0.0625, %v945_v62  ;;  %11016 = vrsqrt.f32 %v1013_v29  ;;  %10234 = vmatmul.mubr.msk.f32.gmra.mrb[16].mxu0 %vm665_vm0, %v12444_v4  ;;  %10286 = vmatmul.mubr.msk.f32.gmra.mrb[16].mxu1 %vm665_vm0, %v12444_v4  ;;  %v1108_v27 = vmul.f32 %v12279_v14, %v1070_v12 }
 0x179   : > { %17507 = vst [vmem:[#allocation26_spill] sm:$0xff] %v12448_v7  ;;  %v11007_v18 = vpop.eup %11006  ;;  %v1014_v16 = vadd.f32 1e-05, %v982_v40  ;;  %10236 = vmatprep.mubr.msk.f32.mxu0 %vm665_vm0, %v12448_v7  ;;  %10288 = vmatprep.mubr.msk.f32.mxu1 %vm665_vm0, %v12448_v7  ;;  %v1109_v61 = vmul.f32 %v12279_v14, %v1071_v59 }
 0x17a   : > { %v1015_v33 = vadd.f32 1e-05, %v983_v21  ;;  %v11009_v30 = vpop.eup %11008  ;;  %v948_v13 = vpop.xlane.xlu1 %947  ;;  %v12461_v1 = vadd.f32 %v12285_v0, %v1108_v27  ;;  %v1072_v35 = vmul.f32 %v11007_v18, %v12206_v58 }
 0x17b   : > { %v951_v60 = vpop.xlane.xlu0 %950  ;;  %11018 = vrsqrt.f32 %v1014_v16  ;;  %v984_v8 = vmul.f32 0.0625, %v948_v13  ;;  %v1073_v10 = vmul.f32 %v11009_v30, %v12215_v41  ;;  %v12471_v5 = vadd.f32 %v12285_v0, %v1109_v61 }
 0x17c   : > { %17508 = vst [vmem:[#allocation27_spill] sm:$0xff] %v12461_v1  ;;  %v985_v25 = vmul.f32 0.0625, %v951_v60  ;;  %11020 = vrsqrt.f32 %v1015_v33  ;;  %10237 = vmatmul.mubr.msk.f32.gmra.mrb[18].mxu0 %vm665_vm0, %v12461_v1  ;;  %10289 = vmatmul.mubr.msk.f32.gmra.mrb[18].mxu1 %vm665_vm0, %v12461_v1  ;;  %v1110_v42 = vmul.f32 %v12279_v14, %v1072_v35 }
 0x17d   : > { %17509 = vst [vmem:[#allocation28_spill] sm:$0xff] %v12471_v5  ;;  %v11011_v20 = vpop.eup %11010  ;;  %v1016_v48 = vadd.f32 1e-05, %v984_v8  ;;  %v1111_v15 = vmul.f32 %v12279_v14, %v1073_v10  ;;  %10239 = vmatprep.mubr.msk.f32.mxu0 %vm665_vm0, %v12471_v5  ;;  %10291 = vmatprep.mubr.msk.f32.mxu1 %vm665_vm0, %v12471_v5 }
 0x17e   : > { %v1017_v58 = vadd.f32 1e-05, %v985_v25  ;;  %v11013_v17 = vpop.eup %11012  ;;  %v954_v41 = vpop.xlane.xlu1 %953  ;;  %v12480_v37 = vadd.f32 %v12285_v0, %v1110_v42  ;;  %v1074_v26 = vmul.f32 %v11011_v20, %v12218_v28 }
 0x17f   : > { %11022 = vrsqrt.f32 %v1016_v48  ;;  %v986_v54 = vmul.f32 0.0625, %v954_v41  ;;  %v12484_v11 = vadd.f32 %v12285_v0, %v1111_v15  ;;  %v1075_v29 = vmul.f32 %v11013_v17, %v12227_v45  ;;  %v2602_v17 = vld [vmem:[%s17264_s9 + $0x8] sm:$0xff] }
 0x180   : > { %17510 = vst [vmem:[#allocation29_spill] sm:$0xff] %v12480_v37  ;;  %11024 = vrsqrt.f32 %v1017_v58  ;;  %10240 = vmatmul.mubr.msk.f32.gmra.mrb[20].mxu0 %vm665_vm0, %v12480_v37  ;;  %10292 = vmatmul.mubr.msk.f32.gmra.mrb[20].mxu1 %vm665_vm0, %v12480_v37  ;;  %v1112_v43 = vmul.f32 %v12279_v14, %v1074_v26  ;;  %v2603_v26 = vld [vmem:[%s17264_s9 + $0x10] sm:$0xff] }
 0x181   : > { %17511 = vst [vmem:[#allocation30_spill] sm:$0xff] %v12484_v11  ;;  %v11015_v9 = vpop.eup %11014  ;;  %v1018_v31 = vadd.f32 1e-05, %v986_v54  ;;  %10242 = vmatprep.mubr.msk.f32.mxu0 %vm665_vm0, %v12484_v11  ;;  %10294 = vmatprep.mubr.msk.f32.mxu1 %vm665_vm0, %v12484_v11  ;;  %v1113_v28 = vmul.f32 %v12279_v14, %v1075_v29  ;;  %v2604_v54 = vld [vmem:[%s17264_s9 + $0x18] sm:$0xff]  ;;  %v3222_v29 = vld [vmem:[%s17262_s7] sm:$0xff] }
 0x182   : > { %v11017_v45 = vpop.eup %11016  ;;  %v12498_v62 = vadd.f32 %v12285_v0, %v1112_v43  ;;  %v1076_v12 = vmul.f32 %v11015_v9, %v12230_v32  ;;  %v10545_v43 = vpack.c.bf16 %v2604_v54, %v2603_v26  ;;  %v3223_v9 = vld [vmem:[%s17262_s7 + $0x8] sm:$0xff] }
 0x183   : > { %11026 = vrsqrt.f32 %v1018_v31  ;;  %v12502_v40 = vadd.f32 %v12285_v0, %v1113_v28  ;;  %v1077_v21 = vmul.f32 %v11017_v45, %v12239_v36  ;;  %v3224_v31 = vld [vmem:[%s17262_s7 + $0x10] sm:$0xff]  ;;  %v3225_v28 = vld [vmem:[%s17262_s7 + $0x18] sm:$0xff]  ;;  %v10549_v45 = vpack.c.bf16 %v3223_v9, %v3222_v29 }
 0x184   : > { %17512 = vst [vmem:[#allocation31_spill] sm:$0xff] %v12498_v62  ;;  %10243 = vmatmul.mubr.msk.f32.gmra.mrb[22].mxu0 %vm665_vm0, %v12498_v62  ;;  %10295 = vmatmul.mubr.msk.f32.gmra.mrb[22].mxu1 %vm665_vm0, %v12498_v62  ;;  %v1114_v27 = vmul.f32 %v12279_v14, %v1076_v12  ;;  %v10553_v12 = vpack.c.bf16 %v3225_v28, %v3224_v31 }
 0x185   : > { %17513 = vst [vmem:[#allocation32_spill] sm:$0xff] %v12502_v40  ;;  %v11019_v59 = vpop.eup %11018  ;;  %10245 = vmatprep.mubr.msk.f32.mxu0 %vm665_vm0, %v12502_v40  ;;  %10297 = vmatprep.mubr.msk.f32.mxu1 %vm665_vm0, %v12502_v40  ;;  %v1115_v32 = vmul.f32 %v12279_v14, %v1077_v21  ;;  %v1710_v21 = vlaneseq }
 0x186   : > { %v11021_v18 = vpop.eup %11020  ;;  %v12516_v36 = vadd.f32 %v12285_v0, %v1114_v27  ;;  %v1078_v16 = vmul.f32 %v11019_v59, %v12242_v49  ;;  %10550 = vmatprep.subr.bf16.mxu1 %v10549_v45 }
 0x187   : > { %v12520_v33 = vadd.f32 %v12285_v0, %v1115_v32  ;;  %v1079_v30 = vmul.f32 %v11021_v18, %v12251_v63  ;;  %10552 = vmatpush3.bf16.msra.mxu1 %v10549_v45  ;;  %v12598_v27 = vshrl.u32 %v1710_v21, 7  ;;  %v1709_v18 = vld [vmem:[%s17260_s5] sm:$0xf] }
 0x188   : > { %17514 = vst [vmem:[#allocation33_spill] sm:$0xff] %v12516_v36  ;;  %10246 = vmatmul.mubr.msk.f32.gmra.mrb[24].mxu0 %vm665_vm0, %v12516_v36  ;;  %10298 = vmatmul.mubr.msk.f32.gmra.mrb[24].mxu1 %vm665_vm0, %v12516_v36  ;;  %v1116_v13 = vmul.f32 %v12279_v14, %v1078_v16 }
 0x189   : > { %17515 = vst [vmem:[#allocation34_spill] sm:$0xff] %v12520_v33  ;;  %v11023_v60 = vpop.eup %11022  ;;  %10248 = vmatprep.mubr.msk.f32.mxu0 %vm665_vm0, %v12520_v33  ;;  %10300 = vmatprep.mubr.msk.f32.mxu1 %vm665_vm0, %v12520_v33  ;;  %v1117_v49 = vmul.f32 %v12279_v14, %v1079_v30  ;;  %17521 = vst [vmem:[#allocation40_spill] sm:$0xff] %v12598_v27  ;;  %v17278_v59 = vsub.s32 3, %v12598_v27  ;;  %v17281_v32 = vsub.s32 0, %v12598_v27  ;;  %v17280_v16 = vsub.s32 1, %v12598_v27 }
 0x18a   : > { %v11025_v61 = vpop.eup %11024  ;;  %v12534_v63 = vadd.f32 %v12285_v0, %v1116_v13  ;;  %v1080_v35 = vmul.f32 %v11023_v60, %v12254_v53  ;;  %10554 = vmatprep.subr.bf16.mxu1 %v10553_v12  ;;  %v17279_v30 = vsub.s32 2, %v12598_v27  ;;  %vm1811_vm1 = vcmp.lt.s32.totalorder %v12598_v27, 3 }
 0x18b   : > { %v12538_v8 = vadd.f32 %v12285_v0, %v1117_v49  ;;  %v1081_v25 = vmul.f32 %v11025_v61, %v12263_v19  ;;  %10556 = vmatpush3.bf16.msra.mxu1 %v10553_v12  ;;  %v12611_v60 = vrot.slane %v1709_v18, %v17278_v59  ;;  %v12618_v61 = vrot.slane %v1709_v18, %v17281_v32 }
 0x18c   : > { %17516 = vst [vmem:[#allocation35_spill] sm:$0xff] %v12534_v63  ;;  %10249 = vmatmul.mubr.msk.f32.gmra.mrb[26].mxu0 %vm665_vm0, %v12534_v63  ;;  %10301 = vmatmul.mubr.msk.f32.gmra.mrb[26].mxu1 %vm665_vm0, %v12534_v63  ;;  %v1118_v10 = vmul.f32 %v12279_v14, %v1080_v35  ;;  %vm2008_vm2 = vcmp.lt.s32.totalorder %v12598_v27, 2  ;;  %vm2205_vm3 = vcmp.lt.s32.totalorder %v12598_v27, 1  ;;  %vm1844_vm4 = vcmp.ge.s32.totalorder %v12598_v27, 3 }
 0x18d   : > { %17517 = vst [vmem:[#allocation36_spill] sm:$0xff] %v12538_v8  ;;  %v11027_v42 = vpop.eup %11026  ;;  %10251 = vmatprep.mubr.msk.f32.mxu0 %vm665_vm0, %v12538_v8  ;;  %10303 = vmatprep.mubr.msk.f32.mxu1 %vm665_vm0, %v12538_v8  ;;  %v1119_v53 = vmul.f32 %v12279_v14, %v1081_v25  ;;  %vm2041_vm5 = vcmp.ge.s32.totalorder %v12598_v27, 2  ;;  %vm2238_vm6 = vcmp.ge.s32.totalorder %v12598_v27, 1 }
 0x18e   : > { %v12552_v20 = vadd.f32 %v12285_v0, %v1118_v10  ;;  %v1082_v19 = vmul.f32 %v11027_v42, %v12266_v57  ;;  %v2601_v57 = vld [vmem:[%s17264_s9] sm:$0xff] }
 0x18f   : > { %v12556_v48 = vadd.f32 %v12285_v0, %v1119_v53  ;;  %v10541_v41 = vpack.c.bf16 %v2602_v17, %v2601_v57  ;;  %v12633_v57 = vrot.slane %v1709_v18, %v17280_v16 }
 0x190   : > { %17518 = vst [vmem:[#allocation37_spill] sm:$0xff] %v12552_v20  ;;  %10252 = vmatmul.mubr.msk.f32.gmra.mrb[28].mxu0 %vm665_vm0, %v12552_v20  ;;  %10304 = vmatmul.mubr.msk.f32.gmra.mrb[28].mxu1 %vm665_vm0, %v12552_v20  ;;  %v1120_v58 = vmul.f32 %v12279_v14, %v1082_v19 }
 0x191   : > { %17519 = vst [vmem:[#allocation38_spill] sm:$0xff] %v12556_v48  ;;  %10254 = vmatprep.mubr.msk.f32.mxu0 %vm665_vm0, %v12556_v48  ;;  %10306 = vmatprep.mubr.msk.f32.mxu1 %vm665_vm0, %v12556_v48 }
 0x192   : > { %v12568_v15 = vadd.f32 %v12285_v0, %v1120_v58  ;;  %10542 = vmatprep.subr.bf16.mxu0 %v10541_v41 }
 0x193   : > { %10544 = vmatpush3.bf16.msra.mxu0 %v10541_v41  ;;  %v12638_v41 = vrot.slane %v1709_v18, %v17279_v30 }
 0x194   : > { %17520 = vst [vmem:[#allocation39_spill] sm:$0xff] %v12568_v15  ;;  %10255 = vmatmul.mubr.msk.f32.gmra.mrb[30].mxu0 %vm665_vm0, %v12568_v15  ;;  %10307 = vmatmul.mubr.msk.f32.gmra.mrb[30].mxu1 %vm665_vm0, %v12568_v15 }
 0x195   : > { %10546 = vmatprep.subr.bf16.mxu0 %v10545_v43 }
 0x197   : > { %10548 = vmatpush3.bf16.msra.mxu0 %v10545_v43 }
 0x22b   : > { %v12607_v13 = vpop.f32.mrb[0].mxu0  ;;  %v12613_v49 = vpop.f32.mrb[0].mxu1 }
 0x22c   : > { %17522 = vst [vmem:[#allocation41_spill] sm:$0xff] %v12613_v49  ;;  %v1780_v35 = vrot.slane %v12607_v13, 5  ;;  %v1977_v25 = vrot.slane %v12607_v13, 6  ;;  %v17285_v10 = vrot.slane %v12607_v13, 7  ;;  %v12624_v42 = vpop.f32.mrb[1].mxu0  ;;  %v12627_v53 = vpop.f32.mrb[1].mxu1  ;;  %v1748_v31 = vmul.f32 %v12607_v13, %v12611_v60 }
 0x22d   : > { %17523 = vst [vmem:[#allocation42_spill] sm:$0xff] %v12627_v53  ;;  %v17284_v19 = vrot.slane %v12624_v42, 5  ;;  %v17283_v58 = vrot.slane %v12624_v42, 6  ;;  %v17282_v17 = vrot.slane %v12624_v42, 7  ;;  %v12667_v21 = vmul.f32 %v12611_v60, %v12624_v42 }
 0x22f   : > { %v1842_v26 = vsel %vm1811_vm1, %v17284_v19, %v1780_v35  ;;  %v2039_v54 = vsel %vm2008_vm2, %v17283_v58, %v1977_v25  ;;  %v2236_v29 = vsel %vm2205_vm3, %v17282_v17, %v17285_v10  ;;  %v12654_v43 = vpop.f32.mrb[2].mxu0  ;;  %v12656_v9 = vpop.f32.mrb[2].mxu1 }
 0x230   : > { %17524 = vst [vmem:[#allocation43_spill] sm:$0xff] %v12656_v9  ;;  %v1913_v28 = vmul.f32 %v12618_v61, %v1842_v26  ;;  %v12661_v45 = vpop.f32.mrb[3].mxu0  ;;  %v12663_v12 = vpop.f32.mrb[3].mxu1  ;;  %v2110_v18 = vmul.f32 %v12633_v57, %v2039_v54  ;;  %v1782_v59 = vrot.slane %v12654_v43, 5  ;;  %v1979_v30 = vrot.slane %v12654_v43, 6 }
 0x231   : > { %17525 = vst [vmem:[#allocation44_spill] sm:$0xff] %v12663_v12  ;;  %v2307_v32 = vmul.f32 %v12638_v41, %v2236_v29  ;;  %v1781_v17 = vrot.slane %v12661_v45, 5  ;;  %v1978_v26 = vrot.slane %v12661_v45, 6  ;;  %v12677_v58 = vmul.f32 %v12654_v43, %v12611_v60 }
 0x232   : > { %v1945_v16 = vadd.f32 %v1913_v28, %v1748_v31  ;;  %v1749_v54 = vmul.f32 %v12611_v60, %v12661_v45 }
 0x233   : > { %v12683_v0 = vpop.f32.mrb[4].mxu0  ;;  %v12685_v31 = vpop.f32.mrb[4].mxu1  ;;  %v1840_v28 = vsel %vm1811_vm1, %v1781_v17, %v1782_v59  ;;  %v1841_v14 = vsel %vm1811_vm1, %v1780_v35, %v1781_v17  ;;  %v12693_v2 = vsel %vm2008_vm2, %v1978_v26, %v1979_v30 }
 0x234   : > { %17526 = vst [vmem:[#allocation45_spill] sm:$0xff] %v12685_v31  ;;  %v2142_v29 = vadd.f32 %v2110_v18, %v1945_v16  ;;  %v12695_v19 = vpop.f32.mrb[5].mxu0  ;;  %v12697_v55 = vpop.f32.mrb[5].mxu1  ;;  %v1914_v10 = vmul.f32 %v12618_v61, %v1841_v14  ;;  %v12701_v48 = vmul.f32 %v12618_v61, %v1840_v28  ;;  %v12705_v16 = vsel %vm2008_vm2, %v1977_v25, %v1978_v26 }
 0x235   : > { %17527 = vst [vmem:[#allocation46_spill] sm:$0xff] %v12697_v55  ;;  %v12709_v35 = vmul.f32 %v12683_v0, %v12611_v60  ;;  %v1784_v18 = vrot.slane %v12683_v0, 5  ;;  %v1981_v15 = vrot.slane %v12683_v0, 6  ;;  %v1751_v14 = vmul.f32 %v12611_v60, %v12695_v19 }
 0x236   : > { %v2339_v17 = vadd.f32 %v2307_v32, %v2142_v29  ;;  %v12714_v22 = vadd.f32 %v1914_v10, %v1749_v54  ;;  %v1783_v28 = vrot.slane %v12695_v19, 5  ;;  %v1980_v25 = vrot.slane %v12695_v19, 6  ;;  %v12727_v32 = vld [vmem:[%s17261_s6] ss:$0 sm:$0xff] }
 0x237   : > { %v12720_v26 = vpop.f32.mrb[6].mxu0  ;;  %v12722_v8 = vpop.f32.mrb[6].mxu1 }
 0x238   : > { %17528 = vst [vmem:[#allocation47_spill] sm:$0xff] %v12722_v8  ;;  %v12732_v10 = vmul.f32 %v12720_v26, %v12611_v60  ;;  %v1786_v54 = vrot.slane %v12720_v26, 5  ;;  %v1983_v52 = vrot.slane %v12720_v26, 6  ;;  %v12736_v20 = vpop.f32.mrb[7].mxu0  ;;  %v12738_v39 = vpop.f32.mrb[7].mxu1  ;;  %v1838_v51 = vsel %vm1811_vm1, %v1783_v28, %v1784_v18 }
 0x239   : > { %17529 = vst [vmem:[#allocation48_spill] sm:$0xff] %v12738_v39  ;;  %v1839_v33 = vsel %vm1811_vm1, %v1782_v59, %v1783_v28  ;;  %v12746_v29 = vsel %vm2008_vm2, %v1980_v25, %v1981_v15  ;;  %v12750_v63 = vsel %vm2008_vm2, %v1979_v30, %v1980_v25  ;;  %v12754_v34 = vmul.f32 %v12618_v61, %v1838_v51 }
 0x23a   : > { %v1916_v56 = vmul.f32 %v12618_v61, %v1839_v33  ;;  %v1753_v36 = vmul.f32 %v12611_v60, %v12736_v20  ;;  %v1785_v59 = vrot.slane %v12736_v20, 5  ;;  %v1982_v28 = vrot.slane %v12736_v20, 6 }
 0x23b   : > { %v12762_v6 = vpop.f32.mrb[8].mxu0  ;;  %v12764_v30 = vpop.f32.mrb[8].mxu1  ;;  %v12767_v33 = vadd.f32 %v12727_v32, %v2339_v17 }
 0x23c   : > { %17530 = vst [vmem:[#allocation49_spill] sm:$0xff] %v12764_v30  ;;  %v12769_v51 = vadd.f32 %v1916_v56, %v1751_v14  ;;  %v12773_v25 = vmul.f32 %v12762_v6, %v12611_v60  ;;  %v1788_v40 = vrot.slane %v12762_v6, 5  ;;  %v1985_v11 = vrot.slane %v12762_v6, 6  ;;  %v12777_v62 = vpop.f32.mrb[9].mxu0  ;;  %v12779_v50 = vpop.f32.mrb[9].mxu1 }
 0x23d   : > { %17531 = vst [vmem:[#allocation50_spill] sm:$0xff] %v12779_v50  ;;  %v1836_v44 = vsel %vm1811_vm1, %v1785_v59, %v1786_v54  ;;  %v1837_v17 = vsel %vm1811_vm1, %v1784_v18, %v1785_v59  ;;  %v12787_v56 = vsel %vm2008_vm2, %v1982_v28, %v1983_v52  ;;  %v12791_v14 = vsel %vm2008_vm2, %v1981_v15, %v1982_v28 }
 0x23e   : > { %v1918_v46 = vmul.f32 %v12618_v61, %v1837_v17  ;;  %v12795_v5 = vmul.f32 %v12618_v61, %v1836_v44  ;;  %v1755_v3 = vmul.f32 %v12611_v60, %v12777_v62  ;;  %v1787_v18 = vrot.slane %v12777_v62, 5 }
 0x23f   : > { %v1984_v59 = vrot.slane %v12777_v62, 6  ;;  %v12803_v7 = vpop.f32.mrb[10].mxu0  ;;  %v12805_v15 = vpop.f32.mrb[10].mxu1 }
 0x240   : > { %17532 = vst [vmem:[#allocation51_spill] sm:$0xff] %v12805_v15  ;;  %v12808_v17 = vadd.f32 %v1918_v46, %v1753_v36  ;;  %v12812_v44 = vmul.f32 %v12803_v7, %v12611_v60  ;;  %v1790_v37 = vrot.slane %v12803_v7, 5  ;;  %v1987_v1 = vrot.slane %v12803_v7, 6  ;;  %v12816_v4 = vpop.f32.mrb[11].mxu0  ;;  %v12818_v47 = vpop.f32.mrb[11].mxu1 }
 0x241   : > { %17533 = vst [vmem:[#allocation52_spill] sm:$0xff] %v12818_v47  ;;  %v1834_v23 = vsel %vm1811_vm1, %v1787_v18, %v1788_v40  ;;  %v1835_v28 = vsel %vm1811_vm1, %v1786_v54, %v1787_v18  ;;  %v12826_v46 = vsel %vm2008_vm2, %v1984_v59, %v1985_v11  ;;  %v12830_v36 = vsel %vm2008_vm2, %v1983_v52, %v1984_v59 }
 0x242   : > { %v1920_v24 = vmul.f32 %v12618_v61, %v1835_v28  ;;  %v12834_v38 = vmul.f32 %v12618_v61, %v1834_v23  ;;  %v1757_v47 = vmul.f32 %v12611_v60, %v12816_v4  ;;  %v1789_v54 = vrot.slane %v12816_v4, 5 }
 0x243   : > { %v1986_v18 = vrot.slane %v12816_v4, 6  ;;  %v12842_v50 = vpop.f32.mrb[12].mxu0  ;;  %v12844_v52 = vpop.f32.mrb[12].mxu1  ;;  %v2111_v59 = vmul.f32 %v12633_v57, %v12705_v16 }
 0x244   : > { %17534 = vst [vmem:[#allocation53_spill] sm:$0xff] %v12842_v50  ;;  %17535 = vst [vmem:[#allocation54_spill] sm:$0xff] %v12844_v52  ;;  %v12848_v23 = vadd.f32 %v1920_v24, %v1755_v3  ;;  %v12852_v28 = vmul.f32 %v12842_v50, %v12611_v60  ;;  %v1792_v15 = vrot.slane %v12842_v50, 5  ;;  %v1989_v8 = vrot.slane %v12842_v50, 6  ;;  %v12856_v39 = vpop.f32.mrb[13].mxu0  ;;  %v12858_v30 = vpop.f32.mrb[13].mxu1 }
 0x245   : > { %17537 = vst [vmem:[#allocation56_spill] sm:$0xff] %v12856_v39  ;;  %17538 = vst [vmem:[#allocation57_spill] sm:$0xff] %v12858_v30  ;;  %v1832_v52 = vsel %vm1811_vm1, %v1789_v54, %v1790_v37  ;;  %v1833_v16 = vsel %vm1811_vm1, %v1788_v40, %v1789_v54  ;;  %v12866_v24 = vsel %vm2008_vm2, %v1986_v18, %v1987_v1  ;;  %v1791_v40 = vrot.slane %v12856_v39, 5 }
 0x246   : > { %17536 = vst [vmem:[#allocation55_spill] sm:$0xff] %v12852_v28  ;;  %v12870_v3 = vsel %vm2008_vm2, %v1985_v11, %v1986_v18  ;;  %v1922_v31 = vmul.f32 %v12618_v61, %v1833_v16  ;;  %v12874_v55 = vmul.f32 %v12618_v61, %v1832_v52  ;;  %v1759_v9 = vmul.f32 %v12611_v60, %v12856_v39 }
 0x247   : > { %v1988_v54 = vrot.slane %v12856_v39, 6  ;;  %v12882_v49 = vpop.f32.mrb[14].mxu0  ;;  %v12884_v11 = vpop.f32.mrb[14].mxu1  ;;  %v2143_v18 = vadd.f32 %v2111_v59, %v12714_v22  ;;  %v1830_v12 = vsel %vm1811_vm1, %v1791_v40, %v1792_v15  ;;  %v1831_v22 = vsel %vm1811_vm1, %v1790_v37, %v1791_v40 }
 0x248   : > { %17539 = vst [vmem:[#allocation58_spill] sm:$0xff] %v12882_v49  ;;  %17540 = vst [vmem:[#allocation59_spill] sm:$0xff] %v12884_v11  ;;  %v12887_v16 = vadd.f32 %v1922_v31, %v1757_v47  ;;  %v12891_v52 = vmul.f32 %v12882_v49, %v12611_v60  ;;  %v1794_v30 = vrot.slane %v12882_v49, 5  ;;  %v1991_v53 = vrot.slane %v12882_v49, 6  ;;  %v12895_v50 = vpop.f32.mrb[15].mxu0  ;;  %v12897_v28 = vpop.f32.mrb[15].mxu1 }
 0x249   : > { %17542 = vst [vmem:[#allocation61_spill] sm:$0xff] %v12895_v50  ;;  %17543 = vst [vmem:[#allocation62_spill] sm:$0xff] %v12897_v28  ;;  %v12905_v47 = vsel %vm2008_vm2, %v1988_v54, %v1989_v8  ;;  %v12909_v31 = vsel %vm2008_vm2, %v1987_v1, %v1988_v54  ;;  %v1924_v59 = vmul.f32 %v12618_v61, %v1831_v22  ;;  %v1793_v37 = vrot.slane %v12895_v50, 5 }
 0x24a   : > { %17541 = vst [vmem:[#allocation60_spill] sm:$0xff] %v12891_v52  ;;  %17544 = vst [vmem:[#allocation63_spill] sm:$0xff] %v12905_v47  ;;  %v12913_v11 = vmul.f32 %v12618_v61, %v1830_v12  ;;  %v1761_v52 = vmul.f32 %v12611_v60, %v12895_v50  ;;  %v1990_v40 = vrot.slane %v12895_v50, 6  ;;  %v17549_v54 = vrot.slane %v12661_v45, 7 }
 0x24b   : > { %17545 = vst [vmem:[#allocation64_spill] sm:$0xff] %v12909_v31  ;;  %v12921_v39 = vpop.f32.mrb[16].mxu0  ;;  %v12923_v1 = vpop.f32.mrb[16].mxu1  ;;  %v17550_v12 = vrot.slane %v12607_v13, 7  ;;  %v12931_v28 = vadd.f32 %v1924_v59, %v1759_v9  ;;  %v1828_v13 = vsel %vm1811_vm1, %v1793_v37, %v1794_v30 }
 0x24c   : > { %17546 = vst [vmem:[#allocation65_spill] sm:$0xff] %v12913_v11  ;;  %17547 = vst [vmem:[#allocation66_spill] sm:$0xff] %v12921_v39  ;;  %v12935_v49 = vmul.f32 %v12921_v39, %v12611_v60  ;;  %v1796_v11 = vrot.slane %v12921_v39, 5  ;;  %v1993_v47 = vrot.slane %v12921_v39, 6  ;;  %v12939_v50 = vpop.f32.mrb[17].mxu0  ;;  %v12949_v9 = vsel %vm2008_vm2, %v1990_v40, %v1991_v53 }
 0x24d   : > { %17548 = vst [vmem:[#allocation67_spill] sm:$0xff] %v12923_v1  ;;  %v2235_v22 = vsel %vm2205_vm3, %v17550_v12, %v17549_v54  ;;  %17551 = vst [vmem:[#allocation68_spill] sm:$0xff] %v12931_v28  ;;  %v12941_v1 = vpop.f32.mrb[17].mxu1  ;;  %v1829_v54 = vsel %vm1811_vm1, %v1792_v15, %v1793_v37  ;;  %v12953_v59 = vsel %vm2008_vm2, %v1989_v8, %v1990_v40  ;;  %v1795_v15 = vrot.slane %v12939_v50, 5 }
 0x24e   : > { %17552 = vst [vmem:[#allocation69_spill] sm:$0xff] %v12935_v49  ;;  %17553 = vst [vmem:[#allocation70_spill] sm:$0xff] %v12939_v50  ;;  %v1926_v12 = vmul.f32 %v12618_v61, %v1829_v54  ;;  %v12957_v49 = vmul.f32 %v12618_v61, %v1828_v13  ;;  %v1763_v28 = vmul.f32 %v12611_v60, %v12939_v50  ;;  %v1992_v37 = vrot.slane %v12939_v50, 6 }
 0x24f   : > { %17554 = vst [vmem:[#allocation71_spill] sm:$0xff] %v12941_v1  ;;  %17555 = vst [vmem:[#allocation72_spill] sm:$0xff] %v12949_v9  ;;  %v12965_v31 = vpop.f32.mrb[18].mxu0  ;;  %v12967_v8 = vpop.f32.mrb[18].mxu1  ;;  %v2308_v40 = vmul.f32 %v12638_v41, %v2235_v22  ;;  %v1826_v9 = vsel %vm1811_vm1, %v1795_v15, %v1796_v11  ;;  %v1827_v22 = vsel %vm1811_vm1, %v1794_v30, %v1795_v15 }
 0x250   : > { %17556 = vst [vmem:[#allocation73_spill] sm:$0xff] %v12953_v59  ;;  %17557 = vst [vmem:[#allocation74_spill] sm:$0xff] %v12957_v49  ;;  %v12970_v54 = vadd.f32 %v1926_v12, %v1761_v52  ;;  %v12974_v13 = vmul.f32 %v12965_v31, %v12611_v60  ;;  %v1798_v1 = vrot.slane %v12965_v31, 5  ;;  %v1995_v39 = vrot.slane %v12965_v31, 6  ;;  %v12978_v49 = vpop.f32.mrb[19].mxu0  ;;  %v12980_v59 = vpop.f32.mrb[19].mxu1 }
 0x251   : > { %17558 = vst [vmem:[#allocation75_spill] sm:$0xff] %v12965_v31  ;;  %17559 = vst [vmem:[#allocation76_spill] sm:$0xff] %v12967_v8  ;;  %v12988_v52 = vsel %vm2008_vm2, %v1992_v37, %v1993_v47  ;;  %v12992_v12 = vsel %vm2008_vm2, %v1991_v53, %v1992_v37  ;;  %v1928_v8 = vmul.f32 %v12618_v61, %v1827_v22  ;;  %v1797_v30 = vrot.slane %v12978_v49, 5 }
 0x252   : > { %17560 = vst [vmem:[#allocation77_spill] sm:$0xff] %v12970_v54  ;;  %17561 = vst [vmem:[#allocation78_spill] sm:$0xff] %v12974_v13  ;;  %v12996_v13 = vmul.f32 %v12618_v61, %v1826_v9  ;;  %v1765_v50 = vmul.f32 %v12611_v60, %v12978_v49  ;;  %v1994_v15 = vrot.slane %v12978_v49, 6  ;;  %v2340_v37 = vadd.f32 %v2308_v40, %v2143_v18 }
 0x253   : > { %17562 = vst [vmem:[#allocation79_spill] sm:$0xff] %v12978_v49  ;;  %17563 = vst [vmem:[#allocation80_spill] sm:$0xff] %v12980_v59  ;;  %v13004_v54 = vpop.f32.mrb[20].mxu0  ;;  %v13006_v53 = vpop.f32.mrb[20].mxu1  ;;  %v13008_v22 = vadd.f32 %v1928_v8, %v1763_v28  ;;  %v1825_v18 = vsel %vm1811_vm1, %v1796_v11, %v1797_v30 }
 0x254   : > { %17564 = vst [vmem:[#allocation81_spill] sm:$0xff] %v12988_v52  ;;  %17565 = vst [vmem:[#allocation82_spill] sm:$0xff] %v12992_v12  ;;  %v13012_v9 = vmul.f32 %v13004_v54, %v12611_v60  ;;  %v1800_v59 = vrot.slane %v13004_v54, 5  ;;  %v1997_v31 = vrot.slane %v13004_v54, 6  ;;  %v13018_v12 = vpop.f32.mrb[21].mxu1  ;;  %v1824_v52 = vsel %vm1811_vm1, %v1797_v30, %v1798_v1 }
 0x255   : > { %17566 = vst [vmem:[#allocation83_spill] sm:$0xff] %v12996_v13  ;;  %17567 = vst [vmem:[#allocation84_spill] sm:$0xff] %v13004_v54  ;;  %v13016_v13 = vpop.f32.mrb[21].mxu0  ;;  %v13026_v28 = vsel %vm2008_vm2, %v1994_v15, %v1995_v39  ;;  %v13030_v8 = vsel %vm2008_vm2, %v1993_v47, %v1994_v15  ;;  %v1930_v40 = vmul.f32 %v12618_v61, %v1825_v18 }
 0x256   : > { %17568 = vst [vmem:[#allocation85_spill] sm:$0xff] %v13006_v53  ;;  %17569 = vst [vmem:[#allocation86_spill] sm:$0xff] %v13012_v9  ;;  %v13034_v53 = vmul.f32 %v12618_v61, %v1824_v52  ;;  %v1767_v9 = vmul.f32 %v12611_v60, %v13016_v13  ;;  %v1799_v11 = vrot.slane %v13016_v13, 5  ;;  %v1996_v30 = vrot.slane %v13016_v13, 6 }
 0x257   : > { %17570 = vst [vmem:[#allocation87_spill] sm:$0xff] %v13016_v13  ;;  %17571 = vst [vmem:[#allocation88_spill] sm:$0xff] %v13018_v12  ;;  %v13042_v49 = vpop.f32.mrb[22].mxu0  ;;  %v13044_v47 = vpop.f32.mrb[22].mxu1  ;;  %v13047_v15 = vadd.f32 %v12727_v32, %v2340_v37  ;;  %v13049_v52 = vadd.f32 %v1930_v40, %v1765_v50 }
 0x258   : > { %17572 = vst [vmem:[#allocation89_spill] sm:$0xff] %v13026_v28  ;;  %17573 = vst [vmem:[#allocation90_spill] sm:$0xff] %v13030_v8  ;;  %v13053_v18 = vmul.f32 %v13042_v49, %v12611_v60  ;;  %v1802_v12 = vrot.slane %v13042_v49, 5  ;;  %v1999_v54 = vrot.slane %v13042_v49, 6  ;;  %v13059_v28 = vpop.f32.mrb[23].mxu1  ;;  %v1823_v37 = vsel %vm1811_vm1, %v1798_v1, %v1799_v11 }
 0x259   : > { %17574 = vst [vmem:[#allocation91_spill] sm:$0xff] %v13034_v53  ;;  %17575 = vst [vmem:[#allocation92_spill] sm:$0xff] %v13042_v49  ;;  %v13057_v53 = vpop.f32.mrb[23].mxu0  ;;  %v13067_v50 = vsel %vm2008_vm2, %v1996_v30, %v1997_v31  ;;  %v13071_v40 = vsel %vm2008_vm2, %v1995_v39, %v1996_v30 }
 0x25a   : > { %17576 = vst [vmem:[#allocation93_spill] sm:$0xff] %v13044_v47  ;;  %17577 = vst [vmem:[#allocation94_spill] sm:$0xff] %v13049_v52  ;;  %v1822_v47 = vsel %vm1811_vm1, %v1799_v11, %v1800_v59  ;;  %v1769_v52 = vmul.f32 %v12611_v60, %v13057_v53  ;;  %v1801_v1 = vrot.slane %v13057_v53, 5  ;;  %v1998_v11 = vrot.slane %v13057_v53, 6 }
 0x25b   : > { %17578 = vst [vmem:[#allocation95_spill] sm:$0xff] %v13053_v18  ;;  %17579 = vst [vmem:[#allocation96_spill] sm:$0xff] %v13057_v53  ;;  %v1932_v18 = vmul.f32 %v12618_v61, %v1823_v37  ;;  %v13075_v13 = vmul.f32 %v12618_v61, %v1822_v47  ;;  %v13083_v8 = vpop.f32.mrb[24].mxu0  ;;  %v13085_v39 = vpop.f32.mrb[24].mxu1 }
 0x25c   : > { %17580 = vst [vmem:[#allocation97_spill] sm:$0xff] %v13059_v28  ;;  %17581 = vst [vmem:[#allocation98_spill] sm:$0xff] %v13067_v50  ;;  %v13092_v47 = vmul.f32 %v13083_v8, %v12611_v60  ;;  %v1804_v28 = vrot.slane %v13083_v8, 5  ;;  %v2001_v49 = vrot.slane %v13083_v8, 6  ;;  %v1820_v50 = vsel %vm1811_vm1, %v1801_v1, %v1802_v12 }
 0x25d   : > { %17582 = vst [vmem:[#allocation99_spill] sm:$0xff] %v13071_v40  ;;  %17583 = vst [vmem:[#allocation100_spill] sm:$0xff] %v13075_v13  ;;  %v13088_v37 = vadd.f32 %v1932_v18, %v1767_v9  ;;  %v13096_v13 = vpop.f32.mrb[25].mxu0  ;;  %v13098_v40 = vpop.f32.mrb[25].mxu1  ;;  %v1821_v30 = vsel %vm1811_vm1, %v1800_v59, %v1801_v1  ;;  %v13106_v9 = vsel %vm2008_vm2, %v1998_v11, %v1999_v54 }
 0x25e   : > { %17584 = vst [vmem:[#allocation101_spill] sm:$0xff] %v13083_v8  ;;  %17585 = vst [vmem:[#allocation102_spill] sm:$0xff] %v13085_v39  ;;  %v13110_v18 = vsel %vm2008_vm2, %v1997_v31, %v1998_v11  ;;  %v1934_v39 = vmul.f32 %v12618_v61, %v1821_v30  ;;  %v1771_v53 = vmul.f32 %v12611_v60, %v13096_v13  ;;  %v1803_v59 = vrot.slane %v13096_v13, 5 }
 0x25f   : > { %17586 = vst [vmem:[#allocation103_spill] sm:$0xff] %v13088_v37  ;;  %17587 = vst [vmem:[#allocation104_spill] sm:$0xff] %v13092_v47  ;;  %v13114_v47 = vmul.f32 %v12618_v61, %v1820_v50  ;;  %v2000_v1 = vrot.slane %v13096_v13, 6  ;;  %v13122_v37 = vpop.f32.mrb[26].mxu0  ;;  %v13124_v31 = vpop.f32.mrb[26].mxu1  ;;  %v1947_v11 = vadd.f32 %v12701_v48, %v12677_v58 }
 0x260   : > { %17588 = vst [vmem:[#allocation105_spill] sm:$0xff] %v13096_v13  ;;  %17589 = vst [vmem:[#allocation106_spill] sm:$0xff] %v13098_v40  ;;  %v13128_v50 = vadd.f32 %v1934_v39, %v1769_v52  ;;  %v13132_v30 = vmul.f32 %v13122_v37, %v12611_v60  ;;  %v1806_v40 = vrot.slane %v13122_v37, 5  ;;  %v2003_v8 = vrot.slane %v13122_v37, 6 }
 0x261   : > { %17590 = vst [vmem:[#allocation107_spill] sm:$0xff] %v13106_v9  ;;  %17591 = vst [vmem:[#allocation108_spill] sm:$0xff] %v13114_v47  ;;  %v13136_v47 = vpop.f32.mrb[27].mxu0  ;;  %v13138_v9 = vpop.f32.mrb[27].mxu1  ;;  %v1819_v48 = vsel %vm1811_vm1, %v1802_v12, %v1803_v59  ;;  %v13147_v58 = vsel %vm2008_vm2, %v2000_v1, %v2001_v49  ;;  %v13151_v52 = vsel %vm2008_vm2, %v1999_v54, %v2000_v1 }
 0x262   : > { %17592 = vst [vmem:[#allocation109_spill] sm:$0xff] %v13122_v37  ;;  %17593 = vst [vmem:[#allocation110_spill] sm:$0xff] %v13124_v31  ;;  %v1818_v31 = vsel %vm1811_vm1, %v1803_v59, %v1804_v28  ;;  %v1936_v39 = vmul.f32 %v12618_v61, %v1819_v48  ;;  %v1773_v13 = vmul.f32 %v12611_v60, %v13136_v47  ;;  %v1805_v12 = vrot.slane %v13136_v47, 5 }
 0x263   : > { %17594 = vst [vmem:[#allocation111_spill] sm:$0xff] %v13128_v50  ;;  %17595 = vst [vmem:[#allocation112_spill] sm:$0xff] %v13132_v30  ;;  %v2002_v59 = vrot.slane %v13136_v47, 6  ;;  %v13164_v54 = vpop.f32.mrb[28].mxu0  ;;  %v13166_v1 = vpop.f32.mrb[28].mxu1 }
 0x264   : > { %17596 = vst [vmem:[#allocation113_spill] sm:$0xff] %v13136_v47  ;;  %17597 = vst [vmem:[#allocation114_spill] sm:$0xff] %v13138_v9  ;;  %v13155_v9 = vmul.f32 %v12618_v61, %v1818_v31  ;;  %v2112_v31 = vmul.f32 %v12633_v57, %v12693_v2  ;;  %v13170_v48 = vadd.f32 %v1936_v39, %v1771_v53  ;;  %v1808_v37 = vrot.slane %v13164_v54, 5 }
 0x265   : > { %17598 = vst [vmem:[#allocation115_spill] sm:$0xff] %v13147_v58  ;;  %17599 = vst [vmem:[#allocation116_spill] sm:$0xff] %v13151_v52  ;;  %v13174_v30 = vmul.f32 %v13164_v54, %v12611_v60  ;;  %v13178_v52 = vpop.f32.mrb[29].mxu0  ;;  %v13180_v58 = vpop.f32.mrb[29].mxu1  ;;  %v1817_v2 = vsel %vm1811_vm1, %v1804_v28, %v1805_v12  ;;  %v13189_v53 = vsel %vm2008_vm2, %v2002_v59, %v2003_v8 }
 0x266   : > { %17600 = vst [vmem:[#allocation117_spill] sm:$0xff] %v13155_v9  ;;  %17601 = vst [vmem:[#allocation118_spill] sm:$0xff] %v13164_v54  ;;  %v2005_v9 = vrot.slane %v13164_v54, 6  ;;  %v13193_v39 = vsel %vm2008_vm2, %v2001_v49, %v2002_v59  ;;  %v1807_v28 = vrot.slane %v13178_v52, 5  ;;  %v2144_v59 = vadd.f32 %v2112_v31, %v1947_v11 }
 0x267   : > { %17602 = vst [vmem:[#allocation119_spill] sm:$0xff] %v13166_v1  ;;  %17603 = vst [vmem:[#allocation120_spill] sm:$0xff] %v13170_v48  ;;  %v1816_v1 = vsel %vm1811_vm1, %v1805_v12, %v1806_v40  ;;  %v1775_v48 = vmul.f32 %v12611_v60, %v13178_v52  ;;  %v2004_v12 = vrot.slane %v13178_v52, 6  ;;  %v13205_v50 = vpop.f32.mrb[30].mxu0  ;;  %v13207_v49 = vpop.f32.mrb[30].mxu1 }
 0x268   : > { %17604 = vst [vmem:[#allocation121_spill] sm:$0xff] %v13174_v30  ;;  %17605 = vst [vmem:[#allocation122_spill] sm:$0xff] %v13178_v52  ;;  %v1938_v30 = vmul.f32 %v12618_v61, %v1817_v2  ;;  %v1810_v47 = vrot.slane %v13205_v50, 5  ;;  %v2007_v54 = vrot.slane %v13205_v50, 6  ;;  %v1815_v11 = vsel %vm1811_vm1, %v1806_v40, %v1807_v28 }
 0x269   : > { %17606 = vst [vmem:[#allocation123_spill] sm:$0xff] %v13180_v58  ;;  %17607 = vst [vmem:[#allocation124_spill] sm:$0xff] %v13189_v53  ;;  %v13197_v58 = vmul.f32 %v12618_v61, %v1816_v1  ;;  %v13213_v1 = vmul.f32 %v13205_v50, %v12611_v60  ;;  %v1814_v53 = vsel %vm1811_vm1, %v1807_v28, %v1808_v37  ;;  %v17616_v40 = vrot.slane %v12624_v42, 6 }
 0x26a   : > { %17608 = vst [vmem:[#allocation125_spill] sm:$0xff] %v13193_v39  ;;  %17610 = vst [vmem:[#allocation127_spill] sm:$0xff] %v13207_v49  ;;  %v13209_v2 = vadd.f32 %v1938_v30, %v1773_v13  ;;  %v13219_v39 = vpop.f32.mrb[31].mxu1  ;;  %v13227_v13 = vsel %vm2008_vm2, %v2004_v12, %v2005_v9  ;;  %v13231_v30 = vsel %vm2008_vm2, %v2003_v8, %v2004_v12 }
 0x26b   : > { %17609 = vst [vmem:[#allocation126_spill] sm:$0xff] %v13197_v58  ;;  %17611 = vst [vmem:[#allocation128_spill] sm:$0xff] %v13213_v1  ;;  %v13217_v58 = vpop.f32.mrb[31].mxu0  ;;  %v1940_v31 = vmul.f32 %v12618_v61, %v1815_v11  ;;  %v13235_v49 = vmul.f32 %v12618_v61, %v1814_v53  ;;  %v2040_v28 = vsel %vm2008_vm2, %v2007_v54, %v17616_v40 }
 0x26c   : > { %17612 = vst [vmem:[#allocation129_spill] sm:$0xff] %v13219_v39  ;;  %17613 = vst [vmem:[#allocation130_spill] sm:$0xff] %v13227_v13  ;;  %v17615_v39 = vrot.slane %v12624_v42, 5  ;;  %v1777_v12 = vmul.f32 %v12611_v60, %v13217_v58  ;;  %v1809_v53 = vrot.slane %v13217_v58, 5  ;;  %v2073_v8 = vsel %vm2041_vm5, %v2040_v28, 0.0 }
 0x26d   : > { %17614 = vst [vmem:[#allocation131_spill] sm:$0xff] %v13235_v49  ;;  %v13251_v11 = vadd.f32 %v1940_v31, %v1775_v48  ;;  %v2006_v49 = vrot.slane %v13217_v58, 6  ;;  %v17617_v60 = vrot.slane %v12624_v42, 7  ;;  %v17618_v48 = vrot.slane %v13205_v50, 7 }
 0x26e   : > { %v1843_v1 = vsel %vm1811_vm1, %v1810_v47, %v17615_v39  ;;  %v1812_v40 = vsel %vm1811_vm1, %v1809_v53, %v1810_v47  ;;  %v2109_v28 = vmul.f32 %v12633_v57, %v2073_v8 }
 0x26f   : > { %v1876_v13 = vsel %vm1844_vm4, %v1843_v1, 0.0  ;;  %v1813_v1 = vsel %vm1811_vm1, %v1808_v37, %v1809_v53  ;;  %v2237_v31 = vsel %vm2205_vm3, %v17618_v48, %v17617_v60  ;;  %v13274_v47 = vsel %vm2008_vm2, %v2006_v49, %v2007_v54 }
 0x270   : > { %v1912_v52 = vmul.f32 %v12618_v61, %v1876_v13  ;;  %v1942_v39 = vmul.f32 %v12618_v61, %v1813_v1  ;;  %v13270_v13 = vmul.f32 %v12618_v61, %v1812_v40  ;;  %v13278_v37 = vsel %vm2008_vm2, %v2005_v9, %v2006_v49 }
 0x271   : > { %v2270_v53 = vsel %vm2238_vm6, %v2237_v31, 0.0  ;;  %v17619_v1 = vsub.f32 0.0, %v12767_v33  ;;  %v17620_v54 = vsub.f32 0.0, %v13047_v15  ;;  %v17621_v9 = vrot.slane %v12654_v43, 7 }
 0x272   : > { %v1944_v42 = vadd.f32 %v1912_v52, %v12667_v21  ;;  %v13286_v61 = vadd.f32 %v1942_v39, %v1777_v12  ;;  %v2306_v40 = vmul.f32 %v12638_v41, %v2270_v53  ;;  %v17622_v49 = vrot.slane %v12661_v45, 7 }
 0x273   : > { %v2443_v60 = vmul.f32 1.442695, %v17619_v1  ;;  %v2445_v48 = vmul.f32 1.442695, %v17620_v54  ;;  %v2113_v12 = vmul.f32 %v12633_v57, %v12750_v63  ;;  %v17623_v39 = vrot.slane %v12695_v19, 7 }
 0x274   : > { %v2234_v21 = vsel %vm2205_vm3, %v17622_v49, %v17621_v9  ;;  %v2141_v52 = vadd.f32 %v2109_v28, %v1944_v42  ;;  %v17624_v31 = vmov %v17621_v9  ;;  %v1949_v45 = vadd.f32 %v12754_v34, %v12709_v35 }
 0x275   : > { %11028 = vpow2.f32 %v2443_v60  ;;  %v2309_v8 = vmul.f32 %v12638_v41, %v2234_v21  ;;  %v2233_v53 = vsel %vm2205_vm3, %v17624_v31, %v17623_v39  ;;  %v2114_v42 = vmul.f32 %v12633_v57, %v12746_v29 }
 0x276   : > { %11030 = vpow2.f32 %v2445_v48  ;;  %v2338_v28 = vadd.f32 %v2306_v40, %v2141_v52  ;;  %v2145_v60 = vadd.f32 %v2113_v12, %v12769_v51  ;;  %v2310_v63 = vmul.f32 %v12638_v41, %v2233_v53 }
 0x277   : > { %v2341_v1 = vadd.f32 %v2309_v8, %v2144_v59  ;;  %v2146_v54 = vadd.f32 %v2114_v42, %v1949_v45  ;;  %v17625_v48 = vrot.slane %v12683_v0, 7  ;;  %v17626_v43 = vmov %v17623_v39 }
 0x278   : > { %v2115_v34 = vmul.f32 %v12633_v57, %v12791_v14  ;;  %v17627_v35 = vrot.slane %v12736_v20, 7  ;;  %v13327_v59 = vadd.f32 %v12727_v32, %v2338_v28  ;;  %v2342_v19 = vadd.f32 %v2310_v63, %v2145_v60 }
 0x279   : > { %v2232_v9 = vsel %vm2205_vm3, %v17626_v43, %v17625_v48  ;;  %v17628_v29 = vmov %v17625_v48  ;;  %v13330_v40 = vadd.f32 %v12727_v32, %v2341_v1  ;;  %v1951_v52 = vadd.f32 %v12795_v5, %v12732_v10 }
 0x27a   : > { %v2231_v51 = vsel %vm2205_vm3, %v17628_v29, %v17627_v35  ;;  %v2311_v49 = vmul.f32 %v12638_v41, %v2232_v9  ;;  %v2147_v21 = vadd.f32 %v2115_v34, %v12808_v17  ;;  %v2116_v0 = vmul.f32 %v12633_v57, %v12787_v56 }
 0x27b   : > { %v2312_v14 = vmul.f32 %v12638_v41, %v2231_v51  ;;  %v2409_v8 = vsub.f32 0.0, %v13327_v59  ;;  %v2412_v12 = vsub.f32 0.0, %v13330_v40  ;;  %v13342_v39 = vadd.f32 %v12727_v32, %v2342_v19 }
 0x27c   : > { %v2343_v31 = vadd.f32 %v2311_v49, %v2146_v54  ;;  %v2148_v45 = vadd.f32 %v2116_v0, %v1951_v52  ;;  %v17629_v17 = vrot.slane %v12720_v26, 7  ;;  %v17630_v42 = vmov %v17627_v35 }
 0x27d   : > { %v2344_v53 = vadd.f32 %v2312_v14, %v2147_v21  ;;  %v2117_v10 = vmul.f32 %v12633_v57, %v12830_v36  ;;  %v2441_v56 = vmul.f32 1.442695, %v2409_v8  ;;  %v2447_v28 = vmul.f32 1.442695, %v2412_v12 }
 0x27e   : > { %v2230_v5 = vsel %vm2205_vm3, %v17630_v42, %v17629_v17  ;;  %v2413_v1 = vsub.f32 0.0, %v13342_v39  ;;  %v13354_v60 = vadd.f32 %v12727_v32, %v2343_v31  ;;  %v17631_v48 = vrot.slane %v12777_v62, 7 }
 0x27f   : > { %v13357_v63 = vadd.f32 %v12727_v32, %v2344_v53  ;;  %v2313_v54 = vmul.f32 %v12638_v41, %v2230_v5  ;;  %v2149_v20 = vadd.f32 %v2117_v10, %v12848_v23  ;;  %v17632_v43 = vmov %v17629_v17  ;;  %v11029_v9 = vpop.eup %11028 }
 0x280   : > { %v2229_v36 = vsel %vm2205_vm3, %v17632_v43, %v17631_v48  ;;  %11032 = vpow2.f32 %v2441_v56  ;;  %v2449_v34 = vmul.f32 1.442695, %v2413_v1  ;;  %v2414_v35 = vsub.f32 0.0, %v13354_v60  ;;  %v11031_v51 = vpop.eup %11030 }
 0x281   : > { %v2314_v29 = vmul.f32 %v12638_v41, %v2229_v36  ;;  %v2506_v19 = vadd.f32 1.0, %v11029_v9  ;;  %11034 = vpow2.f32 %v2447_v28  ;;  %v2415_v49 = vsub.f32 0.0, %v13357_v63 }
 0x282   : > { %v2345_v23 = vadd.f32 %v2313_v54, %v2148_v45  ;;  %v2507_v21 = vadd.f32 1.0, %v11031_v51  ;;  %11036 = vpow2.f32 %v2449_v34  ;;  %v2451_v14 = vmul.f32 1.442695, %v2414_v35  ;;  %v17639_v35 = vld [vmem:[#allocation64_spill] sm:$0xff] }
 0x283   : > { %v2346_v26 = vadd.f32 %v2314_v29, %v2149_v20  ;;  %11038 = vrcp.f32 %v2506_v19  ;;  %v2453_v52 = vmul.f32 1.442695, %v2415_v49  ;;  %v1953_v8 = vadd.f32 %v12834_v38, %v12773_v25  ;;  %v17640_v51 = vld [vmem:[#allocation56_spill] sm:$0xff] }
 0x284   : > { %v13371_v0 = vadd.f32 %v12727_v32, %v2345_v23  ;;  %11040 = vrcp.f32 %v2507_v21  ;;  %v2118_v31 = vmul.f32 %v12633_v57, %v12826_v46  ;;  %v17633_v53 = vrot.slane %v12762_v6, 7 }
 0x285   : > { %v13376_v12 = vadd.f32 %v12727_v32, %v2346_v26  ;;  %v17634_v45 = vmov %v17631_v48  ;;  %11042 = vpow2.f32 %v2451_v14  ;;  %v2119_v38 = vmul.f32 %v12633_v57, %v12870_v3  ;;  %v17643_v26 = vld [vmem:[#allocation68_spill] sm:$0xff] }
 0x286   : > { %v2228_v17 = vsel %vm2205_vm3, %v17634_v45, %v17633_v53  ;;  %v2416_v42 = vsub.f32 0.0, %v13371_v0  ;;  %11044 = vpow2.f32 %v2453_v52  ;;  %v2150_v10 = vadd.f32 %v2118_v31, %v1953_v8 }
 0x287   : > { %v2315_v5 = vmul.f32 %v12638_v41, %v2228_v17  ;;  %v2417_v25 = vsub.f32 0.0, %v13376_v12  ;;  %v17635_v46 = vrot.slane %v12816_v4, 7  ;;  %v17636_v56 = vmov %v17633_v53 }
 0x288   : > { %v2455_v28 = vmul.f32 1.442695, %v2416_v42  ;;  %v2151_v1 = vadd.f32 %v2119_v38, %v12887_v16  ;;  %v1955_v20 = vadd.f32 %v12874_v55, %v12812_v44  ;;  %v2120_v43 = vmul.f32 %v12633_v57, %v12866_v24  ;;  %v17644_v42 = vld [vmem:[#allocation55_spill] sm:$0xff] }
 0x289   : > { %v2227_v62 = vsel %vm2205_vm3, %v17636_v56, %v17635_v46  ;;  %v2457_v3 = vmul.f32 1.442695, %v2417_v25  ;;  %v2347_v48 = vadd.f32 %v2315_v5, %v2150_v10  ;;  %v17637_v36 = vrot.slane %v12803_v7, 7  ;;  %v17645_v5 = vld [vmem:[#allocation65_spill] sm:$0xff] }
 0x28a   : > { %v2316_v54 = vmul.f32 %v12638_v41, %v2227_v62  ;;  %v17638_v6 = vmov %v17635_v46  ;;  %11046 = vpow2.f32 %v2455_v28  ;;  %v2121_v29 = vmul.f32 %v12633_v57, %v17639_v35  ;;  %v11033_v55 = vpop.eup %11032  ;;  %v17649_v35 = vld [vmem:[#allocation53_spill] sm:$0xff] }
 0x28b   : > { %v2226_v9 = vsel %vm2205_vm3, %v17638_v6, %v17637_v36  ;;  %11048 = vpow2.f32 %v2457_v3  ;;  %v13413_v44 = vadd.f32 %v12727_v32, %v2347_v48  ;;  %v2152_v24 = vadd.f32 %v2120_v43, %v1955_v20  ;;  %v11035_v23 = vpop.eup %11034  ;;  %v17648_v6 = vld [vmem:[#allocation63_spill] sm:$0xff] }
 0x28c   : > { %v2348_v34 = vadd.f32 %v2316_v54, %v2151_v1  ;;  %v2317_v16 = vmul.f32 %v12638_v41, %v2226_v9  ;;  %v17641_v19 = vrot.slane %v17640_v51, 7  ;;  %v17642_v4 = vmov %v17637_v36  ;;  %v11037_v31 = vpop.eup %11036 }
 0x28d   : > { %v2505_v21 = vadd.f32 1.0, %v11033_v55  ;;  %v2153_v52 = vadd.f32 %v2121_v29, %v17643_v26  ;;  %v2508_v53 = vadd.f32 1.0, %v11035_v23  ;;  %v2418_v45 = vsub.f32 0.0, %v13413_v44  ;;  %v11039_v38 = vpop.eup %11038 }
 0x28e   : > { %v2225_v49 = vsel %vm2205_vm3, %v17642_v4, %v17641_v19  ;;  %v13422_v14 = vadd.f32 %v12727_v32, %v2348_v34  ;;  %v2349_v17 = vadd.f32 %v2317_v16, %v2152_v24  ;;  %v1957_v7 = vadd.f32 %v17645_v5, %v17644_v42  ;;  %v11041_v56 = vpop.eup %11040 }
 0x28f   : > { %v2318_v8 = vmul.f32 %v12638_v41, %v2225_v49  ;;  %11050 = vrcp.f32 %v2505_v21  ;;  %v2509_v25 = vadd.f32 1.0, %v11037_v31  ;;  %v13431_v62 = vmul.f32 %v11039_v38, %v12767_v33  ;;  %v11043_v54 = vpop.eup %11042  ;;  %v17652_v21 = vld [vmem:[#allocation73_spill] sm:$0xff] }
 0x290   : > { %v2419_v10 = vsub.f32 0.0, %v13422_v14  ;;  %11052 = vrcp.f32 %v2508_v53  ;;  %v2459_v28 = vmul.f32 1.442695, %v2418_v45  ;;  %v13434_v1 = vadd.f32 %v12727_v32, %v2349_v17  ;;  %v11045_v43 = vpop.eup %11044 }
 0x291   : > { %v2350_v46 = vadd.f32 %v2318_v8, %v2153_v52  ;;  %17646 = vst [vmem:[#allocation64_spill] sm:$0xff] %v13431_v62  ;;  %v13437_v20 = vmul.f32 %v11041_v56, %v13047_v15  ;;  %11054 = vrcp.f32 %v2509_v25  ;;  %v2510_v36 = vadd.f32 1.0, %v11043_v54  ;;  %v17653_v52 = vld [vmem:[#allocation61_spill] sm:$0xff]  ;;  %v17657_v25 = vld [vmem:[#allocation60_spill] sm:$0xff] }
 0x292   : > { %v2461_v3 = vmul.f32 1.442695, %v2419_v10  ;;  %11056 = vpow2.f32 %v2459_v28  ;;  %v2420_v33 = vsub.f32 0.0, %v13434_v1  ;;  %v2122_v9 = vmul.f32 %v12633_v57, %v17648_v6  ;;  %v17658_v10 = vld [vmem:[#allocation74_spill] sm:$0xff]  ;;  %v17659_v28 = vld [vmem:[#allocation72_spill] sm:$0xff] }
 0x293   : > { %17647 = vst [vmem:[#allocation56_spill] sm:$0xff] %v13437_v20  ;;  %v13440_v48 = vadd.f32 %v12727_v32, %v2350_v46  ;;  %v2511_v34 = vadd.f32 1.0, %v11045_v43  ;;  %v17650_v15 = vrot.slane %v17649_v35, 7  ;;  %v17651_v29 = vmov %v17641_v19 }
 0x294   : > { %11058 = vpow2.f32 %v2461_v3  ;;  %v2463_v24 = vmul.f32 1.442695, %v2420_v33  ;;  %v2154_v19 = vadd.f32 %v2122_v9, %v1957_v7  ;;  %v11047_v49 = vpop.eup %11046  ;;  %v2123_v26 = vmul.f32 %v12633_v57, %v17652_v21  ;;  %v17656_v7 = vld [vmem:[#allocation77_spill] sm:$0xff]  ;;  %v17660_v3 = vld [vmem:[#allocation58_spill] sm:$0xff] }
 0x295   : > { %v2421_v16 = vsub.f32 0.0, %v13440_v48  ;;  %v2224_v55 = vsel %vm2205_vm3, %v17651_v29, %v17650_v15  ;;  %11060 = vrcp.f32 %v2510_v36  ;;  %v17654_v8 = vrot.slane %v17653_v52, 7  ;;  %v11049_v53 = vpop.eup %11048 }
 0x296   : > { %v2319_v4 = vmul.f32 %v12638_v41, %v2224_v55  ;;  %11062 = vrcp.f32 %v2511_v34  ;;  %v17655_v31 = vmov %v17650_v15  ;;  %v2512_v45 = vadd.f32 1.0, %v11047_v49 }
 0x297   : > { %v2465_v23 = vmul.f32 1.442695, %v2421_v16  ;;  %v2223_v51 = vsel %vm2205_vm3, %v17655_v31, %v17654_v8  ;;  %11064 = vpow2.f32 %v2463_v24  ;;  %v2513_v5 = vadd.f32 1.0, %v11049_v53  ;;  %v17663_v16 = vld [vmem:[#allocation82_spill] sm:$0xff] }
 0x298   : > { %v2351_v17 = vadd.f32 %v2319_v4, %v2154_v19  ;;  %v2320_v42 = vmul.f32 %v12638_v41, %v2223_v51  ;;  %v2155_v38 = vadd.f32 %v2123_v26, %v17656_v7  ;;  %v1959_v46 = vadd.f32 %v17658_v10, %v17657_v25  ;;  %v17665_v19 = vld [vmem:[#allocation70_spill] sm:$0xff]  ;;  %v17672_v25 = vld [vmem:[#allocation81_spill] sm:$0xff] }
 0x299   : > { %11066 = vpow2.f32 %v2465_v23  ;;  %v2124_v54 = vmul.f32 %v12633_v57, %v17659_v28  ;;  %v17661_v43 = vrot.slane %v17660_v3, 7  ;;  %v17662_v36 = vmov %v17654_v8  ;;  %v11051_v6 = vpop.eup %11050 }
 0x29a   : > { %11068 = vrcp.f32 %v2512_v45  ;;  %v13466_v56 = vadd.f32 %v12727_v32, %v2351_v17  ;;  %v2352_v9 = vadd.f32 %v2320_v42, %v2155_v38  ;;  %v2125_v35 = vmul.f32 %v12633_v57, %v17663_v16  ;;  %v11053_v15 = vpop.eup %11052  ;;  %v17670_v45 = vld [vmem:[#allocation69_spill] sm:$0xff]  ;;  %v17671_v17 = vld [vmem:[#allocation83_spill] sm:$0xff] }
 0x29b   : > { %v2222_v33 = vsel %vm2205_vm3, %v17662_v36, %v17661_v43  ;;  %11070 = vrcp.f32 %v2513_v5  ;;  %v13480_v29 = vmul.f32 %v11051_v6, %v13327_v59  ;;  %v2156_v24 = vadd.f32 %v2124_v54, %v1959_v46  ;;  %v11055_v21 = vpop.eup %11054  ;;  %v17673_v54 = vld [vmem:[#allocation66_spill] sm:$0xff] }
 0x29c   : > { %v2321_v34 = vmul.f32 %v12638_v41, %v2222_v33  ;;  %v2422_v55 = vsub.f32 0.0, %v13466_v56  ;;  %v17666_v4 = vrot.slane %v17665_v19, 7  ;;  %v17667_v49 = vmov %v17661_v43  ;;  %v11057_v31 = vpop.eup %11056 }
 0x29d   : > { %17664 = vst [vmem:[#allocation68_spill] sm:$0xff] %v13480_v29  ;;  %v13490_v26 = vmul.f32 %v11053_v15, %v13330_v40  ;;  %v13493_v52 = vadd.f32 %v12727_v32, %v2352_v9  ;;  %v2157_v59 = vadd.f32 %v2125_v35, %v13008_v22  ;;  %10317 = vmatprep.mubr.msk.f32.mxu0 %vm2612_vm7, %v13480_v29  ;;  %v2514_v22 = vadd.f32 1.0, %v11057_v31 }
 0x29e   : > { %v2221_v23 = vsel %vm2205_vm3, %v17667_v49, %v17666_v4  ;;  %10373 = vmatprep.mubr.msk.f32.mxu1 %vm2612_vm7, %v13480_v29  ;;  %v13502_v51 = vmul.f32 %v11055_v21, %v13342_v39  ;;  %v2467_v53 = vmul.f32 1.442695, %v2422_v55  ;;  %v2353_v40 = vadd.f32 %v2321_v34, %v2156_v24  ;;  %v11059_v5 = vpop.eup %11058  ;;  %10318 = vmatmul.mubr.msk.f32.vlgmr.msra.gmra.mrb[32].mxu0 %vm2612_vm7, %v13431_v62  ;;  %v17678_v21 = vld [vmem:[#allocation90_spill] sm:$0xff] }
 0x29f   : > { %17668 = vst [vmem:[#allocation55_spill] sm:$0xff] %v13490_v26  ;;  %v2322_v8 = vmul.f32 %v12638_v41, %v2221_v23  ;;  %v1961_v42 = vadd.f32 %v17671_v17, %v17670_v45  ;;  %10374 = vmatmul.mubr.msk.f32.vlgmr.msra.gmra.mrb[32].mxu1 %vm2612_vm7, %v13431_v62  ;;  %v2423_v7 = vsub.f32 0.0, %v13493_v52  ;;  %v2126_v39 = vmul.f32 %v12633_v57, %v17672_v25  ;;  %v11061_v10 = vpop.eup %11060 }
 0x2a0   : > { %17669 = vst [vmem:[#allocation65_spill] sm:$0xff] %v13502_v51  ;;  %10320 = vmatprep.mubr.msk.f32.mxu0 %vm2612_vm7, %v13437_v20  ;;  %10376 = vmatprep.mubr.msk.f32.mxu1 %vm2612_vm7, %v13437_v20  ;;  %v2515_v46 = vadd.f32 1.0, %v11059_v5  ;;  %11072 = vpow2.f32 %v2467_v53  ;;  %v13518_v28 = vadd.f32 %v12727_v32, %v2353_v40  ;;  %v17674_v3 = vrot.slane %v17673_v54, 7  ;;  %v11063_v33 = vpop.eup %11062 }
 0x2a1   : > { %v2354_v38 = vadd.f32 %v2322_v8, %v2157_v59  ;;  %v17675_v43 = vmov %v17666_v4  ;;  %v13527_v6 = vmul.f32 %v11061_v10, %v13354_v60  ;;  %11074 = vrcp.f32 %v2514_v22  ;;  %v11065_v16 = vpop.eup %11064  ;;  %v17679_v8 = vld [vmem:[#allocation79_spill] sm:$0xff] }
 0x2a2   : > { %v2220_v36 = vsel %vm2205_vm3, %v17675_v43, %v17674_v3  ;;  %v2469_v9 = vmul.f32 1.442695, %v2423_v7  ;;  %v13533_v35 = vmul.f32 %v11063_v33, %v13357_v63  ;;  %11076 = vrcp.f32 %v2515_v46  ;;  %10321 = vmatmul.mubr.msk.f32.gmra.mrb[34].mxu0 %vm2612_vm7, %v13490_v26  ;;  %v17684_v7 = vld [vmem:[#allocation94_spill] sm:$0xff]  ;;  %v17686_v10 = vld [vmem:[#allocation91_spill] sm:$0xff] }
 0x2a3   : > { %17676 = vst [vmem:[#allocation63_spill] sm:$0xff] %v13527_v6  ;;  %v13530_v34 = vadd.f32 %v12727_v32, %v2354_v38  ;;  %v2424_v15 = vsub.f32 0.0, %v13518_v28  ;;  %v2158_v55 = vadd.f32 %v2126_v39, %v1961_v42  ;;  %v11067_v24 = vpop.eup %11066  ;;  %10377 = vmatmul.mubr.msk.f32.gmra.mrb[34].mxu1 %vm2612_vm7, %v13490_v26  ;;  %v2516_v60 = vadd.f32 1.0, %v11065_v16  ;;  %10323 = vmatprep.mubr.msk.f32.mxu0 %vm2612_vm7, %v13502_v51  ;;  %v17685_v39 = vld [vmem:[#allocation78_spill] sm:$0xff]  ;;  %v17688_v43 = vld [vmem:[#allocation75_spill] sm:$0xff] }
 0x2a4   : > { %17677 = vst [vmem:[#allocation53_spill] sm:$0xff] %v13533_v35  ;;  %11078 = vpow2.f32 %v2469_v9  ;;  %v2323_v4 = vmul.f32 %v12638_v41, %v2220_v36  ;;  %v11069_v49 = vpop.eup %11068  ;;  %10379 = vmatprep.mubr.msk.f32.mxu1 %vm2612_vm7, %v13502_v51  ;;  %v2517_v63 = vadd.f32 1.0, %v11067_v24  ;;  %v2127_v59 = vmul.f32 %v12633_v57, %v17678_v21  ;;  %v17691_v9 = vld [vmem:[#allocation99_spill] sm:$0xff] }
 0x2a5   : > { %v2425_v19 = vsub.f32 0.0, %v13530_v34  ;;  %v2471_v23 = vmul.f32 1.442695, %v2424_v15  ;;  %v17680_v31 = vrot.slane %v17679_v8, 7  ;;  %v17681_v53 = vmov %v17674_v3  ;;  %v11071_v45 = vpop.eup %11070 }
 0x2a6   : > { %v13555_v17 = vmul.f32 %v11069_v49, %v13371_v0  ;;  %11080 = vrcp.f32 %v2516_v60  ;;  %v2355_v5 = vadd.f32 %v2323_v4, %v2158_v55  ;;  %v13558_v22 = vmul.f32 %v11071_v45, %v13376_v12  ;;  %10324 = vmatmul.mubr.msk.f32.gmra.mrb[36].mxu0 %vm2612_vm7, %v13527_v6  ;;  %v17687_v12 = vld [vmem:[#allocation89_spill] sm:$0xff]  ;;  %v17692_v60 = vld [vmem:[#allocation87_spill] sm:$0xff] }
 0x2a7   : > { %v2219_v40 = vsel %vm2205_vm3, %v17681_v53, %v17680_v31  ;;  %v2473_v42 = vmul.f32 1.442695, %v2425_v19  ;;  %11082 = vrcp.f32 %v2517_v63  ;;  %v2159_v38 = vadd.f32 %v2127_v59, %v17684_v7  ;;  %10380 = vmatmul.mubr.msk.f32.gmra.mrb[36].mxu1 %vm2612_vm7, %v13527_v6  ;;  %10326 = vmatprep.mubr.msk.f32.mxu0 %vm2612_vm7, %v13533_v35  ;;  %v17695_v59 = vld [vmem:[#allocation103_spill] sm:$0xff]  ;;  %v17696_v53 = vld [vmem:[#allocation86_spill] sm:$0xff] }
 0x2a8   : > { %17682 = vst [vmem:[#allocation73_spill] sm:$0xff] %v13555_v17  ;;  %17683 = vst [vmem:[#allocation61_spill] sm:$0xff] %v13558_v22  ;;  %v2324_v25 = vmul.f32 %v12638_v41, %v2219_v40  ;;  %11084 = vpow2.f32 %v2471_v23  ;;  %v13567_v0 = vadd.f32 %v12727_v32, %v2355_v5  ;;  %v1963_v46 = vadd.f32 %v17686_v10, %v17685_v39  ;;  %v13596_v23 = vld [vmem:[%s17261_s6] ss:$0 sm:$0xff]  ;;  %v17697_v40 = vld [vmem:[#allocation100_spill] sm:$0xff] }
 0x2a9   : > { %v2128_v54 = vmul.f32 %v12633_v57, %v17687_v12  ;;  %10382 = vmatprep.mubr.msk.f32.mxu1 %vm2612_vm7, %v13533_v35  ;;  %11086 = vpow2.f32 %v2473_v42  ;;  %v17689_v36 = vrot.slane %v17688_v43, 7  ;;  %v17690_v33 = vmov %v17680_v31 }
 0x2aa   : > { %v2356_v3 = vadd.f32 %v2324_v25, %v2159_v38  ;;  %v2129_v16 = vmul.f32 %v12633_v57, %v17691_v9  ;;  %v2426_v15 = vsub.f32 0.0, %v13567_v0  ;;  %v17693_v19 = vrot.slane %v17692_v60, 7  ;;  %v11073_v63 = vpop.eup %11072  ;;  %10327 = vmatmul.mubr.msk.f32.gmra.mrb[38].mxu0 %vm2612_vm7, %v13555_v17  ;;  %v17698_v25 = vld [vmem:[#allocation98_spill] sm:$0xff] }
 0x2ab   : > { %v2218_v32 = vsel %vm2205_vm3, %v17690_v33, %v17689_v36  ;;  %v2160_v55 = vadd.f32 %v2128_v54, %v1963_v46  ;;  %v17694_v4 = vmov %v17689_v36  ;;  %v1965_v45 = vadd.f32 %v17697_v40, %v17696_v53  ;;  %v11075_v42 = vpop.eup %11074  ;;  %10383 = vmatmul.mubr.msk.f32.gmra.mrb[38].mxu1 %vm2612_vm7, %v13555_v17  ;;  %10329 = vmatprep.mubr.msk.f32.mxu0 %vm2612_vm7, %v13558_v22 }
 0x2ac   : > { %v2325_v24 = vmul.f32 %v12638_v41, %v2218_v32  ;;  %v2217_v49 = vsel %vm2205_vm3, %v17694_v4, %v17693_v19  ;;  %v13599_v21 = vadd.f32 %v13596_v23, %v2356_v3  ;;  %v2161_v8 = vadd.f32 %v2129_v16, %v17695_v59  ;;  %v11077_v10 = vpop.eup %11076  ;;  %10385 = vmatprep.mubr.msk.f32.mxu1 %vm2612_vm7, %v13558_v22  ;;  %v17700_v3 = vld [vmem:[#allocation84_spill] sm:$0xff] }
 0x2ad   : > { %v2326_v31 = vmul.f32 %v12638_v41, %v2217_v49  ;;  %v2518_v5 = vadd.f32 1.0, %v11073_v63  ;;  %v2475_v7 = vmul.f32 1.442695, %v2426_v15  ;;  %v2130_v39 = vmul.f32 %v12633_v57, %v17698_v25  ;;  %v17704_v49 = vld [vmem:[#allocation96_spill] sm:$0xff] }
 0x2ae   : > { %v2357_v38 = vadd.f32 %v2325_v24, %v2160_v55  ;;  %v13616_v46 = vmul.f32 %v11075_v42, %v13413_v44  ;;  %v2427_v12 = vsub.f32 0.0, %v13599_v21  ;;  %v17701_v43 = vrot.slane %v17700_v3, 7  ;;  %v11079_v32 = vpop.eup %11078 }
 0x2af   : > { %v2358_v54 = vadd.f32 %v2326_v31, %v2161_v8  ;;  %v17702_v36 = vmov %v17693_v19  ;;  %v13626_v9 = vmul.f32 %v11077_v10, %v13422_v14  ;;  %11088 = vrcp.f32 %v2518_v5  ;;  %v17709_v10 = vld [vmem:[#allocation111_spill] sm:$0xff] }
 0x2b0   : > { %17699 = vst [vmem:[#allocation77_spill] sm:$0xff] %v13616_v46  ;;  %v2216_v33 = vsel %vm2205_vm3, %v17702_v36, %v17701_v43  ;;  %v13629_v16 = vadd.f32 %v13596_v23, %v2357_v38  ;;  %v2162_v44 = vadd.f32 %v2130_v39, %v1965_v45  ;;  %v2519_v15 = vadd.f32 1.0, %v11079_v32  ;;  %v11081_v19 = vpop.eup %11080  ;;  %10330 = vmatmul.mubr.msk.f32.gmra.mrb[40].mxu0 %vm2612_vm7, %v13616_v46  ;;  %v17712_v36 = vld [vmem:[#allocation107_spill] sm:$0xff] }
 0x2b1   : > { %17703 = vst [vmem:[#allocation60_spill] sm:$0xff] %v13626_v9  ;;  %11090 = vpow2.f32 %v2475_v7  ;;  %v2477_v55 = vmul.f32 1.442695, %v2427_v12  ;;  %v13632_v24 = vadd.f32 %v13596_v23, %v2358_v54  ;;  %10386 = vmatmul.mubr.msk.f32.gmra.mrb[40].mxu1 %vm2612_vm7, %v13616_v46  ;;  %v2327_v60 = vmul.f32 %v12638_v41, %v2216_v33  ;;  %v11083_v31 = vpop.eup %11082  ;;  %10332 = vmatprep.mubr.msk.f32.mxu0 %vm2612_vm7, %v13626_v9  ;;  %v17710_v54 = vld [vmem:[#allocation95_spill] sm:$0xff] }
 0x2b2   : > { %v2428_v14 = vsub.f32 0.0, %v13629_v16  ;;  %v2131_v4 = vmul.f32 %v12633_v57, %v13110_v18  ;;  %v17705_v63 = vrot.slane %v17704_v49, 7  ;;  %v17706_v59 = vmov %v17701_v43  ;;  %10388 = vmatprep.mubr.msk.f32.mxu1 %vm2612_vm7, %v13626_v9  ;;  %v11085_v45 = vpop.eup %11084 }
 0x2b3   : > { %v13653_v53 = vmul.f32 %v11081_v19, %v13434_v1  ;;  %11092 = vrcp.f32 %v2519_v15  ;;  %v2429_v18 = vsub.f32 0.0, %v13632_v24  ;;  %v13658_v42 = vmul.f32 %v11083_v31, %v13440_v48  ;;  %v11087_v38 = vpop.eup %11086  ;;  %v17711_v1 = vld [vmem:[#allocation108_spill] sm:$0xff] }
 0x2b4   : > { %v2215_v8 = vsel %vm2205_vm3, %v17706_v59, %v17705_v63  ;;  %11094 = vpow2.f32 %v2477_v55  ;;  %v2479_v5 = vmul.f32 1.442695, %v2428_v14  ;;  %v2359_v7 = vadd.f32 %v2327_v60, %v2162_v44  ;;  %v17713_v44 = vld [vmem:[#allocation92_spill] sm:$0xff] }
 0x2b5   : > { %17707 = vst [vmem:[#allocation74_spill] sm:$0xff] %v13653_v53  ;;  %v2328_v40 = vmul.f32 %v12638_v41, %v2215_v8  ;;  %17708 = vst [vmem:[#allocation72_spill] sm:$0xff] %v13658_v42  ;;  %v2520_v25 = vadd.f32 1.0, %v11085_v45  ;;  %v2481_v39 = vmul.f32 1.442695, %v2429_v18  ;;  %v2163_v12 = vadd.f32 %v2131_v4, %v17709_v10  ;;  %10333 = vmatmul.mubr.msk.f32.gmra.mrb[42].mxu0 %vm2612_vm7, %v13653_v53  ;;  %v17716_v14 = vld [vmem:[#allocation116_spill] sm:$0xff] }
 0x2b6   : > { %v1967_v3 = vadd.f32 %v17711_v1, %v17710_v54  ;;  %10389 = vmatmul.mubr.msk.f32.gmra.mrb[42].mxu1 %vm2612_vm7, %v13653_v53  ;;  %v2521_v43 = vadd.f32 1.0, %v11087_v38  ;;  %11096 = vpow2.f32 %v2479_v5  ;;  %v13668_v48 = vadd.f32 %v13596_v23, %v2359_v7  ;;  %10335 = vmatprep.mubr.msk.f32.mxu0 %vm2612_vm7, %v13658_v42  ;;  %v17717_v31 = vld [vmem:[#allocation120_spill] sm:$0xff]  ;;  %v17722_v54 = vld [vmem:[#allocation117_spill] sm:$0xff] }
 0x2b7   : > { %v2132_v33 = vmul.f32 %v12633_v57, %v17712_v36  ;;  %10391 = vmatprep.mubr.msk.f32.mxu1 %vm2612_vm7, %v13658_v42  ;;  %11098 = vrcp.f32 %v2520_v25  ;;  %v2360_v32 = vadd.f32 %v2328_v40, %v2163_v12  ;;  %v17714_v15 = vrot.slane %v17713_v44, 7  ;;  %v17718_v40 = vld [vmem:[#allocation105_spill] sm:$0xff]  ;;  %v17721_v12 = vld [vmem:[#allocation104_spill] sm:$0xff]  ;;  %v17724_v36 = vld [vmem:[#allocation115_spill] sm:$0xff] }
 0x2b8   : > { %v17715_v55 = vmov %v17705_v63  ;;  %v2133_v60 = vmul.f32 %v12633_v57, %v17716_v14  ;;  %11100 = vrcp.f32 %v2521_v43  ;;  %v2430_v4 = vsub.f32 0.0, %v13668_v48 }
 0x2b9   : > { %v2214_v19 = vsel %vm2205_vm3, %v17715_v55, %v17714_v15  ;;  %v2164_v63 = vadd.f32 %v2132_v33, %v1967_v3  ;;  %11102 = vpow2.f32 %v2481_v39  ;;  %v13687_v8 = vadd.f32 %v13596_v23, %v2360_v32  ;;  %v11089_v7 = vpop.eup %11088  ;;  %v17725_v32 = vld [vmem:[#allocation101_spill] sm:$0xff] }
 0x2ba   : > { %v2329_v59 = vmul.f32 %v12638_v41, %v2214_v19  ;;  %v2165_v18 = vadd.f32 %v2133_v60, %v17717_v31  ;;  %v17719_v49 = vrot.slane %v17718_v40, 7  ;;  %v17720_v45 = vmov %v17714_v15  ;;  %v17728_v31 = vld [vmem:[#allocation125_spill] sm:$0xff] }
 0x2bb   : > { %v2483_v38 = vmul.f32 1.442695, %v2430_v4  ;;  %v1969_v39 = vadd.f32 %v17722_v54, %v17721_v12  ;;  %v11091_v1 = vpop.eup %11090  ;;  %v13700_v3 = vmul.f32 %v11089_v7, %v13466_v56  ;;  %v2431_v43 = vsub.f32 0.0, %v13687_v8  ;;  %v17730_v54 = vld [vmem:[#allocation113_spill] sm:$0xff] }
 0x2bc   : > { %v2213_v5 = vsel %vm2205_vm3, %v17720_v45, %v17719_v49  ;;  %v2361_v25 = vadd.f32 %v2329_v59, %v2164_v63  ;;  %v2134_v33 = vmul.f32 %v12633_v57, %v17724_v36  ;;  %v17726_v44 = vrot.slane %v17725_v32, 7  ;;  %v17733_v36 = vld [vmem:[#allocation112_spill] sm:$0xff] }
 0x2bd   : > { %v2330_v10 = vmul.f32 %v12638_v41, %v2213_v5  ;;  %17723 = vst [vmem:[#allocation58_spill] sm:$0xff] %v13700_v3  ;;  %v17727_v15 = vmov %v17719_v49  ;;  %v2522_v19 = vadd.f32 1.0, %v11091_v1  ;;  %11104 = vpow2.f32 %v2483_v38  ;;  %v11093_v56 = vpop.eup %11092  ;;  %10336 = vmatmul.mubr.msk.f32.gmra.mrb[44].mxu0 %vm2612_vm7, %v13700_v3  ;;  %10392 = vmatmul.mubr.msk.f32.gmra.mrb[44].mxu1 %vm2612_vm7, %v13700_v3 }
 0x2be   : > { %v2212_v55 = vsel %vm2205_vm3, %v17727_v15, %v17726_v44  ;;  %v13712_v14 = vadd.f32 %v13596_v23, %v2361_v25  ;;  %v2485_v4 = vmul.f32 1.442695, %v2431_v43  ;;  %v2166_v63 = vadd.f32 %v2134_v33, %v1969_v39  ;;  %v11095_v49 = vpop.eup %11094  ;;  %v17734_v33 = vld [vmem:[#allocation126_spill] sm:$0xff] }
 0x2bf   : > { %v2362_v60 = vadd.f32 %v2330_v10, %v2165_v18  ;;  %v2331_v59 = vmul.f32 %v12638_v41, %v2212_v55  ;;  %v2135_v40 = vmul.f32 %v12633_v57, %v17728_v31  ;;  %v13722_v45 = vmul.f32 %v11093_v56, %v13493_v52 }
 0x2c0   : > { %11106 = vrcp.f32 %v2522_v19  ;;  %v2432_v18 = vsub.f32 0.0, %v13712_v14  ;;  %v2523_v7 = vadd.f32 1.0, %v11095_v49  ;;  %v11097_v10 = vpop.eup %11096  ;;  %v17731_v39 = vrot.slane %v17730_v54, 7  ;;  %v17741_v54 = vld [vmem:[#allocation122_spill] sm:$0xff] }
 0x2c1   : > { %17729 = vst [vmem:[#allocation82_spill] sm:$0xff] %v13722_v45  ;;  %v13726_v5 = vadd.f32 %v13596_v23, %v2362_v60  ;;  %11108 = vpow2.f32 %v2485_v4  ;;  %v2363_v38 = vadd.f32 %v2331_v59, %v2166_v63  ;;  %v2167_v25 = vadd.f32 %v2135_v40, %v13209_v2  ;;  %10338 = vmatprep.mubr.msk.f32.mxu0 %vm2612_vm7, %v13722_v45  ;;  %v17736_v4 = vld [vmem:[#allocation124_spill] sm:$0xff] }
 0x2c2   : > { %10394 = vmatprep.mubr.msk.f32.mxu1 %vm2612_vm7, %v13722_v45  ;;  %v2487_v52 = vmul.f32 1.442695, %v2432_v18  ;;  %v17732_v1 = vmov %v17726_v44  ;;  %v1971_v2 = vadd.f32 %v17734_v33, %v17733_v36  ;;  %v11099_v44 = vpop.eup %11098  ;;  %11110 = vrcp.f32 %v2523_v7  ;;  %v17738_v7 = vld [vmem:[#allocation109_spill] sm:$0xff] }
 0x2c3   : > { %v2433_v12 = vsub.f32 0.0, %v13726_v5  ;;  %v2211_v43 = vsel %vm2205_vm3, %v17732_v1, %v17731_v39  ;;  %v2524_v15 = vadd.f32 1.0, %v11097_v10  ;;  %v13743_v55 = vadd.f32 %v13596_v23, %v2363_v38  ;;  %v11101_v60 = vpop.eup %11100 }
 0x2c4   : > { %v2332_v19 = vmul.f32 %v12638_v41, %v2211_v43  ;;  %v13747_v56 = vmul.f32 %v11099_v44, %v13518_v28  ;;  %11112 = vpow2.f32 %v2487_v52  ;;  %v2136_v63 = vmul.f32 %v12633_v57, %v17736_v4  ;;  %v11103_v59 = vpop.eup %11102  ;;  %v17745_v44 = vld [vmem:[#allocation131_spill] sm:$0xff] }
 0x2c5   : > { %v2489_v32 = vmul.f32 1.442695, %v2433_v12  ;;  %v13752_v31 = vmul.f32 %v11101_v60, %v13530_v34  ;;  %11114 = vrcp.f32 %v2524_v15  ;;  %v2434_v40 = vsub.f32 0.0, %v13743_v55 }
 0x2c6   : > { %17735 = vst [vmem:[#allocation70_spill] sm:$0xff] %v13747_v56  ;;  %v2364_v49 = vadd.f32 %v2332_v19, %v2167_v25  ;;  %10339 = vmatmul.mubr.msk.f32.gmra.mrb[46].mxu0 %vm2612_vm7, %v13747_v56  ;;  %10395 = vmatmul.mubr.msk.f32.gmra.mrb[46].mxu1 %vm2612_vm7, %v13747_v56  ;;  %v2525_v28 = vadd.f32 1.0, %v11103_v59  ;;  %v2168_v18 = vadd.f32 %v2136_v63, %v1971_v2  ;;  %v17739_v38 = vrot.slane %v17738_v7, 7  ;;  %v17744_v2 = vld [vmem:[#allocation121_spill] sm:$0xff]  ;;  %v17746_v19 = vld [vmem:[#allocation130_spill] sm:$0xff]  ;;  %v3452_v59 = vld [vmem:[%s17263_s8 + $0x8] sm:$0xff] }
 0x2c7   : > { %17737 = vst [vmem:[#allocation69_spill] sm:$0xff] %v13752_v31  ;;  %11116 = vpow2.f32 %v2489_v32  ;;  %v17740_v10 = vmov %v17731_v39  ;;  %10341 = vmatprep.mubr.msk.f32.mxu0 %vm2612_vm7, %v13752_v31  ;;  %10397 = vmatprep.mubr.msk.f32.mxu1 %vm2612_vm7, %v13752_v31  ;;  %v2491_v25 = vmul.f32 1.442695, %v2434_v40  ;;  %v2137_v39 = vmul.f32 %v12633_v57, %v13231_v30  ;;  %v11105_v1 = vpop.eup %11104  ;;  %v3451_v63 = vld [vmem:[%s17263_s8] sm:$0xff] }
 0x2c8   : > { %v2210_v34 = vsel %vm2205_vm3, %v17740_v10, %v17739_v38  ;;  %v13770_v52 = vadd.f32 %v13596_v23, %v2364_v49  ;;  %11118 = vrcp.f32 %v2525_v28  ;;  %v17742_v43 = vrot.slane %v17741_v54, 7 }
 0x2c9   : > { %v2333_v12 = vmul.f32 %v12638_v41, %v2210_v34  ;;  %v17743_v36 = vmov %v17739_v38  ;;  %v1973_v15 = vadd.f32 %v17745_v44, %v17744_v2  ;;  %v2138_v60 = vmul.f32 %v12633_v57, %v17746_v19  ;;  %v17747_v38 = vld [vmem:[#allocation118_spill] sm:$0xff] }
 0x2ca   : > { %v2209_v33 = vsel %vm2205_vm3, %v17743_v36, %v17742_v43  ;;  %v2526_v32 = vadd.f32 1.0, %v11105_v1  ;;  %11120 = vpow2.f32 %v2491_v25  ;;  %v2435_v4 = vsub.f32 0.0, %v13770_v52  ;;  %v11107_v40 = vpop.eup %11106 }
 0x2cb   : > { %v2365_v30 = vadd.f32 %v2333_v12, %v2168_v18  ;;  %v2169_v49 = vadd.f32 %v2137_v39, %v13251_v11  ;;  %v2334_v28 = vmul.f32 %v12638_v41, %v2209_v33  ;;  %v2170_v7 = vadd.f32 %v2138_v60, %v1973_v15  ;;  %v11109_v25 = vpop.eup %11108 }
 0x2cc   : > { %v17748_v10 = vrot.slane %v17747_v38, 7  ;;  %v17749_v34 = vmov %v17742_v43  ;;  %v13801_v12 = vmul.f32 %v11107_v40, %v13567_v0  ;;  %11122 = vrcp.f32 %v2526_v32  ;;  %v11111_v2 = vpop.eup %11110 }
 0x2cd   : > { %v2493_v1 = vmul.f32 1.442695, %v2435_v4  ;;  %v13804_v43 = vadd.f32 %v13596_v23, %v2365_v30  ;;  %v2527_v11 = vadd.f32 1.0, %v11109_v25  ;;  %v2366_v39 = vadd.f32 %v2334_v28, %v2169_v49 }
 0x2ce   : > { %v2208_v18 = vsel %vm2205_vm3, %v17749_v34, %v17748_v10  ;;  %17750 = vst [vmem:[#allocation83_spill] sm:$0xff] %v13801_v12  ;;  %v10557_v33 = vpack.c.bf16 %v3452_v59, %v3451_v63  ;;  %10342 = vmatmul.mubr.msk.f32.gmra.mrb[48].mxu0 %vm2612_vm7, %v13801_v12  ;;  %10398 = vmatmul.mubr.msk.f32.gmra.mrb[48].mxu1 %vm2612_vm7, %v13801_v12  ;;  %v17751_v44 = vrot.slane %v13217_v58, 7  ;;  %v17752_v15 = vmov %v17748_v10  ;;  %v11113_v60 = vpop.eup %11112  ;;  %v17755_v10 = vld [vmem:[#allocation128_spill] sm:$0xff] }
 0x2cf   : > { %v2335_v36 = vmul.f32 %v12638_v41, %v2208_v18  ;;  %11124 = vpow2.f32 %v2493_v1  ;;  %v2436_v0 = vsub.f32 0.0, %v13804_v43  ;;  %v2139_v54 = vmul.f32 %v12633_v57, %v13278_v37  ;;  %v11115_v63 = vpop.eup %11114  ;;  %v3453_v1 = vld [vmem:[%s17263_s8 + $0x10] sm:$0xff] }
 0x2d0   : > { %v2207_v19 = vsel %vm2205_vm3, %v17752_v15, %v17751_v44  ;;  %v13821_v32 = vmul.f32 %v11111_v2, %v13599_v21  ;;  %11126 = vrcp.f32 %v2527_v11  ;;  %v13824_v4 = vadd.f32 %v13596_v23, %v2366_v39  ;;  %10558 = vmatprep.subr.bf16.mxu0 %v10557_v33  ;;  %v3685_v2 = vld [vmem:[%s17271_s16 + $0x28] sm:$0xff] }
 0x2d1   : > { %v2367_v30 = vadd.f32 %v2335_v36, %v2170_v7  ;;  %v2528_v59 = vadd.f32 1.0, %v11113_v60  ;;  %v2495_v37 = vmul.f32 1.442695, %v2436_v0  ;;  %v2171_v40 = vadd.f32 %v2139_v54, %v13286_v61  ;;  %10560 = vmatpush3.bf16.msra.mxu0 %v10557_v33  ;;  %v11117_v28 = vpop.eup %11116  ;;  %v3681_v33 = vld [vmem:[%s17271_s16 + $0x8] sm:$0xff]  ;;  %v3680_v60 = vld [vmem:[%s17271_s16] sm:$0xff] }
 0x2d2   : > { %17753 = vst [vmem:[#allocation81_spill] sm:$0xff] %v13821_v32  ;;  %v2336_v49 = vmul.f32 %v12638_v41, %v2207_v19  ;;  %10344 = vmatprep.mubr.msk.f32.mxu0 %vm2612_vm7, %v13821_v32  ;;  %10400 = vmatprep.mubr.msk.f32.mxu1 %vm2612_vm7, %v13821_v32  ;;  %v13833_v21 = vmul.f32 %v11115_v63, %v13629_v16  ;;  %v2437_v7 = vsub.f32 0.0, %v13824_v4  ;;  %v2529_v34 = vadd.f32 1.0, %v11117_v28  ;;  %v11119_v16 = vpop.eup %11118 }
 0x2d3   : > { %v13837_v38 = vadd.f32 %v13596_v23, %v2367_v30  ;;  %v1975_v61 = vadd.f32 %v13270_v13, %v17755_v10  ;;  %11128 = vrcp.f32 %v2528_v59  ;;  %v2140_v25 = vmul.f32 %v12633_v57, %v13274_v47  ;;  %v3454_v47 = vld [vmem:[%s17263_s8 + $0x18] sm:$0xff]  ;;  %v3684_v30 = vld [vmem:[%s17271_s16 + $0x20] sm:$0xff] }
 0x2d4   : > { %17754 = vst [vmem:[#allocation66_spill] sm:$0xff] %v13833_v21  ;;  %v2368_v18 = vadd.f32 %v2336_v49, %v2171_v40  ;;  %10345 = vmatmul.mubr.msk.f32.gmra.mrb[50].mxu0 %vm2612_vm7, %v13833_v21  ;;  %10401 = vmatmul.mubr.msk.f32.gmra.mrb[50].mxu1 %vm2612_vm7, %v13833_v21  ;;  %11130 = vpow2.f32 %v2495_v37  ;;  %v2497_v11 = vmul.f32 1.442695, %v2437_v7  ;;  %v17756_v39 = vrot.slane %v13205_v50, 7  ;;  %v11121_v0 = vpop.eup %11120 }
 0x2d5   : > { %v2438_v13 = vsub.f32 0.0, %v13837_v38  ;;  %v17757_v36 = vmov %v17751_v44  ;;  %v13867_v50 = vmul.f32 %v11119_v16, %v13632_v24  ;;  %11132 = vrcp.f32 %v2529_v34 }
 0x2d6   : > { %v2206_v57 = vsel %vm2205_vm3, %v17757_v36, %v17756_v39  ;;  %v13870_v58 = vadd.f32 %v13596_v23, %v2368_v18  ;;  %v2172_v54 = vadd.f32 %v2140_v25, %v1975_v61  ;;  %v2530_v44 = vadd.f32 1.0, %v11121_v0  ;;  %v11123_v24 = vpop.eup %11122 }
 0x2d7   : > { %17758 = vst [vmem:[#allocation90_spill] sm:$0xff] %v13867_v50  ;;  %11134 = vpow2.f32 %v2497_v11  ;;  %v2499_v15 = vmul.f32 1.442695, %v2438_v13  ;;  %v2337_v19 = vmul.f32 %v12638_v41, %v2206_v57  ;;  %10347 = vmatprep.mubr.msk.f32.mxu0 %vm2612_vm7, %v13867_v50  ;;  %10403 = vmatprep.mubr.msk.f32.mxu1 %vm2612_vm7, %v13867_v50  ;;  %v10561_v59 = vpack.c.bf16 %v3454_v47, %v3453_v1 }
 0x2d8   : > { %v2439_v63 = vsub.f32 0.0, %v13870_v58  ;;  %v10565_v37 = vpack.c.bf16 %v3685_v2, %v3681_v33  ;;  %v13885_v41 = vmul.f32 %v11123_v24, %v13668_v48  ;;  %11136 = vrcp.f32 %v2530_v44 }
 0x2d9   : > { %v2369_v40 = vadd.f32 %v2337_v19, %v2172_v54  ;;  %v11125_v49 = vpop.eup %11124  ;;  %11138 = vpow2.f32 %v2499_v15  ;;  %10562 = vmatprep.subr.bf16.mxu0 %v10561_v59  ;;  %v13887_v7 = vpack.c.bf16 %v3684_v30, %v3680_v60 }
 0x2da   : > { %17759 = vst [vmem:[#allocation79_spill] sm:$0xff] %v13885_v41  ;;  %v2501_v28 = vmul.f32 1.442695, %v2439_v63  ;;  %10813 = vmatprep.subr.bf16.mxu1 %v10565_v37  ;;  %v11127_v10 = vpop.eup %11126  ;;  %10348 = vmatmul.mubr.msk.f32.gmra.mrb[52].mxu0 %vm2612_vm7, %v13885_v41  ;;  %v2531_v61 = vadd.f32 1.0, %v11125_v49  ;;  %v3692_v49 = vld [vmem:[%s17271_s16 + $0x60] sm:$0xff] }
 0x2db   : > { %10404 = vmatmul.mubr.msk.f32.gmra.mrb[52].mxu1 %vm2612_vm7, %v13885_v41  ;;  %v2408_v48 = vadd.f32 %v13596_v23, %v2369_v40  ;;  %v13895_v34 = vmul.f32 %v11127_v10, %v13687_v8  ;;  %10564 = vmatpush3.bf16.msra.mxu0 %v10561_v59  ;;  %v3687_v10 = vld [vmem:[%s17271_s16 + $0x38] sm:$0xff] }
 0x2dc   : > { %11140 = vpow2.f32 %v2501_v28  ;;  %10815 = vmatpush1.bf16.msra.mxu1 %v13887_v7  ;;  %10566 = vmatprep.subr.bf16.mxu0 %v10565_v37  ;;  %v3688_v37 = vld [vmem:[%s17271_s16 + $0x40] sm:$0xff] }
 0x2dd   : > { %17760 = vst [vmem:[#allocation94_spill] sm:$0xff] %v13895_v34  ;;  %11142 = vrcp.f32 %v2531_v61  ;;  %v2440_v18 = vsub.f32 0.0, %v2408_v48  ;;  %v11129_v25 = vpop.eup %11128  ;;  %10350 = vmatprep.mubr.msk.f32.mxu0 %vm2612_vm7, %v13895_v34  ;;  %10406 = vmatprep.mubr.msk.f32.mxu1 %vm2612_vm7, %v13895_v34  ;;  %v14017_v28 = vpack.c.bf16 %v3692_v49, %v3688_v37  ;;  %v17390_v61 = vmov 0.0  }
 0x2de   : > { %v11131_v1 = vpop.eup %11130  ;;  %v13903_v23 = vmul.f32 %v11129_v25, %v13712_v14 }
 0x2df   : > { %v2503_v8 = vmul.f32 1.442695, %v2440_v18  ;;  %v11133_v16 = vpop.eup %11132  ;;  %v2532_v11 = vadd.f32 1.0, %v11131_v1  ;;  %v14063_v18 = vld [vmem:[%s17265_s10] ss:$0 sm:$0xff] }
 0x2e0   : > { %17761 = vst [vmem:[#allocation78_spill] sm:$0xff] %v13903_v23  ;;  %10351 = vmatmul.mubr.msk.f32.gmra.mrb[54].mxu0 %vm2612_vm7, %v13903_v23  ;;  %10407 = vmatmul.mubr.msk.f32.gmra.mrb[54].mxu1 %vm2612_vm7, %v13903_v23  ;;  %v13910_v39 = vmul.f32 %v11133_v16, %v13726_v5 }
 0x2e1   : > { %v11135_v13 = vpop.eup %11134  ;;  %11144 = vpow2.f32 %v2503_v8 }
 0x2e2   : > { %17762 = vst [vmem:[#allocation91_spill] sm:$0xff] %v13910_v39  ;;  %11146 = vrcp.f32 %v2532_v11  ;;  %v2533_v36 = vadd.f32 1.0, %v11135_v13  ;;  %v11137_v57 = vpop.eup %11136  ;;  %10353 = vmatprep.mubr.msk.f32.mxu0 %vm2612_vm7, %v13910_v39  ;;  %10409 = vmatprep.mubr.msk.f32.mxu1 %vm2612_vm7, %v13910_v39 }
 0x2e3   : > { %v11139_v14 = vpop.eup %11138  ;;  %v13917_v47 = vmul.f32 %v11137_v57, %v13743_v55 }
 0x2e4   : > { %11148 = vrcp.f32 %v2533_v36  ;;  %v2534_v33 = vadd.f32 1.0, %v11139_v14 }
 0x2e5   : > { %17763 = vst [vmem:[#allocation89_spill] sm:$0xff] %v13917_v47  ;;  %10354 = vmatmul.mubr.msk.f32.gmra.mrb[56].mxu0 %vm2612_vm7, %v13917_v47  ;;  %10410 = vmatmul.mubr.msk.f32.gmra.mrb[56].mxu1 %vm2612_vm7, %v13917_v47 }
 0x2e6   : > { %v11141_v2 = vpop.eup %11140  ;;  %11150 = vrcp.f32 %v2534_v33 }
 0x2e7   : > { %v11143_v5 = vpop.eup %11142  ;;  %v2535_v0 = vadd.f32 1.0, %v11141_v2 }
 0x2e8   : > { %v13924_v54 = vmul.f32 %v11143_v5, %v13770_v52 }
 0x2e9   : > { %11152 = vrcp.f32 %v2535_v0 }
 0x2ea   : > { %17764 = vst [vmem:[#allocation75_spill] sm:$0xff] %v13924_v54  ;;  %10356 = vmatprep.mubr.msk.f32.mxu0 %vm2612_vm7, %v13924_v54  ;;  %10412 = vmatprep.mubr.msk.f32.mxu1 %vm2612_vm7, %v13924_v54 }
 0x2eb   : > { %v11145_v55 = vpop.eup %11144 }
 0x2ec   : > { %v11147_v44 = vpop.eup %11146  ;;  %v2536_v15 = vadd.f32 1.0, %v11145_v55 }
 0x2ed   : > { %v13931_v19 = vmul.f32 %v11147_v44, %v13804_v43 }
 0x2ee   : > { %v11149_v60 = vpop.eup %11148  ;;  %11154 = vrcp.f32 %v2536_v15 }
 0x2ef   : > { %17765 = vst [vmem:[#allocation99_spill] sm:$0xff] %v13931_v19  ;;  %10357 = vmatmul.mubr.msk.f32.gmra.mrb[58].mxu0 %vm2612_vm7, %v13931_v19  ;;  %10413 = vmatmul.mubr.msk.f32.gmra.mrb[58].mxu1 %vm2612_vm7, %v13931_v19  ;;  %v13938_v52 = vmul.f32 %v11149_v60, %v13824_v4 }
 0x2f0   : > { %v11151_v30 = vpop.eup %11150 }
 0x2f1   : > { %17766 = vst [vmem:[#allocation87_spill] sm:$0xff] %v13938_v52  ;;  %10359 = vmatprep.mubr.msk.f32.mxu0 %vm2612_vm7, %v13938_v52  ;;  %10415 = vmatprep.mubr.msk.f32.mxu1 %vm2612_vm7, %v13938_v52  ;;  %v13945_v43 = vmul.f32 %v11151_v30, %v13837_v38  ;;  %v3689_v38 = vld [vmem:[%s17271_s16 + $0x48] sm:$0xff] }
 0x2f3   : > { %17767 = vst [vmem:[#allocation103_spill] sm:$0xff] %v13945_v43  ;;  %v11153_v24 = vpop.eup %11152  ;;  %10360 = vmatmul.mubr.msk.f32.gmra.mrb[60].mxu0 %vm2612_vm7, %v13945_v43  ;;  %10416 = vmatmul.mubr.msk.f32.gmra.mrb[60].mxu1 %vm2612_vm7, %v13945_v43 }
 0x2f4   : > { %v13952_v4 = vmul.f32 %v11153_v24, %v13870_v58  ;;  %v3693_v58 = vld [vmem:[%s17271_s16 + $0x68] sm:$0xff] }
 0x2f5   : > { %v14012_v40 = vpack.c.bf16 %v3693_v58, %v3689_v38 }
 0x2f6   : > { %17768 = vst [vmem:[#allocation86_spill] sm:$0xff] %v13952_v4  ;;  %10362 = vmatprep.mubr.msk.f32.mxu0 %vm2612_vm7, %v13952_v4  ;;  %10418 = vmatprep.mubr.msk.f32.mxu1 %vm2612_vm7, %v13952_v4 }
 0x2f7   : > { %10814 = vmatprep.subr.bf16.mxu1 %v14012_v40 }
 0x2f8   : > { %v11155_v63 = vpop.eup %11154  ;;  %10816 = vmatpush1.bf16.msra.mxu1 %v14017_v28 }
 0x2f9   : > { %v13958_v59 = vmul.f32 %v11155_v63, %v2408_v48 }
 0x2fb   : > { %17769 = vst [vmem:[#allocation100_spill] sm:$0xff] %v13958_v59  ;;  %10363 = vmatmul.mubr.msk.f32.gmra.mrb[62].mxu0 %vm2612_vm7, %v13958_v59  ;;  %10419 = vmatmul.mubr.msk.f32.gmra.mrb[62].mxu1 %vm2612_vm7, %v13958_v59 }
 0x2fc   : > { %10429 = vmatprep.mubr.msk.f32.mxu0 %vm2612_vm7, %v13480_v29  ;;  %3946 = vmatprep.mubr.f32.mxu1 %v17390_v61 }
 0x2ff   : > { %10430 = vmatmul.mubr.msk.f32.vlgmr.msra.gmra.mrb[64].mxu0 %vm2612_vm7, %v13431_v62 }
 0x300   : > { %10432 = vmatprep.mubr.msk.f32.mxu0 %vm2612_vm7, %v13437_v20  ;;  %10568 = vmatpush1.bf16.msra.mxu0 %v13887_v7  ;;  %v3683_v7 = vld [vmem:[%s17271_s16 + $0x18] sm:$0xff] }
 0x301   : > { %10570 = vmatprep.subr.bf16.mxu0 %v14012_v40  ;;  %v14056_v48 = vpack.c.bf16 %v3687_v10, %v3683_v7 }
 0x303   : > { %10433 = vmatmul.mubr.msk.f32.gmra.mrb[66].mxu0 %vm2612_vm7, %v13490_v26 }
 0x304   : > { %10435 = vmatprep.mubr.msk.f32.mxu0 %vm2612_vm7, %v13502_v51  ;;  %10572 = vmatpush1.bf16.msra.mxu0 %v14017_v28 }
 0x305   : > { %10574 = vmatprep.subr.bf16.mxu0 %v14056_v48 }
 0x307   : > { %10436 = vmatmul.mubr.msk.f32.gmra.mrb[68].mxu0 %vm2612_vm7, %v13527_v6 }
 0x308   : > { %10438 = vmatprep.mubr.msk.f32.mxu0 %vm2612_vm7, %v13533_v35 }
 0x30b   : > { %10439 = vmatmul.mubr.msk.f32.gmra.mrb[70].mxu0 %vm2612_vm7, %v13555_v17 }
 0x30c   : > { %10441 = vmatprep.mubr.msk.f32.mxu0 %vm2612_vm7, %v13558_v22 }
 0x30f   : > { %10442 = vmatmul.mubr.msk.f32.gmra.mrb[72].mxu0 %vm2612_vm7, %v13616_v46 }
 0x310   : > { %10444 = vmatprep.mubr.msk.f32.mxu0 %vm2612_vm7, %v13626_v9 }
 0x313   : > { %10445 = vmatmul.mubr.msk.f32.gmra.mrb[74].mxu0 %vm2612_vm7, %v13653_v53 }
 0x314   : > { %10447 = vmatprep.mubr.msk.f32.mxu0 %vm2612_vm7, %v13658_v42 }
 0x317   : > { %10448 = vmatmul.mubr.msk.f32.gmra.mrb[76].mxu0 %vm2612_vm7, %v13700_v3 }
 0x318   : > { %10450 = vmatprep.mubr.msk.f32.mxu0 %vm2612_vm7, %v13722_v45 }
 0x31b   : > { %10451 = vmatmul.mubr.msk.f32.gmra.mrb[78].mxu0 %vm2612_vm7, %v13747_v56 }
 0x31c   : > { %10453 = vmatprep.mubr.msk.f32.mxu0 %vm2612_vm7, %v13752_v31 }
 0x31f   : > { %10454 = vmatmul.mubr.msk.f32.gmra.mrb[80].mxu0 %vm2612_vm7, %v13801_v12 }
 0x320   : > { %10456 = vmatprep.mubr.msk.f32.mxu0 %vm2612_vm7, %v13821_v32 }
 0x323   : > { %10457 = vmatmul.mubr.msk.f32.gmra.mrb[82].mxu0 %vm2612_vm7, %v13833_v21 }
 0x324   : > { %10459 = vmatprep.mubr.msk.f32.mxu0 %vm2612_vm7, %v13867_v50 }
 0x327   : > { %10460 = vmatmul.mubr.msk.f32.gmra.mrb[84].mxu0 %vm2612_vm7, %v13885_v41 }
 0x328   : > { %10462 = vmatprep.mubr.msk.f32.mxu0 %vm2612_vm7, %v13895_v34 }
 0x32b   : > { %10463 = vmatmul.mubr.msk.f32.gmra.mrb[86].mxu0 %vm2612_vm7, %v13903_v23 }
 0x32c   : > { %10465 = vmatprep.mubr.msk.f32.mxu0 %vm2612_vm7, %v13910_v39 }
 0x32f   : > { %10466 = vmatmul.mubr.msk.f32.gmra.mrb[88].mxu0 %vm2612_vm7, %v13917_v47 }
 0x330   : > { %10468 = vmatprep.mubr.msk.f32.mxu0 %vm2612_vm7, %v13924_v54 }
 0x333   : > { %10469 = vmatmul.mubr.msk.f32.gmra.mrb[90].mxu0 %vm2612_vm7, %v13931_v19 }
 0x334   : > { %10471 = vmatprep.mubr.msk.f32.mxu0 %vm2612_vm7, %v13938_v52 }
 0x337   : > { %10472 = vmatmul.mubr.msk.f32.gmra.mrb[92].mxu0 %vm2612_vm7, %v13945_v43 }
 0x338   : > { %10474 = vmatprep.mubr.msk.f32.mxu0 %vm2612_vm7, %v13952_v4 }
 0x33b   : > { %10475 = vmatmul.mubr.msk.f32.gmra.mrb[94].mxu0 %vm2612_vm7, %v13958_v59 }
 0x33c   : > { %3856 = vmatprep.mubr.f32.mxu0 %v17390_v61 }
 0x371   : > { %v10319_v25 = vpop.f32.mrb[32].mxu0 }
 0x372   : > { %v14065_v1 = vpop.f32.mrb[32].mxu1  ;;  %v14068_v8 = vadd.f32 %v10319_v25, %v14063_v18  ;;  %v2775_v16 = vpop.f32.mrb[33].mxu0 }
 0x373   : > { %17770 = vst [vmem:[#allocation98_spill] sm:$0xff] %v14065_v1  ;;  %v14070_v11 = vpop.f32.mrb[33].mxu1  ;;  %v14073_v13 = vadd.f32 %v14063_v18, %v2775_v16 }
 0x374   : > { %17771 = vst [vmem:[#allocation84_spill] sm:$0xff] %v14070_v11  ;;  %v2967_v36 = vand.u32 2147483647, %v14068_v8 }
 0x375   : > { %v2966_v57 = vand.u32 2147483647, %v14073_v13  ;;  %v10322_v14 = vpop.f32.mrb[34].mxu0 }
 0x376   : > { %v14077_v33 = vpop.f32.mrb[34].mxu1  ;;  %v2999_v2 = vsub.f32 0.0, %v2967_v36  ;;  %v14080_v5 = vadd.f32 %v10322_v14, %v14063_v18  ;;  %v2785_v0 = vpop.f32.mrb[35].mxu0 }
 0x377   : > { %17772 = vst [vmem:[#allocation96_spill] sm:$0xff] %v14077_v33  ;;  %v14082_v55 = vpop.f32.mrb[35].mxu1  ;;  %v2998_v44 = vsub.f32 0.0, %v2966_v57  ;;  %v14085_v15 = vadd.f32 %v14063_v18, %v2785_v0 }
 0x378   : > { %17773 = vst [vmem:[#allocation111_spill] sm:$0xff] %v14082_v55  ;;  %v3032_v60 = vmul.f32 1.442695, %v2999_v2  ;;  %v2969_v30 = vand.u32 2147483647, %v14080_v5 }
 0x379   : > { %v3030_v24 = vmul.f32 1.442695, %v2998_v44  ;;  %v2968_v63 = vand.u32 2147483647, %v14085_v15  ;;  %v10325_v38 = vpop.f32.mrb[36].mxu0 }
 0x37a   : > { %11156 = vpow2.f32 %v3032_v60  ;;  %v3001_v58 = vsub.f32 0.0, %v2969_v30  ;;  %v14090_v37 = vadd.f32 %v10325_v38, %v14063_v18  ;;  %v14092_v49 = vpop.f32.mrb[36].mxu1  ;;  %v2795_v7 = vpop.f32.mrb[37].mxu0 }
 0x37b   : > { %17774 = vst [vmem:[#allocation95_spill] sm:$0xff] %v14092_v49  ;;  %11158 = vpow2.f32 %v3030_v24  ;;  %v3000_v10 = vsub.f32 0.0, %v2968_v63  ;;  %v14095_v25 = vadd.f32 %v14063_v18, %v2795_v7  ;;  %v14097_v16 = vpop.f32.mrb[37].mxu1 }
 0x37c   : > { %17775 = vst [vmem:[#allocation108_spill] sm:$0xff] %v14097_v16  ;;  %v3036_v36 = vmul.f32 1.442695, %v3001_v58  ;;  %v2971_v57 = vand.u32 2147483647, %v14090_v37 }
 0x37d   : > { %v3034_v14 = vmul.f32 1.442695, %v3000_v10  ;;  %v2970_v2 = vand.u32 2147483647, %v14095_v25  ;;  %v10328_v0 = vpop.f32.mrb[38].mxu0  ;;  %v2938_v21 = vmax.f32 %v14095_v25, 0.0 }
 0x37e   : > { %11160 = vpow2.f32 %v3036_v36  ;;  %v3003_v44 = vsub.f32 0.0, %v2971_v57  ;;  %v14102_v60 = vadd.f32 %v10328_v0, %v14063_v18  ;;  %v14104_v30 = vpop.f32.mrb[38].mxu1  ;;  %v2805_v24 = vpop.f32.mrb[39].mxu0 }
 0x37f   : > { %17776 = vst [vmem:[#allocation107_spill] sm:$0xff] %v14104_v30  ;;  %11162 = vpow2.f32 %v3034_v14  ;;  %v3002_v63 = vsub.f32 0.0, %v2970_v2  ;;  %v14107_v38 = vadd.f32 %v14063_v18, %v2805_v24  ;;  %v14109_v58 = vpop.f32.mrb[39].mxu1 }
 0x380   : > { %17777 = vst [vmem:[#allocation92_spill] sm:$0xff] %v14109_v58  ;;  %v2973_v7 = vand.u32 2147483647, %v14102_v60  ;;  %v3040_v57 = vmul.f32 1.442695, %v3003_v44 }
 0x381   : > { %v3038_v10 = vmul.f32 1.442695, %v3002_v63  ;;  %v2972_v61 = vand.u32 2147483647, %v14107_v38 }
 0x382   : > { %v3005_v33 = vsub.f32 0.0, %v2973_v7 }
 0x383   : > { %v10331_v36 = vpop.f32.mrb[40].mxu0  ;;  %11164 = vpow2.f32 %v3038_v10  ;;  %v3004_v30 = vsub.f32 0.0, %v2972_v61  ;;  %v4873_v61 = vld [vmem:[%s17271_s16 + $0x8] sm:$0xff] }
 0x384   : > { %v14113_v49 = vpop.f32.mrb[40].mxu1  ;;  %v2815_v0 = vpop.f32.mrb[41].mxu0  ;;  %11166 = vpow2.f32 %v3040_v57  ;;  %v14122_v44 = vadd.f32 %v10331_v36, %v14063_v18 }
 0x385   : > { %17778 = vst [vmem:[#allocation116_spill] sm:$0xff] %v14113_v49  ;;  %v14116_v14 = vadd.f32 %v14063_v18, %v2815_v0  ;;  %v14118_v2 = vpop.f32.mrb[41].mxu1  ;;  %v11157_v24 = vpop.eup %11156  ;;  %v3042_v55 = vmul.f32 1.442695, %v3004_v30  ;;  %v4877_v0 = vld [vmem:[%s17271_s16 + $0x28] sm:$0xff] }
 0x386   : > { %17779 = vst [vmem:[#allocation120_spill] sm:$0xff] %v14118_v2  ;;  %v11159_v16 = vpop.eup %11158  ;;  %v3095_v58 = vadd.f32 1.0, %v11157_v24  ;;  %v3044_v24 = vmul.f32 1.442695, %v3005_v33  ;;  %v2975_v59 = vand.u32 2147483647, %v14122_v44 }
 0x387   : > { %v2974_v63 = vand.u32 2147483647, %v14116_v14  ;;  %v3094_v1 = vadd.f32 1.0, %v11159_v16  ;;  %v10581_v16 = vpack.c.bf16 %v4877_v0, %v4873_v61 }
 0x388   : > { %v10334_v49 = vpop.f32.mrb[42].mxu0  ;;  %11168 = vlog2.f32 %v3095_v58  ;;  %v11161_v57 = vpop.eup %11160 }
 0x389   : > { %v14124_v10 = vpop.f32.mrb[42].mxu1  ;;  %v2825_v30 = vpop.f32.mrb[43].mxu0  ;;  %11170 = vlog2.f32 %v3094_v1  ;;  %v3006_v2 = vsub.f32 0.0, %v2974_v63  ;;  %10582 = vmatprep.subr.bf16.mxu1 %v10581_v16  ;;  %v3097_v58 = vadd.f32 1.0, %v11161_v57  ;;  %v3007_v16 = vsub.f32 0.0, %v2975_v59 }
 0x38a   : > { %17780 = vst [vmem:[#allocation105_spill] sm:$0xff] %v14124_v10  ;;  %v14132_v7 = vpop.f32.mrb[43].mxu1  ;;  %v11163_v36 = vpop.eup %11162  ;;  %v14135_v10 = vadd.f32 %v10334_v49, %v14063_v18  ;;  %11172 = vpow2.f32 %v3042_v55  ;;  %v14139_v4 = vadd.f32 %v14063_v18, %v2825_v30 }
 0x38b   : > { %17781 = vst [vmem:[#allocation104_spill] sm:$0xff] %v14132_v7  ;;  %v3096_v11 = vadd.f32 1.0, %v11163_v36  ;;  %v3046_v33 = vmul.f32 1.442695, %v3006_v2  ;;  %v3682_v2 = vld [vmem:[%s17271_s16 + $0x10] sm:$0xff] }
 0x38c   : > { %v2977_v63 = vand.u32 2147483647, %v14135_v10  ;;  %v2976_v55 = vand.u32 2147483647, %v14139_v4  ;;  %v3048_v43 = vmul.f32 1.442695, %v3007_v16 }
 0x38d   : > { %11174 = vlog2.f32 %v3096_v11  ;;  %v11165_v1 = vpop.eup %11164 }
 0x38e   : > { %11176 = vpow2.f32 %v3044_v24  ;;  %v11167_v30 = vpop.eup %11166  ;;  %v3098_v11 = vadd.f32 1.0, %v11165_v1  ;;  %v3686_v24 = vld [vmem:[%s17271_s16 + $0x30] sm:$0xff]  ;;  %v3691_v1 = vld [vmem:[%s17271_s16 + $0x58] sm:$0xff] }
 0x38f   : > { %11178 = vlog2.f32 %v3097_v58  ;;  %v3008_v58 = vsub.f32 0.0, %v2976_v55 }
 0x390   : > { %v10337_v7 = vpop.f32.mrb[44].mxu0  ;;  %v14141_v61 = vpop.f32.mrb[44].mxu1  ;;  %11180 = vpow2.f32 %v3046_v33  ;;  %v14169_v33 = vpack.c.bf16 %v3686_v24, %v3682_v2  ;;  %v3690_v2 = vld [vmem:[%s17271_s16 + $0x50] sm:$0xff] }
 0x391   : > { %17782 = vst [vmem:[#allocation117_spill] sm:$0xff] %v14141_v61  ;;  %v2835_v49 = vpop.f32.mrb[45].mxu0  ;;  %v14144_v0 = vpop.f32.mrb[45].mxu1  ;;  %v14148_v36 = vadd.f32 %v10337_v7, %v14063_v18  ;;  %v3009_v61 = vsub.f32 0.0, %v2977_v63  ;;  %v2934_v7 = vmax.f32 %v14073_v13, 0.0  ;;  %v3099_v13 = vadd.f32 1.0, %v11167_v30 }
 0x392   : > { %17783 = vst [vmem:[#allocation115_spill] sm:$0xff] %v14144_v0  ;;  %v14151_v57 = vadd.f32 %v14063_v18, %v2835_v49  ;;  %v11169_v59 = vpop.eup %11168  ;;  %v3695_v49 = vld [vmem:[%s17271_s16 + $0x78] sm:$0xff]  ;;  %11182 = vlog2.f32 %v3098_v11  ;;  %v3694_v30 = vld [vmem:[%s17271_s16 + $0x70] sm:$0xff] }
 0x393   : > { %v11171_v0 = vpop.eup %11170  ;;  %v2979_v19 = vand.u32 2147483647, %v14148_v36  ;;  %v3129_v34 = vmul.f32 0.6931472, %v11169_v59  ;;  %v14179_v41 = vpack.c.bf16 %v3695_v49, %v3691_v1  ;;  %11184 = vpow2.f32 %v3048_v43 }
 0x394   : > { %v3127_v52 = vmul.f32 0.6931472, %v11171_v0  ;;  %v11173_v63 = vpop.eup %11172  ;;  %v2978_v16 = vand.u32 2147483647, %v14151_v57  ;;  %v3052_v0 = vmul.f32 1.442695, %v3009_v61  ;;  %11186 = vlog2.f32 %v3099_v13 }
 0x395   : > { %v3100_v61 = vadd.f32 1.0, %v11173_v63  ;;  %v3011_v59 = vsub.f32 0.0, %v2979_v19  ;;  %v17786_v49 = vmov 0.0  }
 0x396   : > { %v14177_v23 = vadd.f32 %v3127_v52, %v2934_v7  ;;  %v2935_v52 = vmax.f32 %v14068_v8, 0.0  ;;  %v3010_v7 = vsub.f32 0.0, %v2978_v16  ;;  %11188 = vpow2.f32 %v3052_v0 }
 0x397   : > { %v11175_v11 = vpop.eup %11174  ;;  %v3056_v0 = vmul.f32 1.442695, %v3011_v59 }
 0x398   : > { %9622 = vmatmul.mubr.msk.f32.vlgmr.msra.gmra.mrb[96].mxu0 %vm2612_vm7, %v14177_v23  ;;  %v14195_v43 = vadd.f32 %v3129_v34, %v2935_v52 }
 0x399   : > { %v10340_v27 = vpop.f32.mrb[46].mxu0  ;;  %v14167_v54 = vpop.f32.mrb[46].mxu1  ;;  %10576 = vmatpush1.bf16.msra.mxu0 %v14169_v33  ;;  %3862 = vmatprep.mubr.f32.mxu0 %v17786_v49 }
 0x39a   : > { %17784 = vst [vmem:[#allocation101_spill] sm:$0xff] %v14167_v54  ;;  %v14173_v55 = vadd.f32 %v10340_v27, %v14063_v18  ;;  %v2845_v47 = vpop.f32.mrb[47].mxu0  ;;  %v14175_v39 = vpop.f32.mrb[47].mxu1  ;;  %v3050_v27 = vmul.f32 1.442695, %v3008_v58  ;;  %10578 = vmatprep.subr.bf16.mxu0 %v14179_v41 }
 0x39b   : > { %17785 = vst [vmem:[#allocation125_spill] sm:$0xff] %v14175_v39  ;;  %v11177_v54 = vpop.eup %11176  ;;  %v14193_v39 = vpack.c.bf16 %v3694_v30, %v3690_v2  ;;  %v3131_v58 = vmul.f32 0.6931472, %v11175_v11  ;;  %v14199_v13 = vadd.f32 %v14063_v18, %v2845_v47  ;;  %v2936_v2 = vmax.f32 %v14085_v15, 0.0 }
 0x39c   : > { %v2981_v24 = vand.u32 2147483647, %v14173_v55  ;;  %v11179_v8 = vpop.eup %11178  ;;  %v3101_v19 = vadd.f32 1.0, %v11177_v54  ;;  %11190 = vpow2.f32 %v3050_v27  ;;  %9623 = vmatmul.mubr.msk.f32.gmra.mrb[98].mxu0 %vm2612_vm7, %v14195_v43  ;;  %v3054_v54 = vmul.f32 1.442695, %v3010_v7 }
 0x39d   : > { %v11181_v50 = vpop.eup %11180  ;;  %11192 = vlog2.f32 %v3100_v61  ;;  %3868 = vmatprep.mubr.f32.mxu0 %v17786_v49  ;;  %10580 = vmatpush1.bf16.msra.mxu0 %v14193_v39  ;;  %v14217_v27 = vadd.f32 %v3131_v58, %v2936_v2  ;;  %v3133_v52 = vmul.f32 0.6931472, %v11179_v8  ;;  %v2980_v7 = vand.u32 2147483647, %v14199_v13 }
 0x39e   : > { %v3013_v1 = vsub.f32 0.0, %v2981_v24  ;;  %10590 = vmatprep.subr.bf16.mxu0 %v14056_v48  ;;  %v11183_v61 = vpop.eup %11182  ;;  %v3102_v59 = vadd.f32 1.0, %v11181_v50  ;;  %v2949_v3 = vmax.f32 %v14173_v55, 0.0 }
 0x39f   : > { %v11185_v58 = vpop.eup %11184 }
 0x3a0   : > { %v3060_v63 = vmul.f32 1.442695, %v3013_v1  ;;  %9624 = vmatmul.mubr.msk.f32.gmra.mrb[100].mxu0 %vm2612_vm7, %v14217_v27  ;;  %v3103_v32 = vadd.f32 1.0, %v11185_v58 }
 0x3a1   : > { %v10343_v16 = vpop.f32.mrb[48].mxu0  ;;  %v14201_v24 = vpop.f32.mrb[48].mxu1  ;;  %3874 = vmatprep.mubr.f32.mxu0 %v17786_v49 }
 0x3a2   : > { %17787 = vst [vmem:[#allocation113_spill] sm:$0xff] %v14201_v24  ;;  %v14205_v34 = vadd.f32 %v10343_v16, %v14063_v18  ;;  %v2855_v30 = vpop.f32.mrb[49].mxu0  ;;  %v14207_v11 = vpop.f32.mrb[49].mxu1  ;;  %11194 = vpow2.f32 %v3060_v63  ;;  %v2937_v63 = vmax.f32 %v14080_v5, 0.0 }
 0x3a3   : > { %17788 = vst [vmem:[#allocation112_spill] sm:$0xff] %v14207_v11  ;;  %v14212_v47 = vadd.f32 %v14063_v18, %v2855_v30  ;;  %11196 = vlog2.f32 %v3101_v19  ;;  %v3012_v11 = vsub.f32 0.0, %v2980_v7 }
 0x3a4   : > { %v2983_v15 = vand.u32 2147483647, %v14205_v34  ;;  %11198 = vpow2.f32 %v3056_v0  ;;  %v14236_v0 = vadd.f32 %v3133_v52, %v2937_v63 }
 0x3a5   : > { %v2982_v1 = vand.u32 2147483647, %v14212_v47  ;;  %11200 = vpow2.f32 %v3054_v54 }
 0x3a6   : > { %v3015_v16 = vsub.f32 0.0, %v2983_v15  ;;  %v3135_v15 = vmul.f32 0.6931472, %v11183_v61  ;;  %11202 = vlog2.f32 %v3102_v59  ;;  %9625 = vmatmul.mubr.msk.f32.gmra.mrb[102].mxu0 %vm2612_vm7, %v14236_v0  ;;  %v2939_v59 = vmax.f32 %v14090_v37, 0.0 }
 0x3a7   : > { %v10346_v30 = vpop.f32.mrb[50].mxu0  ;;  %v14223_v24 = vpop.f32.mrb[50].mxu1  ;;  %v3014_v48 = vsub.f32 0.0, %v2982_v1  ;;  %3880 = vmatprep.mubr.f32.mxu0 %v17786_v49 }
 0x3a8   : > { %17789 = vst [vmem:[#allocation126_spill] sm:$0xff] %v14223_v24  ;;  %v14228_v8 = vadd.f32 %v10346_v30, %v14063_v18  ;;  %v2865_v50 = vpop.f32.mrb[51].mxu0  ;;  %v14230_v19 = vpop.f32.mrb[51].mxu1  ;;  %v3064_v5 = vmul.f32 1.442695, %v3015_v16  ;;  %v14247_v25 = vadd.f32 %v3135_v15, %v2938_v21 }
 0x3a9   : > { %17790 = vst [vmem:[#allocation124_spill] sm:$0xff] %v14230_v19  ;;  %v14234_v2 = vadd.f32 %v14063_v18, %v2865_v50  ;;  %v11187_v24 = vpop.eup %11186  ;;  %v3062_v54 = vmul.f32 1.442695, %v3014_v48 }
 0x3aa   : > { %v2985_v1 = vand.u32 2147483647, %v14228_v8  ;;  %v11189_v30 = vpop.eup %11188  ;;  %11204 = vpow2.f32 %v3064_v5  ;;  %v3137_v58 = vmul.f32 0.6931472, %v11187_v24  ;;  %v3058_v5 = vmul.f32 1.442695, %v3012_v11  ;;  %9626 = vmatmul.mubr.msk.f32.gmra.mrb[104].mxu0 %vm2612_vm7, %v14247_v25 }
 0x3ab   : > { %v2984_v19 = vand.u32 2147483647, %v14234_v2  ;;  %v11191_v16 = vpop.eup %11190  ;;  %11206 = vpow2.f32 %v3062_v54  ;;  %v3105_v24 = vadd.f32 1.0, %v11189_v30  ;;  %3886 = vmatprep.mubr.f32.mxu0 %v17786_v49  ;;  %v2953_v17 = vmax.f32 %v14228_v8, 0.0 }
 0x3ac   : > { %v3017_v52 = vsub.f32 0.0, %v2985_v1  ;;  %v11193_v61 = vpop.eup %11192  ;;  %11208 = vlog2.f32 %v3103_v32 }
 0x3ad   : > { %v3016_v7 = vsub.f32 0.0, %v2984_v19  ;;  %v10349_v63 = vpop.f32.mrb[52].mxu0  ;;  %v11195_v50 = vpop.eup %11194  ;;  %v3104_v19 = vadd.f32 1.0, %v11191_v16 }
 0x3ae   : > { %v14245_v48 = vpop.f32.mrb[52].mxu1  ;;  %v3068_v12 = vmul.f32 1.442695, %v3017_v52  ;;  %v14250_v31 = vadd.f32 %v10349_v63, %v14063_v18  ;;  %v2875_v54 = vpop.f32.mrb[53].mxu0  ;;  %v3109_v56 = vadd.f32 1.0, %v11195_v50  ;;  %v14262_v52 = vadd.f32 %v3137_v58, %v2939_v59 }
 0x3af   : > { %17791 = vst [vmem:[#allocation109_spill] sm:$0xff] %v14245_v48  ;;  %v14252_v1 = vpop.f32.mrb[53].mxu1  ;;  %v3066_v45 = vmul.f32 1.442695, %v3016_v7  ;;  %v14255_v37 = vadd.f32 %v14063_v18, %v2875_v54  ;;  %v11197_v21 = vpop.eup %11196  ;;  %v3139_v7 = vmul.f32 0.6931472, %v11193_v61 }
 0x3b0   : > { %17792 = vst [vmem:[#allocation122_spill] sm:$0xff] %v14252_v1  ;;  %11210 = vpow2.f32 %v3068_v12  ;;  %v2987_v11 = vand.u32 2147483647, %v14250_v31  ;;  %v11199_v15 = vpop.eup %11198  ;;  %v2940_v54 = vmax.f32 %v14107_v38, 0.0  ;;  %9627 = vmatmul.mubr.msk.f32.gmra.mrb[106].mxu0 %vm2612_vm7, %v14262_v52  ;;  %v3141_v38 = vmul.f32 0.6931472, %v11197_v21 }
 0x3b1   : > { %11212 = vlog2.f32 %v3109_v56  ;;  %v2986_v32 = vand.u32 2147483647, %v14255_v37  ;;  %v11201_v63 = vpop.eup %11200  ;;  %3892 = vmatprep.mubr.f32.mxu0 %v17786_v49  ;;  %v3107_v1 = vadd.f32 1.0, %v11199_v15  ;;  %v4872_v15 = vld [vmem:[%s17271_s16] sm:$0xff] }
 0x3b2   : > { %11214 = vpow2.f32 %v3058_v5  ;;  %v3019_v50 = vsub.f32 0.0, %v2987_v11  ;;  %v11203_v48 = vpop.eup %11202 }
 0x3b3   : > { %11216 = vpow2.f32 %v3066_v45  ;;  %v3018_v30 = vsub.f32 0.0, %v2986_v32  ;;  %v10352_v16 = vpop.f32.mrb[54].mxu0  ;;  %v14265_v12 = vpop.f32.mrb[54].mxu1  ;;  %v14278_v32 = vadd.f32 %v3139_v7, %v2940_v54 }
 0x3b4   : > { %17793 = vst [vmem:[#allocation121_spill] sm:$0xff] %v14265_v12  ;;  %11218 = vlog2.f32 %v3104_v19  ;;  %v3072_v56 = vmul.f32 1.442695, %v3019_v50  ;;  %v14270_v59 = vadd.f32 %v10352_v16, %v14063_v18  ;;  %v2885_v61 = vpop.f32.mrb[55].mxu0  ;;  %v14272_v58 = vpop.f32.mrb[55].mxu1  ;;  %v2941_v19 = vmax.f32 %v14102_v60, 0.0 }
 0x3b5   : > { %17794 = vst [vmem:[#allocation131_spill] sm:$0xff] %v14272_v58  ;;  %v11205_v45 = vpop.eup %11204  ;;  %11220 = vlog2.f32 %v3105_v24  ;;  %v3070_v5 = vmul.f32 1.442695, %v3018_v30  ;;  %v14276_v11 = vadd.f32 %v14063_v18, %v2885_v61  ;;  %9628 = vmatmul.mubr.msk.f32.gmra.mrb[108].mxu0 %vm2612_vm7, %v14278_v32  ;;  %v3106_v24 = vadd.f32 1.0, %v11201_v63 }
 0x3b6   : > { %v11207_v12 = vpop.eup %11206  ;;  %v3111_v50 = vadd.f32 1.0, %v11205_v45  ;;  %11222 = vpow2.f32 %v3072_v56  ;;  %v2989_v16 = vand.u32 2147483647, %v14270_v59  ;;  %3898 = vmatprep.mubr.f32.mxu0 %v17786_v49  ;;  %v14288_v60 = vadd.f32 %v3141_v38, %v2941_v19 }
 0x3b7   : > { %v3110_v58 = vadd.f32 1.0, %v11207_v12  ;;  %11224 = vpow2.f32 %v3070_v5  ;;  %v2988_v21 = vand.u32 2147483647, %v14276_v11  ;;  %v4876_v12 = vld [vmem:[%s17271_s16 + $0x20] sm:$0xff]  ;;  %v11209_v56 = vpop.eup %11208  ;;  %v2942_v19 = vmax.f32 %v14116_v14, 0.0 }
 0x3b8   : > { %11226 = vlog2.f32 %v3111_v50  ;;  %v3021_v30 = vsub.f32 0.0, %v2989_v16  ;;  %v10355_v7 = vpop.f32.mrb[56].mxu0  ;;  %v14285_v54 = vpop.f32.mrb[56].mxu1  ;;  %v3143_v50 = vmul.f32 0.6931472, %v11203_v48 }
 0x3b9   : > { %17795 = vst [vmem:[#allocation130_spill] sm:$0xff] %v14285_v54  ;;  %11228 = vlog2.f32 %v3110_v58  ;;  %v3020_v63 = vsub.f32 0.0, %v2988_v21  ;;  %v14297_v61 = vadd.f32 %v10355_v7, %v14063_v18  ;;  %v2895_v45 = vpop.f32.mrb[57].mxu0  ;;  %v14299_v5 = vpop.f32.mrb[57].mxu1  ;;  %9629 = vmatmul.mubr.msk.f32.gmra.mrb[110].mxu0 %vm2612_vm7, %v14288_v60  ;;  %v10583_v58 = vpack.c.bf16 %v4876_v12, %v4872_v15 }
 0x3ba   : > { %17796 = vst [vmem:[#allocation118_spill] sm:$0xff] %v14299_v5  ;;  %v11211_v38 = vpop.eup %11210  ;;  %v14303_v16 = vadd.f32 %v14063_v18, %v2895_v45  ;;  %v3076_v42 = vmul.f32 1.442695, %v3021_v30  ;;  %11230 = vlog2.f32 %v3106_v24  ;;  %3904 = vmatprep.mubr.f32.mxu0 %v17786_v49  ;;  %v14311_v9 = vadd.f32 %v3143_v50, %v2942_v19 }
 0x3bb   : > { %v11213_v54 = vpop.eup %11212  ;;  %v3074_v53 = vmul.f32 1.442695, %v3020_v63  ;;  %v2991_v48 = vand.u32 2147483647, %v14297_v61  ;;  %11232 = vlog2.f32 %v3107_v1  ;;  %v3113_v45 = vadd.f32 1.0, %v11211_v38 }
 0x3bc   : > { %v11215_v21 = vpop.eup %11214  ;;  %v3157_v7 = vmul.f32 0.6931472, %v11213_v54  ;;  %v2990_v5 = vand.u32 2147483647, %v14303_v16  ;;  %v3145_v55 = vmul.f32 0.6931472, %v11209_v56 }
 0x3bd   : > { %v11217_v14 = vpop.eup %11216  ;;  %11234 = vpow2.f32 %v3074_v53  ;;  %v2943_v54 = vmax.f32 %v14122_v44, 0.0  ;;  %v3108_v12 = vadd.f32 1.0, %v11215_v21  ;;  %9630 = vmatmul.mubr.msk.f32.gmra.mrb[112].mxu0 %vm2612_vm7, %v14311_v9  ;;  %v3023_v1 = vsub.f32 0.0, %v2991_v48 }
 0x3be   : > { %v11219_v30 = vpop.eup %11218  ;;  %v14313_v63 = vadd.f32 %v3157_v7, %v2949_v3  ;;  %v3112_v46 = vadd.f32 1.0, %v11217_v14  ;;  %v3022_v15 = vsub.f32 0.0, %v2990_v5  ;;  %11236 = vpow2.f32 %v3076_v42  ;;  %3910 = vmatprep.mubr.f32.mxu0 %v17786_v49 }
 0x3bf   : > { %v11221_v24 = vpop.eup %11220  ;;  %v14324_v42 = vadd.f32 %v3145_v55, %v2943_v54  ;;  %v3147_v44 = vmul.f32 0.6931472, %v11219_v30  ;;  %v2944_v38 = vmax.f32 %v14139_v4, 0.0 }
 0x3c0   : > { %v11223_v22 = vpop.eup %11222  ;;  %11238 = vlog2.f32 %v3112_v46  ;;  %v3078_v50 = vmul.f32 1.442695, %v3022_v15  ;;  %9637 = vmatmul.mubr.msk.f32.vlgmr.msra.gmra.mrb[64].mxu1 %vm2612_vm7, %v14313_v63  ;;  %v2945_v46 = vmax.f32 %v14135_v10, 0.0  ;;  %v3149_v4 = vmul.f32 0.6931472, %v11221_v24 }
 0x3c1   : > { %v11225_v3 = vpop.eup %11224  ;;  %11240 = vlog2.f32 %v3113_v45  ;;  %3952 = vmatprep.mubr.f32.mxu1 %v17786_v49  ;;  %10584 = vmatpush1.bf16.msra.mxu1 %v10583_v58  ;;  %v2950_v45 = vmax.f32 %v14212_v47, 0.0  ;;  %v3080_v10 = vmul.f32 1.442695, %v3023_v1  ;;  %v3115_v15 = vadd.f32 1.0, %v11223_v22 }
 0x3c2   : > { %v10358_v53 = vpop.f32.mrb[58].mxu0  ;;  %v14321_v56 = vpop.f32.mrb[58].mxu1  ;;  %v3114_v19 = vadd.f32 1.0, %v11225_v3  ;;  %10586 = vmatprep.subr.bf16.mxu1 %v14012_v40  ;;  %11242 = vlog2.f32 %v3108_v12  ;;  %9631 = vmatmul.mubr.msk.f32.gmra.mrb[114].mxu0 %vm2612_vm7, %v14324_v42  ;;  %v14343_v54 = vadd.f32 %v3147_v44, %v2944_v38  ;;  %v14355_v44 = vadd.f32 %v3149_v4, %v2945_v46 }
 0x3c3   : > { %17797 = vst [vmem:[#allocation128_spill] sm:$0xff] %v14321_v56  ;;  %v11227_v5 = vpop.eup %11226  ;;  %v14329_v21 = vadd.f32 %v10358_v53, %v14063_v18  ;;  %v2905_v7 = vpop.f32.mrb[59].mxu0  ;;  %11244 = vpow2.f32 %v3078_v50  ;;  %3916 = vmatprep.mubr.f32.mxu0 %v17786_v49  ;;  %v2951_v53 = vmax.f32 %v14205_v34, 0.0 }
 0x3c4   : > { %v14331_v48 = vpop.f32.mrb[59].mxu1  ;;  %v11229_v14 = vpop.eup %11228  ;;  %v14336_v58 = vadd.f32 %v14063_v18, %v2905_v7  ;;  %11246 = vlog2.f32 %v3114_v19  ;;  %v3161_v1 = vmul.f32 0.6931472, %v11227_v5 }
 0x3c5   : > { %17798 = vst [vmem:[#allocation132_spill] sm:$0xff] %v14331_v48  ;;  %v2993_v55 = vand.u32 2147483647, %v14329_v21  ;;  %v3159_v30 = vmul.f32 0.6931472, %v11229_v14  ;;  %10588 = vmatpush1.bf16.msra.mxu1 %v14017_v28  ;;  %v11231_v47 = vpop.eup %11230  ;;  %11248 = vpow2.f32 %v3080_v10 }
 0x3c6   : > { %v2992_v40 = vand.u32 2147483647, %v14336_v58  ;;  %v10361_v12 = vpop.f32.mrb[60].mxu0  ;;  %v14346_v3 = vpop.f32.mrb[60].mxu1  ;;  %9632 = vmatmul.mubr.msk.f32.gmra.mrb[116].mxu0 %vm2612_vm7, %v14343_v54  ;;  %11250 = vlog2.f32 %v3115_v15  ;;  %v3151_v46 = vmul.f32 0.6931472, %v11231_v47 }
 0x3c7   : > { %17799 = vst [vmem:[#allocation133_spill] sm:$0xff] %v14346_v3  ;;  %v14348_v24 = vadd.f32 %v3159_v30, %v2950_v45  ;;  %v11233_v50 = vpop.eup %11232  ;;  %v2915_v14 = vpop.f32.mrb[61].mxu0  ;;  %v3025_v38 = vsub.f32 0.0, %v2993_v55  ;;  %v14358_v19 = vadd.f32 %v10361_v12, %v14063_v18  ;;  %3922 = vmatprep.mubr.f32.mxu0 %v17786_v49  ;;  %v14368_v55 = vadd.f32 %v3161_v1, %v2951_v53 }
 0x3c8   : > { %v3024_v7 = vsub.f32 0.0, %v2992_v40  ;;  %v14351_v22 = vpop.f32.mrb[61].mxu1  ;;  %v11235_v28 = vpop.eup %11234  ;;  %v14361_v5 = vadd.f32 %v14063_v18, %v2915_v14  ;;  %v2946_v12 = vmax.f32 %v14151_v57, 0.0  ;;  %v2952_v14 = vmax.f32 %v14234_v2, 0.0 }
 0x3c9   : > { %17800 = vst [vmem:[#allocation134_spill] sm:$0xff] %v14351_v22  ;;  %9638 = vmatmul.mubr.msk.f32.gmra.mrb[66].mxu1 %vm2612_vm7, %v14348_v24  ;;  %v11237_v34 = vpop.eup %11236  ;;  %v3116_v45 = vadd.f32 1.0, %v11235_v28  ;;  %v3153_v15 = vmul.f32 0.6931472, %v11233_v50  ;;  %v3084_v28 = vmul.f32 1.442695, %v3025_v38 }
 0x3ca   : > { %v3082_v30 = vmul.f32 1.442695, %v3024_v7  ;;  %3958 = vmatprep.mubr.f32.mxu1 %v17786_v49  ;;  %v11239_v4 = vpop.eup %11238  ;;  %v2994_v10 = vand.u32 2147483647, %v14361_v5  ;;  %9633 = vmatmul.mubr.msk.f32.gmra.mrb[118].mxu0 %vm2612_vm7, %v14355_v44  ;;  %v2995_v7 = vand.u32 2147483647, %v14358_v19  ;;  %v14382_v50 = vadd.f32 %v3151_v46, %v2946_v12 }
 0x3cb   : > { %v11241_v40 = vpop.eup %11240  ;;  %v3163_v3 = vmul.f32 0.6931472, %v11239_v4  ;;  %3928 = vmatprep.mubr.f32.mxu0 %v17786_v49  ;;  %v2947_v57 = vmax.f32 %v14148_v36, 0.0  ;;  %v3117_v53 = vadd.f32 1.0, %v11237_v34 }
 0x3cc   : > { %11252 = vpow2.f32 %v3082_v30  ;;  %v3026_v47 = vsub.f32 0.0, %v2994_v10  ;;  %v11243_v1 = vpop.eup %11242  ;;  %v3165_v56 = vmul.f32 0.6931472, %v11241_v40 }
 0x3cd   : > { %9639 = vmatmul.mubr.msk.f32.gmra.mrb[68].mxu1 %vm2612_vm7, %v14368_v55  ;;  %11254 = vlog2.f32 %v3116_v45  ;;  %v11245_v38 = vpop.eup %11244  ;;  %v14386_v22 = vadd.f32 %v3163_v3, %v2952_v14  ;;  %v14394_v34 = vadd.f32 %v3153_v15, %v2947_v57  ;;  %v3027_v45 = vsub.f32 0.0, %v2995_v7 }
 0x3ce   : > { %v10364_v2 = vpop.f32.mrb[62].mxu0  ;;  %v14379_v4 = vpop.f32.mrb[62].mxu1  ;;  %3964 = vmatprep.mubr.f32.mxu1 %v17786_v49  ;;  %9634 = vmatmul.mubr.msk.f32.gmra.mrb[120].mxu0 %vm2612_vm7, %v14382_v50  ;;  %11256 = vpow2.f32 %v3084_v28  ;;  %v3086_v46 = vmul.f32 1.442695, %v3026_v47  ;;  %v3118_v8 = vadd.f32 1.0, %v11245_v38  ;;  %v14408_v7 = vadd.f32 %v3165_v56, %v2953_v17 }
 0x3cf   : > { %v2925_v30 = vpop.f32.mrb[63].mxu0  ;;  %v14384_v10 = vpop.f32.mrb[63].mxu1  ;;  %v14397_v12 = vadd.f32 %v10364_v2, %v14063_v18  ;;  %3934 = vmatprep.mubr.f32.mxu0 %v17786_v49  ;;  %11258 = vlog2.f32 %v3117_v53  ;;  %v3155_v14 = vmul.f32 0.6931472, %v11243_v1  ;;  %v2948_v57 = vmax.f32 %v14199_v13, 0.0 }
 0x3d0   : > { %v11247_v48 = vpop.eup %11246  ;;  %v14390_v36 = vadd.f32 %v14063_v18, %v2925_v30  ;;  %v2954_v2 = vmax.f32 %v14255_v37, 0.0  ;;  %v3088_v53 = vmul.f32 1.442695, %v3027_v45  ;;  %11260 = vpow2.f32 %v3086_v46 }
 0x3d1   : > { %9640 = vmatmul.mubr.msk.f32.gmra.mrb[70].mxu1 %vm2612_vm7, %v14386_v22  ;;  %v11249_v15 = vpop.eup %11248  ;;  %v3167_v18 = vmul.f32 0.6931472, %v11247_v48  ;;  %v2997_v38 = vand.u32 2147483647, %v14397_v12  ;;  %11262 = vlog2.f32 %v3118_v8  ;;  %v14421_v13 = vadd.f32 %v3155_v14, %v2948_v57 }
 0x3d2   : > { %v2996_v3 = vand.u32 2147483647, %v14390_v36  ;;  %v14403_v40 = vpop.f32.mrb[64].mxu0  ;;  %3970 = vmatprep.mubr.f32.mxu1 %v17786_v49  ;;  %v11251_v47 = vpop.eup %11250  ;;  %9635 = vmatmul.mubr.msk.f32.gmra.mrb[122].mxu0 %vm2612_vm7, %v14394_v34  ;;  %v3119_v17 = vadd.f32 1.0, %v11249_v15  ;;  %11264 = vpow2.f32 %v3088_v53 }
 0x3d3   : > { %v14406_v28 = vpop.f32.mrb[65].mxu0  ;;  %3940 = vmatprep.mubr.f32.mxu0 %v17786_v49  ;;  %v14425_v1 = vadd.f32 %v3167_v18, %v2954_v2  ;;  %v3169_v45 = vmul.f32 0.6931472, %v11251_v47  ;;  %v3029_v8 = vsub.f32 0.0, %v2997_v38  ;;  %v2956_v38 = vmax.f32 %v14276_v11, 0.0 }
 0x3d4   : > { %v3028_v30 = vsub.f32 0.0, %v2996_v3  ;;  %v2955_v3 = vmax.f32 %v14250_v31, 0.0  ;;  %11266 = vlog2.f32 %v3119_v17 }
 0x3d5   : > { %9641 = vmatmul.mubr.msk.f32.gmra.mrb[72].mxu1 %vm2612_vm7, %v14408_v7 }
 0x3d6   : > { %v14418_v56 = vpop.f32.mrb[66].mxu0  ;;  %3976 = vmatprep.mubr.f32.mxu1 %v17786_v49  ;;  %v11253_v37 = vpop.eup %11252  ;;  %9636 = vmatmul.mubr.msk.f32.gmra.mrb[124].mxu0 %vm2612_vm7, %v14421_v13  ;;  %v3090_v15 = vmul.f32 1.442695, %v3028_v30  ;;  %v14438_v2 = vadd.f32 %v3169_v45, %v2955_v3  ;;  %v3092_v30 = vmul.f32 1.442695, %v3029_v8 }
 0x3d7   : > { %v14423_v48 = vpop.f32.mrb[67].mxu0  ;;  %v11255_v46 = vpop.eup %11254  ;;  %4113 = vmatprep.mubr.f32.mxu0 %v17786_v49  ;;  %v3120_v14 = vadd.f32 1.0, %v11253_v37 }
 0x3d8   : > { %v11257_v18 = vpop.eup %11256  ;;  %v3171_v31 = vmul.f32 0.6931472, %v11255_v46  ;;  %11268 = vpow2.f32 %v3090_v15 }
 0x3d9   : > { %9642 = vmatmul.mubr.msk.f32.gmra.mrb[74].mxu1 %vm2612_vm7, %v14425_v1  ;;  %v11259_v53 = vpop.eup %11258  ;;  %v3121_v17 = vadd.f32 1.0, %v11257_v18  ;;  %11270 = vlog2.f32 %v3120_v14  ;;  %v5501_v18 = vld [vmem:[%s17272_s17 + $0x18] sm:$0xff] }
 0x3da   : > { %v14433_v57 = vpop.f32.mrb[68].mxu0  ;;  %3982 = vmatprep.mubr.f32.mxu1 %v17786_v49  ;;  %9654 = vmatmul.mubr.msk.f32.vlgmr.msra.gmra.mrb[126].mxu0 %vm2612_vm7, %v14177_v23  ;;  %v11261_v45 = vpop.eup %11260  ;;  %v14452_v3 = vadd.f32 %v3171_v31, %v2956_v38  ;;  %v3173_v11 = vmul.f32 0.6931472, %v11259_v53  ;;  %11272 = vpow2.f32 %v3092_v30 }
 0x3db   : > { %v14436_v47 = vpop.f32.mrb[69].mxu0  ;;  %10592 = vmatpush1.bf16.msra.mxu0 %v14169_v33  ;;  %4119 = vmatprep.mubr.f32.mxu0 %v17786_v49  ;;  %v11263_v8 = vpop.eup %11262  ;;  %v2957_v33 = vmax.f32 %v14270_v59, 0.0  ;;  %11274 = vlog2.f32 %v3121_v17  ;;  %v3122_v15 = vadd.f32 1.0, %v11261_v45  ;;  %v5503_v59 = vld [vmem:[%s17272_s17 + $0x28] sm:$0xff] }
 0x3dc   : > { %10594 = vmatprep.subr.bf16.mxu0 %v14179_v41  ;;  %v5499_v41 = vld [vmem:[%s17272_s17 + $0x8] sm:$0xff]  ;;  %v11265_v31 = vpop.eup %11264  ;;  %v3175_v30 = vmul.f32 0.6931472, %v11263_v8 }
 0x3dd   : > { %9643 = vmatmul.mubr.msk.f32.gmra.mrb[76].mxu1 %vm2612_vm7, %v14438_v2  ;;  %v14476_v38 = vadd.f32 %v3173_v11, %v2957_v33  ;;  %v10597_v17 = vpack.c.bf16 %v5503_v59, %v5499_v41  ;;  %v3123_v11 = vadd.f32 1.0, %v11265_v31  ;;  %11276 = vlog2.f32 %v3122_v15 }
 0x3de   : > { %v14446_v37 = vpop.f32.mrb[70].mxu0  ;;  %3988 = vmatprep.mubr.f32.mxu1 %v17786_v49  ;;  %9655 = vmatmul.mubr.msk.f32.gmra.mrb[128].mxu0 %vm2612_vm7, %v14195_v43  ;;  %v11267_v45 = vpop.eup %11266 }
 0x3df   : > { %17801 = vst [vmem:[#allocation135_spill] sm:$0xff] %v14446_v37  ;;  %v14450_v46 = vpop.f32.mrb[71].mxu0  ;;  %4125 = vmatprep.mubr.f32.mxu0 %v17786_v49  ;;  %10596 = vmatpush1.bf16.msra.mxu0 %v14193_v39  ;;  %v5505_v39 = vld [vmem:[%s17272_s17 + $0x38] sm:$0xff]  ;;  %v2958_v37 = vmax.f32 %v14303_v16, 0.0  ;;  %11278 = vlog2.f32 %v3123_v11 }
 0x3e0   : > { %10598 = vmatprep.subr.bf16.mxu1 %v10597_v17 }
 0x3e1   : > { %9644 = vmatmul.mubr.msk.f32.gmra.mrb[78].mxu1 %vm2612_vm7, %v14452_v3  ;;  %v14492_v59 = vadd.f32 %v3175_v30, %v2958_v37 }
 0x3e2   : > { %v14461_v14 = vpop.f32.mrb[72].mxu0  ;;  %3994 = vmatprep.mubr.f32.mxu1 %v17786_v49  ;;  %9656 = vmatmul.mubr.msk.f32.gmra.mrb[130].mxu0 %vm2612_vm7, %v14217_v27  ;;  %v11269_v33 = vpop.eup %11268 }
 0x3e3   : > { %17802 = vst [vmem:[#allocation136_spill] sm:$0xff] %v14461_v14  ;;  %v14474_v53 = vpop.f32.mrb[73].mxu0  ;;  %v10613_v14 = vpack.c.bf16 %v5505_v39, %v5501_v18  ;;  %4131 = vmatprep.mubr.f32.mxu0 %v17786_v49  ;;  %v3177_v18 = vmul.f32 0.6931472, %v11267_v45  ;;  %v11271_v16 = vpop.eup %11270  ;;  %v2959_v39 = vmax.f32 %v14297_v61, 0.0  ;;  %v3124_v15 = vadd.f32 1.0, %v11269_v33 }
 0x3e4   : > { %v11273_v37 = vpop.eup %11272  ;;  %v3179_v17 = vmul.f32 0.6931472, %v11271_v16  ;;  %v2960_v61 = vmax.f32 %v14336_v58, 0.0  ;;  %v2961_v58 = vmax.f32 %v14329_v21, 0.0  ;;  %v2962_v21 = vmax.f32 %v14361_v5, 0.0 }
 0x3e5   : > { %9645 = vmatmul.mubr.msk.f32.gmra.mrb[80].mxu1 %vm2612_vm7, %v14476_v38  ;;  %10614 = vmatprep.subr.bf16.mxu0 %v10613_v14  ;;  %v14505_v14 = vadd.f32 %v3177_v18, %v2959_v39  ;;  %v11275_v45 = vpop.eup %11274  ;;  %v3125_v11 = vadd.f32 1.0, %v11273_v37  ;;  %11280 = vlog2.f32 %v3124_v15  ;;  %v2963_v5 = vmax.f32 %v14358_v19, 0.0 }
 0x3e6   : > { %v14487_v8 = vpop.f32.mrb[74].mxu0  ;;  %4000 = vmatprep.mubr.f32.mxu1 %v17786_v49  ;;  %9657 = vmatmul.mubr.msk.f32.gmra.mrb[132].mxu0 %vm2612_vm7, %v14236_v0  ;;  %v14518_v16 = vadd.f32 %v3179_v17, %v2960_v61  ;;  %v3181_v39 = vmul.f32 0.6931472, %v11275_v45  ;;  %v2964_v19 = vmax.f32 %v14390_v36, 0.0 }
 0x3e7   : > { %v14490_v41 = vpop.f32.mrb[75].mxu0  ;;  %4137 = vmatprep.mubr.f32.mxu0 %v17786_v49  ;;  %11282 = vlog2.f32 %v3125_v11 }
 0x3e8   : > { %v14531_v17 = vadd.f32 %v3181_v39, %v2961_v58 }
 0x3e9   : > { %9646 = vmatmul.mubr.msk.f32.gmra.mrb[82].mxu1 %vm2612_vm7, %v14492_v59 }
 0x3ea   : > { %v14500_v31 = vpop.f32.mrb[76].mxu0  ;;  %4006 = vmatprep.mubr.f32.mxu1 %v17786_v49  ;;  %9658 = vmatmul.mubr.msk.f32.gmra.mrb[134].mxu0 %vm2612_vm7, %v14247_v25 }
 0x3eb   : > { %17803 = vst [vmem:[#allocation137_spill] sm:$0xff] %v14500_v31  ;;  %v14503_v30 = vpop.f32.mrb[77].mxu0  ;;  %4143 = vmatprep.mubr.f32.mxu0 %v17786_v49  ;;  %v11277_v31 = vpop.eup %11276 }
 0x3ec   : > { %v3183_v45 = vmul.f32 0.6931472, %v11277_v31  ;;  %v11279_v61 = vpop.eup %11278 }
 0x3ed   : > { %9647 = vmatmul.mubr.msk.f32.gmra.mrb[84].mxu1 %vm2612_vm7, %v14505_v14  ;;  %v3185_v31 = vmul.f32 0.6931472, %v11279_v61 }
 0x3ee   : > { %v14513_v33 = vpop.f32.mrb[78].mxu0  ;;  %4012 = vmatprep.mubr.f32.mxu1 %v17786_v49  ;;  %9659 = vmatmul.mubr.msk.f32.gmra.mrb[136].mxu0 %vm2612_vm7, %v14262_v52  ;;  %v14544_v39 = vadd.f32 %v3183_v45, %v2962_v21 }
 0x3ef   : > { %17804 = vst [vmem:[#allocation138_spill] sm:$0xff] %v14513_v33  ;;  %v14516_v18 = vpop.f32.mrb[79].mxu0  ;;  %4149 = vmatprep.mubr.f32.mxu0 %v17786_v49  ;;  %v11281_v58 = vpop.eup %11280  ;;  %v14557_v45 = vadd.f32 %v3185_v31, %v2963_v5  ;;  %v2965_v5 = vmax.f32 %v14397_v12, 0.0  ;;  %v5502_v12 = vld [vmem:[%s17272_s17 + $0x20] sm:$0xff] }
 0x3f0   : > { %17805 = vst [vmem:[#allocation139_spill] sm:$0xff] %v14516_v18  ;;  %v3187_v61 = vmul.f32 0.6931472, %v11281_v58  ;;  %v5506_v33 = vld [vmem:[%s17272_s17 + $0x40] sm:$0xff] }
 0x3f1   : > { %9648 = vmatmul.mubr.msk.f32.gmra.mrb[86].mxu1 %vm2612_vm7, %v14518_v16  ;;  %v11283_v21 = vpop.eup %11282  ;;  %v5510_v18 = vld [vmem:[%s17272_s17 + $0x60] sm:$0xff] }
 0x3f2   : > { %v14526_v15 = vpop.f32.mrb[80].mxu0  ;;  %4018 = vmatprep.mubr.f32.mxu1 %v17786_v49  ;;  %9660 = vmatmul.mubr.msk.f32.gmra.mrb[138].mxu0 %vm2612_vm7, %v14278_v32  ;;  %v14570_v31 = vadd.f32 %v3187_v61, %v2964_v19  ;;  %v3189_v58 = vmul.f32 0.6931472, %v11283_v21  ;;  %v5498_v61 = vld [vmem:[%s17272_s17] sm:$0xff]  ;;  %v5507_v21 = vld [vmem:[%s17272_s17 + $0x48] sm:$0xff] }
 0x3f3   : > { %17806 = vst [vmem:[#allocation140_spill] sm:$0xff] %v14526_v15  ;;  %v14529_v37 = vpop.f32.mrb[81].mxu0  ;;  %4155 = vmatprep.mubr.f32.mxu0 %v17786_v49  ;;  %v5511_v19 = vld [vmem:[%s17272_s17 + $0x68] sm:$0xff] }
 0x3f4   : > { %17807 = vst [vmem:[#allocation141_spill] sm:$0xff] %v14529_v37 }
 0x3f5   : > { %9649 = vmatmul.mubr.msk.f32.gmra.mrb[88].mxu1 %vm2612_vm7, %v14531_v17 }
 0x3f6   : > { %v14539_v11 = vpop.f32.mrb[82].mxu0  ;;  %4024 = vmatprep.mubr.f32.mxu1 %v17786_v49  ;;  %9661 = vmatmul.mubr.msk.f32.gmra.mrb[140].mxu0 %vm2612_vm7, %v14288_v60 }
 0x3f7   : > { %17808 = vst [vmem:[#allocation142_spill] sm:$0xff] %v14539_v11  ;;  %v14542_v15 = vpop.f32.mrb[83].mxu0  ;;  %4161 = vmatprep.mubr.f32.mxu0 %v17786_v49 }
 0x3f8   : > { %17809 = vst [vmem:[#allocation143_spill] sm:$0xff] %v14542_v15 }
 0x3f9   : > { %9650 = vmatmul.mubr.msk.f32.gmra.mrb[90].mxu1 %vm2612_vm7, %v14544_v39 }
 0x3fa   : > { %v14552_v37 = vpop.f32.mrb[84].mxu0  ;;  %4030 = vmatprep.mubr.f32.mxu1 %v17786_v49  ;;  %9662 = vmatmul.mubr.msk.f32.gmra.mrb[142].mxu0 %vm2612_vm7, %v14311_v9 }
 0x3fb   : > { %17810 = vst [vmem:[#allocation144_spill] sm:$0xff] %v14552_v37  ;;  %v14555_v11 = vpop.f32.mrb[85].mxu0  ;;  %4167 = vmatprep.mubr.f32.mxu0 %v17786_v49 }
 0x3fc   : > { %17811 = vst [vmem:[#allocation145_spill] sm:$0xff] %v14555_v11  ;;  %v10601_v11 = vpack.c.bf16 %v5511_v19, %v5507_v21  ;;  %v10603_v21 = vpack.c.bf16 %v5510_v18, %v5506_v33  ;;  %v5523_v33 = vld [vmem:[%s17272_s17 + $0xc8] sm:$0xff] }
 0x3fd   : > { %9651 = vmatmul.mubr.msk.f32.gmra.mrb[92].mxu1 %vm2612_vm7, %v14557_v45 }
 0x3fe   : > { %v14565_v15 = vpop.f32.mrb[86].mxu0  ;;  %4036 = vmatprep.mubr.f32.mxu1 %v17786_v49  ;;  %9663 = vmatmul.mubr.msk.f32.gmra.mrb[144].mxu0 %vm2612_vm7, %v14324_v42 }
 0x3ff   : > { %17812 = vst [vmem:[#allocation146_spill] sm:$0xff] %v14565_v15  ;;  %v14568_v37 = vpop.f32.mrb[87].mxu0  ;;  %4173 = vmatprep.mubr.f32.mxu0 %v17786_v49 }
 0x400   : > { %17813 = vst [vmem:[#allocation147_spill] sm:$0xff] %v14568_v37  ;;  %v14583_v37 = vadd.f32 %v3189_v58, %v2965_v5  ;;  %v10599_v5 = vpack.c.bf16 %v5502_v12, %v5498_v61  ;;  %v5515_v61 = vld [vmem:[%s17272_s17 + $0x88] sm:$0xff] }
 0x401   : > { %9652 = vmatmul.mubr.msk.f32.gmra.mrb[94].mxu1 %vm2612_vm7, %v14570_v31 }
 0x402   : > { %v14578_v36 = vpop.f32.mrb[88].mxu0  ;;  %4042 = vmatprep.mubr.f32.mxu1 %v17786_v49  ;;  %9664 = vmatmul.mubr.msk.f32.gmra.mrb[146].mxu0 %vm2612_vm7, %v14343_v54 }
 0x403   : > { %17814 = vst [vmem:[#allocation148_spill] sm:$0xff] %v14578_v36  ;;  %v14581_v15 = vpop.f32.mrb[89].mxu0  ;;  %4179 = vmatprep.mubr.f32.mxu0 %v17786_v49  ;;  %v14607_v36 = vmul.f32 %v14177_v23, %v13480_v29  ;;  %v5519_v23 = vld [vmem:[%s17272_s17 + $0xa8] sm:$0xff]  ;;  %v14635_v29 = vmul.f32 %v14195_v43, %v13431_v62  ;;  %v5522_v62 = vld [vmem:[%s17272_s17 + $0xc0] sm:$0xff] }
 0x404   : > { %17815 = vst [vmem:[#allocation149_spill] sm:$0xff] %v14581_v15  ;;  %v5527_v43 = vld [vmem:[%s17272_s17 + $0xe8] sm:$0xff] }
 0x405   : > { %9653 = vmatmul.mubr.msk.f32.gmra.mrb[96].mxu1 %vm2612_vm7, %v14583_v37 }
 0x406   : > { %v14602_v58 = vpop.f32.mrb[90].mxu0  ;;  %5048 = vmatprep.mubr.f32.mxu1 %v17786_v49  ;;  %9665 = vmatmul.mubr.msk.f32.gmra.mrb[148].mxu0 %vm2612_vm7, %v14355_v44 }
 0x407   : > { %17816 = vst [vmem:[#allocation150_spill] sm:$0xff] %v14602_v58  ;;  %v14609_v15 = vpop.f32.mrb[91].mxu0  ;;  %4185 = vmatprep.mubr.f32.mxu0 %v17786_v49  ;;  %v10605_v58 = vpack.c.bf16 %v5519_v23, %v5515_v61  ;;  %v14661_v61 = vmul.f32 %v14217_v27, %v13437_v20  ;;  %v10609_v23 = vpack.c.bf16 %v5527_v43, %v5523_v33 }
 0x408   : > { %17817 = vst [vmem:[#allocation151_spill] sm:$0xff] %v14609_v15  ;;  %v5514_v15 = vld [vmem:[%s17272_s17 + $0x80] sm:$0xff] }
 0x409   : > { %9686 = vmatmul.mubr.msk.f32.vlgmr.msra.gmra.mrb[98].mxu1 %vm2612_vm7, %v14607_v36 }
 0x40a   : > { %v14628_v12 = vpop.f32.mrb[92].mxu0  ;;  %5054 = vmatprep.mubr.f32.mxu1 %v17786_v49  ;;  %10600 = vmatpush1.bf16.msra.mxu1 %v10599_v5 }
 0x40b   : > { %17818 = vst [vmem:[#allocation152_spill] sm:$0xff] %v14628_v12  ;;  %v14631_v19 = vpop.f32.mrb[93].mxu0  ;;  %10602 = vmatprep.subr.bf16.mxu1 %v10601_v11  ;;  %v5518_v12 = vld [vmem:[%s17272_s17 + $0xa0] sm:$0xff]  ;;  %9666 = vmatmul.mubr.msk.f32.gmra.mrb[150].mxu0 %vm2612_vm7, %v14382_v50 }
 0x40c   : > { %17819 = vst [vmem:[#allocation153_spill] sm:$0xff] %v14631_v19  ;;  %4191 = vmatprep.mubr.f32.mxu0 %v17786_v49  ;;  %v10607_v11 = vpack.c.bf16 %v5518_v12, %v5514_v15  ;;  %v14677_v15 = vmul.f32 %v14236_v0, %v13490_v26  ;;  %v14707_v0 = vmul.f32 %v14278_v32, %v13533_v35  ;;  %v17823_v32 = vld [vmem:[#allocation61_spill] sm:$0xff] }
 0x40d   : > { %9687 = vmatmul.mubr.msk.f32.gmra.mrb[100].mxu1 %vm2612_vm7, %v14635_v29  ;;  %v14727_v12 = vmul.f32 %v14311_v9, %v17823_v32  ;;  %v17825_v9 = vld [vmem:[#allocation60_spill] sm:$0xff] }
 0x40e   : > { %v14654_v18 = vpop.f32.mrb[94].mxu0  ;;  %5060 = vmatprep.mubr.f32.mxu1 %v17786_v49  ;;  %10604 = vmatpush1.bf16.msra.mxu1 %v10603_v21  ;;  %v14747_v33 = vmul.f32 %v14343_v54, %v17825_v9  ;;  %v17827_v54 = vld [vmem:[#allocation72_spill] sm:$0xff] }
 0x40f   : > { %17820 = vst [vmem:[#allocation154_spill] sm:$0xff] %v14654_v18  ;;  %v14657_v5 = vpop.f32.mrb[95].mxu0  ;;  %10606 = vmatprep.subr.bf16.mxu1 %v10605_v58  ;;  %v5526_v18 = vld [vmem:[%s17272_s17 + $0xe0] sm:$0xff]  ;;  %9667 = vmatmul.mubr.msk.f32.gmra.mrb[152].mxu0 %vm2612_vm7, %v14394_v34  ;;  %v14687_v58 = vmul.f32 %v14247_v25, %v13502_v51  ;;  %v17822_v25 = vld [vmem:[#allocation73_spill] sm:$0xff] }
 0x410   : > { %17821 = vst [vmem:[#allocation155_spill] sm:$0xff] %v14657_v5  ;;  %4197 = vmatprep.mubr.f32.mxu0 %v17786_v49  ;;  %v10611_v27 = vpack.c.bf16 %v5526_v18, %v5522_v62  ;;  %v14697_v62 = vmul.f32 %v14262_v52, %v13527_v6  ;;  %v14717_v52 = vmul.f32 %v14288_v60, %v17822_v25  ;;  %v17824_v60 = vld [vmem:[#allocation77_spill] sm:$0xff] }
 0x411   : > { %9688 = vmatmul.mubr.msk.f32.gmra.mrb[102].mxu1 %vm2612_vm7, %v14661_v61  ;;  %v14737_v21 = vmul.f32 %v14324_v42, %v17824_v60  ;;  %v17826_v42 = vld [vmem:[#allocation74_spill] sm:$0xff]  ;;  %v14767_v18 = vmul.f32 %v14382_v50, %v17827_v54 }
 0x412   : > { %5066 = vmatprep.mubr.f32.mxu1 %v17786_v49  ;;  %10608 = vmatpush1.bf16.msra.mxu1 %v10607_v11  ;;  %v14757_v43 = vmul.f32 %v14355_v44, %v17826_v42  ;;  %v17828_v44 = vld [vmem:[#allocation58_spill] sm:$0xff]  ;;  %v5504_v42 = vld [vmem:[%s17272_s17 + $0x30] sm:$0xff] }
 0x413   : > { %10610 = vmatprep.subr.bf16.mxu1 %v10609_v23  ;;  %9668 = vmatmul.mubr.msk.f32.gmra.mrb[154].mxu0 %vm2612_vm7, %v14421_v13  ;;  %v14777_v11 = vmul.f32 %v14394_v34, %v17828_v44  ;;  %v17829_v50 = vld [vmem:[#allocation82_spill] sm:$0xff]  ;;  %v5509_v44 = vld [vmem:[%s17272_s17 + $0x58] sm:$0xff] }
 0x414   : > { %4203 = vmatprep.mubr.f32.mxu0 %v17786_v49  ;;  %v14787_v23 = vmul.f32 %v14421_v13, %v17829_v50  ;;  %v17830_v34 = vld [vmem:[#allocation70_spill] sm:$0xff]  ;;  %v17831_v13 = vld [vmem:[#allocation69_spill] sm:$0xff] }
 0x415   : > { %9689 = vmatmul.mubr.msk.f32.gmra.mrb[104].mxu1 %vm2612_vm7, %v14677_v15  ;;  %v14807_v25 = vmul.f32 %v14348_v24, %v17831_v13  ;;  %v5513_v50 = vld [vmem:[%s17272_s17 + $0x78] sm:$0xff] }
 0x416   : > { %5072 = vmatprep.mubr.f32.mxu1 %v17786_v49  ;;  %10612 = vmatpush1.bf16.msra.mxu1 %v10611_v27  ;;  %v14797_v27 = vmul.f32 %v14313_v63, %v17830_v34 }
 0x417   : > { %9669 = vmatmul.mubr.msk.f32.gmra.mrb[156].mxu0 %vm2612_vm7, %v14313_v63  ;;  %v17832_v63 = vld [vmem:[#allocation83_spill] sm:$0xff] }
 0x418   : > { %4209 = vmatprep.mubr.f32.mxu0 %v17786_v49  ;;  %v14817_v32 = vmul.f32 %v14368_v55, %v17832_v63  ;;  %v10617_v63 = vpack.c.bf16 %v5513_v50, %v5509_v44  ;;  %v5516_v50 = vld [vmem:[%s17272_s17 + $0x90] sm:$0xff] }
 0x419   : > { %9690 = vmatmul.mubr.msk.f32.gmra.mrb[106].mxu1 %vm2612_vm7, %v14687_v58 }
 0x41a   : > { %5078 = vmatprep.mubr.f32.mxu1 %v17786_v49 }
 0x41b   : > { %9670 = vmatmul.mubr.msk.f32.gmra.mrb[158].mxu0 %vm2612_vm7, %v14348_v24  ;;  %v17833_v24 = vld [vmem:[#allocation81_spill] sm:$0xff] }
 0x41c   : > { %4215 = vmatprep.mubr.f32.mxu0 %v17786_v49  ;;  %v14827_v60 = vmul.f32 %v14386_v22, %v17833_v24  ;;  %v5508_v24 = vld [vmem:[%s17272_s17 + $0x50] sm:$0xff] }
 0x41d   : > { %9691 = vmatmul.mubr.msk.f32.gmra.mrb[108].mxu1 %vm2612_vm7, %v14697_v62 }
 0x41e   : > { %5084 = vmatprep.mubr.f32.mxu1 %v17786_v49 }
 0x41f   : > { %9671 = vmatmul.mubr.msk.f32.gmra.mrb[160].mxu0 %vm2612_vm7, %v14368_v55  ;;  %v17834_v55 = vld [vmem:[#allocation66_spill] sm:$0xff] }
 0x420   : > { %4221 = vmatprep.mubr.f32.mxu0 %v17786_v49  ;;  %v14837_v9 = vmul.f32 %v14408_v7, %v17834_v55  ;;  %v5512_v55 = vld [vmem:[%s17272_s17 + $0x70] sm:$0xff] }
 0x421   : > { %9692 = vmatmul.mubr.msk.f32.gmra.mrb[110].mxu1 %vm2612_vm7, %v14707_v0 }
 0x422   : > { %5090 = vmatprep.mubr.f32.mxu1 %v17786_v49 }
 0x423   : > { %9672 = vmatmul.mubr.msk.f32.gmra.mrb[162].mxu0 %vm2612_vm7, %v14386_v22  ;;  %v5500_v22 = vld [vmem:[%s17272_s17 + $0x10] sm:$0xff] }
 0x424   : > { %4227 = vmatprep.mubr.f32.mxu0 %v17786_v49  ;;  %v10615_v34 = vpack.c.bf16 %v5504_v42, %v5500_v22  ;;  %v5517_v22 = vld [vmem:[%s17272_s17 + $0x98] sm:$0xff]  ;;  %v10619_v42 = vpack.c.bf16 %v5512_v55, %v5508_v24  ;;  %v17838_v24 = vld [vmem:[#allocation78_spill] sm:$0xff] }
 0x425   : > { %9693 = vmatmul.mubr.msk.f32.gmra.mrb[112].mxu1 %vm2612_vm7, %v14717_v52 }
 0x426   : > { %5096 = vmatprep.mubr.f32.mxu1 %v17786_v49 }
 0x427   : > { %9673 = vmatmul.mubr.msk.f32.gmra.mrb[164].mxu0 %vm2612_vm7, %v14408_v7  ;;  %v17835_v7 = vld [vmem:[#allocation90_spill] sm:$0xff] }
 0x428   : > { %4233 = vmatprep.mubr.f32.mxu0 %v17786_v49  ;;  %v14853_v54 = vmul.f32 %v14425_v1, %v17835_v7  ;;  %v17837_v7 = vld [vmem:[#allocation94_spill] sm:$0xff] }
 0x429   : > { %9694 = vmatmul.mubr.msk.f32.gmra.mrb[114].mxu1 %vm2612_vm7, %v14727_v12 }
 0x42a   : > { %5102 = vmatprep.mubr.f32.mxu1 %v17786_v49 }
 0x42b   : > { %9674 = vmatmul.mubr.msk.f32.gmra.mrb[166].mxu0 %vm2612_vm7, %v14425_v1  ;;  %v17836_v1 = vld [vmem:[#allocation79_spill] sm:$0xff] }
 0x42c   : > { %4239 = vmatprep.mubr.f32.mxu0 %v17786_v49  ;;  %v14869_v13 = vmul.f32 %v14438_v2, %v17836_v1  ;;  %v5520_v1 = vld [vmem:[%s17272_s17 + $0xb0] sm:$0xff] }
 0x42d   : > { %9695 = vmatmul.mubr.msk.f32.gmra.mrb[116].mxu1 %vm2612_vm7, %v14737_v21 }
 0x42e   : > { %5108 = vmatprep.mubr.f32.mxu1 %v17786_v49 }
 0x42f   : > { %9675 = vmatmul.mubr.msk.f32.gmra.mrb[168].mxu0 %vm2612_vm7, %v14438_v2  ;;  %v5521_v2 = vld [vmem:[%s17272_s17 + $0xb8] sm:$0xff] }
 0x430   : > { %4245 = vmatprep.mubr.f32.mxu0 %v17786_v49  ;;  %v10621_v44 = vpack.c.bf16 %v5521_v2, %v5517_v22  ;;  %v5524_v22 = vld [vmem:[%s17272_s17 + $0xd0] sm:$0xff] }
 0x431   : > { %9696 = vmatmul.mubr.msk.f32.gmra.mrb[118].mxu1 %vm2612_vm7, %v14747_v33  ;;  %v5528_v2 = vld [vmem:[%s17272_s17 + $0xf0] sm:$0xff] }
 0x432   : > { %5114 = vmatprep.mubr.f32.mxu1 %v17786_v49 }
 0x433   : > { %9676 = vmatmul.mubr.msk.f32.gmra.mrb[170].mxu0 %vm2612_vm7, %v14452_v3 }
 0x434   : > { %4251 = vmatprep.mubr.f32.mxu0 %v17786_v49 }
 0x435   : > { %9697 = vmatmul.mubr.msk.f32.gmra.mrb[120].mxu1 %vm2612_vm7, %v14757_v43 }
 0x436   : > { %5120 = vmatprep.mubr.f32.mxu1 %v17786_v49 }
 0x437   : > { %9677 = vmatmul.mubr.msk.f32.gmra.mrb[172].mxu0 %vm2612_vm7, %v14476_v38 }
 0x438   : > { %4257 = vmatprep.mubr.f32.mxu0 %v17786_v49 }
 0x439   : > { %9698 = vmatmul.mubr.msk.f32.gmra.mrb[122].mxu1 %vm2612_vm7, %v14767_v18 }
 0x43a   : > { %5126 = vmatprep.mubr.f32.mxu1 %v17786_v49 }
 0x43b   : > { %9678 = vmatmul.mubr.msk.f32.gmra.mrb[174].mxu0 %vm2612_vm7, %v14492_v59 }
 0x43c   : > { %4263 = vmatprep.mubr.f32.mxu0 %v17786_v49 }
 0x43d   : > { %9699 = vmatmul.mubr.msk.f32.gmra.mrb[124].mxu1 %vm2612_vm7, %v14777_v11 }
 0x43e   : > { %5132 = vmatprep.mubr.f32.mxu1 %v17786_v49 }
 0x43f   : > { %9679 = vmatmul.mubr.msk.f32.gmra.mrb[176].mxu0 %vm2612_vm7, %v14505_v14 }
 0x440   : > { %4269 = vmatprep.mubr.f32.mxu0 %v17786_v49 }
 0x441   : > { %9700 = vmatmul.mubr.msk.f32.gmra.mrb[126].mxu1 %vm2612_vm7, %v14787_v23 }
 0x442   : > { %5138 = vmatprep.mubr.f32.mxu1 %v17786_v49 }
 0x443   : > { %9680 = vmatmul.mubr.msk.f32.gmra.mrb[178].mxu0 %vm2612_vm7, %v14518_v16 }
 0x444   : > { %4275 = vmatprep.mubr.f32.mxu0 %v17786_v49 }
 0x445   : > { %9701 = vmatmul.mubr.msk.f32.gmra.mrb[128].mxu1 %vm2612_vm7, %v14797_v27 }
 0x446   : > { %5144 = vmatprep.mubr.f32.mxu1 %v17786_v49 }
 0x447   : > { %9681 = vmatmul.mubr.msk.f32.gmra.mrb[180].mxu0 %vm2612_vm7, %v14531_v17 }
 0x448   : > { %4281 = vmatprep.mubr.f32.mxu0 %v17786_v49 }
 0x449   : > { %9702 = vmatmul.mubr.msk.f32.gmra.mrb[130].mxu1 %vm2612_vm7, %v14807_v25 }
 0x44a   : > { %5150 = vmatprep.mubr.f32.mxu1 %v17786_v49 }
 0x44b   : > { %9682 = vmatmul.mubr.msk.f32.gmra.mrb[182].mxu0 %vm2612_vm7, %v14544_v39 }
 0x44c   : > { %4287 = vmatprep.mubr.f32.mxu0 %v17786_v49 }
 0x44d   : > { %9703 = vmatmul.mubr.msk.f32.gmra.mrb[132].mxu1 %vm2612_vm7, %v14817_v32 }
 0x44e   : > { %5156 = vmatprep.mubr.f32.mxu1 %v17786_v49 }
 0x44f   : > { %9683 = vmatmul.mubr.msk.f32.gmra.mrb[184].mxu0 %vm2612_vm7, %v14557_v45 }
 0x450   : > { %4293 = vmatprep.mubr.f32.mxu0 %v17786_v49 }
 0x451   : > { %9704 = vmatmul.mubr.msk.f32.gmra.mrb[134].mxu1 %vm2612_vm7, %v14827_v60 }
 0x452   : > { %5162 = vmatprep.mubr.f32.mxu1 %v17786_v49 }
 0x453   : > { %9684 = vmatmul.mubr.msk.f32.gmra.mrb[186].mxu0 %vm2612_vm7, %v14570_v31 }
 0x454   : > { %4299 = vmatprep.mubr.f32.mxu0 %v17786_v49 }
 0x455   : > { %9705 = vmatmul.mubr.msk.f32.gmra.mrb[136].mxu1 %vm2612_vm7, %v14837_v9 }
 0x456   : > { %5168 = vmatprep.mubr.f32.mxu1 %v17786_v49 }
 0x457   : > { %9685 = vmatmul.mubr.msk.f32.gmra.mrb[188].mxu0 %vm2612_vm7, %v14583_v37 }
 0x458   : > { %5305 = vmatprep.mubr.f32.mxu0 %v17786_v49 }
 0x459   : > { %9706 = vmatmul.mubr.msk.f32.gmra.mrb[138].mxu1 %vm2612_vm7, %v14853_v54 }
 0x45a   : > { %5174 = vmatprep.mubr.f32.mxu1 %v17786_v49 }
 0x45b   : > { %9718 = vmatmul.mubr.msk.f32.vlgmr.msra.gmra.mrb[190].mxu0 %vm2612_vm7, %v14607_v36  ;;  %v14891_v36 = vmul.f32 %v14452_v3, %v17837_v7  ;;  %v5529_v3 = vld [vmem:[%s17272_s17 + $0xf8] sm:$0xff] }
 0x45c   : > { %10616 = vmatpush1.bf16.msra.mxu0 %v10615_v34  ;;  %5311 = vmatprep.mubr.f32.mxu0 %v17786_v49  ;;  %v5525_v34 = vld [vmem:[%s17272_s17 + $0xd8] sm:$0xff] }
 0x45d   : > { %9707 = vmatmul.mubr.msk.f32.gmra.mrb[140].mxu1 %vm2612_vm7, %v14869_v13  ;;  %10618 = vmatprep.subr.bf16.mxu0 %v10617_v63  ;;  %v10623_v63 = vpack.c.bf16 %v5520_v1, %v5516_v50  ;;  %v10625_v55 = vpack.c.bf16 %v5529_v3, %v5525_v34  ;;  %v6400_v50 = vld [vmem:[%s17272_s17 + $0x18] sm:$0xff]  ;;  %v14958_v34 = vld [vmem:[%s17266_s11] sm:$0xf] }
 0x45e   : > { %5180 = vmatprep.mubr.f32.mxu1 %v17786_v49 }
 0x45f   : > { %9719 = vmatmul.mubr.msk.f32.gmra.mrb[192].mxu0 %vm2612_vm7, %v14635_v29  ;;  %v14913_v29 = vmul.f32 %v14476_v38, %v17838_v24  ;;  %v10627_v38 = vpack.c.bf16 %v5528_v2, %v5524_v22  ;;  %v17842_v24 = vld [vmem:[#allocation40_spill] sm:$0xff] }
 0x460   : > { %5317 = vmatprep.mubr.f32.mxu0 %v17786_v49  ;;  %10620 = vmatpush1.bf16.msra.mxu0 %v10619_v42  ;;  %v17839_v42 = vld [vmem:[#allocation91_spill] sm:$0xff]  ;;  %v17844_v2 = vsub.s32 1, %v17842_v24 }
 0x461   : > { %9708 = vmatmul.mubr.msk.f32.gmra.mrb[142].mxu1 %vm2612_vm7, %v14891_v36  ;;  %10622 = vmatprep.subr.bf16.mxu0 %v10621_v44  ;;  %v14929_v7 = vmul.f32 %v14492_v59, %v17839_v42  ;;  %v6398_v59 = vld [vmem:[%s17272_s17 + $0x8] sm:$0xff] }
 0x462   : > { %5186 = vmatprep.mubr.f32.mxu1 %v17786_v49 }
 0x463   : > { %9720 = vmatmul.mubr.msk.f32.gmra.mrb[194].mxu0 %vm2612_vm7, %v14661_v61  ;;  %v17840_v61 = vld [vmem:[#allocation89_spill] sm:$0xff] }
 0x464   : > { %5323 = vmatprep.mubr.f32.mxu0 %v17786_v49  ;;  %10624 = vmatpush1.bf16.msra.mxu0 %v10623_v63  ;;  %v14939_v44 = vmul.f32 %v14505_v14, %v17840_v61  ;;  %v6404_v14 = vld [vmem:[%s17272_s17 + $0x38] sm:$0xff] }
 0x465   : > { %9709 = vmatmul.mubr.msk.f32.gmra.mrb[144].mxu1 %vm2612_vm7, %v14913_v29  ;;  %10626 = vmatprep.subr.bf16.mxu0 %v10625_v55  ;;  %v10645_v3 = vpack.c.bf16 %v6404_v14, %v6400_v50  ;;  %v17843_v55 = vsub.s32 0, %v17842_v24 }
 0x466   : > { %5192 = vmatprep.mubr.f32.mxu1 %v17786_v49 }
 0x467   : > { %9721 = vmatmul.mubr.msk.f32.gmra.mrb[196].mxu0 %vm2612_vm7, %v14677_v15  ;;  %v6402_v15 = vld [vmem:[%s17272_s17 + $0x28] sm:$0xff]  ;;  %v14971_v22 = vrot.slane %v14958_v34, %v17843_v55 }
 0x468   : > { %5329 = vmatprep.mubr.f32.mxu0 %v17786_v49  ;;  %10628 = vmatpush1.bf16.msra.mxu0 %v10627_v38  ;;  %v10629_v1 = vpack.c.bf16 %v6402_v15, %v6398_v59  ;;  %v14978_v38 = vrot.slane %v14958_v34, %v17844_v2  ;;  %v17847_v2 = vld [vmem:[#allocation103_spill] sm:$0xff] }
 0x469   : > { %9710 = vmatmul.mubr.msk.f32.gmra.mrb[146].mxu1 %vm2612_vm7, %v14929_v7  ;;  %10646 = vmatprep.subr.bf16.mxu0 %v10645_v3 }
 0x46a   : > { %5198 = vmatprep.mubr.f32.mxu1 %v17786_v49  ;;  %10630 = vmatprep.subr.bf16.mxu1 %v10629_v1  ;;  %v17846_v1 = vld [vmem:[#allocation87_spill] sm:$0xff] }
 0x46b   : > { %9722 = vmatmul.mubr.msk.f32.gmra.mrb[198].mxu0 %vm2612_vm7, %v14687_v58  ;;  %v17841_v58 = vld [vmem:[#allocation75_spill] sm:$0xff]  ;;  %v3858_v61 = vpop.f32.mrb[96].mxu0 }
 0x46c   : > { %5335 = vmatprep.mubr.f32.mxu0 %v17786_v49  ;;  %v14966_v63 = vmul.f32 %v14518_v16, %v17841_v58  ;;  %v17845_v16 = vld [vmem:[#allocation99_spill] sm:$0xff]  ;;  %v4328_v59 = vmul.f32 %v14971_v22, %v3858_v61 }
 0x46d   : > { %9711 = vmatmul.mubr.msk.f32.gmra.mrb[148].mxu1 %vm2612_vm7, %v14939_v44  ;;  %v14986_v42 = vmul.f32 %v14531_v17, %v17845_v16  ;;  %v14998_v17 = vmul.f32 %v14544_v39, %v17846_v1  ;;  %v15010_v16 = vmul.f32 %v14557_v45, %v17847_v2  ;;  %v17849_v2 = vld [vmem:[#allocation100_spill] sm:$0xff] }
 0x46e   : > { %5204 = vmatprep.mubr.f32.mxu1 %v17786_v49  ;;  %v4456_v50 = vmul.f32 1.442695, %v4328_v59 }
 0x46f   : > { %9723 = vmatmul.mubr.msk.f32.gmra.mrb[200].mxu0 %vm2612_vm7, %v14697_v62  ;;  %v3860_v62 = vpop.f32.mrb[97].mxu0 }
 0x470   : > { %5341 = vmatprep.mubr.f32.mxu0 %v17786_v49  ;;  %v4329_v15 = vmul.f32 %v14978_v38, %v3860_v62  ;;  %v3864_v3 = vpop.f32.mrb[98].mxu0  ;;  %11284 = vpow2.f32 %v4456_v50  ;;  %v17848_v50 = vld [vmem:[#allocation86_spill] sm:$0xff] }
 0x471   : > { %9712 = vmatmul.mubr.msk.f32.gmra.mrb[150].mxu1 %vm2612_vm7, %v14966_v63  ;;  %v4332_v58 = vmul.f32 %v14971_v22, %v3864_v3  ;;  %v15022_v1 = vmul.f32 %v14570_v31, %v17848_v50  ;;  %v6410_v50 = vld [vmem:[%s17272_s17 + $0x68] sm:$0xff] }
 0x472   : > { %5210 = vmatprep.mubr.f32.mxu1 %v17786_v49  ;;  %v4458_v14 = vmul.f32 1.442695, %v4329_v15 }
 0x473   : > { %9724 = vmatmul.mubr.msk.f32.gmra.mrb[202].mxu0 %vm2612_vm7, %v14707_v0  ;;  %v3866_v0 = vpop.f32.mrb[99].mxu0  ;;  %v4464_v39 = vmul.f32 1.442695, %v4332_v58 }
 0x474   : > { %5347 = vmatprep.mubr.f32.mxu0 %v17786_v49  ;;  %11286 = vpow2.f32 %v4458_v14  ;;  %v4333_v55 = vmul.f32 %v14978_v38, %v3866_v0  ;;  %v3870_v59 = vpop.f32.mrb[100].mxu0 }
 0x475   : > { %9713 = vmatmul.mubr.msk.f32.gmra.mrb[152].mxu1 %vm2612_vm7, %v14986_v42  ;;  %11288 = vpow2.f32 %v4464_v39  ;;  %v3872_v62 = vpop.f32.mrb[101].mxu0 }
 0x476   : > { %5216 = vmatprep.mubr.f32.mxu1 %v17786_v49  ;;  %v4466_v61 = vmul.f32 1.442695, %v4333_v55  ;;  %v4337_v15 = vmul.f32 %v14978_v38, %v3872_v62  ;;  %v6401_v62 = vld [vmem:[%s17272_s17 + $0x20] sm:$0xff] }
 0x477   : > { %9725 = vmatmul.mubr.msk.f32.gmra.mrb[204].mxu0 %vm2612_vm7, %v14717_v52  ;;  %v4336_v52 = vmul.f32 %v14971_v22, %v3870_v59 }
 0x478   : > { %5353 = vmatprep.mubr.f32.mxu0 %v17786_v49  ;;  %11290 = vpow2.f32 %v4466_v61  ;;  %v4474_v14 = vmul.f32 1.442695, %v4337_v15  ;;  %v15034_v61 = vmul.f32 %v14583_v37, %v17849_v2  ;;  %v6406_v37 = vld [vmem:[%s17272_s17 + $0x48] sm:$0xff]  ;;  %v6409_v2 = vld [vmem:[%s17272_s17 + $0x60] sm:$0xff] }
 0x479   : > { %9714 = vmatmul.mubr.msk.f32.gmra.mrb[154].mxu1 %vm2612_vm7, %v14998_v17  ;;  %v4472_v45 = vmul.f32 1.442695, %v4336_v52  ;;  %v3876_v3 = vpop.f32.mrb[102].mxu0  ;;  %v6397_v52 = vld [vmem:[%s17272_s17] sm:$0xff] }
 0x47a   : > { %5222 = vmatprep.mubr.f32.mxu1 %v17786_v49  ;;  %v3878_v58 = vpop.f32.mrb[103].mxu0  ;;  %v11285_v55 = vpop.eup %11284 }
 0x47b   : > { %9726 = vmatmul.mubr.msk.f32.gmra.mrb[206].mxu0 %vm2612_vm7, %v14727_v12  ;;  %11292 = vpow2.f32 %v4472_v45  ;;  %v4340_v12 = vmul.f32 %v14971_v22, %v3876_v3  ;;  %v4341_v0 = vmul.f32 %v14978_v38, %v3878_v58  ;;  %4712 = vst [vmem:[#allocation2] sm:$0xff] %v11285_v55 }
 0x47c   : > { %5359 = vmatprep.mubr.f32.mxu0 %v17786_v49  ;;  %11294 = vpow2.f32 %v4474_v14 }
 0x47d   : > { %9715 = vmatmul.mubr.msk.f32.gmra.mrb[156].mxu1 %vm2612_vm7, %v15010_v16  ;;  %v4480_v31 = vmul.f32 1.442695, %v4340_v12  ;;  %v4482_v59 = vmul.f32 1.442695, %v4341_v0  ;;  %v10631_v12 = vpack.c.bf16 %v6401_v62, %v6397_v52  ;;  %v6414_v52 = vld [vmem:[%s17272_s17 + $0x88] sm:$0xff] }
 0x47e   : > { %5228 = vmatprep.mubr.f32.mxu1 %v17786_v49  ;;  %v11287_v39 = vpop.eup %11286  ;;  %v6418_v62 = vld [vmem:[%s17272_s17 + $0xa8] sm:$0xff] }
 0x47f   : > { %9727 = vmatmul.mubr.msk.f32.gmra.mrb[208].mxu0 %vm2612_vm7, %v14737_v21  ;;  %v3882_v21 = vpop.f32.mrb[104].mxu0  ;;  %4713 = vst [vmem:[#allocation2 + $0x8] sm:$0xff] %v11287_v39  ;;  %11296 = vpow2.f32 %v4480_v31  ;;  %v11289_v3 = vpop.eup %11288  ;;  %v10633_v31 = vpack.c.bf16 %v6410_v50, %v6406_v37  ;;  %v6405_v39 = vld [vmem:[%s17272_s17 + $0x40] sm:$0xff] }
 0x480   : > { %5365 = vmatprep.mubr.f32.mxu0 %v17786_v49  ;;  %v4344_v15 = vmul.f32 %v14971_v22, %v3882_v21  ;;  %v3884_v45 = vpop.f32.mrb[105].mxu0  ;;  %11298 = vpow2.f32 %v4482_v59  ;;  %4716 = vst [vmem:[#allocation2 + $0x20] sm:$0xff] %v11289_v3  ;;  %v10635_v50 = vpack.c.bf16 %v6409_v2, %v6405_v39  ;;  %v6426_v39 = vld [vmem:[%s17272_s17 + $0xe8] sm:$0xff]  ;;  %v17851_v2 = vld [vmem:[#allocation98_spill] sm:$0xff] }
 0x481   : > { %9716 = vmatmul.mubr.msk.f32.gmra.mrb[158].mxu1 %vm2612_vm7, %v15022_v1  ;;  %v4345_v14 = vmul.f32 %v14978_v38, %v3884_v45 }
 0x482   : > { %5234 = vmatprep.mubr.f32.mxu1 %v17786_v49  ;;  %v11291_v58 = vpop.eup %11290 }
 0x483   : > { %9728 = vmatmul.mubr.msk.f32.gmra.mrb[210].mxu0 %vm2612_vm7, %v14747_v33  ;;  %v4488_v33 = vmul.f32 1.442695, %v4344_v15  ;;  %v4490_v0 = vmul.f32 1.442695, %v4345_v14  ;;  %v3888_v55 = vpop.f32.mrb[106].mxu0  ;;  %4717 = vst [vmem:[#allocation2 + $0x28] sm:$0xff] %v11291_v58  ;;  %v10637_v58 = vpack.c.bf16 %v6418_v62, %v6414_v52 }
 0x484   : > { %5371 = vmatprep.mubr.f32.mxu0 %v17786_v49  ;;  %v4348_v59 = vmul.f32 %v14971_v22, %v3888_v55  ;;  %v3890_v21 = vpop.f32.mrb[107].mxu0  ;;  %v17850_v15 = vld [vmem:[#allocation84_spill] sm:$0xff]  ;;  %v6417_v55 = vld [vmem:[%s17272_s17 + $0xa0] sm:$0xff] }
 0x485   : > { %9717 = vmatmul.mubr.msk.f32.gmra.mrb[160].mxu1 %vm2612_vm7, %v15034_v61  ;;  %11300 = vpow2.f32 %v4488_v33  ;;  %v4349_v45 = vmul.f32 %v14978_v38, %v3890_v21  ;;  %v11293_v37 = vpop.eup %11292 }
 0x486   : > { %5691 = vmatprep.mubr.f32.mxu1 %v17786_v49  ;;  %11302 = vpow2.f32 %v4490_v0  ;;  %v11295_v14 = vpop.eup %11294  ;;  %4720 = vst [vmem:[#allocation2 + $0x40] sm:$0xff] %v11293_v37  ;;  %v6413_v0 = vld [vmem:[%s17272_s17 + $0x80] sm:$0xff] }
 0x487   : > { %9729 = vmatmul.mubr.msk.f32.gmra.mrb[212].mxu0 %vm2612_vm7, %v14757_v43  ;;  %v4496_v43 = vmul.f32 1.442695, %v4348_v59  ;;  %v4498_v3 = vmul.f32 1.442695, %v4349_v45  ;;  %4721 = vst [vmem:[#allocation2 + $0x48] sm:$0xff] %v11295_v14  ;;  %v10639_v62 = vpack.c.bf16 %v6417_v55, %v6413_v0  ;;  %v17852_v0 = vld [vmem:[#allocation111_spill] sm:$0xff] }
 0x488   : > { %5377 = vmatprep.mubr.f32.mxu0 %v17786_v49  ;;  %v3894_v33 = vpop.f32.mrb[108].mxu0 }
 0x489   : > { %9750 = vmatmul.mubr.msk.f32.vlgmr.msra.gmra.mrb[162].mxu1 %vm5530_vm8, %v17850_v15  ;;  %11304 = vpow2.f32 %v4496_v43  ;;  %v4352_v59 = vmul.f32 %v14971_v22, %v3894_v33  ;;  %v11297_v52 = vpop.eup %11296  ;;  %v6425_v33 = vld [vmem:[%s17272_s17 + $0xe0] sm:$0xff] }
 0x48a   : > { %5697 = vmatprep.mubr.f32.mxu1 %v17786_v49  ;;  %10632 = vmatpush1.bf16.msra.mxu1 %v10631_v12  ;;  %v3896_v12 = vpop.f32.mrb[109].mxu0  ;;  %11306 = vpow2.f32 %v4498_v3  ;;  %v11299_v45 = vpop.eup %11298  ;;  %4724 = vst [vmem:[#allocation2 + $0x60] sm:$0xff] %v11297_v52  ;;  %v6421_v3 = vld [vmem:[%s17272_s17 + $0xc0] sm:$0xff] }
 0x48b   : > { %10634 = vmatprep.subr.bf16.mxu1 %v10633_v31  ;;  %9730 = vmatmul.mubr.msk.f32.gmra.mrb[214].mxu0 %vm2612_vm7, %v14767_v18  ;;  %v6422_v31 = vld [vmem:[%s17272_s17 + $0xc8] sm:$0xff]  ;;  %v4353_v21 = vmul.f32 %v14978_v38, %v3896_v12  ;;  %v4504_v18 = vmul.f32 1.442695, %v4352_v59  ;;  %4725 = vst [vmem:[#allocation2 + $0x68] sm:$0xff] %v11299_v45 }
 0x48c   : > { %5383 = vmatprep.mubr.f32.mxu0 %v17786_v49  ;;  %v3900_v43 = vpop.f32.mrb[110].mxu0  ;;  %v10641_v14 = vpack.c.bf16 %v6426_v39, %v6422_v31  ;;  %v10643_v31 = vpack.c.bf16 %v6425_v33, %v6421_v3 }
 0x48d   : > { %9751 = vmatmul.mubr.msk.f32.gmra.mrb[164].mxu1 %vm5530_vm8, %v17851_v2  ;;  %v4506_v37 = vmul.f32 1.442695, %v4353_v21  ;;  %11308 = vpow2.f32 %v4504_v18  ;;  %v4356_v59 = vmul.f32 %v14971_v22, %v3900_v43 }
 0x48e   : > { %5703 = vmatprep.mubr.f32.mxu1 %v17786_v49  ;;  %10636 = vmatpush1.bf16.msra.mxu1 %v10635_v50  ;;  %v3902_v50 = vpop.f32.mrb[111].mxu0 }
 0x48f   : > { %10638 = vmatprep.subr.bf16.mxu1 %v10637_v58  ;;  %9731 = vmatmul.mubr.msk.f32.gmra.mrb[216].mxu0 %vm2612_vm7, %v14777_v11  ;;  %11310 = vpow2.f32 %v4506_v37  ;;  %v4357_v58 = vmul.f32 %v14978_v38, %v3902_v50  ;;  %v11301_v55 = vpop.eup %11300  ;;  %v4512_v12 = vmul.f32 1.442695, %v4356_v59  ;;  %v17853_v37 = vld [vmem:[#allocation96_spill] sm:$0xff] }
 0x490   : > { %5389 = vmatprep.mubr.f32.mxu0 %v17786_v49  ;;  %v11303_v39 = vpop.eup %11302  ;;  %4728 = vst [vmem:[#allocation2 + $0x80] sm:$0xff] %v11301_v55  ;;  %v3906_v52 = vpop.f32.mrb[112].mxu0 }
 0x491   : > { %9752 = vmatmul.mubr.msk.f32.gmra.mrb[166].mxu1 %vm5530_vm8, %v17852_v0  ;;  %v4514_v21 = vmul.f32 1.442695, %v4357_v58  ;;  %4729 = vst [vmem:[#allocation2 + $0x88] sm:$0xff] %v11303_v39  ;;  %11312 = vpow2.f32 %v4512_v12  ;;  %v4360_v18 = vmul.f32 %v14971_v22, %v3906_v52  ;;  %v3908_v45 = vpop.f32.mrb[113].mxu0  ;;  %v17854_v52 = vld [vmem:[#allocation108_spill] sm:$0xff] }
 0x492   : > { %5709 = vmatprep.mubr.f32.mxu1 %v17786_v49  ;;  %10640 = vmatpush1.bf16.msra.mxu1 %v10639_v62  ;;  %v4361_v3 = vmul.f32 %v14978_v38, %v3908_v45 }
 0x493   : > { %10642 = vmatprep.subr.bf16.mxu1 %v10641_v14  ;;  %v3948_v11 = vpop.f32.mrb[64].mxu1  ;;  %9732 = vmatmul.mubr.msk.f32.gmra.mrb[218].mxu0 %vm2612_vm7, %v14787_v23  ;;  %11314 = vpow2.f32 %v4514_v21  ;;  %v11305_v14 = vpop.eup %11304  ;;  %v4520_v59 = vmul.f32 1.442695, %v4360_v18 }
 0x494   : > { %v4388_v62 = vmul.f32 %v14971_v22, %v3948_v11  ;;  %v3950_v43 = vpop.f32.mrb[65].mxu1  ;;  %5395 = vmatprep.mubr.f32.mxu0 %v17786_v49  ;;  %v11307_v50 = vpop.eup %11306  ;;  %4732 = vst [vmem:[#allocation2 + $0xa0] sm:$0xff] %v11305_v14  ;;  %v4522_v58 = vmul.f32 1.442695, %v4361_v3 }
 0x495   : > { %9753 = vmatmul.mubr.msk.f32.gmra.mrb[168].mxu1 %vm5530_vm8, %v17853_v37  ;;  %v4389_v33 = vmul.f32 %v14978_v38, %v3950_v43  ;;  %v3912_v55 = vpop.f32.mrb[114].mxu0  ;;  %4733 = vst [vmem:[#allocation2 + $0xa8] sm:$0xff] %v11307_v50  ;;  %11316 = vpow2.f32 %v4520_v59  ;;  %v17855_v50 = vld [vmem:[#allocation95_spill] sm:$0xff] }
 0x496   : > { %5715 = vmatprep.mubr.f32.mxu1 %v17786_v49  ;;  %10644 = vmatpush1.bf16.msra.mxu1 %v10643_v31  ;;  %v4576_v23 = vmul.f32 1.442695, %v4388_v62  ;;  %v4364_v39 = vmul.f32 %v14971_v22, %v3912_v55  ;;  %v3914_v21 = vpop.f32.mrb[115].mxu0 }
 0x497   : > { %v4578_v12 = vmul.f32 1.442695, %v4389_v33  ;;  %9733 = vmatmul.mubr.msk.f32.gmra.mrb[220].mxu0 %vm2612_vm7, %v14797_v27  ;;  %v4365_v31 = vmul.f32 %v14978_v38, %v3914_v21  ;;  %v11309_v11 = vpop.eup %11308 }
 0x498   : > { %11318 = vpow2.f32 %v4576_v23  ;;  %5401 = vmatprep.mubr.f32.mxu0 %v17786_v49  ;;  %v4528_v18 = vmul.f32 1.442695, %v4364_v39  ;;  %4736 = vst [vmem:[#allocation2 + $0xc0] sm:$0xff] %v11309_v11 }
 0x499   : > { %9754 = vmatmul.mubr.msk.f32.gmra.mrb[170].mxu1 %vm5530_vm8, %v17854_v52  ;;  %11320 = vpow2.f32 %v4578_v12  ;;  %v11311_v45 = vpop.eup %11310  ;;  %v4530_v62 = vmul.f32 1.442695, %v4365_v31  ;;  %v3918_v43 = vpop.f32.mrb[116].mxu0 }
 0x49a   : > { %5721 = vmatprep.mubr.f32.mxu1 %v17786_v49  ;;  %11322 = vpow2.f32 %v4522_v58  ;;  %4737 = vst [vmem:[#allocation2 + $0xc8] sm:$0xff] %v11311_v45  ;;  %v4368_v3 = vmul.f32 %v14971_v22, %v3918_v43  ;;  %v3920_v14 = vpop.f32.mrb[117].mxu0 }
 0x49b   : > { %11324 = vpow2.f32 %v4528_v18  ;;  %9734 = vmatmul.mubr.msk.f32.gmra.mrb[222].mxu0 %vm2612_vm7, %v14807_v25  ;;  %v4369_v23 = vmul.f32 %v14978_v38, %v3920_v14  ;;  %v11313_v58 = vpop.eup %11312 }
 0x49c   : > { %v3954_v27 = vpop.f32.mrb[66].mxu1  ;;  %11326 = vpow2.f32 %v4530_v62  ;;  %5407 = vmatprep.mubr.f32.mxu0 %v17786_v49  ;;  %v4536_v12 = vmul.f32 1.442695, %v4368_v3  ;;  %4740 = vst [vmem:[#allocation2 + $0xe0] sm:$0xff] %v11313_v58  ;;  %v17856_v3 = vld [vmem:[#allocation92_spill] sm:$0xff] }
 0x49d   : > { %v4392_v33 = vmul.f32 %v14971_v22, %v3954_v27  ;;  %v3956_v59 = vpop.f32.mrb[67].mxu1  ;;  %9755 = vmatmul.mubr.msk.f32.gmra.mrb[172].mxu1 %vm5530_vm8, %v17855_v50  ;;  %v11315_v39 = vpop.eup %11314  ;;  %v4538_v21 = vmul.f32 1.442695, %v4369_v23 }
 0x49e   : > { %v4393_v55 = vmul.f32 %v14978_v38, %v3956_v59  ;;  %5727 = vmatprep.mubr.f32.mxu1 %v17786_v49  ;;  %v3924_v31 = vpop.f32.mrb[118].mxu0  ;;  %4741 = vst [vmem:[#allocation2 + $0xe8] sm:$0xff] %v11315_v39  ;;  %11328 = vpow2.f32 %v4536_v12 }
 0x49f   : > { %v4584_v25 = vmul.f32 1.442695, %v4392_v33  ;;  %v4372_v45 = vmul.f32 %v14971_v22, %v3924_v31  ;;  %v3926_v62 = vpop.f32.mrb[119].mxu0  ;;  %9735 = vmatmul.mubr.msk.f32.gmra.mrb[224].mxu0 %vm2612_vm7, %v14817_v32  ;;  %v11317_v33 = vpop.eup %11316 }
 0x4a0   : > { %v4586_v11 = vmul.f32 1.442695, %v4393_v55  ;;  %v3960_v18 = vpop.f32.mrb[68].mxu1  ;;  %v4373_v14 = vmul.f32 %v14978_v38, %v3926_v62  ;;  %5413 = vmatprep.mubr.f32.mxu0 %v17786_v49  ;;  %4744 = vst [vmem:[#allocation2 + $0x100] sm:$0xff] %v11317_v33 }
 0x4a1   : > { %11330 = vpow2.f32 %v4584_v25  ;;  %v4396_v43 = vmul.f32 %v14971_v22, %v3960_v18  ;;  %v3962_v27 = vpop.f32.mrb[69].mxu1  ;;  %9756 = vmatmul.mubr.msk.f32.gmra.mrb[174].mxu1 %vm5530_vm8, %v17856_v3  ;;  %v4544_v23 = vmul.f32 1.442695, %v4372_v45  ;;  %v3930_v12 = vpop.f32.mrb[120].mxu0 }
 0x4a2   : > { %11332 = vpow2.f32 %v4586_v11  ;;  %v4397_v59 = vmul.f32 %v14978_v38, %v3962_v27  ;;  %5733 = vmatprep.mubr.f32.mxu1 %v17786_v49  ;;  %v11319_v58 = vpop.eup %11318  ;;  %v4546_v55 = vmul.f32 1.442695, %v4373_v14  ;;  %v4376_v18 = vmul.f32 %v14971_v22, %v3930_v12  ;;  %v3932_v62 = vpop.f32.mrb[121].mxu0 }
 0x4a3   : > { %v4592_v32 = vmul.f32 1.442695, %v4396_v43  ;;  %11334 = vpow2.f32 %v4538_v21  ;;  %v11321_v39 = vpop.eup %11320  ;;  %4772 = vst [vmem:[#allocation2 + $0x1e0] sm:$0xff] %v11319_v58  ;;  %9736 = vmatmul.mubr.msk.f32.gmra.mrb[226].mxu0 %vm2612_vm7, %v14827_v60  ;;  %v17857_v21 = vld [vmem:[#allocation107_spill] sm:$0xff]  ;;  %v4377_v27 = vmul.f32 %v14978_v38, %v3932_v62 }
 0x4a4   : > { %v4594_v25 = vmul.f32 1.442695, %v4397_v59  ;;  %v3966_v31 = vpop.f32.mrb[70].mxu1  ;;  %11336 = vpow2.f32 %v4544_v23  ;;  %v11323_v11 = vpop.eup %11322  ;;  %4773 = vst [vmem:[#allocation2 + $0x1e8] sm:$0xff] %v11321_v39  ;;  %5419 = vmatprep.mubr.f32.mxu0 %v17786_v49  ;;  %v4552_v60 = vmul.f32 1.442695, %v4376_v18 }
 0x4a5   : > { %11338 = vpow2.f32 %v4592_v32  ;;  %v4400_v45 = vmul.f32 %v14971_v22, %v3966_v31  ;;  %v3968_v43 = vpop.f32.mrb[71].mxu1  ;;  %9757 = vmatmul.mubr.msk.f32.gmra.mrb[176].mxu1 %vm5530_vm8, %v17857_v21  ;;  %v11325_v14 = vpop.eup %11324  ;;  %4745 = vst [vmem:[#allocation2 + $0x108] sm:$0xff] %v11323_v11  ;;  %v4554_v58 = vmul.f32 1.442695, %v4377_v27  ;;  %v17858_v11 = vld [vmem:[#allocation120_spill] sm:$0xff] }
 0x4a6   : > { %11340 = vpow2.f32 %v4594_v25  ;;  %v4401_v33 = vmul.f32 %v14978_v38, %v3968_v43  ;;  %5739 = vmatprep.mubr.f32.mxu1 %v17786_v49  ;;  %v11327_v59 = vpop.eup %11326  ;;  %4748 = vst [vmem:[#allocation2 + $0x120] sm:$0xff] %v11325_v14  ;;  %v3936_v32 = vpop.f32.mrb[122].mxu0 }
 0x4a7   : > { %v4600_v23 = vmul.f32 1.442695, %v4400_v45  ;;  %11342 = vpow2.f32 %v4546_v55  ;;  %4749 = vst [vmem:[#allocation2 + $0x128] sm:$0xff] %v11327_v59  ;;  %v4380_v31 = vmul.f32 %v14971_v22, %v3936_v32  ;;  %v3938_v62 = vpop.f32.mrb[123].mxu0  ;;  %9737 = vmatmul.mubr.msk.f32.gmra.mrb[228].mxu0 %vm2612_vm7, %v14837_v9 }
 0x4a8   : > { %v4602_v12 = vmul.f32 1.442695, %v4401_v33  ;;  %v3972_v39 = vpop.f32.mrb[72].mxu1  ;;  %11344 = vpow2.f32 %v4552_v60  ;;  %v4381_v55 = vmul.f32 %v14978_v38, %v3938_v62  ;;  %5425 = vmatprep.mubr.f32.mxu0 %v17786_v49  ;;  %v11329_v45 = vpop.eup %11328 }
 0x4a9   : > { %11346 = vpow2.f32 %v4600_v23  ;;  %v4404_v25 = vmul.f32 %v14971_v22, %v3972_v39  ;;  %v3974_v18 = vpop.f32.mrb[73].mxu1  ;;  %9758 = vmatmul.mubr.msk.f32.gmra.mrb[178].mxu1 %vm5530_vm8, %v17858_v11  ;;  %v4560_v27 = vmul.f32 1.442695, %v4380_v31  ;;  %4752 = vst [vmem:[#allocation2 + $0x140] sm:$0xff] %v11329_v45  ;;  %v3942_v60 = vpop.f32.mrb[124].mxu0 }
 0x4aa   : > { %11348 = vpow2.f32 %v4602_v12  ;;  %v4405_v43 = vmul.f32 %v14978_v38, %v3974_v18  ;;  %5745 = vmatprep.mubr.f32.mxu1 %v17786_v49  ;;  %v4562_v33 = vmul.f32 1.442695, %v4381_v55  ;;  %v4384_v39 = vmul.f32 %v14971_v22, %v3942_v60  ;;  %v3944_v62 = vpop.f32.mrb[125].mxu0  ;;  %v17860_v55 = vld [vmem:[#allocation116_spill] sm:$0xff] }
 0x4ab   : > { %v11331_v14 = vpop.eup %11330  ;;  %v4608_v9 = vmul.f32 1.442695, %v4404_v25  ;;  %11350 = vpow2.f32 %v4554_v58  ;;  %9738 = vmatmul.mubr.msk.f32.gmra.mrb[230].mxu0 %vm2612_vm7, %v14853_v54  ;;  %v17859_v12 = vsub.s32 2, %v17842_v24  ;;  %v4385_v45 = vmul.f32 %v14978_v38, %v3944_v62 }
 0x4ac   : > { %v11333_v59 = vpop.eup %11332  ;;  %4776 = vst [vmem:[#allocation2 + $0x200] sm:$0xff] %v11331_v14  ;;  %v4610_v23 = vmul.f32 1.442695, %v4405_v43  ;;  %v3978_v32 = vpop.f32.mrb[74].mxu1  ;;  %11352 = vpow2.f32 %v4560_v27  ;;  %5431 = vmatprep.mubr.f32.mxu0 %v17786_v49  ;;  %v17861_v54 = vsub.s32 3, %v17842_v24 }
 0x4ad   : > { %v15174_v31 = vrot.slane %v14958_v34, %v17859_v12  ;;  %v11335_v25 = vpop.eup %11334  ;;  %4777 = vst [vmem:[#allocation2 + $0x208] sm:$0xff] %v11333_v59  ;;  %11354 = vpow2.f32 %v4608_v9  ;;  %v4408_v58 = vmul.f32 %v14971_v22, %v3978_v32  ;;  %v3980_v18 = vpop.f32.mrb[75].mxu1  ;;  %9759 = vmatmul.mubr.msk.f32.gmra.mrb[180].mxu1 %vm5530_vm8, %v17860_v55  ;;  %v4568_v9 = vmul.f32 1.442695, %v4384_v39 }
 0x4ae   : > { %v15184_v43 = vrot.slane %v14958_v34, %v17861_v54  ;;  %v11337_v27 = vpop.eup %11336  ;;  %4753 = vst [vmem:[#allocation2 + $0x148] sm:$0xff] %v11335_v25  ;;  %11356 = vpow2.f32 %v4610_v23  ;;  %v4409_v14 = vmul.f32 %v14978_v38, %v3980_v18  ;;  %5751 = vmatprep.mubr.f32.mxu1 %v17786_v49  ;;  %v4570_v32 = vmul.f32 1.442695, %v4385_v45  ;;  %v4115_v62 = vpop.f32.mrb[126].mxu0 }
 0x4af   : > { %v11339_v60 = vpop.eup %11338  ;;  %4756 = vst [vmem:[#allocation2 + $0x160] sm:$0xff] %v11337_v27  ;;  %v4616_v59 = vmul.f32 1.442695, %v4408_v58  ;;  %11358 = vpow2.f32 %v4562_v33  ;;  %v4330_v34 = vmul.f32 %v15174_v31, %v4115_v62  ;;  %v4117_v25 = vpop.f32.mrb[127].mxu0  ;;  %9739 = vmatmul.mubr.msk.f32.gmra.mrb[232].mxu0 %vm2612_vm7, %v14869_v13  ;;  %v17862_v33 = vld [vmem:[#allocation104_spill] sm:$0xff] }
 0x4b0   : > { %v11341_v12 = vpop.eup %11340  ;;  %4780 = vst [vmem:[#allocation2 + $0x220] sm:$0xff] %v11339_v60  ;;  %v4618_v24 = vmul.f32 1.442695, %v4409_v14  ;;  %v3984_v35 = vpop.f32.mrb[76].mxu1  ;;  %11360 = vpow2.f32 %v4568_v9  ;;  %v4331_v18 = vmul.f32 %v15184_v43, %v4117_v25  ;;  %5437 = vmatprep.mubr.f32.mxu0 %v17786_v49 }
 0x4b1   : > { %v11343_v23 = vpop.eup %11342  ;;  %4781 = vst [vmem:[#allocation2 + $0x228] sm:$0xff] %v11341_v12  ;;  %11362 = vpow2.f32 %v4616_v59  ;;  %v4412_v39 = vmul.f32 %v14971_v22, %v3984_v35  ;;  %v3986_v58 = vpop.f32.mrb[77].mxu1  ;;  %9760 = vmatmul.mubr.msk.f32.gmra.mrb[182].mxu1 %vm5530_vm8, %v17862_v33  ;;  %v4460_v13 = vmul.f32 1.442695, %v4330_v34 }
 0x4b2   : > { %v11345_v45 = vpop.eup %11344  ;;  %4757 = vst [vmem:[#allocation2 + $0x168] sm:$0xff] %v11343_v23  ;;  %11364 = vpow2.f32 %v4618_v24  ;;  %v4413_v54 = vmul.f32 %v14978_v38, %v3986_v58  ;;  %5757 = vmatprep.mubr.f32.mxu1 %v17786_v49  ;;  %v4462_v35 = vmul.f32 1.442695, %v4331_v18  ;;  %v4121_v9 = vpop.f32.mrb[128].mxu0 }
 0x4b3   : > { %v11347_v27 = vpop.eup %11346  ;;  %4760 = vst [vmem:[#allocation2 + $0x180] sm:$0xff] %v11345_v45  ;;  %v4624_v14 = vmul.f32 1.442695, %v4412_v39  ;;  %11366 = vpow2.f32 %v4570_v32  ;;  %v4334_v12 = vmul.f32 %v15174_v31, %v4121_v9  ;;  %v4123_v25 = vpop.f32.mrb[129].mxu0  ;;  %9740 = vmatmul.mubr.msk.f32.gmra.mrb[234].mxu0 %vm2612_vm7, %v14891_v36  ;;  %v17863_v32 = vld [vmem:[#allocation105_spill] sm:$0xff] }
 0x4b4   : > { %v11349_v60 = vpop.eup %11348  ;;  %4784 = vst [vmem:[#allocation2 + $0x240] sm:$0xff] %v11347_v27  ;;  %v4626_v59 = vmul.f32 1.442695, %v4413_v54  ;;  %v3990_v62 = vpop.f32.mrb[78].mxu1  ;;  %11368 = vpow2.f32 %v4460_v13  ;;  %v4335_v39 = vmul.f32 %v15184_v43, %v4123_v25  ;;  %5443 = vmatprep.mubr.f32.mxu0 %v17786_v49 }
 0x4b5   : > { %v11351_v24 = vpop.eup %11350  ;;  %4785 = vst [vmem:[#allocation2 + $0x248] sm:$0xff] %v11349_v60  ;;  %11370 = vpow2.f32 %v4624_v14  ;;  %v4416_v34 = vmul.f32 %v14971_v22, %v3990_v62  ;;  %v3992_v23 = vpop.f32.mrb[79].mxu1  ;;  %9761 = vmatmul.mubr.msk.f32.gmra.mrb[184].mxu1 %vm5530_vm8, %v17863_v32  ;;  %v4468_v36 = vmul.f32 1.442695, %v4334_v12 }
 0x4b6   : > { %v11353_v58 = vpop.eup %11352  ;;  %4761 = vst [vmem:[#allocation2 + $0x188] sm:$0xff] %v11351_v24  ;;  %11372 = vpow2.f32 %v4626_v59  ;;  %v4417_v18 = vmul.f32 %v14978_v38, %v3992_v23  ;;  %5763 = vmatprep.mubr.f32.mxu1 %v17786_v49  ;;  %v4470_v13 = vmul.f32 1.442695, %v4335_v39  ;;  %v4127_v27 = vpop.f32.mrb[130].mxu0 }
 0x4b7   : > { %v11355_v45 = vpop.eup %11354  ;;  %4764 = vst [vmem:[#allocation2 + $0x1a0] sm:$0xff] %v11353_v58  ;;  %v4632_v54 = vmul.f32 1.442695, %v4416_v34  ;;  %11374 = vpow2.f32 %v4462_v35  ;;  %v4338_v62 = vmul.f32 %v15174_v31, %v4127_v27  ;;  %v4129_v25 = vpop.f32.mrb[131].mxu0  ;;  %9741 = vmatmul.mubr.msk.f32.gmra.mrb[236].mxu0 %vm2612_vm7, %v14913_v29  ;;  %v17864_v35 = vld [vmem:[#allocation115_spill] sm:$0xff] }
 0x4b8   : > { %v11357_v14 = vpop.eup %11356  ;;  %4788 = vst [vmem:[#allocation2 + $0x260] sm:$0xff] %v11355_v45  ;;  %v4634_v9 = vmul.f32 1.442695, %v4417_v18  ;;  %v3996_v60 = vpop.f32.mrb[80].mxu1  ;;  %11376 = vpow2.f32 %v4468_v36  ;;  %v4339_v34 = vmul.f32 %v15184_v43, %v4129_v25  ;;  %5449 = vmatprep.mubr.f32.mxu0 %v17786_v49 }
 0x4b9   : > { %v11359_v59 = vpop.eup %11358  ;;  %4789 = vst [vmem:[#allocation2 + $0x268] sm:$0xff] %v11357_v14  ;;  %11378 = vpow2.f32 %v4632_v54  ;;  %v4420_v12 = vmul.f32 %v14971_v22, %v3996_v60  ;;  %v3998_v24 = vpop.f32.mrb[81].mxu1  ;;  %9762 = vmatmul.mubr.msk.f32.gmra.mrb[186].mxu1 %vm5530_vm8, %v17864_v35  ;;  %v4476_v29 = vmul.f32 1.442695, %v4338_v62 }
 0x4ba   : > { %v11361_v23 = vpop.eup %11360  ;;  %4765 = vst [vmem:[#allocation2 + $0x1a8] sm:$0xff] %v11359_v59  ;;  %11380 = vpow2.f32 %v4634_v9  ;;  %v4421_v39 = vmul.f32 %v14978_v38, %v3998_v24  ;;  %5769 = vmatprep.mubr.f32.mxu1 %v17786_v49  ;;  %v4478_v36 = vmul.f32 1.442695, %v4339_v34  ;;  %v4133_v45 = vpop.f32.mrb[132].mxu0 }
 0x4bb   : > { %v11363_v58 = vpop.eup %11362  ;;  %4768 = vst [vmem:[#allocation2 + $0x1c0] sm:$0xff] %v11361_v23  ;;  %v4640_v18 = vmul.f32 1.442695, %v4420_v12  ;;  %11382 = vpow2.f32 %v4470_v13  ;;  %v4342_v60 = vmul.f32 %v15174_v31, %v4133_v45  ;;  %v4135_v25 = vpop.f32.mrb[133].mxu0  ;;  %9742 = vmatmul.mubr.msk.f32.gmra.mrb[238].mxu0 %vm2612_vm7, %v14929_v7  ;;  %v17865_v13 = vld [vmem:[#allocation117_spill] sm:$0xff] }
 0x4bc   : > { %v11365_v54 = vpop.eup %11364  ;;  %4792 = vst [vmem:[#allocation2 + $0x280] sm:$0xff] %v11363_v58  ;;  %v4642_v27 = vmul.f32 1.442695, %v4421_v39  ;;  %v4002_v14 = vpop.f32.mrb[82].mxu1  ;;  %11384 = vpow2.f32 %v4476_v29  ;;  %v4343_v12 = vmul.f32 %v15184_v43, %v4135_v25  ;;  %5455 = vmatprep.mubr.f32.mxu0 %v17786_v49 }
 0x4bd   : > { %v11367_v9 = vpop.eup %11366  ;;  %4793 = vst [vmem:[#allocation2 + $0x288] sm:$0xff] %v11365_v54  ;;  %11386 = vpow2.f32 %v4640_v18  ;;  %v4424_v62 = vmul.f32 %v14971_v22, %v4002_v14  ;;  %v4004_v59 = vpop.f32.mrb[83].mxu1  ;;  %9763 = vmatmul.mubr.msk.f32.gmra.mrb[188].mxu1 %vm5530_vm8, %v17865_v13  ;;  %v4484_v7 = vmul.f32 1.442695, %v4342_v60 }
 0x4be   : > { %v11369_v24 = vpop.eup %11368  ;;  %4769 = vst [vmem:[#allocation2 + $0x1c8] sm:$0xff] %v11367_v9  ;;  %11388 = vpow2.f32 %v4642_v27  ;;  %v4425_v34 = vmul.f32 %v14978_v38, %v4004_v59  ;;  %5775 = vmatprep.mubr.f32.mxu1 %v17786_v49  ;;  %v4486_v29 = vmul.f32 1.442695, %v4343_v12  ;;  %v4139_v58 = vpop.f32.mrb[134].mxu0 }
 0x4bf   : > { %v11371_v23 = vpop.eup %11370  ;;  %4714 = vst [vmem:[#allocation2 + $0x10] sm:$0xff] %v11369_v24  ;;  %v4648_v39 = vmul.f32 1.442695, %v4424_v62  ;;  %11390 = vpow2.f32 %v4478_v36  ;;  %v4346_v14 = vmul.f32 %v15174_v31, %v4139_v58  ;;  %v4141_v25 = vpop.f32.mrb[135].mxu0  ;;  %9743 = vmatmul.mubr.msk.f32.gmra.mrb[240].mxu0 %vm2612_vm7, %v14939_v44  ;;  %v17866_v36 = vld [vmem:[#allocation125_spill] sm:$0xff] }
 0x4c0   : > { %v11373_v18 = vpop.eup %11372  ;;  %4796 = vst [vmem:[#allocation2 + $0x2a0] sm:$0xff] %v11371_v23  ;;  %v4650_v45 = vmul.f32 1.442695, %v4425_v34  ;;  %v4008_v54 = vpop.f32.mrb[84].mxu1  ;;  %11392 = vpow2.f32 %v4484_v7  ;;  %v4347_v62 = vmul.f32 %v15184_v43, %v4141_v25  ;;  %5461 = vmatprep.mubr.f32.mxu0 %v17786_v49 }
 0x4c1   : > { %v11375_v27 = vpop.eup %11374  ;;  %4797 = vst [vmem:[#allocation2 + $0x2a8] sm:$0xff] %v11373_v18  ;;  %11394 = vpow2.f32 %v4648_v39  ;;  %v4428_v60 = vmul.f32 %v14971_v22, %v4008_v54  ;;  %v4010_v9 = vpop.f32.mrb[85].mxu1  ;;  %9764 = vmatmul.mubr.msk.f32.gmra.mrb[190].mxu1 %vm5530_vm8, %v17866_v36  ;;  %v4492_v44 = vmul.f32 1.442695, %v4346_v14 }
 0x4c2   : > { %v11377_v59 = vpop.eup %11376  ;;  %4715 = vst [vmem:[#allocation2 + $0x18] sm:$0xff] %v11375_v27  ;;  %11396 = vpow2.f32 %v4650_v45  ;;  %v4429_v12 = vmul.f32 %v14978_v38, %v4010_v9  ;;  %5781 = vmatprep.mubr.f32.mxu1 %v17786_v49  ;;  %v4494_v7 = vmul.f32 1.442695, %v4347_v62  ;;  %v4145_v23 = vpop.f32.mrb[136].mxu0 }
 0x4c3   : > { %v11379_v24 = vpop.eup %11378  ;;  %4718 = vst [vmem:[#allocation2 + $0x30] sm:$0xff] %v11377_v59  ;;  %v4656_v34 = vmul.f32 1.442695, %v4428_v60  ;;  %11398 = vpow2.f32 %v4486_v29  ;;  %v4350_v54 = vmul.f32 %v15174_v31, %v4145_v23  ;;  %v4147_v25 = vpop.f32.mrb[137].mxu0  ;;  %9744 = vmatmul.mubr.msk.f32.gmra.mrb[242].mxu0 %vm2612_vm7, %v14966_v63  ;;  %v17867_v29 = vld [vmem:[#allocation101_spill] sm:$0xff] }
 0x4c4   : > { %v11381_v39 = vpop.eup %11380  ;;  %4800 = vst [vmem:[#allocation2 + $0x2c0] sm:$0xff] %v11379_v24  ;;  %v4658_v58 = vmul.f32 1.442695, %v4429_v12  ;;  %v4014_v18 = vpop.f32.mrb[86].mxu1  ;;  %11400 = vpow2.f32 %v4492_v44  ;;  %v4351_v60 = vmul.f32 %v15184_v43, %v4147_v25  ;;  %5467 = vmatprep.mubr.f32.mxu0 %v17786_v49 }
 0x4c5   : > { %v11383_v45 = vpop.eup %11382  ;;  %4801 = vst [vmem:[#allocation2 + $0x2c8] sm:$0xff] %v11381_v39  ;;  %11402 = vpow2.f32 %v4656_v34  ;;  %v4432_v14 = vmul.f32 %v14971_v22, %v4014_v18  ;;  %v4016_v27 = vpop.f32.mrb[87].mxu1  ;;  %9765 = vmatmul.mubr.msk.f32.gmra.mrb[192].mxu1 %vm5530_vm8, %v17867_v29  ;;  %v4500_v63 = vmul.f32 1.442695, %v4350_v54 }
 0x4c6   : > { %v11385_v9 = vpop.eup %11384  ;;  %4719 = vst [vmem:[#allocation2 + $0x38] sm:$0xff] %v11383_v45  ;;  %11404 = vpow2.f32 %v4658_v58  ;;  %v4433_v62 = vmul.f32 %v14978_v38, %v4016_v27  ;;  %5787 = vmatprep.mubr.f32.mxu1 %v17786_v49  ;;  %v4502_v44 = vmul.f32 1.442695, %v4351_v60  ;;  %v4151_v24 = vpop.f32.mrb[138].mxu0 }
 0x4c7   : > { %v11387_v59 = vpop.eup %11386  ;;  %4722 = vst [vmem:[#allocation2 + $0x50] sm:$0xff] %v11385_v9  ;;  %v4664_v12 = vmul.f32 1.442695, %v4432_v14  ;;  %11406 = vpow2.f32 %v4494_v7  ;;  %v4354_v18 = vmul.f32 %v15174_v31, %v4151_v24  ;;  %v4153_v25 = vpop.f32.mrb[139].mxu0  ;;  %9745 = vmatmul.mubr.msk.f32.gmra.mrb[244].mxu0 %vm2612_vm7, %v14986_v42  ;;  %v17868_v7 = vld [vmem:[#allocation112_spill] sm:$0xff] }
 0x4c8   : > { %v11389_v34 = vpop.eup %11388  ;;  %4804 = vst [vmem:[#allocation2 + $0x2e0] sm:$0xff] %v11387_v59  ;;  %v4666_v23 = vmul.f32 1.442695, %v4433_v62  ;;  %v4020_v39 = vpop.f32.mrb[88].mxu1  ;;  %11408 = vpow2.f32 %v4500_v63  ;;  %v4355_v14 = vmul.f32 %v15184_v43, %v4153_v25  ;;  %5473 = vmatprep.mubr.f32.mxu0 %v17786_v49 }
 0x4c9   : > { %v11391_v58 = vpop.eup %11390  ;;  %4805 = vst [vmem:[#allocation2 + $0x2e8] sm:$0xff] %v11389_v34  ;;  %11410 = vpow2.f32 %v4664_v12  ;;  %v4436_v54 = vmul.f32 %v14971_v22, %v4020_v39  ;;  %v4022_v45 = vpop.f32.mrb[89].mxu1  ;;  %9766 = vmatmul.mubr.msk.f32.gmra.mrb[194].mxu1 %vm5530_vm8, %v17868_v7  ;;  %v4508_v42 = vmul.f32 1.442695, %v4354_v18 }
 0x4ca   : > { %v11393_v27 = vpop.eup %11392  ;;  %4723 = vst [vmem:[#allocation2 + $0x58] sm:$0xff] %v11391_v58  ;;  %11412 = vpow2.f32 %v4666_v23  ;;  %v4437_v60 = vmul.f32 %v14978_v38, %v4022_v45  ;;  %5793 = vmatprep.mubr.f32.mxu1 %v17786_v49  ;;  %v4510_v63 = vmul.f32 1.442695, %v4355_v14  ;;  %v4157_v59 = vpop.f32.mrb[140].mxu0 }
 0x4cb   : > { %v11395_v9 = vpop.eup %11394  ;;  %4726 = vst [vmem:[#allocation2 + $0x70] sm:$0xff] %v11393_v27  ;;  %v4672_v62 = vmul.f32 1.442695, %v4436_v54  ;;  %11414 = vpow2.f32 %v4502_v44  ;;  %v4358_v39 = vmul.f32 %v15174_v31, %v4157_v59  ;;  %v4159_v25 = vpop.f32.mrb[141].mxu0  ;;  %9746 = vmatmul.mubr.msk.f32.gmra.mrb[246].mxu0 %vm2612_vm7, %v14998_v17  ;;  %v17869_v44 = vld [vmem:[#allocation113_spill] sm:$0xff] }
 0x4cc   : > { %v11397_v12 = vpop.eup %11396  ;;  %4808 = vst [vmem:[#allocation2 + $0x300] sm:$0xff] %v11395_v9  ;;  %v4674_v24 = vmul.f32 1.442695, %v4437_v60  ;;  %v4026_v34 = vpop.f32.mrb[90].mxu1  ;;  %11416 = vpow2.f32 %v4508_v42  ;;  %v4359_v54 = vmul.f32 %v15184_v43, %v4159_v25  ;;  %5479 = vmatprep.mubr.f32.mxu0 %v17786_v49 }
 0x4cd   : > { %v11399_v23 = vpop.eup %11398  ;;  %4809 = vst [vmem:[#allocation2 + $0x308] sm:$0xff] %v11397_v12  ;;  %11418 = vpow2.f32 %v4672_v62  ;;  %v4440_v18 = vmul.f32 %v14971_v22, %v4026_v34  ;;  %v4028_v58 = vpop.f32.mrb[91].mxu1  ;;  %9767 = vmatmul.mubr.msk.f32.gmra.mrb[196].mxu1 %vm5530_vm8, %v17869_v44  ;;  %v4516_v17 = vmul.f32 1.442695, %v4358_v39 }
 0x4ce   : > { %v11401_v45 = vpop.eup %11400  ;;  %4727 = vst [vmem:[#allocation2 + $0x78] sm:$0xff] %v11399_v23  ;;  %11420 = vpow2.f32 %v4674_v24  ;;  %v4441_v14 = vmul.f32 %v14978_v38, %v4028_v58  ;;  %5799 = vmatprep.mubr.f32.mxu1 %v17786_v49  ;;  %v4518_v42 = vmul.f32 1.442695, %v4359_v54  ;;  %v4163_v9 = vpop.f32.mrb[142].mxu0 }
 0x4cf   : > { %v11403_v27 = vpop.eup %11402  ;;  %4730 = vst [vmem:[#allocation2 + $0x90] sm:$0xff] %v11401_v45  ;;  %v4680_v60 = vmul.f32 1.442695, %v4440_v18  ;;  %11422 = vpow2.f32 %v4510_v63  ;;  %v4362_v34 = vmul.f32 %v15174_v31, %v4163_v9  ;;  %v4165_v25 = vpop.f32.mrb[143].mxu0  ;;  %9747 = vmatmul.mubr.msk.f32.gmra.mrb[248].mxu0 %vm2612_vm7, %v15010_v16  ;;  %v17870_v63 = vld [vmem:[#allocation124_spill] sm:$0xff] }
 0x4d0   : > { %v11405_v62 = vpop.eup %11404  ;;  %4812 = vst [vmem:[#allocation2 + $0x320] sm:$0xff] %v11403_v27  ;;  %v4682_v59 = vmul.f32 1.442695, %v4441_v14  ;;  %v4032_v12 = vpop.f32.mrb[92].mxu1  ;;  %11424 = vpow2.f32 %v4516_v17  ;;  %v4363_v18 = vmul.f32 %v15184_v43, %v4165_v25  ;;  %5485 = vmatprep.mubr.f32.mxu0 %v17786_v49 }
 0x4d1   : > { %v11407_v24 = vpop.eup %11406  ;;  %4813 = vst [vmem:[#allocation2 + $0x328] sm:$0xff] %v11405_v62  ;;  %11426 = vpow2.f32 %v4680_v60  ;;  %v4444_v39 = vmul.f32 %v14971_v22, %v4032_v12  ;;  %v4034_v23 = vpop.f32.mrb[93].mxu1  ;;  %9768 = vmatmul.mubr.msk.f32.gmra.mrb[198].mxu1 %vm5530_vm8, %v17870_v63  ;;  %v4524_v16 = vmul.f32 1.442695, %v4362_v34 }
 0x4d2   : > { %v11409_v58 = vpop.eup %11408  ;;  %4731 = vst [vmem:[#allocation2 + $0x98] sm:$0xff] %v11407_v24  ;;  %11428 = vpow2.f32 %v4682_v59  ;;  %v4445_v54 = vmul.f32 %v14978_v38, %v4034_v23  ;;  %5805 = vmatprep.mubr.f32.mxu1 %v17786_v49  ;;  %v4526_v17 = vmul.f32 1.442695, %v4363_v18  ;;  %v4169_v27 = vpop.f32.mrb[144].mxu0 }
 0x4d3   : > { %v11411_v45 = vpop.eup %11410  ;;  %4734 = vst [vmem:[#allocation2 + $0xb0] sm:$0xff] %v11409_v58  ;;  %v4688_v14 = vmul.f32 1.442695, %v4444_v39  ;;  %11430 = vpow2.f32 %v4518_v42  ;;  %v4366_v12 = vmul.f32 %v15174_v31, %v4169_v27  ;;  %v4171_v25 = vpop.f32.mrb[145].mxu0  ;;  %9748 = vmatmul.mubr.msk.f32.gmra.mrb[250].mxu0 %vm2612_vm7, %v15022_v1  ;;  %v17871_v42 = vld [vmem:[#allocation126_spill] sm:$0xff]  ;;  %v6399_v58 = vld [vmem:[%s17272_s17 + $0x10] sm:$0xff] }
 0x4d4   : > { %v11413_v60 = vpop.eup %11412  ;;  %4816 = vst [vmem:[#allocation2 + $0x340] sm:$0xff] %v11411_v45  ;;  %v4690_v9 = vmul.f32 1.442695, %v4445_v54  ;;  %v4038_v62 = vpop.f32.mrb[94].mxu1  ;;  %11432 = vpow2.f32 %v4524_v16  ;;  %v4367_v39 = vmul.f32 %v15184_v43, %v4171_v25  ;;  %5491 = vmatprep.mubr.f32.mxu0 %v17786_v49  ;;  %v6403_v54 = vld [vmem:[%s17272_s17 + $0x30] sm:$0xff] }
 0x4d5   : > { %v11415_v59 = vpop.eup %11414  ;;  %4817 = vst [vmem:[#allocation2 + $0x348] sm:$0xff] %v11413_v60  ;;  %11434 = vpow2.f32 %v4688_v14  ;;  %v4448_v34 = vmul.f32 %v14971_v22, %v4038_v62  ;;  %v4040_v24 = vpop.f32.mrb[95].mxu1  ;;  %9769 = vmatmul.mubr.msk.f32.gmra.mrb[200].mxu1 %vm5530_vm8, %v17871_v42  ;;  %v4532_v1 = vmul.f32 1.442695, %v4366_v12 }
 0x4d6   : > { %v11417_v23 = vpop.eup %11416  ;;  %4735 = vst [vmem:[#allocation2 + $0xb8] sm:$0xff] %v11415_v59  ;;  %11436 = vpow2.f32 %v4690_v9  ;;  %v4449_v18 = vmul.f32 %v14978_v38, %v4040_v24  ;;  %5811 = vmatprep.mubr.f32.mxu1 %v17786_v49  ;;  %v4534_v14 = vmul.f32 1.442695, %v4367_v39  ;;  %v4175_v27 = vpop.f32.mrb[146].mxu0  ;;  %v6408_v59 = vld [vmem:[%s17272_s17 + $0x58] sm:$0xff] }
 0x4d7   : > { %v11419_v16 = vpop.eup %11418  ;;  %4738 = vst [vmem:[#allocation2 + $0xd0] sm:$0xff] %v11417_v23  ;;  %v4696_v45 = vmul.f32 1.442695, %v4448_v34  ;;  %11438 = vpow2.f32 %v4526_v17  ;;  %v4370_v12 = vmul.f32 %v15174_v31, %v4175_v27  ;;  %v4177_v25 = vpop.f32.mrb[147].mxu0  ;;  %9749 = vmatmul.mubr.msk.f32.gmra.mrb[252].mxu0 %vm2612_vm7, %v15034_v61  ;;  %v6412_v17 = vld [vmem:[%s17272_s17 + $0x78] sm:$0xff]  ;;  %v17872_v23 = vld [vmem:[#allocation122_spill] sm:$0xff]  ;;  %v10647_v61 = vpack.c.bf16 %v6403_v54, %v6399_v58 }
 0x4d8   : > { %v11421_v60 = vpop.eup %11420  ;;  %4820 = vst [vmem:[#allocation2 + $0x360] sm:$0xff] %v11419_v16  ;;  %v4698_v9 = vmul.f32 1.442695, %v4449_v18  ;;  %v4044_v62 = vpop.f32.mrb[96].mxu1  ;;  %11440 = vpow2.f32 %v4532_v1  ;;  %v4371_v18 = vmul.f32 %v15184_v43, %v4177_v25  ;;  %5948 = vmatprep.mubr.f32.mxu0 %v17786_v49  ;;  %v10649_v6 = vpack.c.bf16 %v6412_v17, %v6408_v59  ;;  %v6411_v58 = vld [vmem:[%s17272_s17 + $0x70] sm:$0xff]  ;;  %v6420_v59 = vld [vmem:[%s17272_s17 + $0xb8] sm:$0xff] }
 0x4d9   : > { %v11423_v34 = vpop.eup %11422  ;;  %4821 = vst [vmem:[#allocation2 + $0x368] sm:$0xff] %v11421_v60  ;;  %11442 = vpow2.f32 %v4696_v45  ;;  %v4452_v24 = vmul.f32 %v14971_v22, %v4044_v62  ;;  %v4046_v39 = vpop.f32.mrb[97].mxu1  ;;  %9770 = vmatmul.mubr.msk.f32.gmra.mrb[202].mxu1 %vm5530_vm8, %v17872_v23  ;;  %v4540_v27 = vmul.f32 1.442695, %v4370_v12  ;;  %v6407_v22 = vld [vmem:[%s17272_s17 + $0x50] sm:$0xff] }
 0x4da   : > { %v11425_v1 = vpop.eup %11424  ;;  %4739 = vst [vmem:[#allocation2 + $0xd8] sm:$0xff] %v11423_v34  ;;  %11444 = vpow2.f32 %v4698_v9  ;;  %v4453_v16 = vmul.f32 %v14978_v38, %v4046_v39  ;;  %5817 = vmatprep.mubr.f32.mxu1 %v17786_v49  ;;  %v4542_v62 = vmul.f32 1.442695, %v4371_v18  ;;  %v4181_v25 = vpop.f32.mrb[148].mxu0  ;;  %v17873_v39 = vld [vmem:[#allocation109_spill] sm:$0xff] }
 0x4db   : > { %v11427_v45 = vpop.eup %11426  ;;  %4742 = vst [vmem:[#allocation2 + $0xf0] sm:$0xff] %v11425_v1  ;;  %v4704_v60 = vmul.f32 1.442695, %v4452_v24  ;;  %11446 = vpow2.f32 %v4534_v14  ;;  %v4374_v12 = vmul.f32 %v15174_v31, %v4181_v25  ;;  %v4183_v34 = vpop.f32.mrb[149].mxu0  ;;  %9782 = vmatmul.mubr.msk.f32.vlgmr.msra.gmra.mrb[254].mxu0 %vm5530_vm8, %v17850_v15  ;;  %v6416_v14 = vld [vmem:[%s17272_s17 + $0x98] sm:$0xff] }
 0x4dc   : > { %v11429_v54 = vpop.eup %11428  ;;  %4824 = vst [vmem:[#allocation2 + $0x380] sm:$0xff] %v11427_v45  ;;  %v4706_v38 = vmul.f32 1.442695, %v4453_v16  ;;  %v15316_v9 = vpop.f32.mrb[98].mxu1  ;;  %11448 = vpow2.f32 %v4540_v27  ;;  %v4375_v18 = vmul.f32 %v15184_v43, %v4183_v34  ;;  %10648 = vmatpush1.bf16.msra.mxu0 %v10647_v61  ;;  %5954 = vmatprep.mubr.f32.mxu0 %v17786_v49  ;;  %v10651_v16 = vpack.c.bf16 %v6411_v58, %v6407_v22  ;;  %v6415_v61 = vld [vmem:[%s17272_s17 + $0x90] sm:$0xff]  ;;  %v6428_v58 = vld [vmem:[%s17272_s17 + $0xf8] sm:$0xff] }
 0x4dd   : > { %v11431_v17 = vpop.eup %11430  ;;  %4825 = vst [vmem:[#allocation2 + $0x388] sm:$0xff] %v11429_v54  ;;  %11450 = vpow2.f32 %v4704_v60  ;;  %v15327_v24 = vpop.f32.mrb[99].mxu1  ;;  %9771 = vmatmul.mubr.msk.f32.gmra.mrb[204].mxu1 %vm5530_vm8, %v17873_v39  ;;  %v4548_v1 = vmul.f32 1.442695, %v4374_v12  ;;  %10650 = vmatprep.subr.bf16.mxu0 %v10649_v6  ;;  %v10653_v25 = vpack.c.bf16 %v6420_v59, %v6416_v14  ;;  %v6419_v54 = vld [vmem:[%s17272_s17 + $0xb0] sm:$0xff]  ;;  %v6424_v6 = vld [vmem:[%s17272_s17 + $0xd8] sm:$0xff] }
 0x4de   : > { %v11433_v15 = vpop.eup %11432  ;;  %4743 = vst [vmem:[#allocation2 + $0xf8] sm:$0xff] %v11431_v17  ;;  %11452 = vpow2.f32 %v4706_v38  ;;  %5823 = vmatprep.mubr.f32.mxu1 %v17786_v49  ;;  %v4550_v45 = vmul.f32 1.442695, %v4375_v18  ;;  %v4187_v60 = vpop.f32.mrb[150].mxu0  ;;  %v17874_v59 = vld [vmem:[#allocation131_spill] sm:$0xff] }
 0x4df   : > { %v11435_v27 = vpop.eup %11434  ;;  %4746 = vst [vmem:[#allocation2 + $0x110] sm:$0xff] %v11433_v15  ;;  %11454 = vpow2.f32 %v4542_v62  ;;  %v4378_v22 = vmul.f32 %v15174_v31, %v4187_v60  ;;  %v4189_v62 = vpop.f32.mrb[151].mxu0  ;;  %9783 = vmatmul.mubr.msk.f32.gmra.mrb[0].mxu0 %vm5530_vm8, %v17851_v2  ;;  %v10655_v15 = vpack.c.bf16 %v6419_v54, %v6415_v61 }
 0x4e0   : > { %v11437_v38 = vpop.eup %11436  ;;  %4828 = vst [vmem:[#allocation2 + $0x3a0] sm:$0xff] %v11435_v27  ;;  %v15340_v12 = vpop.f32.mrb[100].mxu1  ;;  %11456 = vpow2.f32 %v4548_v1  ;;  %v4379_v17 = vmul.f32 %v15184_v43, %v4189_v62  ;;  %5960 = vmatprep.mubr.f32.mxu0 %v17786_v49  ;;  %10652 = vmatpush1.bf16.msra.mxu0 %v10651_v16  ;;  %v6427_v62 = vld [vmem:[%s17272_s17 + $0xf0] sm:$0xff] }
 0x4e1   : > { %v11439_v34 = vpop.eup %11438  ;;  %4829 = vst [vmem:[#allocation2 + $0x3a8] sm:$0xff] %v11437_v38  ;;  %v15351_v14 = vpop.f32.mrb[101].mxu1  ;;  %9772 = vmatmul.mubr.msk.f32.gmra.mrb[206].mxu1 %vm5530_vm8, %v17874_v59  ;;  %11458 = vpow2.f32 %v4550_v45  ;;  %v4556_v18 = vmul.f32 1.442695, %v4378_v22  ;;  %10654 = vmatprep.subr.bf16.mxu0 %v10653_v25  ;;  %v10657_v38 = vpack.c.bf16 %v6428_v58, %v6424_v6  ;;  %v6423_v45 = vld [vmem:[%s17272_s17 + $0xd0] sm:$0xff]  ;;  %v17875_v22 = vld [vmem:[#allocation121_spill] sm:$0xff] }
 0x4e2   : > { %v11441_v2 = vpop.eup %11440  ;;  %4747 = vst [vmem:[#allocation2 + $0x118] sm:$0xff] %v11439_v34  ;;  %5829 = vmatprep.mubr.f32.mxu1 %v17786_v49  ;;  %v4558_v27 = vmul.f32 1.442695, %v4379_v17  ;;  %v4193_v60 = vpop.f32.mrb[152].mxu0 }
 0x4e3   : > { %v11443_v1 = vpop.eup %11442  ;;  %4750 = vst [vmem:[#allocation2 + $0x130] sm:$0xff] %v11441_v2  ;;  %11460 = vpow2.f32 %v4556_v18  ;;  %v4382_v16 = vmul.f32 %v15174_v31, %v4193_v60  ;;  %v4195_v61 = vpop.f32.mrb[153].mxu0  ;;  %9784 = vmatmul.mubr.msk.f32.gmra.mrb[2].mxu0 %vm5530_vm8, %v17852_v0  ;;  %v10659_v2 = vpack.c.bf16 %v6427_v62, %v6423_v45  ;;  %v17876_v45 = vld [vmem:[#allocation118_spill] sm:$0xff] }
 0x4e4   : > { %v11445_v34 = vpop.eup %11444  ;;  %4832 = vst [vmem:[#allocation2 + $0x3c0] sm:$0xff] %v11443_v1  ;;  %v15364_v51 = vpop.f32.mrb[102].mxu1  ;;  %11462 = vpow2.f32 %v4558_v27  ;;  %v4383_v6 = vmul.f32 %v15184_v43, %v4195_v61  ;;  %5966 = vmatprep.mubr.f32.mxu0 %v17786_v49  ;;  %10656 = vmatpush1.bf16.msra.mxu0 %v10655_v15 }
 0x4e5   : > { %v11447_v25 = vpop.eup %11446  ;;  %4833 = vst [vmem:[#allocation2 + $0x3c8] sm:$0xff] %v11445_v34  ;;  %v15369_v54 = vpop.f32.mrb[103].mxu1  ;;  %9773 = vmatmul.mubr.msk.f32.gmra.mrb[208].mxu1 %vm5530_vm8, %v17875_v22  ;;  %v4564_v17 = vmul.f32 1.442695, %v4382_v16  ;;  %10658 = vmatprep.subr.bf16.mxu0 %v10657_v38 }
 0x4e6   : > { %v11449_v58 = vpop.eup %11448  ;;  %4751 = vst [vmem:[#allocation2 + $0x138] sm:$0xff] %v11447_v25  ;;  %5835 = vmatprep.mubr.f32.mxu1 %v17786_v49  ;;  %v4566_v18 = vmul.f32 1.442695, %v4383_v6  ;;  %v4199_v1 = vpop.f32.mrb[154].mxu0 }
 0x4e7   : > { %v11451_v0 = vpop.eup %11450  ;;  %4754 = vst [vmem:[#allocation2 + $0x150] sm:$0xff] %v11449_v58  ;;  %11464 = vpow2.f32 %v4564_v17  ;;  %v4386_v27 = vmul.f32 %v15174_v31, %v4199_v1  ;;  %v4201_v61 = vpop.f32.mrb[155].mxu0  ;;  %9785 = vmatmul.mubr.msk.f32.gmra.mrb[4].mxu0 %vm5530_vm8, %v17853_v37 }
 0x4e8   : > { %v11453_v60 = vpop.eup %11452  ;;  %4836 = vst [vmem:[#allocation2 + $0x3e0] sm:$0xff] %v11451_v0  ;;  %v15376_v34 = vpop.f32.mrb[104].mxu1  ;;  %11466 = vpow2.f32 %v4566_v18  ;;  %v4387_v38 = vmul.f32 %v15184_v43, %v4201_v61  ;;  %5972 = vmatprep.mubr.f32.mxu0 %v17786_v49  ;;  %10660 = vmatpush1.bf16.msra.mxu0 %v10659_v2 }
 0x4e9   : > { %v11455_v25 = vpop.eup %11454  ;;  %4837 = vst [vmem:[#allocation2 + $0x3e8] sm:$0xff] %v11453_v60  ;;  %v15381_v15 = vpop.f32.mrb[105].mxu1  ;;  %9774 = vmatmul.mubr.msk.f32.gmra.mrb[210].mxu1 %vm5530_vm8, %v17876_v45  ;;  %v4572_v16 = vmul.f32 1.442695, %v4386_v27  ;;  %v17877_v60 = vld [vmem:[#allocation130_spill] sm:$0xff] }
 0x4ea   : > { %v11457_v62 = vpop.eup %11456  ;;  %4755 = vst [vmem:[#allocation2 + $0x158] sm:$0xff] %v11455_v25  ;;  %5841 = vmatprep.mubr.f32.mxu1 %v17786_v49  ;;  %v4574_v37 = vmul.f32 1.442695, %v4387_v38  ;;  %v4205_v58 = vpop.f32.mrb[156].mxu0 }
 0x4eb   : > { %v11459_v6 = vpop.eup %11458  ;;  %4758 = vst [vmem:[#allocation2 + $0x170] sm:$0xff] %v11457_v62  ;;  %11468 = vpow2.f32 %v4572_v16  ;;  %v4390_v0 = vmul.f32 %v15174_v31, %v4205_v58  ;;  %v4207_v18 = vpop.f32.mrb[157].mxu0  ;;  %9786 = vmatmul.mubr.msk.f32.gmra.mrb[6].mxu0 %vm5530_vm8, %v17854_v52  ;;  %v17878_v58 = vld [vmem:[#allocation132_spill] sm:$0xff] }
 0x4ec   : > { %4759 = vst [vmem:[#allocation2 + $0x178] sm:$0xff] %v11459_v6  ;;  %v15388_v17 = vpop.f32.mrb[106].mxu1  ;;  %11470 = vpow2.f32 %v4574_v37  ;;  %v4391_v2 = vmul.f32 %v15184_v43, %v4207_v18  ;;  %5978 = vmatprep.mubr.f32.mxu0 %v17786_v49 }
 0x4ed   : > { %v15393_v1 = vpop.f32.mrb[107].mxu1  ;;  %9775 = vmatmul.mubr.msk.f32.gmra.mrb[212].mxu1 %vm5530_vm8, %v17877_v60  ;;  %v11461_v27 = vpop.eup %11460  ;;  %v4580_v61 = vmul.f32 1.442695, %v4390_v0 }
 0x4ee   : > { %5847 = vmatprep.mubr.f32.mxu1 %v17786_v49  ;;  %v11463_v25 = vpop.eup %11462  ;;  %4762 = vst [vmem:[#allocation2 + $0x190] sm:$0xff] %v11461_v27  ;;  %v4582_v38 = vmul.f32 1.442695, %v4391_v2  ;;  %v4211_v62 = vpop.f32.mrb[158].mxu0 }
 0x4ef   : > { %4763 = vst [vmem:[#allocation2 + $0x198] sm:$0xff] %v11463_v25  ;;  %11472 = vpow2.f32 %v4580_v61  ;;  %v4394_v16 = vmul.f32 %v15174_v31, %v4211_v62  ;;  %v4213_v6 = vpop.f32.mrb[159].mxu0  ;;  %9787 = vmatmul.mubr.msk.f32.gmra.mrb[8].mxu0 %vm5530_vm8, %v17855_v50 }
 0x4f0   : > { %v15400_v52 = vpop.f32.mrb[108].mxu1  ;;  %11474 = vpow2.f32 %v4582_v38  ;;  %v4395_v0 = vmul.f32 %v15184_v43, %v4213_v6  ;;  %5984 = vmatprep.mubr.f32.mxu0 %v17786_v49  ;;  %v17879_v6 = vld [vmem:[#allocation128_spill] sm:$0xff] }
 0x4f1   : > { %v15405_v37 = vpop.f32.mrb[109].mxu1  ;;  %9776 = vmatmul.mubr.msk.f32.gmra.mrb[214].mxu1 %vm5530_vm8, %v17878_v58  ;;  %v11465_v18 = vpop.eup %11464  ;;  %v4588_v2 = vmul.f32 1.442695, %v4394_v16 }
 0x4f2   : > { %5853 = vmatprep.mubr.f32.mxu1 %v17786_v49  ;;  %v11467_v27 = vpop.eup %11466  ;;  %4766 = vst [vmem:[#allocation2 + $0x1b0] sm:$0xff] %v11465_v18  ;;  %v4590_v61 = vmul.f32 1.442695, %v4395_v0  ;;  %v4217_v25 = vpop.f32.mrb[160].mxu0 }
 0x4f3   : > { %4767 = vst [vmem:[#allocation2 + $0x1b8] sm:$0xff] %v11467_v27  ;;  %11476 = vpow2.f32 %v4588_v2  ;;  %v4398_v62 = vmul.f32 %v15174_v31, %v4217_v25  ;;  %v4219_v26 = vpop.f32.mrb[161].mxu0  ;;  %9788 = vmatmul.mubr.msk.f32.gmra.mrb[10].mxu0 %vm5530_vm8, %v17856_v3 }
 0x4f4   : > { %v15412_v50 = vpop.f32.mrb[110].mxu1  ;;  %11478 = vpow2.f32 %v4590_v61  ;;  %v4399_v16 = vmul.f32 %v15184_v43, %v4219_v26  ;;  %5990 = vmatprep.mubr.f32.mxu0 %v17786_v49  ;;  %v17881_v61 = vld [vmem:[#allocation134_spill] sm:$0xff] }
 0x4f5   : > { %v15417_v38 = vpop.f32.mrb[111].mxu1  ;;  %9777 = vmatmul.mubr.msk.f32.gmra.mrb[216].mxu1 %vm5530_vm8, %v17879_v6  ;;  %v11469_v0 = vpop.eup %11468  ;;  %v4596_v18 = vmul.f32 1.442695, %v4398_v62 }
 0x4f6   : > { %5859 = vmatprep.mubr.f32.mxu1 %v17786_v49  ;;  %v11471_v2 = vpop.eup %11470  ;;  %4770 = vst [vmem:[#allocation2 + $0x1d0] sm:$0xff] %v11469_v0  ;;  %v4598_v27 = vmul.f32 1.442695, %v4399_v16  ;;  %v4223_v25 = vpop.f32.mrb[162].mxu0 }
 0x4f7   : > { %4771 = vst [vmem:[#allocation2 + $0x1d8] sm:$0xff] %v11471_v2  ;;  %11480 = vpow2.f32 %v4596_v18  ;;  %v4402_v20 = vmul.f32 %v15174_v31, %v4223_v25  ;;  %v4225_v5 = vpop.f32.mrb[163].mxu0  ;;  %9789 = vmatmul.mubr.msk.f32.gmra.mrb[12].mxu0 %vm5530_vm8, %v17857_v21 }
 0x4f8   : > { %v15424_v3 = vpop.f32.mrb[112].mxu1  ;;  %11482 = vpow2.f32 %v4598_v27  ;;  %v4403_v62 = vmul.f32 %v15184_v43, %v4225_v5  ;;  %5996 = vmatprep.mubr.f32.mxu0 %v17786_v49  ;;  %v17884_v27 = vld [vmem:[#allocation133_spill] sm:$0xff] }
 0x4f9   : > { %v15429_v26 = vpop.f32.mrb[113].mxu1  ;;  %9778 = vmatmul.mubr.msk.f32.gmra.mrb[218].mxu1 %vm5530_vm8, %v17881_v61  ;;  %v11473_v16 = vpop.eup %11472  ;;  %v4604_v0 = vmul.f32 1.442695, %v4402_v20 }
 0x4fa   : > { %17880 = vst [vmem:[#allocation40_spill] sm:$0xff] %v15429_v26  ;;  %5865 = vmatprep.mubr.f32.mxu1 %v17786_v49  ;;  %v11475_v18 = vpop.eup %11474  ;;  %4774 = vst [vmem:[#allocation2 + $0x1f0] sm:$0xff] %v11473_v16  ;;  %v4606_v2 = vmul.f32 1.442695, %v4403_v62  ;;  %v4229_v25 = vpop.f32.mrb[164].mxu0 }
 0x4fb   : > { %4775 = vst [vmem:[#allocation2 + $0x1f8] sm:$0xff] %v11475_v18  ;;  %11484 = vpow2.f32 %v4604_v0  ;;  %v4406_v26 = vmul.f32 %v15174_v31, %v4229_v25  ;;  %v4231_v19 = vpop.f32.mrb[165].mxu0  ;;  %9790 = vmatmul.mubr.msk.f32.gmra.mrb[14].mxu0 %vm5530_vm8, %v17858_v11 }
 0x4fc   : > { %v15436_v21 = vpop.f32.mrb[114].mxu1  ;;  %11486 = vpow2.f32 %v4606_v2  ;;  %v4407_v20 = vmul.f32 %v15184_v43, %v4231_v19  ;;  %6002 = vmatprep.mubr.f32.mxu0 %v17786_v49 }
 0x4fd   : > { %17882 = vst [vmem:[#allocation84_spill] sm:$0xff] %v15436_v21  ;;  %v15441_v5 = vpop.f32.mrb[115].mxu1  ;;  %9779 = vmatmul.mubr.msk.f32.gmra.mrb[220].mxu1 %vm5530_vm8, %v17884_v27  ;;  %v11477_v62 = vpop.eup %11476  ;;  %v4612_v16 = vmul.f32 1.442695, %v4406_v26 }
 0x4fe   : > { %17883 = vst [vmem:[#allocation98_spill] sm:$0xff] %v15441_v5  ;;  %5871 = vmatprep.mubr.f32.mxu1 %v17786_v49  ;;  %v11479_v0 = vpop.eup %11478  ;;  %4778 = vst [vmem:[#allocation2 + $0x210] sm:$0xff] %v11477_v62  ;;  %v4614_v18 = vmul.f32 1.442695, %v4407_v20  ;;  %v4235_v25 = vpop.f32.mrb[166].mxu0 }
 0x4ff   : > { %4779 = vst [vmem:[#allocation2 + $0x218] sm:$0xff] %v11479_v0  ;;  %11488 = vpow2.f32 %v4612_v16  ;;  %v4410_v5 = vmul.f32 %v15174_v31, %v4235_v25  ;;  %v4237_v21 = vpop.f32.mrb[167].mxu0  ;;  %9791 = vmatmul.mubr.msk.f32.gmra.mrb[16].mxu0 %vm5530_vm8, %v17860_v55 }
 0x500   : > { %v15448_v11 = vpop.f32.mrb[116].mxu1  ;;  %11490 = vpow2.f32 %v4614_v18  ;;  %v4411_v26 = vmul.f32 %v15184_v43, %v4237_v21  ;;  %6008 = vmatprep.mubr.f32.mxu0 %v17786_v49 }
 0x501   : > { %v15453_v19 = vpop.f32.mrb[117].mxu1  ;;  %9780 = vmatmul.mubr.msk.f32.gmra.mrb[222].mxu1 %vm5530_vm8, %v14384_v10  ;;  %v11481_v2 = vpop.eup %11480  ;;  %v4620_v20 = vmul.f32 1.442695, %v4410_v5 }
 0x502   : > { %17885 = vst [vmem:[#allocation111_spill] sm:$0xff] %v15453_v19  ;;  %5877 = vmatprep.mubr.f32.mxu1 %v17786_v49  ;;  %v11483_v62 = vpop.eup %11482  ;;  %4782 = vst [vmem:[#allocation2 + $0x230] sm:$0xff] %v11481_v2  ;;  %v4622_v16 = vmul.f32 1.442695, %v4411_v26  ;;  %v4241_v0 = vpop.f32.mrb[168].mxu0 }
 0x503   : > { %4783 = vst [vmem:[#allocation2 + $0x238] sm:$0xff] %v11483_v62  ;;  %11492 = vpow2.f32 %v4620_v20  ;;  %v4414_v25 = vmul.f32 %v15174_v31, %v4241_v0  ;;  %v4243_v19 = vpop.f32.mrb[169].mxu0  ;;  %9792 = vmatmul.mubr.msk.f32.gmra.mrb[18].mxu0 %vm5530_vm8, %v17862_v33 }
 0x504   : > { %v15460_v55 = vpop.f32.mrb[118].mxu1  ;;  %11494 = vpow2.f32 %v4622_v16  ;;  %v4415_v5 = vmul.f32 %v15184_v43, %v4243_v19  ;;  %6014 = vmatprep.mubr.f32.mxu0 %v17786_v49 }
 0x505   : > { %v15465_v21 = vpop.f32.mrb[119].mxu1  ;;  %9781 = vmatmul.mubr.msk.f32.gmra.mrb[224].mxu1 %vm5530_vm8, %v14379_v4  ;;  %v11485_v18 = vpop.eup %11484  ;;  %v4628_v26 = vmul.f32 1.442695, %v4414_v25 }
 0x506   : > { %17886 = vst [vmem:[#allocation96_spill] sm:$0xff] %v15465_v21  ;;  %6589 = vmatprep.mubr.f32.mxu1 %v17786_v49  ;;  %v11487_v2 = vpop.eup %11486  ;;  %4786 = vst [vmem:[#allocation2 + $0x250] sm:$0xff] %v11485_v18  ;;  %v4630_v20 = vmul.f32 1.442695, %v4415_v5  ;;  %v4247_v62 = vpop.f32.mrb[170].mxu0 }
 0x507   : > { %4787 = vst [vmem:[#allocation2 + $0x258] sm:$0xff] %v11487_v2  ;;  %11496 = vpow2.f32 %v4628_v26  ;;  %v4418_v0 = vmul.f32 %v15174_v31, %v4247_v62  ;;  %v4249_v21 = vpop.f32.mrb[171].mxu0  ;;  %9793 = vmatmul.mubr.msk.f32.gmra.mrb[20].mxu0 %vm5530_vm8, %v17863_v32 }
 0x508   : > { %v15472_v33 = vpop.f32.mrb[120].mxu1  ;;  %11498 = vpow2.f32 %v4630_v20  ;;  %v4419_v16 = vmul.f32 %v15184_v43, %v4249_v21  ;;  %6020 = vmatprep.mubr.f32.mxu0 %v17786_v49 }
 0x509   : > { %v15477_v19 = vpop.f32.mrb[121].mxu1  ;;  %9814 = vmatmul.mubr.msk.f32.vlgmr.msra.gmra.mrb[226].mxu1 %vm5530_vm8, %v14406_v28  ;;  %v11489_v25 = vpop.eup %11488  ;;  %v4636_v5 = vmul.f32 1.442695, %v4418_v0 }
 0x50a   : > { %17887 = vst [vmem:[#allocation108_spill] sm:$0xff] %v15477_v19  ;;  %6595 = vmatprep.mubr.f32.mxu1 %v17786_v49  ;;  %v11491_v18 = vpop.eup %11490  ;;  %4790 = vst [vmem:[#allocation2 + $0x270] sm:$0xff] %v11489_v25  ;;  %v4638_v26 = vmul.f32 1.442695, %v4419_v16  ;;  %v4253_v2 = vpop.f32.mrb[172].mxu0 }
 0x50b   : > { %4791 = vst [vmem:[#allocation2 + $0x278] sm:$0xff] %v11491_v18  ;;  %11500 = vpow2.f32 %v4636_v5  ;;  %v4422_v62 = vmul.f32 %v15174_v31, %v4253_v2  ;;  %v4255_v19 = vpop.f32.mrb[173].mxu0  ;;  %9794 = vmatmul.mubr.msk.f32.gmra.mrb[22].mxu0 %vm5530_vm8, %v17864_v35 }
 0x50c   : > { %v15484_v32 = vpop.f32.mrb[122].mxu1  ;;  %11502 = vpow2.f32 %v4638_v26  ;;  %v4423_v20 = vmul.f32 %v15184_v43, %v4255_v19  ;;  %6026 = vmatprep.mubr.f32.mxu0 %v17786_v49 }
 0x50d   : > { %v15489_v21 = vpop.f32.mrb[123].mxu1  ;;  %9815 = vmatmul.mubr.msk.f32.gmra.mrb[228].mxu1 %vm5530_vm8, %v14403_v40  ;;  %v11493_v0 = vpop.eup %11492  ;;  %v4644_v16 = vmul.f32 1.442695, %v4422_v62 }
 0x50e   : > { %17888 = vst [vmem:[#allocation95_spill] sm:$0xff] %v15489_v21  ;;  %6601 = vmatprep.mubr.f32.mxu1 %v17786_v49  ;;  %v11495_v25 = vpop.eup %11494  ;;  %4794 = vst [vmem:[#allocation2 + $0x290] sm:$0xff] %v11493_v0  ;;  %v4646_v5 = vmul.f32 1.442695, %v4423_v20  ;;  %v4259_v18 = vpop.f32.mrb[174].mxu0 }
 0x50f   : > { %4795 = vst [vmem:[#allocation2 + $0x298] sm:$0xff] %v11495_v25  ;;  %11504 = vpow2.f32 %v4644_v16  ;;  %v4426_v2 = vmul.f32 %v15174_v31, %v4259_v18  ;;  %v4261_v21 = vpop.f32.mrb[175].mxu0  ;;  %9795 = vmatmul.mubr.msk.f32.gmra.mrb[24].mxu0 %vm5530_vm8, %v17865_v13 }
 0x510   : > { %v15496_v35 = vpop.f32.mrb[124].mxu1  ;;  %11506 = vpow2.f32 %v4646_v5  ;;  %v4427_v26 = vmul.f32 %v15184_v43, %v4261_v21  ;;  %6032 = vmatprep.mubr.f32.mxu0 %v17786_v49 }
 0x511   : > { %v15501_v19 = vpop.f32.mrb[125].mxu1  ;;  %9816 = vmatmul.mubr.msk.f32.gmra.mrb[230].mxu1 %vm5530_vm8, %v14423_v48  ;;  %v11497_v62 = vpop.eup %11496  ;;  %v4652_v20 = vmul.f32 1.442695, %v4426_v2 }
 0x512   : > { %17889 = vst [vmem:[#allocation92_spill] sm:$0xff] %v15501_v19  ;;  %6607 = vmatprep.mubr.f32.mxu1 %v17786_v49  ;;  %v11499_v0 = vpop.eup %11498  ;;  %4798 = vst [vmem:[#allocation2 + $0x2b0] sm:$0xff] %v11497_v62  ;;  %v4654_v16 = vmul.f32 1.442695, %v4427_v26  ;;  %v4265_v25 = vpop.f32.mrb[176].mxu0 }
 0x513   : > { %4799 = vst [vmem:[#allocation2 + $0x2b8] sm:$0xff] %v11499_v0  ;;  %11508 = vpow2.f32 %v4652_v20  ;;  %v4430_v18 = vmul.f32 %v15174_v31, %v4265_v25  ;;  %v4267_v19 = vpop.f32.mrb[177].mxu0  ;;  %9796 = vmatmul.mubr.msk.f32.gmra.mrb[26].mxu0 %vm5530_vm8, %v17866_v36 }
 0x514   : > { %v15508_v13 = vpop.f32.mrb[126].mxu1  ;;  %11510 = vpow2.f32 %v4654_v16  ;;  %v4431_v5 = vmul.f32 %v15184_v43, %v4267_v19  ;;  %6038 = vmatprep.mubr.f32.mxu0 %v17786_v49 }
 0x515   : > { %v15513_v21 = vpop.f32.mrb[127].mxu1  ;;  %9817 = vmatmul.mubr.msk.f32.gmra.mrb[232].mxu1 %vm5530_vm8, %v14418_v56  ;;  %v11501_v2 = vpop.eup %11500  ;;  %v4660_v26 = vmul.f32 1.442695, %v4430_v18 }
 0x516   : > { %17890 = vst [vmem:[#allocation107_spill] sm:$0xff] %v15513_v21  ;;  %6613 = vmatprep.mubr.f32.mxu1 %v17786_v49  ;;  %v11503_v62 = vpop.eup %11502  ;;  %4802 = vst [vmem:[#allocation2 + $0x2d0] sm:$0xff] %v11501_v2  ;;  %v4662_v20 = vmul.f32 1.442695, %v4431_v5  ;;  %v4271_v0 = vpop.f32.mrb[178].mxu0 }
 0x517   : > { %4803 = vst [vmem:[#allocation2 + $0x2d8] sm:$0xff] %v11503_v62  ;;  %11512 = vpow2.f32 %v4660_v26  ;;  %v4434_v25 = vmul.f32 %v15174_v31, %v4271_v0  ;;  %v4273_v21 = vpop.f32.mrb[179].mxu0  ;;  %9797 = vmatmul.mubr.msk.f32.gmra.mrb[28].mxu0 %vm5530_vm8, %v17867_v29 }
 0x518   : > { %v15520_v36 = vpop.f32.mrb[128].mxu1  ;;  %11514 = vpow2.f32 %v4662_v20  ;;  %v4435_v16 = vmul.f32 %v15184_v43, %v4273_v21  ;;  %6044 = vmatprep.mubr.f32.mxu0 %v17786_v49 }
 0x519   : > { %v15525_v19 = vpop.f32.mrb[129].mxu1  ;;  %9818 = vmatmul.mubr.msk.f32.gmra.mrb[234].mxu1 %vm5530_vm8, %v14436_v47  ;;  %v11505_v18 = vpop.eup %11504  ;;  %v4668_v5 = vmul.f32 1.442695, %v4434_v25 }
 0x51a   : > { %17891 = vst [vmem:[#allocation120_spill] sm:$0xff] %v15525_v19  ;;  %6619 = vmatprep.mubr.f32.mxu1 %v17786_v49  ;;  %v11507_v2 = vpop.eup %11506  ;;  %4806 = vst [vmem:[#allocation2 + $0x2f0] sm:$0xff] %v11505_v18  ;;  %v4670_v26 = vmul.f32 1.442695, %v4435_v16  ;;  %v4277_v62 = vpop.f32.mrb[180].mxu0 }
 0x51b   : > { %4807 = vst [vmem:[#allocation2 + $0x2f8] sm:$0xff] %v11507_v2  ;;  %11516 = vpow2.f32 %v4668_v5  ;;  %v4438_v0 = vmul.f32 %v15174_v31, %v4277_v62  ;;  %v4279_v19 = vpop.f32.mrb[181].mxu0  ;;  %9798 = vmatmul.mubr.msk.f32.gmra.mrb[30].mxu0 %vm5530_vm8, %v17868_v7 }
 0x51c   : > { %v15532_v29 = vpop.f32.mrb[130].mxu1  ;;  %11518 = vpow2.f32 %v4670_v26  ;;  %v4439_v20 = vmul.f32 %v15184_v43, %v4279_v19  ;;  %6050 = vmatprep.mubr.f32.mxu0 %v17786_v49 }
 0x51d   : > { %v15537_v21 = vpop.f32.mrb[131].mxu1  ;;  %9819 = vmatmul.mubr.msk.f32.gmra.mrb[236].mxu1 %vm5530_vm8, %v14433_v57  ;;  %v11509_v25 = vpop.eup %11508  ;;  %v4676_v16 = vmul.f32 1.442695, %v4438_v0 }
 0x51e   : > { %17892 = vst [vmem:[#allocation116_spill] sm:$0xff] %v15537_v21  ;;  %6625 = vmatprep.mubr.f32.mxu1 %v17786_v49  ;;  %v11511_v18 = vpop.eup %11510  ;;  %4810 = vst [vmem:[#allocation2 + $0x310] sm:$0xff] %v11509_v25  ;;  %v4678_v5 = vmul.f32 1.442695, %v4439_v20  ;;  %v4283_v2 = vpop.f32.mrb[182].mxu0 }
 0x51f   : > { %4811 = vst [vmem:[#allocation2 + $0x318] sm:$0xff] %v11511_v18  ;;  %11520 = vpow2.f32 %v4676_v16  ;;  %v4442_v62 = vmul.f32 %v15174_v31, %v4283_v2  ;;  %v4285_v21 = vpop.f32.mrb[183].mxu0  ;;  %9799 = vmatmul.mubr.msk.f32.gmra.mrb[32].mxu0 %vm5530_vm8, %v17869_v44 }
 0x520   : > { %v15544_v7 = vpop.f32.mrb[132].mxu1  ;;  %11522 = vpow2.f32 %v4678_v5  ;;  %v4443_v26 = vmul.f32 %v15184_v43, %v4285_v21  ;;  %6056 = vmatprep.mubr.f32.mxu0 %v17786_v49  ;;  %v17896_v5 = vld [vmem:[#allocation135_spill] sm:$0xff] }
 0x521   : > { %v15549_v19 = vpop.f32.mrb[133].mxu1  ;;  %9820 = vmatmul.mubr.msk.f32.gmra.mrb[238].mxu1 %vm5530_vm8, %v14450_v46  ;;  %v11513_v0 = vpop.eup %11512  ;;  %v4684_v20 = vmul.f32 1.442695, %v4442_v62 }
 0x522   : > { %17893 = vst [vmem:[#allocation104_spill] sm:$0xff] %v15549_v19  ;;  %6631 = vmatprep.mubr.f32.mxu1 %v17786_v49  ;;  %v11515_v25 = vpop.eup %11514  ;;  %4814 = vst [vmem:[#allocation2 + $0x330] sm:$0xff] %v11513_v0  ;;  %v4686_v16 = vmul.f32 1.442695, %v4443_v26  ;;  %v4289_v18 = vpop.f32.mrb[184].mxu0 }
 0x523   : > { %4815 = vst [vmem:[#allocation2 + $0x338] sm:$0xff] %v11515_v25  ;;  %11524 = vpow2.f32 %v4684_v20  ;;  %v4446_v2 = vmul.f32 %v15174_v31, %v4289_v18  ;;  %v4291_v19 = vpop.f32.mrb[185].mxu0  ;;  %9800 = vmatmul.mubr.msk.f32.gmra.mrb[34].mxu0 %vm5530_vm8, %v17870_v63 }
 0x524   : > { %v15556_v44 = vpop.f32.mrb[134].mxu1  ;;  %11526 = vpow2.f32 %v4686_v16  ;;  %v4447_v62 = vmul.f32 %v15184_v43, %v4291_v19  ;;  %6062 = vmatprep.mubr.f32.mxu0 %v17786_v49 }
 0x525   : > { %17894 = vst [vmem:[#allocation105_spill] sm:$0xff] %v15556_v44  ;;  %v15561_v21 = vpop.f32.mrb[135].mxu1  ;;  %9821 = vmatmul.mubr.msk.f32.gmra.mrb[240].mxu1 %vm5530_vm8, %v17896_v5  ;;  %v11517_v26 = vpop.eup %11516  ;;  %v4692_v0 = vmul.f32 1.442695, %v4446_v2 }
 0x526   : > { %17895 = vst [vmem:[#allocation115_spill] sm:$0xff] %v15561_v21  ;;  %6637 = vmatprep.mubr.f32.mxu1 %v17786_v49  ;;  %v11519_v20 = vpop.eup %11518  ;;  %4818 = vst [vmem:[#allocation2 + $0x350] sm:$0xff] %v11517_v26  ;;  %v4694_v25 = vmul.f32 1.442695, %v4447_v62  ;;  %v4295_v18 = vpop.f32.mrb[186].mxu0 }
 0x527   : > { %4819 = vst [vmem:[#allocation2 + $0x358] sm:$0xff] %v11519_v20  ;;  %11528 = vpow2.f32 %v4692_v0  ;;  %v4450_v21 = vmul.f32 %v15174_v31, %v4295_v18  ;;  %v4297_v44 = vpop.f32.mrb[187].mxu0  ;;  %9801 = vmatmul.mubr.msk.f32.gmra.mrb[36].mxu0 %vm5530_vm8, %v17871_v42 }
 0x528   : > { %v15568_v63 = vpop.f32.mrb[136].mxu1  ;;  %11530 = vpow2.f32 %v4694_v25  ;;  %v4451_v16 = vmul.f32 %v15184_v43, %v4297_v44  ;;  %6068 = vmatprep.mubr.f32.mxu0 %v17786_v49  ;;  %v17898_v25 = vld [vmem:[#allocation136_spill] sm:$0xff] }
 0x529   : > { %v15573_v19 = vpop.f32.mrb[137].mxu1  ;;  %9822 = vmatmul.mubr.msk.f32.gmra.mrb[242].mxu1 %vm5530_vm8, %v14474_v53  ;;  %v11521_v2 = vpop.eup %11520  ;;  %v4700_v62 = vmul.f32 1.442695, %v4450_v21 }
 0x52a   : > { %17897 = vst [vmem:[#allocation117_spill] sm:$0xff] %v15573_v19  ;;  %6643 = vmatprep.mubr.f32.mxu1 %v17786_v49  ;;  %v11523_v26 = vpop.eup %11522  ;;  %4822 = vst [vmem:[#allocation2 + $0x370] sm:$0xff] %v11521_v2  ;;  %v4702_v0 = vmul.f32 1.442695, %v4451_v16  ;;  %v4301_v20 = vpop.f32.mrb[188].mxu0 }
 0x52b   : > { %4823 = vst [vmem:[#allocation2 + $0x378] sm:$0xff] %v11523_v26  ;;  %11532 = vpow2.f32 %v4700_v62  ;;  %v4454_v18 = vmul.f32 %v15174_v31, %v4301_v20  ;;  %v4303_v19 = vpop.f32.mrb[189].mxu0  ;;  %9802 = vmatmul.mubr.msk.f32.gmra.mrb[38].mxu0 %vm5530_vm8, %v17872_v23 }
 0x52c   : > { %v15580_v42 = vpop.f32.mrb[138].mxu1  ;;  %11534 = vpow2.f32 %v4702_v0  ;;  %v4455_v21 = vmul.f32 %v15184_v43, %v4303_v19  ;;  %6074 = vmatprep.mubr.f32.mxu0 %v17786_v49 }
 0x52d   : > { %v15585_v44 = vpop.f32.mrb[139].mxu1  ;;  %9823 = vmatmul.mubr.msk.f32.gmra.mrb[244].mxu1 %vm5530_vm8, %v17898_v25  ;;  %v11525_v16 = vpop.eup %11524  ;;  %v4708_v2 = vmul.f32 1.442695, %v4454_v18 }
 0x52e   : > { %6649 = vmatprep.mubr.f32.mxu1 %v17786_v49  ;;  %v11527_v62 = vpop.eup %11526  ;;  %4826 = vst [vmem:[#allocation2 + $0x390] sm:$0xff] %v11525_v16  ;;  %v4710_v31 = vmul.f32 1.442695, %v4455_v21  ;;  %v15592_v26 = vpop.f32.mrb[190].mxu0 }
 0x52f   : > { %4827 = vst [vmem:[#allocation2 + $0x398] sm:$0xff] %v11527_v62  ;;  %11536 = vpow2.f32 %v4708_v2  ;;  %v15596_v20 = vpop.f32.mrb[191].mxu0  ;;  %9803 = vmatmul.mubr.msk.f32.gmra.mrb[40].mxu0 %vm5530_vm8, %v17873_v39 }
 0x530   : > { %v15594_v23 = vpop.f32.mrb[140].mxu1  ;;  %11538 = vpow2.f32 %v4710_v31  ;;  %6080 = vmatprep.mubr.f32.mxu0 %v17786_v49 }
 0x531   : > { %v15600_v43 = vpop.f32.mrb[141].mxu1  ;;  %9824 = vmatmul.mubr.msk.f32.gmra.mrb[246].mxu1 %vm5530_vm8, %v14490_v41  ;;  %v11529_v19 = vpop.eup %11528 }
 0x532   : > { %6655 = vmatprep.mubr.f32.mxu1 %v17786_v49  ;;  %v11531_v0 = vpop.eup %11530  ;;  %4830 = vst [vmem:[#allocation2 + $0x3b0] sm:$0xff] %v11529_v19  ;;  %v15606_v18 = vpop.f32.mrb[192].mxu0 }
 0x533   : > { %4831 = vst [vmem:[#allocation2 + $0x3b8] sm:$0xff] %v11531_v0  ;;  %v15610_v16 = vpop.f32.mrb[193].mxu0  ;;  %9804 = vmatmul.mubr.msk.f32.gmra.mrb[42].mxu0 %vm5530_vm8, %v17874_v59 }
 0x534   : > { %v15608_v21 = vpop.f32.mrb[142].mxu1  ;;  %6086 = vmatprep.mubr.f32.mxu0 %v17786_v49 }
 0x535   : > { %v15614_v39 = vpop.f32.mrb[143].mxu1  ;;  %9825 = vmatmul.mubr.msk.f32.gmra.mrb[248].mxu1 %vm5530_vm8, %v14487_v8  ;;  %v11533_v2 = vpop.eup %11532 }
 0x536   : > { %17899 = vst [vmem:[#allocation125_spill] sm:$0xff] %v15614_v39  ;;  %6661 = vmatprep.mubr.f32.mxu1 %v17786_v49  ;;  %v11535_v62 = vpop.eup %11534  ;;  %4834 = vst [vmem:[#allocation2 + $0x3d0] sm:$0xff] %v11533_v2  ;;  %v15620_v31 = vpop.f32.mrb[194].mxu0 }
 0x537   : > { %17900 = vst [vmem:[#allocation101_spill] sm:$0xff] %v15620_v31  ;;  %4835 = vst [vmem:[#allocation2 + $0x3d8] sm:$0xff] %v11535_v62  ;;  %v15624_v0 = vpop.f32.mrb[195].mxu0  ;;  %9805 = vmatmul.mubr.msk.f32.gmra.mrb[44].mxu0 %vm5530_vm8, %v17875_v22 }
 0x538   : > { %v15622_v19 = vpop.f32.mrb[144].mxu1  ;;  %17902 = vst [vmem:[#allocation113_spill] sm:$0xff] %v15624_v0  ;;  %6092 = vmatprep.mubr.f32.mxu0 %v17786_v49 }
 0x539   : > { %17901 = vst [vmem:[#allocation112_spill] sm:$0xff] %v15622_v19  ;;  %v15628_v59 = vpop.f32.mrb[145].mxu1  ;;  %9826 = vmatmul.mubr.msk.f32.gmra.mrb[250].mxu1 %vm5530_vm8, %v14503_v30  ;;  %v11537_v39 = vpop.eup %11536 }
 0x53a   : > { %17903 = vst [vmem:[#allocation124_spill] sm:$0xff] %v15628_v59  ;;  %6667 = vmatprep.mubr.f32.mxu1 %v17786_v49  ;;  %v11539_v2 = vpop.eup %11538  ;;  %4838 = vst [vmem:[#allocation2 + $0x3f0] sm:$0xff] %v11537_v39  ;;  %v15634_v62 = vpop.f32.mrb[196].mxu0  ;;  %v17908_v59 = vld [vmem:[#allocation137_spill] sm:$0xff] }
 0x53b   : > { %17904 = vst [vmem:[#allocation126_spill] sm:$0xff] %v15634_v62  ;;  %4839 = vst [vmem:[#allocation2 + $0x3f8] sm:$0xff] %v11539_v2  ;;  %v15638_v0 = vpop.f32.mrb[197].mxu0  ;;  %9806 = vmatmul.mubr.msk.f32.gmra.mrb[46].mxu0 %vm5530_vm8, %v17876_v45  ;;  %v17913_v45 = vld [vmem:[#allocation139_spill] sm:$0xff] }
 0x53c   : > { %v15636_v19 = vpop.f32.mrb[146].mxu1  ;;  %17906 = vst [vmem:[#allocation109_spill] sm:$0xff] %v15638_v0  ;;  %6098 = vmatprep.mubr.f32.mxu0 %v17786_v49 }
 0x53d   : > { %17905 = vst [vmem:[#allocation122_spill] sm:$0xff] %v15636_v19  ;;  %v15642_v22 = vpop.f32.mrb[147].mxu1  ;;  %9827 = vmatmul.mubr.msk.f32.gmra.mrb[252].mxu1 %vm5530_vm8, %v17908_v59 }
 0x53e   : > { %17907 = vst [vmem:[#allocation131_spill] sm:$0xff] %v15642_v22  ;;  %6673 = vmatprep.mubr.f32.mxu1 %v17786_v49  ;;  %v15648_v39 = vpop.f32.mrb[198].mxu0 }
 0x53f   : > { %17909 = vst [vmem:[#allocation121_spill] sm:$0xff] %v15648_v39  ;;  %v15652_v2 = vpop.f32.mrb[199].mxu0  ;;  %9807 = vmatmul.mubr.msk.f32.gmra.mrb[48].mxu0 %vm5530_vm8, %v17877_v60  ;;  %v17918_v60 = vld [vmem:[#allocation138_spill] sm:$0xff] }
 0x540   : > { %v15650_v62 = vpop.f32.mrb[148].mxu1  ;;  %17911 = vst [vmem:[#allocation130_spill] sm:$0xff] %v15652_v2  ;;  %6104 = vmatprep.mubr.f32.mxu0 %v17786_v49 }
 0x541   : > { %17910 = vst [vmem:[#allocation118_spill] sm:$0xff] %v15650_v62  ;;  %v15656_v0 = vpop.f32.mrb[149].mxu1  ;;  %9828 = vmatmul.mubr.msk.f32.gmra.mrb[254].mxu1 %vm5530_vm8, %v17913_v45 }
 0x542   : > { %17912 = vst [vmem:[#allocation132_spill] sm:$0xff] %v15656_v0  ;;  %6679 = vmatprep.mubr.f32.mxu1 %v17786_v49  ;;  %v15662_v22 = vpop.f32.mrb[200].mxu0 }
 0x543   : > { %17914 = vst [vmem:[#allocation128_spill] sm:$0xff] %v15662_v22  ;;  %v15666_v39 = vpop.f32.mrb[201].mxu0  ;;  %9808 = vmatmul.mubr.msk.f32.gmra.mrb[50].mxu0 %vm5530_vm8, %v17878_v58  ;;  %v17923_v58 = vld [vmem:[#allocation141_spill] sm:$0xff] }
 0x544   : > { %v15664_v19 = vpop.f32.mrb[150].mxu1  ;;  %17916 = vst [vmem:[#allocation133_spill] sm:$0xff] %v15666_v39  ;;  %6110 = vmatprep.mubr.f32.mxu0 %v17786_v49 }
 0x545   : > { %17915 = vst [vmem:[#allocation134_spill] sm:$0xff] %v15664_v19  ;;  %v15670_v2 = vpop.f32.mrb[151].mxu1  ;;  %9829 = vmatmul.mubr.msk.f32.gmra.mrb[0].mxu1 %vm5530_vm8, %v17918_v60 }
 0x546   : > { %17917 = vst [vmem:[#allocation135_spill] sm:$0xff] %v15670_v2  ;;  %6685 = vmatprep.mubr.f32.mxu1 %v17786_v49  ;;  %v15676_v0 = vpop.f32.mrb[202].mxu0 }
 0x547   : > { %17919 = vst [vmem:[#allocation136_spill] sm:$0xff] %v15676_v0  ;;  %v15680_v22 = vpop.f32.mrb[203].mxu0  ;;  %9809 = vmatmul.mubr.msk.f32.gmra.mrb[52].mxu0 %vm5530_vm8, %v17879_v6  ;;  %v17928_v6 = vld [vmem:[#allocation140_spill] sm:$0xff] }
 0x548   : > { %v15678_v62 = vpop.f32.mrb[152].mxu1  ;;  %17921 = vst [vmem:[#allocation139_spill] sm:$0xff] %v15680_v22  ;;  %6116 = vmatprep.mubr.f32.mxu0 %v17786_v49 }
 0x549   : > { %17920 = vst [vmem:[#allocation137_spill] sm:$0xff] %v15678_v62  ;;  %v15684_v39 = vpop.f32.mrb[153].mxu1  ;;  %9830 = vmatmul.mubr.msk.f32.gmra.mrb[2].mxu1 %vm5530_vm8, %v17923_v58 }
 0x54a   : > { %17922 = vst [vmem:[#allocation138_spill] sm:$0xff] %v15684_v39  ;;  %6691 = vmatprep.mubr.f32.mxu1 %v17786_v49  ;;  %v15690_v2 = vpop.f32.mrb[204].mxu0 }
 0x54b   : > { %17924 = vst [vmem:[#allocation141_spill] sm:$0xff] %v15690_v2  ;;  %v15694_v0 = vpop.f32.mrb[205].mxu0  ;;  %9810 = vmatmul.mubr.msk.f32.gmra.mrb[54].mxu0 %vm5530_vm8, %v17881_v61  ;;  %v17933_v61 = vld [vmem:[#allocation143_spill] sm:$0xff] }
 0x54c   : > { %v15692_v19 = vpop.f32.mrb[154].mxu1  ;;  %17926 = vst [vmem:[#allocation157_spill] sm:$0xff] %v15694_v0  ;;  %6122 = vmatprep.mubr.f32.mxu0 %v17786_v49 }
 0x54d   : > { %17925 = vst [vmem:[#allocation156_spill] sm:$0xff] %v15692_v19  ;;  %v15698_v22 = vpop.f32.mrb[155].mxu1  ;;  %9831 = vmatmul.mubr.msk.f32.gmra.mrb[4].mxu1 %vm5530_vm8, %v17928_v6 }
 0x54e   : > { %17927 = vst [vmem:[#allocation158_spill] sm:$0xff] %v15698_v22  ;;  %6697 = vmatprep.mubr.f32.mxu1 %v17786_v49  ;;  %v15704_v39 = vpop.f32.mrb[206].mxu0 }
 0x54f   : > { %17929 = vst [vmem:[#allocation140_spill] sm:$0xff] %v15704_v39  ;;  %v15708_v2 = vpop.f32.mrb[207].mxu0  ;;  %9811 = vmatmul.mubr.msk.f32.gmra.mrb[56].mxu0 %vm5530_vm8, %v17884_v27  ;;  %v17938_v27 = vld [vmem:[#allocation142_spill] sm:$0xff] }
 0x550   : > { %v15706_v62 = vpop.f32.mrb[156].mxu1  ;;  %17931 = vst [vmem:[#allocation160_spill] sm:$0xff] %v15708_v2  ;;  %6128 = vmatprep.mubr.f32.mxu0 %v17786_v49 }
 0x551   : > { %17930 = vst [vmem:[#allocation159_spill] sm:$0xff] %v15706_v62  ;;  %v15712_v0 = vpop.f32.mrb[157].mxu1  ;;  %9832 = vmatmul.mubr.msk.f32.gmra.mrb[6].mxu1 %vm5530_vm8, %v17933_v61 }
 0x552   : > { %17932 = vst [vmem:[#allocation161_spill] sm:$0xff] %v15712_v0  ;;  %6703 = vmatprep.mubr.f32.mxu1 %v17786_v49  ;;  %v15718_v22 = vpop.f32.mrb[208].mxu0 }
 0x553   : > { %17934 = vst [vmem:[#allocation143_spill] sm:$0xff] %v15718_v22  ;;  %v15722_v39 = vpop.f32.mrb[209].mxu0  ;;  %9812 = vmatmul.mubr.msk.f32.gmra.mrb[58].mxu0 %vm5530_vm8, %v14384_v10  ;;  %v17943_v10 = vld [vmem:[#allocation145_spill] sm:$0xff] }
 0x554   : > { %v15720_v19 = vpop.f32.mrb[158].mxu1  ;;  %17936 = vst [vmem:[#allocation163_spill] sm:$0xff] %v15722_v39  ;;  %6134 = vmatprep.mubr.f32.mxu0 %v17786_v49 }
 0x555   : > { %17935 = vst [vmem:[#allocation162_spill] sm:$0xff] %v15720_v19  ;;  %v15726_v2 = vpop.f32.mrb[159].mxu1  ;;  %9833 = vmatmul.mubr.msk.f32.gmra.mrb[8].mxu1 %vm5530_vm8, %v17938_v27 }
 0x556   : > { %17937 = vst [vmem:[#allocation164_spill] sm:$0xff] %v15726_v2  ;;  %6709 = vmatprep.mubr.f32.mxu1 %v17786_v49  ;;  %v15732_v0 = vpop.f32.mrb[210].mxu0 }
 0x557   : > { %17939 = vst [vmem:[#allocation142_spill] sm:$0xff] %v15732_v0  ;;  %v15736_v22 = vpop.f32.mrb[211].mxu0  ;;  %9813 = vmatmul.mubr.msk.f32.gmra.mrb[60].mxu0 %vm5530_vm8, %v14379_v4 }
 0x558   : > { %v15734_v62 = vpop.f32.mrb[160].mxu1  ;;  %17941 = vst [vmem:[#allocation166_spill] sm:$0xff] %v15736_v22  ;;  %6846 = vmatprep.mubr.f32.mxu0 %v17786_v49 }
 0x559   : > { %17940 = vst [vmem:[#allocation165_spill] sm:$0xff] %v15734_v62  ;;  %v15740_v39 = vpop.f32.mrb[161].mxu1  ;;  %9834 = vmatmul.mubr.msk.f32.gmra.mrb[10].mxu1 %vm5530_vm8, %v17943_v10  ;;  %v17946_v62 = vld [vmem:[#allocation144_spill] sm:$0xff] }
 0x55a   : > { %17942 = vst [vmem:[#allocation167_spill] sm:$0xff] %v15740_v39  ;;  %6715 = vmatprep.mubr.f32.mxu1 %v17786_v49  ;;  %v15746_v2 = vpop.f32.mrb[212].mxu0 }
 0x55b   : > { %17944 = vst [vmem:[#allocation145_spill] sm:$0xff] %v15746_v2  ;;  %v15748_v0 = vpop.f32.mrb[213].mxu0  ;;  %9846 = vmatmul.mubr.msk.f32.vlgmr.msra.gmra.mrb[62].mxu0 %vm5530_vm8, %v14406_v28 }
 0x55c   : > { %v5693_v19 = vpop.f32.mrb[162].mxu1  ;;  %17945 = vst [vmem:[#allocation168_spill] sm:$0xff] %v15748_v0  ;;  %6852 = vmatprep.mubr.f32.mxu0 %v17786_v49 }
 0x55d   : > { %v6141_v22 = vmul.f32 %v5693_v19, %v15316_v9  ;;  %v5695_v4 = vpop.f32.mrb[163].mxu1  ;;  %9835 = vmatmul.mubr.msk.f32.gmra.mrb[12].mxu1 %vm5530_vm8, %v17946_v62  ;;  %v17947_v19 = vld [vmem:[#allocation147_spill] sm:$0xff] }
 0x55e   : > { %v6142_v39 = vmul.f32 %v5695_v4, %v15327_v24  ;;  %6721 = vmatprep.mubr.f32.mxu1 %v17786_v49  ;;  %v15758_v2 = vpop.f32.mrb[214].mxu0 }
 0x55f   : > { %6269 = vst [vmem:[#allocation3] sm:$0xff] %v6141_v22  ;;  %v15760_v31 = vpop.f32.mrb[215].mxu0  ;;  %9847 = vmatmul.mubr.msk.f32.gmra.mrb[64].mxu0 %vm5530_vm8, %v14403_v40 }
 0x560   : > { %6270 = vst [vmem:[#allocation3 + $0x8] sm:$0xff] %v6142_v39  ;;  %v5699_v0 = vpop.f32.mrb[164].mxu1  ;;  %6858 = vmatprep.mubr.f32.mxu0 %v17786_v49 }
 0x561   : > { %v6145_v28 = vmul.f32 %v5699_v0, %v15340_v12  ;;  %v5701_v9 = vpop.f32.mrb[165].mxu1  ;;  %9836 = vmatmul.mubr.msk.f32.gmra.mrb[14].mxu1 %vm5530_vm8, %v17947_v19  ;;  %v17948_v0 = vld [vmem:[#allocation146_spill] sm:$0xff] }
 0x562   : > { %v6146_v24 = vmul.f32 %v5701_v9, %v15351_v14  ;;  %6727 = vmatprep.mubr.f32.mxu1 %v17786_v49  ;;  %v15770_v22 = vpop.f32.mrb[216].mxu0 }
 0x563   : > { %6273 = vst [vmem:[#allocation3 + $0x20] sm:$0xff] %v6145_v28  ;;  %v15772_v4 = vpop.f32.mrb[217].mxu0  ;;  %9848 = vmatmul.mubr.msk.f32.gmra.mrb[66].mxu0 %vm5530_vm8, %v14423_v48 }
 0x564   : > { %6274 = vst [vmem:[#allocation3 + $0x28] sm:$0xff] %v6146_v24  ;;  %v5705_v39 = vpop.f32.mrb[166].mxu1  ;;  %6864 = vmatprep.mubr.f32.mxu0 %v17786_v49 }
 0x565   : > { %v6149_v40 = vmul.f32 %v5705_v39, %v15364_v51  ;;  %v5707_v12 = vpop.f32.mrb[167].mxu1  ;;  %9837 = vmatmul.mubr.msk.f32.gmra.mrb[16].mxu1 %vm5530_vm8, %v17948_v0  ;;  %v17949_v39 = vld [vmem:[#allocation149_spill] sm:$0xff] }
 0x566   : > { %v6150_v14 = vmul.f32 %v5707_v12, %v15369_v54  ;;  %6733 = vmatprep.mubr.f32.mxu1 %v17786_v49  ;;  %v15782_v28 = vpop.f32.mrb[218].mxu0 }
 0x567   : > { %6277 = vst [vmem:[#allocation3 + $0x40] sm:$0xff] %v6149_v40  ;;  %v15784_v24 = vpop.f32.mrb[219].mxu0  ;;  %9849 = vmatmul.mubr.msk.f32.gmra.mrb[68].mxu0 %vm5530_vm8, %v14418_v56 }
 0x568   : > { %6278 = vst [vmem:[#allocation3 + $0x48] sm:$0xff] %v6150_v14  ;;  %v5711_v9 = vpop.f32.mrb[168].mxu1  ;;  %6870 = vmatprep.mubr.f32.mxu0 %v17786_v49 }
 0x569   : > { %v6153_v51 = vmul.f32 %v5711_v9, %v15376_v34  ;;  %v5713_v48 = vpop.f32.mrb[169].mxu1  ;;  %9838 = vmatmul.mubr.msk.f32.gmra.mrb[18].mxu1 %vm5530_vm8, %v17949_v39  ;;  %v17950_v9 = vld [vmem:[#allocation148_spill] sm:$0xff] }
 0x56a   : > { %v6154_v54 = vmul.f32 %v5713_v48, %v15381_v15  ;;  %6739 = vmatprep.mubr.f32.mxu1 %v17786_v49  ;;  %v15794_v40 = vpop.f32.mrb[220].mxu0 }
 0x56b   : > { %6281 = vst [vmem:[#allocation3 + $0x60] sm:$0xff] %v6153_v51  ;;  %v15796_v14 = vpop.f32.mrb[221].mxu0  ;;  %9850 = vmatmul.mubr.msk.f32.gmra.mrb[70].mxu0 %vm5530_vm8, %v14436_v47 }
 0x56c   : > { %6282 = vst [vmem:[#allocation3 + $0x68] sm:$0xff] %v6154_v54  ;;  %v5717_v12 = vpop.f32.mrb[170].mxu1  ;;  %6876 = vmatprep.mubr.f32.mxu0 %v17786_v49 }
 0x56d   : > { %v6157_v56 = vmul.f32 %v5717_v12, %v15388_v17  ;;  %v5719_v34 = vpop.f32.mrb[171].mxu1  ;;  %9839 = vmatmul.mubr.msk.f32.gmra.mrb[20].mxu1 %vm5530_vm8, %v17950_v9  ;;  %v17951_v12 = vld [vmem:[#allocation151_spill] sm:$0xff] }
 0x56e   : > { %v6158_v15 = vmul.f32 %v5719_v34, %v15393_v1  ;;  %6745 = vmatprep.mubr.f32.mxu1 %v17786_v49  ;;  %v15806_v51 = vpop.f32.mrb[222].mxu0 }
 0x56f   : > { %6285 = vst [vmem:[#allocation3 + $0x80] sm:$0xff] %v6157_v56  ;;  %v15808_v54 = vpop.f32.mrb[223].mxu0  ;;  %9851 = vmatmul.mubr.msk.f32.gmra.mrb[72].mxu0 %vm5530_vm8, %v14433_v57 }
 0x570   : > { %6286 = vst [vmem:[#allocation3 + $0x88] sm:$0xff] %v6158_v15  ;;  %v5723_v48 = vpop.f32.mrb[172].mxu1  ;;  %6882 = vmatprep.mubr.f32.mxu0 %v17786_v49 }
 0x571   : > { %v6161_v47 = vmul.f32 %v5723_v48, %v15400_v52  ;;  %v5725_v17 = vpop.f32.mrb[173].mxu1  ;;  %9840 = vmatmul.mubr.msk.f32.gmra.mrb[22].mxu1 %vm5530_vm8, %v17951_v12  ;;  %v17952_v48 = vld [vmem:[#allocation150_spill] sm:$0xff] }
 0x572   : > { %v6162_v1 = vmul.f32 %v5725_v17, %v15405_v37  ;;  %6751 = vmatprep.mubr.f32.mxu1 %v17786_v49  ;;  %v15818_v56 = vpop.f32.mrb[224].mxu0 }
 0x573   : > { %6289 = vst [vmem:[#allocation3 + $0xa0] sm:$0xff] %v6161_v47  ;;  %v15820_v15 = vpop.f32.mrb[225].mxu0  ;;  %9852 = vmatmul.mubr.msk.f32.gmra.mrb[74].mxu0 %vm5530_vm8, %v14450_v46 }
 0x574   : > { %6290 = vst [vmem:[#allocation3 + $0xa8] sm:$0xff] %v6162_v1  ;;  %v5729_v34 = vpop.f32.mrb[174].mxu1  ;;  %6888 = vmatprep.mubr.f32.mxu0 %v17786_v49 }
 0x575   : > { %v6165_v57 = vmul.f32 %v5729_v34, %v15412_v50  ;;  %v5731_v52 = vpop.f32.mrb[175].mxu1  ;;  %9841 = vmatmul.mubr.msk.f32.gmra.mrb[24].mxu1 %vm5530_vm8, %v17952_v48  ;;  %v17955_v34 = vld [vmem:[#allocation153_spill] sm:$0xff] }
 0x576   : > { %v6166_v37 = vmul.f32 %v5731_v52, %v15417_v38  ;;  %6757 = vmatprep.mubr.f32.mxu1 %v17786_v49  ;;  %v15830_v47 = vpop.f32.mrb[226].mxu0  ;;  %v17956_v38 = vld [vmem:[#allocation40_spill] sm:$0xff] }
 0x577   : > { %6293 = vst [vmem:[#allocation3 + $0xc0] sm:$0xff] %v6165_v57  ;;  %17953 = vst [vmem:[#allocation144_spill] sm:$0xff] %v15830_v47  ;;  %v15832_v1 = vpop.f32.mrb[227].mxu0  ;;  %9853 = vmatmul.mubr.msk.f32.gmra.mrb[76].mxu0 %vm5530_vm8, %v17896_v5  ;;  %v17959_v47 = vld [vmem:[#allocation152_spill] sm:$0xff] }
 0x578   : > { %6294 = vst [vmem:[#allocation3 + $0xc8] sm:$0xff] %v6166_v37  ;;  %v5735_v17 = vpop.f32.mrb[176].mxu1  ;;  %17954 = vst [vmem:[#allocation147_spill] sm:$0xff] %v15832_v1  ;;  %6894 = vmatprep.mubr.f32.mxu0 %v17786_v49 }
 0x579   : > { %v6169_v46 = vmul.f32 %v5735_v17, %v15424_v3  ;;  %v5737_v50 = vpop.f32.mrb[177].mxu1  ;;  %9842 = vmatmul.mubr.msk.f32.gmra.mrb[26].mxu1 %vm5530_vm8, %v17955_v34  ;;  %v17958_v3 = vld [vmem:[#allocation84_spill] sm:$0xff] }
 0x57a   : > { %v6170_v52 = vmul.f32 %v5737_v50, %v17956_v38  ;;  %6763 = vmatprep.mubr.f32.mxu1 %v17786_v49  ;;  %v15842_v57 = vpop.f32.mrb[228].mxu0  ;;  %v17960_v50 = vld [vmem:[#allocation98_spill] sm:$0xff] }
 0x57b   : > { %6297 = vst [vmem:[#allocation3 + $0xe0] sm:$0xff] %v6169_v46  ;;  %v15844_v1 = vpop.f32.mrb[229].mxu0  ;;  %9854 = vmatmul.mubr.msk.f32.gmra.mrb[78].mxu0 %vm5530_vm8, %v14474_v53 }
 0x57c   : > { %6298 = vst [vmem:[#allocation3 + $0xe8] sm:$0xff] %v6170_v52  ;;  %v5741_v37 = vpop.f32.mrb[178].mxu1  ;;  %17957 = vst [vmem:[#allocation146_spill] sm:$0xff] %v15844_v1  ;;  %6900 = vmatprep.mubr.f32.mxu0 %v17786_v49 }
 0x57d   : > { %v6173_v5 = vmul.f32 %v5741_v37, %v17958_v3  ;;  %v5743_v17 = vpop.f32.mrb[179].mxu1  ;;  %9843 = vmatmul.mubr.msk.f32.gmra.mrb[28].mxu1 %vm5530_vm8, %v17959_v47  ;;  %v17963_v3 = vld [vmem:[#allocation155_spill] sm:$0xff] }
 0x57e   : > { %v6174_v38 = vmul.f32 %v5743_v17, %v17960_v50  ;;  %6769 = vmatprep.mubr.f32.mxu1 %v17786_v49  ;;  %v15854_v46 = vpop.f32.mrb[230].mxu0  ;;  %v17964_v17 = vld [vmem:[#allocation111_spill] sm:$0xff] }
 0x57f   : > { %6301 = vst [vmem:[#allocation3 + $0x100] sm:$0xff] %v6173_v5  ;;  %17961 = vst [vmem:[#allocation149_spill] sm:$0xff] %v15854_v46  ;;  %v15856_v1 = vpop.f32.mrb[231].mxu0  ;;  %9855 = vmatmul.mubr.msk.f32.gmra.mrb[80].mxu0 %vm5530_vm8, %v17898_v25 }
 0x580   : > { %6302 = vst [vmem:[#allocation3 + $0x108] sm:$0xff] %v6174_v38  ;;  %v5747_v52 = vpop.f32.mrb[180].mxu1  ;;  %17962 = vst [vmem:[#allocation148_spill] sm:$0xff] %v15856_v1  ;;  %6906 = vmatprep.mubr.f32.mxu0 %v17786_v49 }
 0x581   : > { %v6177_v53 = vmul.f32 %v5747_v52, %v15448_v11  ;;  %v5749_v37 = vpop.f32.mrb[181].mxu1  ;;  %9844 = vmatmul.mubr.msk.f32.gmra.mrb[30].mxu1 %vm5530_vm8, %v17963_v3  ;;  %v17967_v52 = vld [vmem:[#allocation154_spill] sm:$0xff] }
 0x582   : > { %v6178_v50 = vmul.f32 %v5749_v37, %v17964_v17  ;;  %6775 = vmatprep.mubr.f32.mxu1 %v17786_v49  ;;  %v15866_v5 = vpop.f32.mrb[232].mxu0  ;;  %v17968_v37 = vld [vmem:[#allocation96_spill] sm:$0xff] }
 0x583   : > { %6305 = vst [vmem:[#allocation3 + $0x120] sm:$0xff] %v6177_v53  ;;  %17965 = vst [vmem:[#allocation151_spill] sm:$0xff] %v15866_v5  ;;  %v15868_v1 = vpop.f32.mrb[233].mxu0  ;;  %9856 = vmatmul.mubr.msk.f32.gmra.mrb[82].mxu0 %vm5530_vm8, %v14490_v41 }
 0x584   : > { %6306 = vst [vmem:[#allocation3 + $0x128] sm:$0xff] %v6178_v50  ;;  %v5753_v38 = vpop.f32.mrb[182].mxu1  ;;  %17966 = vst [vmem:[#allocation150_spill] sm:$0xff] %v15868_v1  ;;  %6912 = vmatprep.mubr.f32.mxu0 %v17786_v49 }
 0x585   : > { %v6181_v11 = vmul.f32 %v5753_v38, %v15460_v55  ;;  %v5755_v25 = vpop.f32.mrb[183].mxu1  ;;  %9845 = vmatmul.mubr.msk.f32.gmra.mrb[32].mxu1 %vm5530_vm8, %v17967_v52  ;;  %v17969_v38 = vld [vmem:[#allocation108_spill] sm:$0xff] }
 0x586   : > { %v6182_v17 = vmul.f32 %v5755_v25, %v17968_v37  ;;  %v15877_v53 = vpop.f32.mrb[234].mxu0 }
 0x587   : > { %6309 = vst [vmem:[#allocation3 + $0x140] sm:$0xff] %v6181_v11  ;;  %v15879_v5 = vpop.f32.mrb[235].mxu0  ;;  %9857 = vmatmul.mubr.msk.f32.gmra.mrb[84].mxu0 %vm5530_vm8, %v14487_v8 }
 0x588   : > { %6310 = vst [vmem:[#allocation3 + $0x148] sm:$0xff] %v6182_v17  ;;  %v5759_v50 = vpop.f32.mrb[184].mxu1  ;;  %6918 = vmatprep.mubr.f32.mxu0 %v17786_v49 }
 0x589   : > { %v6185_v41 = vmul.f32 %v5759_v50, %v15472_v33  ;;  %v5761_v55 = vpop.f32.mrb[185].mxu1  ;;  %v17970_v33 = vld [vmem:[#allocation95_spill] sm:$0xff] }
 0x58a   : > { %v6186_v1 = vmul.f32 %v5761_v55, %v17969_v38  ;;  %v15886_v46 = vpop.f32.mrb[236].mxu0 }
 0x58b   : > { %6313 = vst [vmem:[#allocation3 + $0x160] sm:$0xff] %v6185_v41  ;;  %v15888_v25 = vpop.f32.mrb[237].mxu0  ;;  %9858 = vmatmul.mubr.msk.f32.gmra.mrb[86].mxu0 %vm5530_vm8, %v14503_v30 }
 0x58c   : > { %6314 = vst [vmem:[#allocation3 + $0x168] sm:$0xff] %v6186_v1  ;;  %v5765_v11 = vpop.f32.mrb[186].mxu1  ;;  %6924 = vmatprep.mubr.f32.mxu0 %v17786_v49 }
 0x58d   : > { %v6189_v37 = vmul.f32 %v5765_v11, %v15484_v32  ;;  %v5767_v8 = vpop.f32.mrb[187].mxu1  ;;  %v17971_v32 = vld [vmem:[#allocation92_spill] sm:$0xff] }
 0x58e   : > { %v6190_v17 = vmul.f32 %v5767_v8, %v17970_v33  ;;  %v15895_v50 = vpop.f32.mrb[238].mxu0 }
 0x58f   : > { %6317 = vst [vmem:[#allocation3 + $0x180] sm:$0xff] %v6189_v37  ;;  %v15897_v55 = vpop.f32.mrb[239].mxu0  ;;  %9859 = vmatmul.mubr.msk.f32.gmra.mrb[88].mxu0 %vm5530_vm8, %v17908_v59 }
 0x590   : > { %6318 = vst [vmem:[#allocation3 + $0x188] sm:$0xff] %v6190_v17  ;;  %v5771_v41 = vpop.f32.mrb[188].mxu1  ;;  %6930 = vmatprep.mubr.f32.mxu0 %v17786_v49 }
 0x591   : > { %v6193_v1 = vmul.f32 %v5771_v41, %v15496_v35  ;;  %v5773_v30 = vpop.f32.mrb[189].mxu1  ;;  %v17972_v35 = vld [vmem:[#allocation107_spill] sm:$0xff] }
 0x592   : > { %v6194_v38 = vmul.f32 %v5773_v30, %v17971_v32  ;;  %v15904_v11 = vpop.f32.mrb[240].mxu0 }
 0x593   : > { %6321 = vst [vmem:[#allocation3 + $0x1a0] sm:$0xff] %v6193_v1  ;;  %v15906_v8 = vpop.f32.mrb[241].mxu0  ;;  %9860 = vmatmul.mubr.msk.f32.gmra.mrb[90].mxu0 %vm5530_vm8, %v17913_v45 }
 0x594   : > { %6322 = vst [vmem:[#allocation3 + $0x1a8] sm:$0xff] %v6194_v38  ;;  %v5777_v37 = vpop.f32.mrb[190].mxu1  ;;  %6936 = vmatprep.mubr.f32.mxu0 %v17786_v49 }
 0x595   : > { %v6197_v33 = vmul.f32 %v5777_v37, %v15508_v13  ;;  %v5779_v59 = vpop.f32.mrb[191].mxu1  ;;  %v17973_v13 = vld [vmem:[#allocation120_spill] sm:$0xff] }
 0x596   : > { %v6198_v17 = vmul.f32 %v5779_v59, %v17972_v35  ;;  %v15913_v41 = vpop.f32.mrb[242].mxu0 }
 0x597   : > { %6325 = vst [vmem:[#allocation3 + $0x1c0] sm:$0xff] %v6197_v33  ;;  %v15915_v30 = vpop.f32.mrb[243].mxu0  ;;  %9861 = vmatmul.mubr.msk.f32.gmra.mrb[92].mxu0 %vm5530_vm8, %v17918_v60 }
 0x598   : > { %6326 = vst [vmem:[#allocation3 + $0x1c8] sm:$0xff] %v6198_v17  ;;  %v5783_v1 = vpop.f32.mrb[192].mxu1  ;;  %6942 = vmatprep.mubr.f32.mxu0 %v17786_v49 }
 0x599   : > { %v6201_v32 = vmul.f32 %v5783_v1, %v15520_v36  ;;  %v5785_v45 = vpop.f32.mrb[193].mxu1  ;;  %v17974_v36 = vld [vmem:[#allocation116_spill] sm:$0xff] }
 0x59a   : > { %v6202_v38 = vmul.f32 %v5785_v45, %v17973_v13  ;;  %v15922_v37 = vpop.f32.mrb[244].mxu0 }
 0x59b   : > { %6329 = vst [vmem:[#allocation3 + $0x1e0] sm:$0xff] %v6201_v32  ;;  %v15924_v59 = vpop.f32.mrb[245].mxu0  ;;  %9862 = vmatmul.mubr.msk.f32.gmra.mrb[94].mxu0 %vm5530_vm8, %v17923_v58 }
 0x59c   : > { %6330 = vst [vmem:[#allocation3 + $0x1e8] sm:$0xff] %v6202_v38  ;;  %v5789_v33 = vpop.f32.mrb[194].mxu1  ;;  %6948 = vmatprep.mubr.f32.mxu0 %v17786_v49 }
 0x59d   : > { %v6205_v35 = vmul.f32 %v5789_v33, %v15532_v29  ;;  %v5791_v60 = vpop.f32.mrb[195].mxu1  ;;  %v17976_v29 = vld [vmem:[#allocation104_spill] sm:$0xff] }
 0x59e   : > { %v6206_v17 = vmul.f32 %v5791_v60, %v17974_v36  ;;  %v15931_v1 = vpop.f32.mrb[246].mxu0  ;;  %v17977_v36 = vld [vmem:[#allocation105_spill] sm:$0xff] }
 0x59f   : > { %6333 = vst [vmem:[#allocation3 + $0x200] sm:$0xff] %v6205_v35  ;;  %v15933_v45 = vpop.f32.mrb[247].mxu0  ;;  %9863 = vmatmul.mubr.msk.f32.gmra.mrb[96].mxu0 %vm5530_vm8, %v17928_v6 }
 0x5a0   : > { %6334 = vst [vmem:[#allocation3 + $0x208] sm:$0xff] %v6206_v17  ;;  %v5795_v32 = vpop.f32.mrb[196].mxu1  ;;  %17975 = vst [vmem:[#allocation153_spill] sm:$0xff] %v15933_v45  ;;  %6954 = vmatprep.mubr.f32.mxu0 %v17786_v49 }
 0x5a1   : > { %v6209_v13 = vmul.f32 %v5795_v32, %v15544_v7  ;;  %v5797_v58 = vpop.f32.mrb[197].mxu1  ;;  %v17978_v7 = vld [vmem:[#allocation115_spill] sm:$0xff] }
 0x5a2   : > { %v6210_v38 = vmul.f32 %v5797_v58, %v17976_v29  ;;  %v15940_v33 = vpop.f32.mrb[248].mxu0 }
 0x5a3   : > { %6337 = vst [vmem:[#allocation3 + $0x220] sm:$0xff] %v6209_v13  ;;  %v15942_v60 = vpop.f32.mrb[249].mxu0  ;;  %9864 = vmatmul.mubr.msk.f32.gmra.mrb[98].mxu0 %vm5530_vm8, %v17933_v61 }
 0x5a4   : > { %6338 = vst [vmem:[#allocation3 + $0x228] sm:$0xff] %v6210_v38  ;;  %v5801_v35 = vpop.f32.mrb[198].mxu1  ;;  %6960 = vmatprep.mubr.f32.mxu0 %v17786_v49  ;;  %v17979_v38 = vld [vmem:[#allocation117_spill] sm:$0xff] }
 0x5a5   : > { %v6213_v17 = vmul.f32 %v5801_v35, %v17977_v36  ;;  %v5803_v6 = vpop.f32.mrb[199].mxu1 }
 0x5a6   : > { %v6214_v32 = vmul.f32 %v5803_v6, %v17978_v7  ;;  %v15949_v45 = vpop.f32.mrb[250].mxu0 }
 0x5a7   : > { %6341 = vst [vmem:[#allocation3 + $0x240] sm:$0xff] %v6213_v17  ;;  %v15951_v58 = vpop.f32.mrb[251].mxu0  ;;  %9865 = vmatmul.mubr.msk.f32.gmra.mrb[100].mxu0 %vm5530_vm8, %v17938_v27 }
 0x5a8   : > { %6342 = vst [vmem:[#allocation3 + $0x248] sm:$0xff] %v6214_v32  ;;  %v5807_v13 = vpop.f32.mrb[200].mxu1  ;;  %6966 = vmatprep.mubr.f32.mxu0 %v17786_v49 }
 0x5a9   : > { %v6217_v29 = vmul.f32 %v5807_v13, %v15568_v63  ;;  %v5809_v61 = vpop.f32.mrb[201].mxu1 }
 0x5aa   : > { %v6218_v35 = vmul.f32 %v5809_v61, %v17979_v38  ;;  %v15958_v36 = vpop.f32.mrb[252].mxu0 }
 0x5ab   : > { %6345 = vst [vmem:[#allocation3 + $0x260] sm:$0xff] %v6217_v29  ;;  %v15960_v6 = vpop.f32.mrb[253].mxu0  ;;  %9866 = vmatmul.mubr.msk.f32.gmra.mrb[102].mxu0 %vm5530_vm8, %v17943_v10 }
 0x5ac   : > { %6346 = vst [vmem:[#allocation3 + $0x268] sm:$0xff] %v6218_v35  ;;  %v5813_v17 = vpop.f32.mrb[202].mxu1  ;;  %6972 = vmatprep.mubr.f32.mxu0 %v17786_v49 }
 0x5ad   : > { %v6221_v7 = vmul.f32 %v5813_v17, %v15580_v42  ;;  %v5815_v27 = vpop.f32.mrb[203].mxu1 }
 0x5ae   : > { %v6222_v63 = vmul.f32 %v5815_v27, %v15585_v44  ;;  %v5950_v32 = vpop.f32.mrb[254].mxu0 }
 0x5af   : > { %6349 = vst [vmem:[#allocation3 + $0x280] sm:$0xff] %v6221_v7  ;;  %v6143_v29 = vmul.f32 %v5950_v32, %v15592_v26  ;;  %v5952_v61 = vpop.f32.mrb[255].mxu0  ;;  %9867 = vmatmul.mubr.msk.f32.gmra.mrb[104].mxu0 %vm5530_vm8, %v17946_v62 }
 0x5b0   : > { %6350 = vst [vmem:[#allocation3 + $0x288] sm:$0xff] %v6222_v63  ;;  %v5819_v13 = vpop.f32.mrb[204].mxu1  ;;  %v6144_v42 = vmul.f32 %v5952_v61, %v15596_v20  ;;  %6978 = vmatprep.mubr.f32.mxu0 %v17786_v49 }
 0x5b1   : > { %v6225_v38 = vmul.f32 %v5819_v13, %v15594_v23  ;;  %v5821_v10 = vpop.f32.mrb[205].mxu1  ;;  %6271 = vst [vmem:[#allocation3 + $0x10] sm:$0xff] %v6143_v29 }
 0x5b2   : > { %v6226_v35 = vmul.f32 %v5821_v10, %v15600_v43  ;;  %6272 = vst [vmem:[#allocation3 + $0x18] sm:$0xff] %v6144_v42  ;;  %v5956_v44 = vpop.f32.mrb[0].mxu0  ;;  %v17980_v43 = vld [vmem:[#allocation125_spill] sm:$0xff]  ;;  %v17984_v10 = vld [vmem:[#allocation124_spill] sm:$0xff] }
 0x5b3   : > { %6353 = vst [vmem:[#allocation3 + $0x2a0] sm:$0xff] %v6225_v38  ;;  %v6147_v26 = vmul.f32 %v5956_v44, %v15606_v18  ;;  %v5958_v7 = vpop.f32.mrb[1].mxu0  ;;  %9868 = vmatmul.mubr.msk.f32.gmra.mrb[106].mxu0 %vm5530_vm8, %v17947_v19  ;;  %v17981_v18 = vld [vmem:[#allocation101_spill] sm:$0xff] }
 0x5b4   : > { %6354 = vst [vmem:[#allocation3 + $0x2a8] sm:$0xff] %v6226_v35  ;;  %v5825_v17 = vpop.f32.mrb[206].mxu1  ;;  %v6148_v20 = vmul.f32 %v5958_v7, %v15610_v16  ;;  %6984 = vmatprep.mubr.f32.mxu0 %v17786_v49  ;;  %v17983_v16 = vld [vmem:[#allocation113_spill] sm:$0xff] }
 0x5b5   : > { %v6229_v23 = vmul.f32 %v5825_v17, %v15608_v21  ;;  %v5827_v62 = vpop.f32.mrb[207].mxu1  ;;  %6275 = vst [vmem:[#allocation3 + $0x30] sm:$0xff] %v6147_v26  ;;  %v17982_v21 = vld [vmem:[#allocation112_spill] sm:$0xff]  ;;  %v17985_v17 = vld [vmem:[#allocation126_spill] sm:$0xff] }
 0x5b6   : > { %v6230_v27 = vmul.f32 %v5827_v62, %v17980_v43  ;;  %6276 = vst [vmem:[#allocation3 + $0x38] sm:$0xff] %v6148_v20  ;;  %v5962_v63 = vpop.f32.mrb[2].mxu0  ;;  %v17987_v20 = vld [vmem:[#allocation109_spill] sm:$0xff] }
 0x5b7   : > { %6357 = vst [vmem:[#allocation3 + $0x2c0] sm:$0xff] %v6229_v23  ;;  %v6151_v13 = vmul.f32 %v5962_v63, %v17981_v18  ;;  %v5964_v29 = vpop.f32.mrb[3].mxu0  ;;  %9869 = vmatmul.mubr.msk.f32.gmra.mrb[108].mxu0 %vm5530_vm8, %v17948_v0  ;;  %v17986_v0 = vld [vmem:[#allocation122_spill] sm:$0xff] }
 0x5b8   : > { %6358 = vst [vmem:[#allocation3 + $0x2c8] sm:$0xff] %v6230_v27  ;;  %v5831_v32 = vpop.f32.mrb[208].mxu1  ;;  %v6152_v38 = vmul.f32 %v5964_v29, %v17983_v16  ;;  %6990 = vmatprep.mubr.f32.mxu0 %v17786_v49  ;;  %v17988_v27 = vld [vmem:[#allocation131_spill] sm:$0xff]  ;;  %v17991_v16 = vld [vmem:[#allocation130_spill] sm:$0xff] }
 0x5b9   : > { %v6233_v19 = vmul.f32 %v5831_v32, %v17982_v21  ;;  %v5833_v61 = vpop.f32.mrb[209].mxu1  ;;  %6279 = vst [vmem:[#allocation3 + $0x50] sm:$0xff] %v6151_v13  ;;  %v17989_v13 = vld [vmem:[#allocation121_spill] sm:$0xff] }
 0x5ba   : > { %v6234_v42 = vmul.f32 %v5833_v61, %v17984_v10  ;;  %6280 = vst [vmem:[#allocation3 + $0x58] sm:$0xff] %v6152_v38  ;;  %v5968_v35 = vpop.f32.mrb[4].mxu0  ;;  %v17992_v10 = vld [vmem:[#allocation132_spill] sm:$0xff] }
 0x5bb   : > { %6361 = vst [vmem:[#allocation3 + $0x2e0] sm:$0xff] %v6233_v19  ;;  %v6155_v26 = vmul.f32 %v5968_v35, %v17985_v17  ;;  %v5970_v7 = vpop.f32.mrb[5].mxu0  ;;  %9870 = vmatmul.mubr.msk.f32.gmra.mrb[110].mxu0 %vm5530_vm8, %v17949_v39  ;;  %v17990_v39 = vld [vmem:[#allocation118_spill] sm:$0xff]  ;;  %v17993_v17 = vld [vmem:[#allocation128_spill] sm:$0xff] }
 0x5bc   : > { %6362 = vst [vmem:[#allocation3 + $0x2e8] sm:$0xff] %v6234_v42  ;;  %v5837_v44 = vpop.f32.mrb[210].mxu1  ;;  %v6156_v43 = vmul.f32 %v5970_v7, %v17987_v20  ;;  %6996 = vmatprep.mubr.f32.mxu0 %v17786_v49 }
 0x5bd   : > { %v6237_v23 = vmul.f32 %v5837_v44, %v17986_v0  ;;  %v5839_v62 = vpop.f32.mrb[211].mxu1  ;;  %6283 = vst [vmem:[#allocation3 + $0x70] sm:$0xff] %v6155_v26 }
 0x5be   : > { %v6238_v63 = vmul.f32 %v5839_v62, %v17988_v27  ;;  %6284 = vst [vmem:[#allocation3 + $0x78] sm:$0xff] %v6156_v43  ;;  %v5974_v32 = vpop.f32.mrb[6].mxu0  ;;  %v17995_v62 = vld [vmem:[#allocation133_spill] sm:$0xff]  ;;  %v17996_v43 = vld [vmem:[#allocation135_spill] sm:$0xff] }
 0x5bf   : > { %6365 = vst [vmem:[#allocation3 + $0x300] sm:$0xff] %v6237_v23  ;;  %v6159_v29 = vmul.f32 %v5974_v32, %v17989_v13  ;;  %v5976_v21 = vpop.f32.mrb[7].mxu0  ;;  %9871 = vmatmul.mubr.msk.f32.gmra.mrb[112].mxu0 %vm5530_vm8, %v17950_v9  ;;  %v17994_v9 = vld [vmem:[#allocation134_spill] sm:$0xff] }
 0x5c0   : > { %6366 = vst [vmem:[#allocation3 + $0x308] sm:$0xff] %v6238_v63  ;;  %v5843_v18 = vpop.f32.mrb[212].mxu1  ;;  %v6160_v38 = vmul.f32 %v5976_v21, %v17991_v16  ;;  %7002 = vmatprep.mubr.f32.mxu0 %v17786_v49  ;;  %v18000_v16 = vld [vmem:[#allocation138_spill] sm:$0xff] }
 0x5c1   : > { %v6241_v19 = vmul.f32 %v5843_v18, %v17990_v39  ;;  %v5845_v61 = vpop.f32.mrb[213].mxu1  ;;  %6287 = vst [vmem:[#allocation3 + $0x90] sm:$0xff] %v6159_v29  ;;  %v17997_v18 = vld [vmem:[#allocation136_spill] sm:$0xff] }
 0x5c2   : > { %v6242_v42 = vmul.f32 %v5845_v61, %v17992_v10  ;;  %6288 = vst [vmem:[#allocation3 + $0x98] sm:$0xff] %v6160_v38  ;;  %v5980_v35 = vpop.f32.mrb[8].mxu0 }
 0x5c3   : > { %6369 = vst [vmem:[#allocation3 + $0x320] sm:$0xff] %v6241_v19  ;;  %v6163_v26 = vmul.f32 %v5980_v35, %v17993_v17  ;;  %v5982_v7 = vpop.f32.mrb[9].mxu0  ;;  %9872 = vmatmul.mubr.msk.f32.gmra.mrb[114].mxu0 %vm5530_vm8, %v17951_v12  ;;  %v17998_v12 = vld [vmem:[#allocation137_spill] sm:$0xff]  ;;  %v17999_v19 = vld [vmem:[#allocation139_spill] sm:$0xff] }
 0x5c4   : > { %6370 = vst [vmem:[#allocation3 + $0x328] sm:$0xff] %v6242_v42  ;;  %v5849_v44 = vpop.f32.mrb[214].mxu1  ;;  %v6164_v20 = vmul.f32 %v5982_v7, %v17995_v62  ;;  %7008 = vmatprep.mubr.f32.mxu0 %v17786_v49  ;;  %v18001_v35 = vld [vmem:[#allocation141_spill] sm:$0xff] }
 0x5c5   : > { %v6245_v0 = vmul.f32 %v5849_v44, %v17994_v9  ;;  %v5851_v23 = vpop.f32.mrb[215].mxu1  ;;  %6291 = vst [vmem:[#allocation3 + $0xb0] sm:$0xff] %v6163_v26  ;;  %v18003_v9 = vld [vmem:[#allocation157_spill] sm:$0xff] }
 0x5c6   : > { %v6246_v27 = vmul.f32 %v5851_v23, %v17996_v43  ;;  %6292 = vst [vmem:[#allocation3 + $0xb8] sm:$0xff] %v6164_v20  ;;  %v5986_v63 = vpop.f32.mrb[10].mxu0  ;;  %v18004_v23 = vld [vmem:[#allocation158_spill] sm:$0xff] }
 0x5c7   : > { %6373 = vst [vmem:[#allocation3 + $0x340] sm:$0xff] %v6245_v0  ;;  %v6167_v13 = vmul.f32 %v5986_v63, %v17997_v18  ;;  %v5988_v29 = vpop.f32.mrb[11].mxu0  ;;  %9873 = vmatmul.mubr.msk.f32.gmra.mrb[116].mxu0 %vm5530_vm8, %v17952_v48  ;;  %v18002_v48 = vld [vmem:[#allocation156_spill] sm:$0xff] }
 0x5c8   : > { %6374 = vst [vmem:[#allocation3 + $0x348] sm:$0xff] %v6246_v27  ;;  %v5855_v32 = vpop.f32.mrb[216].mxu1  ;;  %v6168_v61 = vmul.f32 %v5988_v29, %v17999_v19  ;;  %7014 = vmatprep.mubr.f32.mxu0 %v17786_v49  ;;  %v18005_v27 = vld [vmem:[#allocation140_spill] sm:$0xff] }
 0x5c9   : > { %v6249_v21 = vmul.f32 %v5855_v32, %v17998_v12  ;;  %v5857_v39 = vpop.f32.mrb[217].mxu1  ;;  %6295 = vst [vmem:[#allocation3 + $0xd0] sm:$0xff] %v6167_v13  ;;  %v18007_v29 = vld [vmem:[#allocation160_spill] sm:$0xff] }
 0x5ca   : > { %v6250_v38 = vmul.f32 %v5857_v39, %v18000_v16  ;;  %6296 = vst [vmem:[#allocation3 + $0xd8] sm:$0xff] %v6168_v61  ;;  %v5992_v10 = vpop.f32.mrb[12].mxu0  ;;  %v18009_v16 = vld [vmem:[#allocation143_spill] sm:$0xff] }
 0x5cb   : > { %6377 = vst [vmem:[#allocation3 + $0x360] sm:$0xff] %v6249_v21  ;;  %v6171_v44 = vmul.f32 %v5992_v10, %v18001_v35  ;;  %v5994_v17 = vpop.f32.mrb[13].mxu0  ;;  %9874 = vmatmul.mubr.msk.f32.gmra.mrb[118].mxu0 %vm5530_vm8, %v17955_v34  ;;  %v18006_v34 = vld [vmem:[#allocation159_spill] sm:$0xff]  ;;  %v18008_v21 = vld [vmem:[#allocation161_spill] sm:$0xff] }
 0x5cc   : > { %6378 = vst [vmem:[#allocation3 + $0x368] sm:$0xff] %v6250_v38  ;;  %v5861_v42 = vpop.f32.mrb[218].mxu1  ;;  %v6172_v0 = vmul.f32 %v5994_v17, %v18003_v9  ;;  %7020 = vmatprep.mubr.f32.mxu0 %v17786_v49 }
 0x5cd   : > { %v6253_v26 = vmul.f32 %v5861_v42, %v18002_v48  ;;  %v5863_v7 = vpop.f32.mrb[219].mxu1  ;;  %6299 = vst [vmem:[#allocation3 + $0xf0] sm:$0xff] %v6171_v44  ;;  %v18011_v44 = vld [vmem:[#allocation163_spill] sm:$0xff]  ;;  %v18012_v48 = vld [vmem:[#allocation164_spill] sm:$0xff] }
 0x5ce   : > { %v6254_v62 = vmul.f32 %v5863_v7, %v18004_v23  ;;  %6300 = vst [vmem:[#allocation3 + $0xf8] sm:$0xff] %v6172_v0  ;;  %v5998_v20 = vpop.f32.mrb[14].mxu0  ;;  %v18013_v0 = vld [vmem:[#allocation142_spill] sm:$0xff] }
 0x5cf   : > { %6381 = vst [vmem:[#allocation3 + $0x380] sm:$0xff] %v6253_v26  ;;  %v6175_v63 = vmul.f32 %v5998_v20, %v18005_v27  ;;  %v6000_v32 = vpop.f32.mrb[15].mxu0  ;;  %9875 = vmatmul.mubr.msk.f32.gmra.mrb[120].mxu0 %vm5530_vm8, %v17959_v47  ;;  %v18010_v47 = vld [vmem:[#allocation162_spill] sm:$0xff] }
 0x5d0   : > { %6382 = vst [vmem:[#allocation3 + $0x388] sm:$0xff] %v6254_v62  ;;  %v5867_v43 = vpop.f32.mrb[220].mxu1  ;;  %v6176_v12 = vmul.f32 %v6000_v32, %v18007_v29  ;;  %7026 = vmatprep.mubr.f32.mxu0 %v17786_v49  ;;  %v18015_v27 = vld [vmem:[#allocation166_spill] sm:$0xff] }
 0x5d1   : > { %v6257_v18 = vmul.f32 %v5867_v43, %v18006_v34  ;;  %v5869_v13 = vpop.f32.mrb[221].mxu1  ;;  %6303 = vst [vmem:[#allocation3 + $0x110] sm:$0xff] %v6175_v63 }
 0x5d2   : > { %v6258_v39 = vmul.f32 %v5869_v13, %v18008_v21  ;;  %6304 = vst [vmem:[#allocation3 + $0x118] sm:$0xff] %v6176_v12  ;;  %v6004_v19 = vpop.f32.mrb[16].mxu0  ;;  %v18017_v13 = vld [vmem:[#allocation145_spill] sm:$0xff] }
 0x5d3   : > { %6385 = vst [vmem:[#allocation3 + $0x3a0] sm:$0xff] %v6257_v18  ;;  %v6179_v38 = vmul.f32 %v6004_v19, %v18009_v16  ;;  %v6006_v10 = vpop.f32.mrb[17].mxu0  ;;  %9876 = vmatmul.mubr.msk.f32.gmra.mrb[122].mxu0 %vm5530_vm8, %v17963_v3  ;;  %v18014_v3 = vld [vmem:[#allocation165_spill] sm:$0xff] }
 0x5d4   : > { %6386 = vst [vmem:[#allocation3 + $0x3a8] sm:$0xff] %v6258_v39  ;;  %v5873_v61 = vpop.f32.mrb[222].mxu1  ;;  %v6180_v17 = vmul.f32 %v6006_v10, %v18011_v44  ;;  %7032 = vmatprep.mubr.f32.mxu0 %v17786_v49  ;;  %v18016_v49 = vld [vmem:[#allocation167_spill] sm:$0xff]  ;;  %v18018_v39 = vld [vmem:[#allocation168_spill] sm:$0xff] }
 0x5d5   : > { %v6261_v42 = vmul.f32 %v5873_v61, %v18010_v47  ;;  %v5875_v35 = vpop.f32.mrb[223].mxu1  ;;  %6307 = vst [vmem:[#allocation3 + $0x130] sm:$0xff] %v6179_v38 }
 0x5d6   : > { %v6262_v26 = vmul.f32 %v5875_v35, %v18012_v48  ;;  %6308 = vst [vmem:[#allocation3 + $0x138] sm:$0xff] %v6180_v17  ;;  %v6010_v7 = vpop.f32.mrb[18].mxu0 }
 0x5d7   : > { %6389 = vst [vmem:[#allocation3 + $0x3c0] sm:$0xff] %v6261_v42  ;;  %v6183_v23 = vmul.f32 %v6010_v7, %v18013_v0  ;;  %v6012_v62 = vpop.f32.mrb[19].mxu0  ;;  %9877 = vmatmul.mubr.msk.f32.gmra.mrb[124].mxu0 %vm5530_vm8, %v17967_v52 }
 0x5d8   : > { %6390 = vst [vmem:[#allocation3 + $0x3c8] sm:$0xff] %v6262_v26  ;;  %v5879_v9 = vpop.f32.mrb[224].mxu1  ;;  %v6184_v63 = vmul.f32 %v6012_v62, %v18015_v27 }
 0x5d9   : > { %v6265_v20 = vmul.f32 %v5879_v9, %v18014_v3  ;;  %v5881_v43 = vpop.f32.mrb[225].mxu1  ;;  %6311 = vst [vmem:[#allocation3 + $0x150] sm:$0xff] %v6183_v23 }
 0x5da   : > { %v6266_v32 = vmul.f32 %v5881_v43, %v18016_v49  ;;  %6312 = vst [vmem:[#allocation3 + $0x158] sm:$0xff] %v6184_v63  ;;  %v6016_v34 = vpop.f32.mrb[20].mxu0 }
 0x5db   : > { %6393 = vst [vmem:[#allocation3 + $0x3e0] sm:$0xff] %v6265_v20  ;;  %v6187_v29 = vmul.f32 %v6016_v34, %v18017_v13  ;;  %v6018_v12 = vpop.f32.mrb[21].mxu0 }
 0x5dc   : > { %6394 = vst [vmem:[#allocation3 + $0x3e8] sm:$0xff] %v6266_v32  ;;  %v6591_v18 = vpop.f32.mrb[226].mxu1  ;;  %v6188_v52 = vmul.f32 %v6018_v12, %v18018_v39 }
 0x5dd   : > { %7039 = vst [vmem:[#allocation4] sm:$0xff] %v6591_v18  ;;  %v6593_v21 = vpop.f32.mrb[227].mxu1  ;;  %6315 = vst [vmem:[#allocation3 + $0x170] sm:$0xff] %v6187_v29 }
 0x5de   : > { %7040 = vst [vmem:[#allocation4 + $0x8] sm:$0xff] %v6593_v21  ;;  %6316 = vst [vmem:[#allocation3 + $0x178] sm:$0xff] %v6188_v52  ;;  %v6022_v19 = vpop.f32.mrb[22].mxu0  ;;  %v18019_v21 = vld [vmem:[#allocation144_spill] sm:$0xff] }
 0x5df   : > { %v6191_v16 = vmul.f32 %v6022_v19, %v15758_v2  ;;  %v6024_v38 = vpop.f32.mrb[23].mxu0  ;;  %v18020_v19 = vld [vmem:[#allocation147_spill] sm:$0xff] }
 0x5e0   : > { %v6597_v61 = vpop.f32.mrb[228].mxu1  ;;  %v6192_v47 = vmul.f32 %v6024_v38, %v15760_v31 }
 0x5e1   : > { %7043 = vst [vmem:[#allocation4 + $0x20] sm:$0xff] %v6597_v61  ;;  %v6599_v10 = vpop.f32.mrb[229].mxu1  ;;  %6319 = vst [vmem:[#allocation3 + $0x190] sm:$0xff] %v6191_v16 }
 0x5e2   : > { %7044 = vst [vmem:[#allocation4 + $0x28] sm:$0xff] %v6599_v10  ;;  %6320 = vst [vmem:[#allocation3 + $0x198] sm:$0xff] %v6192_v47  ;;  %v6028_v42 = vpop.f32.mrb[24].mxu0  ;;  %v18021_v47 = vld [vmem:[#allocation146_spill] sm:$0xff] }
 0x5e3   : > { %v6195_v44 = vmul.f32 %v6028_v42, %v15770_v22  ;;  %v6030_v17 = vpop.f32.mrb[25].mxu0 }
 0x5e4   : > { %v6603_v35 = vpop.f32.mrb[230].mxu1  ;;  %v6196_v26 = vmul.f32 %v6030_v17, %v15772_v4  ;;  %v18022_v17 = vld [vmem:[#allocation149_spill] sm:$0xff] }
 0x5e5   : > { %7047 = vst [vmem:[#allocation4 + $0x40] sm:$0xff] %v6603_v35  ;;  %v6605_v48 = vpop.f32.mrb[231].mxu1  ;;  %6323 = vst [vmem:[#allocation3 + $0x1b0] sm:$0xff] %v6195_v44 }
 0x5e6   : > { %7048 = vst [vmem:[#allocation4 + $0x48] sm:$0xff] %v6605_v48  ;;  %6324 = vst [vmem:[#allocation3 + $0x1b8] sm:$0xff] %v6196_v26  ;;  %v6034_v2 = vpop.f32.mrb[26].mxu0 }
 0x5e7   : > { %v6199_v9 = vmul.f32 %v6034_v2, %v15782_v28  ;;  %v6036_v31 = vpop.f32.mrb[27].mxu0 }
 0x5e8   : > { %v6609_v7 = vpop.f32.mrb[232].mxu1  ;;  %v6200_v23 = vmul.f32 %v6036_v31, %v15784_v24 }
 0x5e9   : > { %7051 = vst [vmem:[#allocation4 + $0x60] sm:$0xff] %v6609_v7  ;;  %v6611_v0 = vpop.f32.mrb[233].mxu1  ;;  %6327 = vst [vmem:[#allocation3 + $0x1d0] sm:$0xff] %v6199_v9  ;;  %v18023_v7 = vld [vmem:[#allocation148_spill] sm:$0xff] }
 0x5ea   : > { %7052 = vst [vmem:[#allocation4 + $0x68] sm:$0xff] %v6611_v0  ;;  %6328 = vst [vmem:[#allocation3 + $0x1d8] sm:$0xff] %v6200_v23  ;;  %v6040_v22 = vpop.f32.mrb[28].mxu0  ;;  %v18024_v0 = vld [vmem:[#allocation151_spill] sm:$0xff] }
 0x5eb   : > { %v6203_v3 = vmul.f32 %v6040_v22, %v15794_v40  ;;  %v6042_v4 = vpop.f32.mrb[29].mxu0 }
 0x5ec   : > { %v6615_v62 = vpop.f32.mrb[234].mxu1  ;;  %v6204_v43 = vmul.f32 %v6042_v4, %v15796_v14 }
 0x5ed   : > { %7055 = vst [vmem:[#allocation4 + $0x80] sm:$0xff] %v6615_v62  ;;  %v6617_v20 = vpop.f32.mrb[235].mxu1  ;;  %6331 = vst [vmem:[#allocation3 + $0x1f0] sm:$0xff] %v6203_v3  ;;  %v18025_v3 = vld [vmem:[#allocation150_spill] sm:$0xff] }
 0x5ee   : > { %7056 = vst [vmem:[#allocation4 + $0x88] sm:$0xff] %v6617_v20  ;;  %6332 = vst [vmem:[#allocation3 + $0x1f8] sm:$0xff] %v6204_v43  ;;  %v6046_v28 = vpop.f32.mrb[30].mxu0 }
 0x5ef   : > { %v6207_v63 = vmul.f32 %v6046_v28, %v15806_v51  ;;  %v6048_v24 = vpop.f32.mrb[31].mxu0 }
 0x5f0   : > { %v6621_v27 = vpop.f32.mrb[236].mxu1  ;;  %v6208_v32 = vmul.f32 %v6048_v24, %v15808_v54 }
 0x5f1   : > { %7059 = vst [vmem:[#allocation4 + $0xa0] sm:$0xff] %v6621_v27  ;;  %v6623_v49 = vpop.f32.mrb[237].mxu1  ;;  %6335 = vst [vmem:[#allocation3 + $0x210] sm:$0xff] %v6207_v63 }
 0x5f2   : > { %7060 = vst [vmem:[#allocation4 + $0xa8] sm:$0xff] %v6623_v49  ;;  %6336 = vst [vmem:[#allocation3 + $0x218] sm:$0xff] %v6208_v32  ;;  %v6052_v40 = vpop.f32.mrb[32].mxu0 }
 0x5f3   : > { %v6211_v18 = vmul.f32 %v6052_v40, %v15818_v56  ;;  %v6054_v14 = vpop.f32.mrb[33].mxu0 }
 0x5f4   : > { %v6627_v34 = vpop.f32.mrb[238].mxu1  ;;  %v6212_v29 = vmul.f32 %v6054_v14, %v15820_v15 }
 0x5f5   : > { %7063 = vst [vmem:[#allocation4 + $0xc0] sm:$0xff] %v6627_v34  ;;  %v6629_v13 = vpop.f32.mrb[239].mxu1  ;;  %6339 = vst [vmem:[#allocation3 + $0x230] sm:$0xff] %v6211_v18 }
 0x5f6   : > { %7064 = vst [vmem:[#allocation4 + $0xc8] sm:$0xff] %v6629_v13  ;;  %6340 = vst [vmem:[#allocation3 + $0x238] sm:$0xff] %v6212_v29  ;;  %v6058_v51 = vpop.f32.mrb[34].mxu0 }
 0x5f7   : > { %v6215_v39 = vmul.f32 %v6058_v51, %v18019_v21  ;;  %v6060_v54 = vpop.f32.mrb[35].mxu0 }
 0x5f8   : > { %v6633_v12 = vpop.f32.mrb[240].mxu1  ;;  %v6216_v61 = vmul.f32 %v6060_v54, %v18020_v19 }
 0x5f9   : > { %7067 = vst [vmem:[#allocation4 + $0xe0] sm:$0xff] %v6633_v12  ;;  %v6635_v52 = vpop.f32.mrb[241].mxu1  ;;  %6343 = vst [vmem:[#allocation3 + $0x250] sm:$0xff] %v6215_v39 }
 0x5fa   : > { %7068 = vst [vmem:[#allocation4 + $0xe8] sm:$0xff] %v6635_v52  ;;  %6344 = vst [vmem:[#allocation3 + $0x258] sm:$0xff] %v6216_v61  ;;  %v6064_v56 = vpop.f32.mrb[36].mxu0 }
 0x5fb   : > { %v6219_v38 = vmul.f32 %v6064_v56, %v15842_v57  ;;  %v6066_v15 = vpop.f32.mrb[37].mxu0 }
 0x5fc   : > { %v6639_v16 = vpop.f32.mrb[242].mxu1  ;;  %v6220_v42 = vmul.f32 %v6066_v15, %v18021_v47 }
 0x5fd   : > { %7071 = vst [vmem:[#allocation4 + $0x100] sm:$0xff] %v6639_v16  ;;  %v6641_v10 = vpop.f32.mrb[243].mxu1  ;;  %6347 = vst [vmem:[#allocation3 + $0x270] sm:$0xff] %v6219_v38 }
 0x5fe   : > { %7072 = vst [vmem:[#allocation4 + $0x108] sm:$0xff] %v6641_v10  ;;  %6348 = vst [vmem:[#allocation3 + $0x278] sm:$0xff] %v6220_v42  ;;  %v6070_v35 = vpop.f32.mrb[38].mxu0 }
 0x5ff   : > { %v6223_v48 = vmul.f32 %v6070_v35, %v18022_v17  ;;  %v6072_v26 = vpop.f32.mrb[39].mxu0  ;;  %v18026_v17 = vld [vmem:[#allocation153_spill] sm:$0xff] }
 0x600   : > { %v6645_v44 = vpop.f32.mrb[244].mxu1  ;;  %v6224_v9 = vmul.f32 %v6072_v26, %v18023_v7 }
 0x601   : > { %7075 = vst [vmem:[#allocation4 + $0x120] sm:$0xff] %v6645_v44  ;;  %v6647_v2 = vpop.f32.mrb[245].mxu1  ;;  %6351 = vst [vmem:[#allocation3 + $0x290] sm:$0xff] %v6223_v48 }
 0x602   : > { %7076 = vst [vmem:[#allocation4 + $0x128] sm:$0xff] %v6647_v2  ;;  %6352 = vst [vmem:[#allocation3 + $0x298] sm:$0xff] %v6224_v9  ;;  %v6076_v57 = vpop.f32.mrb[40].mxu0 }
 0x603   : > { %v6227_v23 = vmul.f32 %v6076_v57, %v18024_v0  ;;  %v6078_v22 = vpop.f32.mrb[41].mxu0 }
 0x604   : > { %v6651_v31 = vpop.f32.mrb[246].mxu1  ;;  %v6228_v4 = vmul.f32 %v6078_v22, %v18025_v3 }
 0x605   : > { %7079 = vst [vmem:[#allocation4 + $0x140] sm:$0xff] %v6651_v31  ;;  %v6653_v62 = vpop.f32.mrb[247].mxu1  ;;  %6355 = vst [vmem:[#allocation3 + $0x2b0] sm:$0xff] %v6227_v23 }
 0x606   : > { %7080 = vst [vmem:[#allocation4 + $0x148] sm:$0xff] %v6653_v62  ;;  %6356 = vst [vmem:[#allocation3 + $0x2b8] sm:$0xff] %v6228_v4  ;;  %v6082_v20 = vpop.f32.mrb[42].mxu0 }
 0x607   : > { %v6231_v28 = vmul.f32 %v6082_v20, %v15877_v53  ;;  %v6084_v27 = vpop.f32.mrb[43].mxu0 }
 0x608   : > { %v6657_v43 = vpop.f32.mrb[248].mxu1  ;;  %v6232_v24 = vmul.f32 %v6084_v27, %v15879_v5 }
 0x609   : > { %7083 = vst [vmem:[#allocation4 + $0x160] sm:$0xff] %v6657_v43  ;;  %v6659_v63 = vpop.f32.mrb[249].mxu1  ;;  %6359 = vst [vmem:[#allocation3 + $0x2d0] sm:$0xff] %v6231_v28 }
 0x60a   : > { %7084 = vst [vmem:[#allocation4 + $0x168] sm:$0xff] %v6659_v63  ;;  %6360 = vst [vmem:[#allocation3 + $0x2d8] sm:$0xff] %v6232_v24  ;;  %v6088_v49 = vpop.f32.mrb[44].mxu0 }
 0x60b   : > { %v6235_v40 = vmul.f32 %v6088_v49, %v15886_v46  ;;  %v6090_v34 = vpop.f32.mrb[45].mxu0 }
 0x60c   : > { %v6663_v32 = vpop.f32.mrb[250].mxu1  ;;  %v6236_v14 = vmul.f32 %v6090_v34, %v15888_v25 }
 0x60d   : > { %7087 = vst [vmem:[#allocation4 + $0x180] sm:$0xff] %v6663_v32  ;;  %v6665_v18 = vpop.f32.mrb[251].mxu1  ;;  %6363 = vst [vmem:[#allocation3 + $0x2f0] sm:$0xff] %v6235_v40 }
 0x60e   : > { %7088 = vst [vmem:[#allocation4 + $0x188] sm:$0xff] %v6665_v18  ;;  %6364 = vst [vmem:[#allocation3 + $0x2f8] sm:$0xff] %v6236_v14  ;;  %v6094_v53 = vpop.f32.mrb[46].mxu0 }
 0x60f   : > { %v6239_v29 = vmul.f32 %v6094_v53, %v15895_v50  ;;  %v6096_v5 = vpop.f32.mrb[47].mxu0 }
 0x610   : > { %v6669_v13 = vpop.f32.mrb[252].mxu1  ;;  %v6240_v12 = vmul.f32 %v6096_v5, %v15897_v55 }
 0x611   : > { %7091 = vst [vmem:[#allocation4 + $0x1a0] sm:$0xff] %v6669_v13  ;;  %v6671_v51 = vpop.f32.mrb[253].mxu1  ;;  %6367 = vst [vmem:[#allocation3 + $0x310] sm:$0xff] %v6239_v29 }
 0x612   : > { %7092 = vst [vmem:[#allocation4 + $0x1a8] sm:$0xff] %v6671_v51  ;;  %6368 = vst [vmem:[#allocation3 + $0x318] sm:$0xff] %v6240_v12  ;;  %v6100_v46 = vpop.f32.mrb[48].mxu0 }
 0x613   : > { %v6243_v39 = vmul.f32 %v6100_v46, %v15904_v11  ;;  %v6102_v25 = vpop.f32.mrb[49].mxu0 }
 0x614   : > { %v6675_v21 = vpop.f32.mrb[254].mxu1  ;;  %v6244_v52 = vmul.f32 %v6102_v25, %v15906_v8 }
 0x615   : > { %7095 = vst [vmem:[#allocation4 + $0x1c0] sm:$0xff] %v6675_v21  ;;  %v6677_v54 = vpop.f32.mrb[255].mxu1  ;;  %6371 = vst [vmem:[#allocation3 + $0x330] sm:$0xff] %v6243_v39 }
 0x616   : > { %7096 = vst [vmem:[#allocation4 + $0x1c8] sm:$0xff] %v6677_v54  ;;  %6372 = vst [vmem:[#allocation3 + $0x338] sm:$0xff] %v6244_v52  ;;  %v6106_v50 = vpop.f32.mrb[50].mxu0 }
 0x617   : > { %v6247_v61 = vmul.f32 %v6106_v50, %v15913_v41  ;;  %v6108_v55 = vpop.f32.mrb[51].mxu0 }
 0x618   : > { %v6681_v19 = vpop.f32.mrb[0].mxu1  ;;  %v6248_v16 = vmul.f32 %v6108_v55, %v15915_v30 }
 0x619   : > { %7099 = vst [vmem:[#allocation4 + $0x1e0] sm:$0xff] %v6681_v19  ;;  %v6683_v56 = vpop.f32.mrb[1].mxu1  ;;  %6375 = vst [vmem:[#allocation3 + $0x350] sm:$0xff] %v6247_v61 }
 0x61a   : > { %7100 = vst [vmem:[#allocation4 + $0x1e8] sm:$0xff] %v6683_v56  ;;  %6376 = vst [vmem:[#allocation3 + $0x358] sm:$0xff] %v6248_v16  ;;  %v6112_v11 = vpop.f32.mrb[52].mxu0 }
 0x61b   : > { %v6251_v15 = vmul.f32 %v6112_v11, %v15922_v37  ;;  %v6114_v8 = vpop.f32.mrb[53].mxu0 }
 0x61c   : > { %v6687_v38 = vpop.f32.mrb[2].mxu1  ;;  %v6252_v47 = vmul.f32 %v6114_v8, %v15924_v59 }
 0x61d   : > { %7103 = vst [vmem:[#allocation4 + $0x200] sm:$0xff] %v6687_v38  ;;  %v6689_v10 = vpop.f32.mrb[3].mxu1  ;;  %6379 = vst [vmem:[#allocation3 + $0x370] sm:$0xff] %v6251_v15 }
 0x61e   : > { %7104 = vst [vmem:[#allocation4 + $0x208] sm:$0xff] %v6689_v10  ;;  %6380 = vst [vmem:[#allocation3 + $0x378] sm:$0xff] %v6252_v47  ;;  %v6118_v41 = vpop.f32.mrb[54].mxu0 }
 0x61f   : > { %v6255_v35 = vmul.f32 %v6118_v41, %v15931_v1  ;;  %v6120_v30 = vpop.f32.mrb[55].mxu0 }
 0x620   : > { %v6693_v42 = vpop.f32.mrb[4].mxu1  ;;  %v6256_v48 = vmul.f32 %v6120_v30, %v18026_v17 }
 0x621   : > { %7107 = vst [vmem:[#allocation4 + $0x220] sm:$0xff] %v6693_v42  ;;  %v6695_v44 = vpop.f32.mrb[5].mxu1  ;;  %6383 = vst [vmem:[#allocation3 + $0x390] sm:$0xff] %v6255_v35 }
 0x622   : > { %7108 = vst [vmem:[#allocation4 + $0x228] sm:$0xff] %v6695_v44  ;;  %6384 = vst [vmem:[#allocation3 + $0x398] sm:$0xff] %v6256_v48  ;;  %v6124_v37 = vpop.f32.mrb[56].mxu0 }
 0x623   : > { %v6259_v2 = vmul.f32 %v6124_v37, %v15940_v33  ;;  %v6126_v59 = vpop.f32.mrb[57].mxu0 }
 0x624   : > { %v6699_v26 = vpop.f32.mrb[6].mxu1  ;;  %v6260_v9 = vmul.f32 %v6126_v59, %v15942_v60 }
 0x625   : > { %7111 = vst [vmem:[#allocation4 + $0x240] sm:$0xff] %v6699_v26  ;;  %v6701_v7 = vpop.f32.mrb[7].mxu1  ;;  %6387 = vst [vmem:[#allocation3 + $0x3b0] sm:$0xff] %v6259_v2 }
 0x626   : > { %7112 = vst [vmem:[#allocation4 + $0x248] sm:$0xff] %v6701_v7  ;;  %6388 = vst [vmem:[#allocation3 + $0x3b8] sm:$0xff] %v6260_v9  ;;  %v6130_v1 = vpop.f32.mrb[58].mxu0 }
 0x627   : > { %v6263_v31 = vmul.f32 %v6130_v1, %v15949_v45  ;;  %v6132_v0 = vpop.f32.mrb[59].mxu0 }
 0x628   : > { %v6705_v57 = vpop.f32.mrb[8].mxu1  ;;  %v6264_v22 = vmul.f32 %v6132_v0, %v15951_v58 }
 0x629   : > { %7115 = vst [vmem:[#allocation4 + $0x260] sm:$0xff] %v6705_v57  ;;  %v6707_v23 = vpop.f32.mrb[9].mxu1  ;;  %6391 = vst [vmem:[#allocation3 + $0x3d0] sm:$0xff] %v6263_v31 }
 0x62a   : > { %7116 = vst [vmem:[#allocation4 + $0x268] sm:$0xff] %v6707_v23  ;;  %6392 = vst [vmem:[#allocation3 + $0x3d8] sm:$0xff] %v6264_v22  ;;  %v6136_v33 = vpop.f32.mrb[60].mxu0 }
 0x62b   : > { %v6267_v3 = vmul.f32 %v6136_v33, %v15958_v36  ;;  %v6138_v60 = vpop.f32.mrb[61].mxu0 }
 0x62c   : > { %v6711_v62 = vpop.f32.mrb[10].mxu1  ;;  %v6268_v20 = vmul.f32 %v6138_v60, %v15960_v6 }
 0x62d   : > { %7119 = vst [vmem:[#allocation4 + $0x280] sm:$0xff] %v6711_v62  ;;  %v6713_v4 = vpop.f32.mrb[11].mxu1  ;;  %6395 = vst [vmem:[#allocation3 + $0x3f0] sm:$0xff] %v6267_v3 }
 0x62e   : > { %7120 = vst [vmem:[#allocation4 + $0x288] sm:$0xff] %v6713_v4  ;;  %6396 = vst [vmem:[#allocation3 + $0x3f8] sm:$0xff] %v6268_v20  ;;  %v6848_v45 = vpop.f32.mrb[62].mxu0 }
 0x62f   : > { %7041 = vst [vmem:[#allocation4 + $0x10] sm:$0xff] %v6848_v45  ;;  %v6850_v28 = vpop.f32.mrb[63].mxu0 }
 0x630   : > { %v6717_v43 = vpop.f32.mrb[12].mxu1  ;;  %7042 = vst [vmem:[#allocation4 + $0x18] sm:$0xff] %v6850_v28 }
 0x631   : > { %7123 = vst [vmem:[#allocation4 + $0x2a0] sm:$0xff] %v6717_v43  ;;  %v6719_v58 = vpop.f32.mrb[13].mxu1 }
 0x632   : > { %7124 = vst [vmem:[#allocation4 + $0x2a8] sm:$0xff] %v6719_v58  ;;  %v6854_v27 = vpop.f32.mrb[64].mxu0 }
 0x633   : > { %7045 = vst [vmem:[#allocation4 + $0x30] sm:$0xff] %v6854_v27  ;;  %v6856_v36 = vpop.f32.mrb[65].mxu0 }
 0x634   : > { %v6723_v63 = vpop.f32.mrb[14].mxu1  ;;  %7046 = vst [vmem:[#allocation4 + $0x38] sm:$0xff] %v6856_v36 }
 0x635   : > { %7127 = vst [vmem:[#allocation4 + $0x2c0] sm:$0xff] %v6723_v63  ;;  %v6725_v24 = vpop.f32.mrb[15].mxu1 }
 0x636   : > { %7128 = vst [vmem:[#allocation4 + $0x2c8] sm:$0xff] %v6725_v24  ;;  %v6860_v6 = vpop.f32.mrb[66].mxu0 }
 0x637   : > { %7049 = vst [vmem:[#allocation4 + $0x50] sm:$0xff] %v6860_v6  ;;  %v6862_v32 = vpop.f32.mrb[67].mxu0 }
 0x638   : > { %v6729_v49 = vpop.f32.mrb[16].mxu1  ;;  %7050 = vst [vmem:[#allocation4 + $0x58] sm:$0xff] %v6862_v32 }
 0x639   : > { %7131 = vst [vmem:[#allocation4 + $0x2e0] sm:$0xff] %v6729_v49  ;;  %v6731_v40 = vpop.f32.mrb[17].mxu1 }
 0x63a   : > { %7132 = vst [vmem:[#allocation4 + $0x2e8] sm:$0xff] %v6731_v40  ;;  %v6866_v34 = vpop.f32.mrb[68].mxu0 }
 0x63b   : > { %7053 = vst [vmem:[#allocation4 + $0x70] sm:$0xff] %v6866_v34  ;;  %v6868_v14 = vpop.f32.mrb[69].mxu0 }
 0x63c   : > { %v6735_v18 = vpop.f32.mrb[18].mxu1  ;;  %7054 = vst [vmem:[#allocation4 + $0x78] sm:$0xff] %v6868_v14 }
 0x63d   : > { %7135 = vst [vmem:[#allocation4 + $0x300] sm:$0xff] %v6735_v18  ;;  %v6737_v53 = vpop.f32.mrb[19].mxu1 }
 0x63e   : > { %7136 = vst [vmem:[#allocation4 + $0x308] sm:$0xff] %v6737_v53  ;;  %v6872_v13 = vpop.f32.mrb[70].mxu0 }
 0x63f   : > { %7057 = vst [vmem:[#allocation4 + $0x90] sm:$0xff] %v6872_v13  ;;  %v6874_v5 = vpop.f32.mrb[71].mxu0 }
 0x640   : > { %v6741_v29 = vpop.f32.mrb[20].mxu1  ;;  %7058 = vst [vmem:[#allocation4 + $0x98] sm:$0xff] %v6874_v5 }
 0x641   : > { %7139 = vst [vmem:[#allocation4 + $0x320] sm:$0xff] %v6741_v29  ;;  %v6743_v51 = vpop.f32.mrb[21].mxu1 }
 0x642   : > { %7140 = vst [vmem:[#allocation4 + $0x328] sm:$0xff] %v6743_v51  ;;  %v6878_v12 = vpop.f32.mrb[72].mxu0 }
 0x643   : > { %7061 = vst [vmem:[#allocation4 + $0xb0] sm:$0xff] %v6878_v12  ;;  %v6880_v21 = vpop.f32.mrb[73].mxu0 }
 0x644   : > { %v6747_v46 = vpop.f32.mrb[22].mxu1  ;;  %7062 = vst [vmem:[#allocation4 + $0xb8] sm:$0xff] %v6880_v21  ;;  %v16085_v21 = vmov 0.0  }
 0x645   : > { %7143 = vst [vmem:[#allocation4 + $0x340] sm:$0xff] %v6747_v46  ;;  %v6749_v39 = vpop.f32.mrb[23].mxu1 }
 0x646   : > { %7144 = vst [vmem:[#allocation4 + $0x348] sm:$0xff] %v6749_v39  ;;  %v6884_v25 = vpop.f32.mrb[74].mxu0  ;;  %v16087_v39 = vmov 0.0  }
 0x647   : > { %7065 = vst [vmem:[#allocation4 + $0xd0] sm:$0xff] %v6884_v25  ;;  %v6886_v52 = vpop.f32.mrb[75].mxu0  ;;  %v16089_v25 = vmov 0.0  }
 0x648   : > { %v6753_v54 = vpop.f32.mrb[24].mxu1  ;;  %7066 = vst [vmem:[#allocation4 + $0xd8] sm:$0xff] %v6886_v52 }
 0x649   : > { %7147 = vst [vmem:[#allocation4 + $0x360] sm:$0xff] %v6753_v54  ;;  %v6755_v50 = vpop.f32.mrb[25].mxu1  ;;  %v16091_v54 = vmov 0.0  }
 0x64a   : > { %7148 = vst [vmem:[#allocation4 + $0x368] sm:$0xff] %v6755_v50  ;;  %v6890_v19 = vpop.f32.mrb[76].mxu0 }
 0x64b   : > { %7069 = vst [vmem:[#allocation4 + $0xf0] sm:$0xff] %v6890_v19  ;;  %v6892_v55 = vpop.f32.mrb[77].mxu0 }
 0x64c   : > { %v6759_v61 = vpop.f32.mrb[26].mxu1  ;;  %7070 = vst [vmem:[#allocation4 + $0xf8] sm:$0xff] %v6892_v55 }
 0x64d   : > { %7151 = vst [vmem:[#allocation4 + $0x380] sm:$0xff] %v6759_v61  ;;  %v6761_v56 = vpop.f32.mrb[27].mxu1 }
 0x64e   : > { %7152 = vst [vmem:[#allocation4 + $0x388] sm:$0xff] %v6761_v56  ;;  %v6896_v16 = vpop.f32.mrb[78].mxu0 }
 0x64f   : > { %7073 = vst [vmem:[#allocation4 + $0x110] sm:$0xff] %v6896_v16  ;;  %v6898_v38 = vpop.f32.mrb[79].mxu0 }
 0x650   : > { %v6765_v11 = vpop.f32.mrb[28].mxu1  ;;  %7074 = vst [vmem:[#allocation4 + $0x118] sm:$0xff] %v6898_v38 }
 0x651   : > { %7155 = vst [vmem:[#allocation4 + $0x3a0] sm:$0xff] %v6765_v11  ;;  %v6767_v15 = vpop.f32.mrb[29].mxu1 }
 0x652   : > { %7156 = vst [vmem:[#allocation4 + $0x3a8] sm:$0xff] %v6767_v15  ;;  %v6902_v8 = vpop.f32.mrb[80].mxu0 }
 0x653   : > { %7077 = vst [vmem:[#allocation4 + $0x130] sm:$0xff] %v6902_v8  ;;  %v6904_v47 = vpop.f32.mrb[81].mxu0 }
 0x654   : > { %v6771_v10 = vpop.f32.mrb[30].mxu1  ;;  %7078 = vst [vmem:[#allocation4 + $0x138] sm:$0xff] %v6904_v47 }
 0x655   : > { %7159 = vst [vmem:[#allocation4 + $0x3c0] sm:$0xff] %v6771_v10  ;;  %v6773_v41 = vpop.f32.mrb[31].mxu1 }
 0x656   : > { %7160 = vst [vmem:[#allocation4 + $0x3c8] sm:$0xff] %v6773_v41  ;;  %v6908_v42 = vpop.f32.mrb[82].mxu0 }
 0x657   : > { %7081 = vst [vmem:[#allocation4 + $0x150] sm:$0xff] %v6908_v42  ;;  %v6910_v30 = vpop.f32.mrb[83].mxu0 }
 0x658   : > { %v6777_v35 = vpop.f32.mrb[32].mxu1  ;;  %7082 = vst [vmem:[#allocation4 + $0x158] sm:$0xff] %v6910_v30 }
 0x659   : > { %7163 = vst [vmem:[#allocation4 + $0x3e0] sm:$0xff] %v6777_v35  ;;  %v6779_v44 = vpop.f32.mrb[33].mxu1 }
 0x65a   : > { %7164 = vst [vmem:[#allocation4 + $0x3e8] sm:$0xff] %v6779_v44  ;;  %v6914_v17 = vpop.f32.mrb[84].mxu0 }
 0x65b   : > { %7085 = vst [vmem:[#allocation4 + $0x170] sm:$0xff] %v6914_v17  ;;  %v6916_v48 = vpop.f32.mrb[85].mxu0 }
 0x65c   : > { %7086 = vst [vmem:[#allocation4 + $0x178] sm:$0xff] %v6916_v48 }
 0x65e   : > { %v6920_v37 = vpop.f32.mrb[86].mxu0 }
 0x65f   : > { %7089 = vst [vmem:[#allocation4 + $0x190] sm:$0xff] %v6920_v37  ;;  %v6922_v26 = vpop.f32.mrb[87].mxu0 }
 0x660   : > { %7090 = vst [vmem:[#allocation4 + $0x198] sm:$0xff] %v6922_v26 }
 0x662   : > { %v6926_v2 = vpop.f32.mrb[88].mxu0 }
 0x663   : > { %7093 = vst [vmem:[#allocation4 + $0x1b0] sm:$0xff] %v6926_v2  ;;  %v6928_v59 = vpop.f32.mrb[89].mxu0 }
 0x664   : > { %7094 = vst [vmem:[#allocation4 + $0x1b8] sm:$0xff] %v6928_v59 }
 0x666   : > { %v6932_v7 = vpop.f32.mrb[90].mxu0 }
 0x667   : > { %7097 = vst [vmem:[#allocation4 + $0x1d0] sm:$0xff] %v6932_v7  ;;  %v6934_v9 = vpop.f32.mrb[91].mxu0 }
 0x668   : > { %7098 = vst [vmem:[#allocation4 + $0x1d8] sm:$0xff] %v6934_v9 }
 0x66a   : > { %v6938_v1 = vpop.f32.mrb[92].mxu0 }
 0x66b   : > { %7101 = vst [vmem:[#allocation4 + $0x1f0] sm:$0xff] %v6938_v1  ;;  %v6940_v57 = vpop.f32.mrb[93].mxu0 }
 0x66c   : > { %7102 = vst [vmem:[#allocation4 + $0x1f8] sm:$0xff] %v6940_v57 }
 0x66e   : > { %v6944_v31 = vpop.f32.mrb[94].mxu0 }
 0x66f   : > { %7105 = vst [vmem:[#allocation4 + $0x210] sm:$0xff] %v6944_v31  ;;  %v6946_v0 = vpop.f32.mrb[95].mxu0 }
 0x670   : > { %7106 = vst [vmem:[#allocation4 + $0x218] sm:$0xff] %v6946_v0 }
 0x672   : > { %v6950_v23 = vpop.f32.mrb[96].mxu0 }
 0x673   : > { %7109 = vst [vmem:[#allocation4 + $0x230] sm:$0xff] %v6950_v23  ;;  %v6952_v22 = vpop.f32.mrb[97].mxu0 }
 0x674   : > { %7110 = vst [vmem:[#allocation4 + $0x238] sm:$0xff] %v6952_v22 }
 0x676   : > { %v6956_v33 = vpop.f32.mrb[98].mxu0 }
 0x677   : > { %7113 = vst [vmem:[#allocation4 + $0x250] sm:$0xff] %v6956_v33  ;;  %v6958_v62 = vpop.f32.mrb[99].mxu0 }
 0x678   : > { %7114 = vst [vmem:[#allocation4 + $0x258] sm:$0xff] %v6958_v62 }
 0x67a   : > { %v6962_v3 = vpop.f32.mrb[100].mxu0 }
 0x67b   : > { %7117 = vst [vmem:[#allocation4 + $0x270] sm:$0xff] %v6962_v3  ;;  %v6964_v60 = vpop.f32.mrb[101].mxu0 }
 0x67c   : > { %7118 = vst [vmem:[#allocation4 + $0x278] sm:$0xff] %v6964_v60 }
 0x67e   : > { %v6968_v4 = vpop.f32.mrb[102].mxu0 }
 0x67f   : > { %7121 = vst [vmem:[#allocation4 + $0x290] sm:$0xff] %v6968_v4  ;;  %v6970_v20 = vpop.f32.mrb[103].mxu0 }
 0x680   : > { %7122 = vst [vmem:[#allocation4 + $0x298] sm:$0xff] %v6970_v20 }
 0x682   : > { %v6974_v45 = vpop.f32.mrb[104].mxu0 }
 0x683   : > { %7125 = vst [vmem:[#allocation4 + $0x2b0] sm:$0xff] %v6974_v45  ;;  %v6976_v43 = vpop.f32.mrb[105].mxu0 }
 0x684   : > { %7126 = vst [vmem:[#allocation4 + $0x2b8] sm:$0xff] %v6976_v43 }
 0x686   : > { %v6980_v28 = vpop.f32.mrb[106].mxu0 }
 0x687   : > { %7129 = vst [vmem:[#allocation4 + $0x2d0] sm:$0xff] %v6980_v28  ;;  %v6982_v58 = vpop.f32.mrb[107].mxu0 }
 0x688   : > { %7130 = vst [vmem:[#allocation4 + $0x2d8] sm:$0xff] %v6982_v58 }
 0x68a   : > { %v6986_v27 = vpop.f32.mrb[108].mxu0 }
 0x68b   : > { %7133 = vst [vmem:[#allocation4 + $0x2f0] sm:$0xff] %v6986_v27  ;;  %v6988_v63 = vpop.f32.mrb[109].mxu0 }
 0x68c   : > { %7134 = vst [vmem:[#allocation4 + $0x2f8] sm:$0xff] %v6988_v63 }
 0x68e   : > { %v6992_v36 = vpop.f32.mrb[110].mxu0 }
 0x68f   : > { %7137 = vst [vmem:[#allocation4 + $0x310] sm:$0xff] %v6992_v36  ;;  %v6994_v24 = vpop.f32.mrb[111].mxu0 }
 0x690   : > { %7138 = vst [vmem:[#allocation4 + $0x318] sm:$0xff] %v6994_v24 }
 0x692   : > { %v6998_v6 = vpop.f32.mrb[112].mxu0 }
 0x693   : > { %7141 = vst [vmem:[#allocation4 + $0x330] sm:$0xff] %v6998_v6  ;;  %v7000_v49 = vpop.f32.mrb[113].mxu0 }
 0x694   : > { %7142 = vst [vmem:[#allocation4 + $0x338] sm:$0xff] %v7000_v49 }
 0x696   : > { %v7004_v32 = vpop.f32.mrb[114].mxu0 }
 0x697   : > { %7145 = vst [vmem:[#allocation4 + $0x350] sm:$0xff] %v7004_v32  ;;  %v7006_v40 = vpop.f32.mrb[115].mxu0 }
 0x698   : > { %7146 = vst [vmem:[#allocation4 + $0x358] sm:$0xff] %v7006_v40 }
 0x69a   : > { %v7010_v34 = vpop.f32.mrb[116].mxu0 }
 0x69b   : > { %7149 = vst [vmem:[#allocation4 + $0x370] sm:$0xff] %v7010_v34  ;;  %v7012_v18 = vpop.f32.mrb[117].mxu0 }
 0x69c   : > { %7150 = vst [vmem:[#allocation4 + $0x378] sm:$0xff] %v7012_v18 }
 0x69e   : > { %v7016_v14 = vpop.f32.mrb[118].mxu0 }
 0x69f   : > { %7153 = vst [vmem:[#allocation4 + $0x390] sm:$0xff] %v7016_v14  ;;  %v7018_v53 = vpop.f32.mrb[119].mxu0 }
 0x6a0   : > { %7154 = vst [vmem:[#allocation4 + $0x398] sm:$0xff] %v7018_v53 }
 0x6a2   : > { %v7022_v13 = vpop.f32.mrb[120].mxu0 }
 0x6a3   : > { %7157 = vst [vmem:[#allocation4 + $0x3b0] sm:$0xff] %v7022_v13  ;;  %v7024_v29 = vpop.f32.mrb[121].mxu0 }
 0x6a4   : > { %7158 = vst [vmem:[#allocation4 + $0x3b8] sm:$0xff] %v7024_v29 }
 0x6a6   : > { %v7028_v5 = vpop.f32.mrb[122].mxu0 }
 0x6a7   : > { %7161 = vst [vmem:[#allocation4 + $0x3d0] sm:$0xff] %v7028_v5  ;;  %v7030_v51 = vpop.f32.mrb[123].mxu0 }
 0x6a8   : > { %7162 = vst [vmem:[#allocation4 + $0x3d8] sm:$0xff] %v7030_v51 }
 0x6aa   : > { %v7034_v12 = vpop.f32.mrb[124].mxu0 }
 0x6ab   : > { %7165 = vst [vmem:[#allocation4 + $0x3f0] sm:$0xff] %v7034_v12  ;;  %v7036_v46 = vpop.f32.mrb[125].mxu0 }
 0x6ac   : > { %7166 = vst [vmem:[#allocation4 + $0x3f8] sm:$0xff] %v7036_v46 }
 0x6ad LB: >> { %s9878_s0 = sshll.u32 %s11781_s30, 3  ;;  %v7203_v52 = vrot.slane %v11777_v54, 7  ;;  %v7204_v50 = vrot.slane %v11773_v25, 7  ;;  %v7205_v19 = vrot.slane %v11769_v39, 7  ;;  %v7206_v61 = vrot.slane %v11765_v21, 7  ;;  %s7172_s30 = sadd.s32 1, %s11781_s30   ;;  %s11781_s30 = sphi %s16093_s30, %s7172_s30   ;;  %v11777_v54 = vphi %v16091_v54, %v7383_v54   ;;  %v11773_v25 = vphi %v16089_v25, %v7384_v25   ;;  %v11769_v39 = vphi %v16087_v39, %v7385_v39   ;;  %v11765_v21 = vphi %v16085_v21, %v7386_v21  }
 0x6ae   : >> { %s7178_s1 = sshra.s32 %s9878_s0, 3  ;;  %vm7391_vm9 = vcmask 1040384   ;;  %vm7396_vm10 = vcmask 1041408   ;;  %vm7401_vm11 = vcmask 1042432   ;;  %vm7406_vm12 = vcmask 1043456   ;;  %p7169_p4 = scmp.ge.s32.totalorder %s7172_s30, 32  }
 0x6af   : >> { %s16103_s22 = sshll.u32 %s7178_s1, 5  ;;  %vm7411_vm13 = vcmask 1044480   ;;  %vm7416_vm14 = vcmask 1045504   ;;  %vm7421_vm15 = vcmask 1046528   ;;  %s8339_s1 = sld [smem:[#allocation5]] (%p7169_p4)  ;;  %vm17120_vm1 = vmpackc.low (%p7169_p4), %vm665_vm0, %vm665_vm0 }
 0x6b0   : >> { %s7182_s24 = scalar_lea.vmem [#allocation2], %s16103_s22  ;;  %s7188_s2 = scalar_lea.vmem [#allocation3], %s16103_s22 }
 0x6b1   : >> { %v16106_v55 = vld [vmem:[%s7182_s24] sm:$0xff]  ;;  %v16108_v56 = vld [vmem:[%s7182_s24 + $0x8] sm:$0xff]  ;;  %v16110_v16 = vld [vmem:[%s7182_s24 + $0x10] sm:$0xff]  ;;  %s16148_s19 = scalar_lea.vmem [#allocation4], %s16103_s22 }
 0x6b2   : >> { %v16112_v11 = vld [vmem:[%s7182_s24 + $0x18] sm:$0xff]  ;;  %v16115_v38 = vld [vmem:[%s7188_s2] sm:$0xff]  ;;  %v16117_v15 = vld [vmem:[%s7188_s2 + $0x8] sm:$0xff]  ;;  %v7211_v8 = vmul.f32 %v7203_v52, %v16106_v55  ;;  %v7212_v10 = vmul.f32 %v7204_v50, %v16108_v56  ;;  %v7213_v47 = vmul.f32 %v7205_v19, %v16110_v16 }
 0x6b3   : >> { %v16122_v41 = vld [vmem:[%s7188_s2 + $0x10] sm:$0xff]  ;;  %v16124_v42 = vld [vmem:[%s7188_s2 + $0x18] sm:$0xff]  ;;  %v7214_v35 = vmul.f32 %v7206_v61, %v16112_v11  ;;  %v16151_v36 = vld [vmem:[%s16148_s19] sm:$0xff] }
 0x6b4   : >> { %v7215_v30 = vadd.f32 %v7211_v8, %v16115_v38  ;;  %v7216_v44 = vadd.f32 %v7212_v10, %v16117_v15  ;;  %v7217_v17 = vadd.f32 %v7213_v47, %v16122_v41  ;;  %v16154_v6 = vld [vmem:[%s16148_s19 + $0x8] sm:$0xff]  ;;  %v16161_v13 = vld [vmem:[%s16148_s19 + $0x10] sm:$0xff]  ;;  %v16165_v5 = vld [vmem:[%s16148_s19 + $0x18] sm:$0xff] }
 0x6b5   : >> { %v7218_v48 = vadd.f32 %v7214_v35, %v16124_v42 }
 0x6b6   : >> { %v7227_v37 = vrot.slane %v7215_v30, 7  ;;  %v7228_v26 = vrot.slane %v7216_v44, 7  ;;  %v7229_v2 = vrot.slane %v7217_v17, 7  ;;  %v7219_v14 = vmul.f32 %v7215_v30, %v16151_v36 }
 0x6b7   : >> { %v7230_v59 = vrot.slane %v7218_v48, 7  ;;  %v7220_v53 = vmul.f32 %v7216_v44, %v16154_v6  ;;  %v7221_v19 = vmul.f32 %v7217_v17, %v16161_v13  ;;  %v7222_v61 = vmul.f32 %v7218_v48, %v16165_v5 }
 0x6b8   : >> { %v7235_v7 = vmul.f32 %v7227_v37, %v16106_v55  ;;  %v7236_v9 = vmul.f32 %v7228_v26, %v16108_v56  ;;  %v7237_v1 = vmul.f32 %v7229_v2, %v16110_v16 }
 0x6b9   : >> { %v7238_v57 = vmul.f32 %v7230_v59, %v16112_v11 }
 0x6ba   : >> { %v7239_v31 = vadd.f32 %v7235_v7, %v16115_v38  ;;  %v7240_v0 = vadd.f32 %v7236_v9, %v16117_v15  ;;  %v7241_v23 = vadd.f32 %v7237_v1, %v16122_v41 }
 0x6bb   : >> { %v7242_v22 = vadd.f32 %v7238_v57, %v16124_v42 }
 0x6bc   : >> { %v7251_v33 = vrot.slane %v7239_v31, 7  ;;  %v7252_v62 = vrot.slane %v7240_v0, 7  ;;  %v7253_v3 = vrot.slane %v7241_v23, 7  ;;  %v7243_v12 = vmul.f32 %v7239_v31, %v16151_v36 }
 0x6bd   : >> { %v7254_v60 = vrot.slane %v7242_v22, 7  ;;  %v7244_v21 = vmul.f32 %v7240_v0, %v16154_v6  ;;  %v7245_v8 = vmul.f32 %v7241_v23, %v16161_v13  ;;  %v7246_v47 = vmul.f32 %v7242_v22, %v16165_v5 }
 0x6be   : >> { %v7259_v4 = vmul.f32 %v7251_v33, %v16106_v55  ;;  %v7260_v20 = vmul.f32 %v7252_v62, %v16108_v56  ;;  %v7261_v45 = vmul.f32 %v7253_v3, %v16110_v16  ;;  %v7392_v44 = vsel %vm7391_vm9, %v7219_v14, %v7243_v12 }
 0x6bf   : >> { %v7262_v43 = vmul.f32 %v7254_v60, %v16112_v11  ;;  %v7393_v26 = vsel %vm7391_vm9, %v7220_v53, %v7244_v21  ;;  %v7394_v0 = vsel %vm7391_vm9, %v7221_v19, %v7245_v8  ;;  %v7395_v22 = vsel %vm7391_vm9, %v7222_v61, %v7246_v47 }
 0x6c0   : >> { %v7263_v28 = vadd.f32 %v7259_v4, %v16115_v38  ;;  %v7264_v58 = vadd.f32 %v7260_v20, %v16117_v15  ;;  %v7265_v27 = vadd.f32 %v7261_v45, %v16122_v41 }
 0x6c1   : >> { %v7266_v63 = vadd.f32 %v7262_v43, %v16124_v42 }
 0x6c2   : >> { %v7275_v24 = vrot.slane %v7263_v28, 7  ;;  %v7276_v49 = vrot.slane %v7264_v58, 7  ;;  %v7277_v32 = vrot.slane %v7265_v27, 7  ;;  %v7267_v2 = vmul.f32 %v7263_v28, %v16151_v36 }
 0x6c3   : >> { %v7278_v40 = vrot.slane %v7266_v63, 7  ;;  %v7268_v17 = vmul.f32 %v7264_v58, %v16154_v6  ;;  %v7269_v1 = vmul.f32 %v7265_v27, %v16161_v13  ;;  %v7270_v57 = vmul.f32 %v7266_v63, %v16165_v5 }
 0x6c4   : >> { %v7283_v34 = vmul.f32 %v7275_v24, %v16106_v55  ;;  %v7284_v18 = vmul.f32 %v7276_v49, %v16108_v56  ;;  %v7285_v29 = vmul.f32 %v7277_v32, %v16110_v16  ;;  %v7397_v4 = vsel %vm7396_vm10, %v7392_v44, %v7267_v2 }
 0x6c5   : >> { %v7286_v51 = vmul.f32 %v7278_v40, %v16112_v11  ;;  %v7398_v20 = vsel %vm7396_vm10, %v7393_v26, %v7268_v17  ;;  %v7399_v27 = vsel %vm7396_vm10, %v7394_v0, %v7269_v1  ;;  %v7400_v63 = vsel %vm7396_vm10, %v7395_v22, %v7270_v57 }
 0x6c6   : >> { %v7287_v46 = vadd.f32 %v7283_v34, %v16115_v38  ;;  %v7288_v39 = vadd.f32 %v7284_v18, %v16117_v15  ;;  %v7289_v25 = vadd.f32 %v7285_v29, %v16122_v41 }
 0x6c7   : >> { %v7290_v54 = vadd.f32 %v7286_v51, %v16124_v42 }
 0x6c8   : >> { %v7299_v52 = vrot.slane %v7287_v46, 7  ;;  %v7300_v50 = vrot.slane %v7288_v39, 7  ;;  %v7301_v10 = vrot.slane %v7289_v25, 7  ;;  %v7291_v33 = vmul.f32 %v7287_v46, %v16151_v36 }
 0x6c9   : >> { %v7302_v35 = vrot.slane %v7290_v54, 7  ;;  %v7292_v3 = vmul.f32 %v7288_v39, %v16154_v6  ;;  %v7293_v24 = vmul.f32 %v7289_v25, %v16161_v13  ;;  %v7294_v32 = vmul.f32 %v7290_v54, %v16165_v5 }
 0x6ca   : >> { %v7307_v30 = vmul.f32 %v7299_v52, %v16106_v55  ;;  %v7308_v37 = vmul.f32 %v7300_v50, %v16108_v56  ;;  %v7309_v48 = vmul.f32 %v7301_v10, %v16110_v16  ;;  %v7402_v18 = vsel %vm7401_vm11, %v7397_v4, %v7291_v33 }
 0x6cb   : >> { %v7310_v59 = vmul.f32 %v7302_v35, %v16112_v11  ;;  %v7403_v53 = vsel %vm7401_vm11, %v7398_v20, %v7292_v3  ;;  %v7404_v50 = vsel %vm7401_vm11, %v7399_v27, %v7293_v24  ;;  %v7405_v61 = vsel %vm7401_vm11, %v7400_v63, %v7294_v32 }
 0x6cc   : >> { %v7311_v7 = vadd.f32 %v7307_v30, %v16115_v38  ;;  %v7312_v9 = vadd.f32 %v7308_v37, %v16117_v15  ;;  %v7313_v31 = vadd.f32 %v7309_v48, %v16122_v41 }
 0x6cd   : >> { %v7314_v23 = vadd.f32 %v7310_v59, %v16124_v42 }
 0x6ce   : >> { %v7323_v62 = vrot.slane %v7311_v7, 7  ;;  %v7324_v60 = vrot.slane %v7312_v9, 7  ;;  %v7325_v45 = vrot.slane %v7313_v31, 7  ;;  %v7315_v29 = vmul.f32 %v7311_v7, %v16151_v36 }
 0x6cf   : >> { %v7326_v43 = vrot.slane %v7314_v23, 7  ;;  %v7316_v51 = vmul.f32 %v7312_v9, %v16154_v6  ;;  %v7317_v25 = vmul.f32 %v7313_v31, %v16161_v13  ;;  %v7318_v54 = vmul.f32 %v7314_v23, %v16165_v5 }
 0x6d0   : >> { %v7331_v28 = vmul.f32 %v7323_v62, %v16106_v55  ;;  %v7332_v58 = vmul.f32 %v7324_v60, %v16108_v56  ;;  %v7333_v49 = vmul.f32 %v7325_v45, %v16110_v16  ;;  %v7407_v30 = vsel %vm7406_vm12, %v7402_v18, %v7315_v29  ;;  %v7561_v18 = vld [vmem:[%s17273_s18 + $0x18] sm:$0xff] (%p7169_p4)  ;;  %v7563_v29 = vld [vmem:[%s17273_s18 + $0x28] sm:$0xff] (%p7169_p4) }
 0x6d1   : >> { %v7334_v40 = vmul.f32 %v7326_v43, %v16112_v11  ;;  %v7408_v44 = vsel %vm7406_vm12, %v7403_v53, %v7316_v51  ;;  %v7409_v48 = vsel %vm7406_vm12, %v7404_v50, %v7317_v25  ;;  %v7410_v59 = vsel %vm7406_vm12, %v7405_v61, %v7318_v54  ;;  %v7562_v53 = vld [vmem:[%s17273_s18 + $0x20] sm:$0xff] (%p7169_p4)  ;;  %v7568_v50 = vld [vmem:[%s17273_s18 + $0x50] sm:$0xff] (%p7169_p4) }
 0x6d2   : >> { %v7335_v34 = vadd.f32 %v7331_v28, %v16115_v38  ;;  %v7336_v14 = vadd.f32 %v7332_v58, %v16117_v15  ;;  %v7337_v12 = vadd.f32 %v7333_v49, %v16122_v41  ;;  %v10668_v51 = vpack.c.bf16 (%p7169_p4), %v7563_v29, %v7562_v53  ;;  %v7598_v53 = vld [vmem:[%s17273_s18 + $0x140] sm:$0xff] (%p7169_p4)  ;;  %v7599_v29 = vld [vmem:[%s17273_s18 + $0x148] sm:$0xff] (%p7169_p4) }
 0x6d3   : >> { %v7338_v46 = vadd.f32 %v7334_v40, %v16124_v42 }
 0x6d4   : >> { %v7347_v21 = vrot.slane %v7335_v34, 7  ;;  %v7348_v39 = vrot.slane %v7336_v14, 7  ;;  %v7349_v52 = vrot.slane %v7337_v12, 7  ;;  %v7339_v8 = vmul.f32 %v7335_v34, %v16151_v36 }
 0x6d5   : >> { %v7350_v19 = vrot.slane %v7338_v46, 7  ;;  %v7340_v47 = vmul.f32 %v7336_v14, %v16154_v6  ;;  %v7341_v7 = vmul.f32 %v7337_v12, %v16161_v13  ;;  %v7342_v1 = vmul.f32 %v7338_v46, %v16165_v5  ;;  %v7564_v12 = vld [vmem:[%s17273_s18 + $0x30] sm:$0xff] (%p7169_p4)  ;;  %v7565_v46 = vld [vmem:[%s17273_s18 + $0x38] sm:$0xff] (%p7169_p4) }
 0x6d6   : >> { %v7355_v10 = vmul.f32 %v7347_v21, %v16106_v55  ;;  %v7356_v35 = vmul.f32 %v7348_v39, %v16108_v56  ;;  %v7357_v37 = vmul.f32 %v7349_v52, %v16110_v16  ;;  %v7412_v0 = vsel %vm7411_vm13, %v7407_v30, %v7339_v8  ;;  %v7570_v8 = vld [vmem:[%s17273_s18 + $0x60] sm:$0xff] (%p7169_p4)  ;;  %v7573_v30 = vld [vmem:[%s17273_s18 + $0x78] sm:$0xff] (%p7169_p4) }
 0x6d7   : >> { %v7358_v26 = vmul.f32 %v7350_v19, %v16112_v11  ;;  %v7413_v22 = vsel %vm7411_vm13, %v7408_v44, %v7340_v47  ;;  %v7414_v58 = vsel %vm7411_vm13, %v7409_v48, %v7341_v7  ;;  %v7415_v63 = vsel %vm7411_vm13, %v7410_v59, %v7342_v1  ;;  %v7569_v19 = vld [vmem:[%s17273_s18 + $0x58] sm:$0xff] (%p7169_p4)  ;;  %v7578_v7 = vld [vmem:[%s17273_s18 + $0xa0] sm:$0xff] (%p7169_p4) }
 0x6d8   : >> { %v7359_v2 = vadd.f32 %v7355_v10, %v16115_v38  ;;  %v7360_v17 = vadd.f32 %v7356_v35, %v16117_v15  ;;  %v7361_v9 = vadd.f32 %v7357_v37, %v16122_v41  ;;  %v10677_v61 = vpack.c.bf16 (%p7169_p4), %v7569_v19, %v7568_v50  ;;  %v7571_v10 = vld [vmem:[%s17273_s18 + $0x68] sm:$0xff] (%p7169_p4)  ;;  %v7572_v35 = vld [vmem:[%s17273_s18 + $0x70] sm:$0xff] (%p7169_p4)  ;;  %v7574_v37 = vld [vmem:[%s17273_s18 + $0x80] sm:$0xff] (%p7169_p4) }
 0x6d9   : >> { %v7362_v57 = vadd.f32 %v7358_v26, %v16124_v42  ;;  %v10680_v47 = vpack.c.bf16 (%p7169_p4), %v7571_v10, %v7570_v8  ;;  %v10683_v44 = vpack.c.bf16 (%p7169_p4), %v7573_v30, %v7572_v35  ;;  %v7575_v26 = vld [vmem:[%s17273_s18 + $0x88] sm:$0xff] (%p7169_p4)  ;;  %v7577_v48 = vld [vmem:[%s17273_s18 + $0x98] sm:$0xff] (%p7169_p4)  ;;  %v7602_v50 = vld [vmem:[%s17273_s18 + $0x160] sm:$0xff] (%p7169_p4) }
 0x6da   : >> { %v7371_v31 = vrot.slane %v7359_v2, 7  ;;  %v7372_v23 = vrot.slane %v7360_v17, 7  ;;  %v7363_v33 = vmul.f32 %v7359_v2, %v16151_v36  ;;  %v7364_v62 = vmul.f32 %v7360_v17, %v16154_v6  ;;  %v7576_v17 = vld [vmem:[%s17273_s18 + $0x90] sm:$0xff] (%p7169_p4)  ;;  %v7603_v19 = vld [vmem:[%s17273_s18 + $0x168] sm:$0xff] (%p7169_p4)  ;;  %v7605_v35 = vld [vmem:[%s17273_s18 + $0x178] sm:$0xff] (%p7169_p4) }
 0x6db   : >> { %v7373_v3 = vrot.slane %v7361_v9, 7  ;;  %v7374_v60 = vrot.slane %v7362_v57, 7  ;;  %v7365_v45 = vmul.f32 %v7361_v9, %v16161_v13  ;;  %v7366_v43 = vmul.f32 %v7362_v57, %v16165_v5  ;;  %v7579_v9 = vld [vmem:[%s17273_s18 + $0xa8] sm:$0xff] (%p7169_p4)  ;;  %v7580_v57 = vld [vmem:[%s17273_s18 + $0xb0] sm:$0xff] (%p7169_p4) }
 0x6dc   : >> { %v7379_v4 = vmul.f32 %v7371_v31, %v16106_v55  ;;  %v7380_v20 = vmul.f32 %v7372_v23, %v16108_v56  ;;  %v7417_v55 = vsel %vm7416_vm14, %v7412_v0, %v7363_v33  ;;  %v7418_v56 = vsel %vm7416_vm14, %v7413_v22, %v7364_v62  ;;  %v7581_v31 = vld [vmem:[%s17273_s18 + $0xb8] sm:$0xff] (%p7169_p4)  ;;  %v7582_v23 = vld [vmem:[%s17273_s18 + $0xc0] sm:$0xff] (%p7169_p4)  ;;  %v7583_v22 = vld [vmem:[%s17273_s18 + $0xc8] sm:$0xff] (%p7169_p4) }
 0x6dd   : >> { %v7381_v28 = vmul.f32 %v7373_v3, %v16110_v16  ;;  %v7382_v27 = vmul.f32 %v7374_v60, %v16112_v11  ;;  %v7420_v24 = vsel %vm7416_vm14, %v7415_v63, %v7366_v43  ;;  %v10686_v2 = vpack.c.bf16 (%p7169_p4), %v7575_v26, %v7574_v37  ;;  %v7584_v62 = vld [vmem:[%s17273_s18 + $0xd0] sm:$0xff] (%p7169_p4)  ;;  %v7585_v3 = vld [vmem:[%s17273_s18 + $0xd8] sm:$0xff] (%p7169_p4)  ;;  %v7591_v63 = vld [vmem:[%s17273_s18 + $0x108] sm:$0xff] (%p7169_p4) }
 0x6de   : >> { %v7383_v54 = vadd.f32 %v7379_v4, %v16115_v38   ;;  %v7384_v25 = vadd.f32 %v7380_v20, %v16117_v15   ;;  %v7419_v38 = vsel %vm7416_vm14, %v7414_v58, %v7365_v45  ;;  %7171 = sbr.rel (!%p7169_p4) target bundleno = 1709 (0x6ad), region = 140  ;;  %v10689_v59 = vpack.c.bf16 (%p7169_p4), %v7577_v48, %v7576_v17  ;;  %v7586_v4 = vld [vmem:[%s17273_s18 + $0xe0] sm:$0xff] (%p7169_p4)  ;;  %v7587_v20 = vld [vmem:[%s17273_s18 + $0xe8] sm:$0xff] (%p7169_p4)  ;;  %v7588_v43 = vld [vmem:[%s17273_s18 + $0xf0] sm:$0xff] (%p7169_p4) }
 0x6df   : >> { %v7385_v39 = vadd.f32 %v7381_v28, %v16122_v41   ;;  %v7386_v21 = vadd.f32 %v7382_v27, %v16124_v42   ;;  %v10692_v1 = vpack.c.bf16 (%p7169_p4), %v7579_v9, %v7578_v7  ;;  %v10695_v0 = vpack.c.bf16 (%p7169_p4), %v7581_v31, %v7580_v57  ;;  %v7589_v28 = vld [vmem:[%s17273_s18 + $0xf8] sm:$0xff] (%p7169_p4)  ;;  %v7590_v27 = vld [vmem:[%s17273_s18 + $0x100] sm:$0xff] (%p7169_p4)  ;;  %v7608_v7 = vld [vmem:[%s17273_s18 + $0x190] sm:$0xff] (%p7169_p4) }
 0x6e0   : >> { %v7387_v16 = vmul.f32 %v7383_v54, %v16151_v36  ;;  %v7388_v11 = vmul.f32 %v7384_v25, %v16154_v6  ;;  %v7558_v36 = vld [vmem:[%s17273_s18] sm:$0xff] (%p7169_p4)  ;;  %v7559_v6 = vld [vmem:[%s17273_s18 + $0x8] sm:$0xff] (%p7169_p4)  ;;  %v10698_v33 = vpack.c.bf16 (%p7169_p4), %v7583_v22, %v7582_v23  ;;  %v10701_v60 = vpack.c.bf16 (%p7169_p4), %v7585_v3, %v7584_v62  ;;  %v7609_v9 = vld [vmem:[%s17273_s18 + $0x198] sm:$0xff] (%p7169_p4) }
 0x6e1   : >> { %v7389_v15 = vmul.f32 %v7385_v39, %v16161_v13  ;;  %v7390_v49 = vmul.f32 %v7386_v21, %v16165_v5  ;;  %v7560_v13 = vld [vmem:[%s17273_s18 + $0x10] sm:$0xff] (%p7169_p4)  ;;  %v11784_v5 = vmov (%p7169_p4), 0.0|0.0   ;;  %v10662_v34 = vpack.c.bf16 (%p7169_p4), %v7559_v6, %v7558_v36  ;;  %v7566_v25 = vld [vmem:[%s17273_s18 + $0x40] sm:$0xff] (%p7169_p4)  ;;  %v7567_v54 = vld [vmem:[%s17273_s18 + $0x48] sm:$0xff] (%p7169_p4) }
 0x6e2   : >> { %v7422_v32 = vsel %vm7421_vm15, %v7417_v55, %v7387_v16  ;;  %v7423_v40 = vsel %vm7421_vm15, %v7418_v56, %v7388_v11  ;;  %10661 = vmatprep.subr.bf16.mxu1 (%p7169_p4), %v11784_v5  ;;  %v10665_v14 = vpack.c.bf16 (%p7169_p4), %v7561_v18, %v7560_v13  ;;  %v10671_v39 = vpack.c.bf16 (%p7169_p4), %v7565_v46, %v7564_v12  ;;  %v7592_v11 = vld [vmem:[%s17273_s18 + $0x110] sm:$0xff] (%p7169_p4)  ;;  %v7597_v13 = vld [vmem:[%s17273_s18 + $0x138] sm:$0xff] (%p7169_p4)  ;;  %v7606_v26 = vld [vmem:[%s17273_s18 + $0x180] sm:$0xff] (%p7169_p4) }
 0x6e3   : >> { %7426 = vst [vmem:[%s16148_s19] sm:$0xff] %v7422_v32  ;;  %7427 = vst [vmem:[%s16148_s19 + $0x8] sm:$0xff] %v7423_v40  ;;  %v7424_v41 = vsel %vm7421_vm15, %v7419_v38, %v7389_v15  ;;  %v7425_v42 = vsel %vm7421_vm15, %v7420_v24, %v7390_v49  ;;  %10663 = vmatpush1.bf16.msra.mxu1 (%p7169_p4), %v10662_v34  ;;  %v10674_v52 = vpack.c.bf16 (%p7169_p4), %v7567_v54, %v7566_v25  ;;  %v7593_v38 = vld [vmem:[%s17273_s18 + $0x118] sm:$0xff] (%p7169_p4)  ;;  %v7594_v32 = vld [vmem:[%s17273_s18 + $0x120] sm:$0xff] (%p7169_p4) }
 0x6e4   : >> { %7428 = vst [vmem:[%s16148_s19 + $0x10] sm:$0xff] %v7424_v41  ;;  %7429 = vst [vmem:[%s16148_s19 + $0x18] sm:$0xff] %v7425_v42  ;;  %10664 = vmatprep.subr.bf16.mxu1 (%p7169_p4), %v11784_v5  ;;  %v10704_v45 = vpack.c.bf16 (%p7169_p4), %v7587_v20, %v7586_v4  ;;  %v10707_v58 = vpack.c.bf16 (%p7169_p4), %v7589_v28, %v7588_v43  ;;  %v10710_v56 = vpack.c.bf16 (%p7169_p4), %v7591_v63, %v7590_v27  ;;  %v7595_v40 = vld [vmem:[%s17273_s18 + $0x128] sm:$0xff] (%p7169_p4)  ;;  %v7596_v6 = vld [vmem:[%s17273_s18 + $0x130] sm:$0xff] (%p7169_p4) }
 0x6e5   : > { %v10713_v15 = vpack.c.bf16 %v7593_v38, %v7592_v11  ;;  %v10716_v42 = vpack.c.bf16 %v7595_v40, %v7594_v32  ;;  %v10719_v18 = vpack.c.bf16 %v7597_v13, %v7596_v6  ;;  %v10722_v12 = vpack.c.bf16 %v7599_v29, %v7598_v53  ;;  %v7611_v23 = vld [vmem:[%s17273_s18 + $0x1a8] sm:$0xff]  ;;  %v7612_v3 = vld [vmem:[%s17273_s18 + $0x1b0] sm:$0xff]  ;;  %v7614_v43 = vld [vmem:[%s17273_s18 + $0x1c0] sm:$0xff] }
 0x6e6   : > { %v10728_v8 = vpack.c.bf16 %v7603_v19, %v7602_v50  ;;  %v10737_v57 = vpack.c.bf16 %v7609_v9, %v7608_v7  ;;  %v7615_v28 = vld [vmem:[%s17273_s18 + $0x1c8] sm:$0xff] }
 0x6e7   : > { %10666 = vmatpush1.bf16.msra.mxu1 %v10665_v14  ;;  %v10746_v27 = vpack.c.bf16 %v7615_v28, %v7614_v43 }
 0x6e8   : > { %10667 = vmatprep.subr.bf16.mxu1 %v11784_v5 }
 0x6eb   : > { %v7431_v21 = vld [vmem:[#allocation4 + $0x8] sm:$0xff]  ;;  %10669 = vmatpush1.bf16.msra.mxu1 %v10668_v51  ;;  %v7430_v55 = vld [vmem:[#allocation4] sm:$0xff]  ;;  %v7456_v43 = vld [vmem:[#allocation4 + $0xd0] sm:$0xff] }
 0x6ec   : > { %7725 = vmatprep.mubr.f32.mxu1 %v7431_v21  ;;  %10670 = vmatprep.subr.bf16.mxu1 %v11784_v5  ;;  %v7435_v16 = vld [vmem:[#allocation4 + $0x28] sm:$0xff]  ;;  %v7434_v24 = vld [vmem:[#allocation4 + $0x20] sm:$0xff]  ;;  %v7600_v21 = vld [vmem:[%s17273_s18 + $0x150] sm:$0xff] }
 0x6ed   : > { %v7439_v49 = vld [vmem:[#allocation4 + $0x48] sm:$0xff]  ;;  %v7438_v41 = vld [vmem:[#allocation4 + $0x40] sm:$0xff]  ;;  %v7461_v28 = vld [vmem:[#allocation4 + $0xf8] sm:$0xff] }
 0x6ee   : > { %v7443_v36 = vld [vmem:[#allocation4 + $0x68] sm:$0xff]  ;;  %v7442_v34 = vld [vmem:[#allocation4 + $0x60] sm:$0xff] }
 0x6ef   : > { %10672 = vmatpush1.bf16.msra.mxu1 %v10671_v39  ;;  %v7447_v14 = vld [vmem:[#allocation4 + $0x88] sm:$0xff]  ;;  %v7446_v51 = vld [vmem:[#allocation4 + $0x80] sm:$0xff]  ;;  %v7601_v39 = vld [vmem:[%s17273_s18 + $0x158] sm:$0xff] }
 0x6f0   : > { %10673 = vmatprep.subr.bf16.mxu1 %v11784_v5  ;;  %v7451_v46 = vld [vmem:[#allocation4 + $0xa8] sm:$0xff]  ;;  %v7450_v25 = vld [vmem:[#allocation4 + $0xa0] sm:$0xff]  ;;  %v10725_v54 = vpack.c.bf16 %v7601_v39, %v7600_v21 }
 0x6f1   : > { %v7459_v10 = vld [vmem:[#allocation4 + $0xe8] sm:$0xff]  ;;  %v7458_v30 = vld [vmem:[#allocation4 + $0xe0] sm:$0xff] }
 0x6f2   : > { %v7463_v37 = vld [vmem:[#allocation4 + $0x108] sm:$0xff]  ;;  %v7462_v17 = vld [vmem:[#allocation4 + $0x100] sm:$0xff] }
 0x6f3   : > { %10675 = vmatpush1.bf16.msra.mxu1 %v10674_v52  ;;  %v7455_v52 = vld [vmem:[#allocation4 + $0xc8] sm:$0xff]  ;;  %v7470_v22 = vld [vmem:[#allocation4 + $0x140] sm:$0xff] }
 0x6f4   : > { %10676 = vmatprep.subr.bf16.mxu1 %v11784_v5  ;;  %v7471_v31 = vld [vmem:[#allocation4 + $0x148] sm:$0xff]  ;;  %v7474_v4 = vld [vmem:[#allocation4 + $0x160] sm:$0xff] }
 0x6f5   : > { %v7475_v62 = vld [vmem:[#allocation4 + $0x168] sm:$0xff]  ;;  %v7502_v29 = vld [vmem:[#allocation4 + $0x240] sm:$0xff] }
 0x6f6   : > { %v7483_v63 = vld [vmem:[#allocation4 + $0x1a8] sm:$0xff]  ;;  %v7514_v39 = vld [vmem:[#allocation4 + $0x2a0] sm:$0xff] }
 0x6f7   : > { %10678 = vmatpush1.bf16.msra.mxu1 %v10677_v61  ;;  %v7454_v61 = vld [vmem:[#allocation4 + $0xc0] sm:$0xff]  ;;  %v7487_v38 = vld [vmem:[#allocation4 + $0x1c8] sm:$0xff] }
 0x6f8   : > { %10679 = vmatprep.subr.bf16.mxu1 %v11784_v5  ;;  %v7491_v40 = vld [vmem:[#allocation4 + $0x1e8] sm:$0xff]  ;;  %v7522_v50 = vld [vmem:[#allocation4 + $0x2e0] sm:$0xff] }
 0x6f9   : > { %v7495_v13 = vld [vmem:[#allocation4 + $0x208] sm:$0xff]  ;;  %v7554_v9 = vld [vmem:[#allocation4 + $0x3e0] sm:$0xff] }
 0x6fa   : > { %v7503_v53 = vld [vmem:[#allocation4 + $0x248] sm:$0xff] }
 0x6fb   : > { %10681 = vmatpush1.bf16.msra.mxu1 %v10680_v47  ;;  %v7604_v47 = vld [vmem:[%s17273_s18 + $0x170] sm:$0xff]  ;;  %v7515_v21 = vld [vmem:[#allocation4 + $0x2a8] sm:$0xff] }
 0x6fc   : > { %10682 = vmatprep.subr.bf16.mxu1 %v11784_v5  ;;  %v7527_v19 = vld [vmem:[#allocation4 + $0x308] sm:$0xff] }
 0x6fd   : > { %v7555_v7 = vld [vmem:[#allocation4 + $0x3e8] sm:$0xff] }
 0x6ff   : > { %10684 = vmatpush1.bf16.msra.mxu1 %v10683_v44  ;;  %v10731_v44 = vpack.c.bf16 %v7605_v35, %v7604_v47  ;;  %v7535_v47 = vld [vmem:[#allocation4 + $0x348] sm:$0xff]  ;;  %v7534_v35 = vld [vmem:[#allocation4 + $0x340] sm:$0xff] }
 0x700   : > { %10685 = vmatprep.subr.bf16.mxu1 %v11784_v5 }
 0x703   : > { %10687 = vmatpush1.bf16.msra.mxu1 %v10686_v2  ;;  %v7607_v2 = vld [vmem:[%s17273_s18 + $0x188] sm:$0xff] }
 0x704   : > { %10688 = vmatprep.subr.bf16.mxu1 %v11784_v5  ;;  %v10734_v48 = vpack.c.bf16 %v7607_v2, %v7606_v26  ;;  %v7542_v26 = vld [vmem:[#allocation4 + $0x380] sm:$0xff]  ;;  %v7547_v2 = vld [vmem:[#allocation4 + $0x3a8] sm:$0xff] }
 0x707   : > { %10690 = vmatpush1.bf16.msra.mxu1 %v10689_v59  ;;  %v7467_v59 = vld [vmem:[#allocation4 + $0x128] sm:$0xff] }
 0x708   : > { %10691 = vmatprep.subr.bf16.mxu1 %v11784_v5 }
 0x70b   : > { %10693 = vmatpush1.bf16.msra.mxu1 %v10692_v1  ;;  %v7466_v1 = vld [vmem:[#allocation4 + $0x120] sm:$0xff] }
 0x70c   : > { %10694 = vmatprep.subr.bf16.mxu1 %v11784_v5 }
 0x70f   : > { %10696 = vmatpush1.bf16.msra.mxu1 %v10695_v0  ;;  %v7610_v0 = vld [vmem:[%s17273_s18 + $0x1a0] sm:$0xff] }
 0x710   : > { %10697 = vmatprep.subr.bf16.mxu1 %v11784_v5 }
 0x713   : > { %10699 = vmatpush1.bf16.msra.mxu1 %v10698_v33  ;;  %v10740_v33 = vpack.c.bf16 %v7611_v23, %v7610_v0  ;;  %v7436_v0 = vld [vmem:[#allocation4 + $0x30] sm:$0xff]  ;;  %v7441_v23 = vld [vmem:[#allocation4 + $0x58] sm:$0xff] }
 0x714   : > { %10700 = vmatprep.subr.bf16.mxu1 %v11784_v5 }
 0x717   : > { %10702 = vmatpush1.bf16.msra.mxu1 %v10701_v60  ;;  %v7613_v60 = vld [vmem:[%s17273_s18 + $0x1b8] sm:$0xff] }
 0x718   : > { %10703 = vmatprep.subr.bf16.mxu1 %v11784_v5  ;;  %v10743_v20 = vpack.c.bf16 %v7613_v60, %v7612_v3  ;;  %v7449_v3 = vld [vmem:[#allocation4 + $0x98] sm:$0xff]  ;;  %v7448_v60 = vld [vmem:[#allocation4 + $0x90] sm:$0xff] }
 0x71b   : > { %10705 = vmatpush1.bf16.msra.mxu1 %v10704_v45  ;;  %v7479_v45 = vld [vmem:[#allocation4 + $0x188] sm:$0xff] }
 0x71c   : > { %10706 = vmatprep.subr.bf16.mxu1 %v11784_v5 }
 0x71f   : > { %10708 = vmatpush1.bf16.msra.mxu1 %v10707_v58  ;;  %v7478_v58 = vld [vmem:[#allocation4 + $0x180] sm:$0xff] }
 0x720   : > { %10709 = vmatprep.subr.bf16.mxu1 %v11784_v5 }
 0x722   : > { %7726 = vmatmul.mubr.f32.vlgmr.msra.gmra.mrb[34].mxu1 %v7430_v55  ;;  %v7616_v55 = vld [vmem:[%s17273_s18 + $0x1d0] sm:$0xff] }
 0x723   : > { %10711 = vmatpush1.bf16.msra.mxu1 %v10710_v56  ;;  %7730 = vmatprep.mubr.f32.mxu1 %v7435_v16  ;;  %v7617_v56 = vld [vmem:[%s17273_s18 + $0x1d8] sm:$0xff]  ;;  %v7482_v16 = vld [vmem:[#allocation4 + $0x1a0] sm:$0xff] }
 0x724   : > { %10712 = vmatprep.subr.bf16.mxu1 %v11784_v5  ;;  %v10749_v11 = vpack.c.bf16 %v7617_v56, %v7616_v55  ;;  %v7469_v55 = vld [vmem:[#allocation4 + $0x138] sm:$0xff]  ;;  %v7468_v56 = vld [vmem:[#allocation4 + $0x130] sm:$0xff] }
 0x726   : > { %7731 = vmatmul.mubr.f32.gmra.mrb[36].mxu1 %v7434_v24  ;;  %v7618_v24 = vld [vmem:[%s17273_s18 + $0x1e0] sm:$0xff] }
 0x727   : > { %7735 = vmatprep.mubr.f32.mxu1 %v7439_v49  ;;  %10714 = vmatpush1.bf16.msra.mxu1 %v10713_v15  ;;  %v7619_v15 = vld [vmem:[%s17273_s18 + $0x1e8] sm:$0xff]  ;;  %v7486_v49 = vld [vmem:[#allocation4 + $0x1c0] sm:$0xff] }
 0x728   : > { %10715 = vmatprep.subr.bf16.mxu1 %v11784_v5  ;;  %v10752_v32 = vpack.c.bf16 %v7619_v15, %v7618_v24  ;;  %v7476_v24 = vld [vmem:[#allocation4 + $0x170] sm:$0xff]  ;;  %v7481_v15 = vld [vmem:[#allocation4 + $0x198] sm:$0xff] }
 0x72a   : > { %7736 = vmatmul.mubr.f32.gmra.mrb[38].mxu1 %v7438_v41  ;;  %v7620_v41 = vld [vmem:[%s17273_s18 + $0x1f0] sm:$0xff] }
 0x72b   : > { %7740 = vmatprep.mubr.f32.mxu1 %v7443_v36  ;;  %10717 = vmatpush1.bf16.msra.mxu1 %v10716_v42  ;;  %v7621_v42 = vld [vmem:[%s17273_s18 + $0x1f8] sm:$0xff]  ;;  %v7490_v36 = vld [vmem:[#allocation4 + $0x1e0] sm:$0xff] }
 0x72c   : > { %10718 = vmatprep.subr.bf16.mxu1 %v11784_v5  ;;  %v10755_v6 = vpack.c.bf16 %v7621_v42, %v7620_v41  ;;  %v7489_v41 = vld [vmem:[#allocation4 + $0x1d8] sm:$0xff]  ;;  %v7488_v42 = vld [vmem:[#allocation4 + $0x1d0] sm:$0xff] }
 0x72e   : > { %7741 = vmatmul.mubr.f32.gmra.mrb[40].mxu1 %v7442_v34  ;;  %v7494_v34 = vld [vmem:[#allocation4 + $0x200] sm:$0xff] }
 0x72f   : > { %7745 = vmatprep.mubr.f32.mxu1 %v7447_v14  ;;  %10720 = vmatpush1.bf16.msra.mxu1 %v10719_v18  ;;  %v7499_v18 = vld [vmem:[#allocation4 + $0x228] sm:$0xff]  ;;  %v7498_v14 = vld [vmem:[#allocation4 + $0x220] sm:$0xff] }
 0x730   : > { %10721 = vmatprep.subr.bf16.mxu1 %v11784_v5 }
 0x732   : > { %7746 = vmatmul.mubr.f32.gmra.mrb[42].mxu1 %v7446_v51  ;;  %v7507_v51 = vld [vmem:[#allocation4 + $0x268] sm:$0xff] }
 0x733   : > { %7750 = vmatprep.mubr.f32.mxu1 %v7451_v46  ;;  %10723 = vmatpush1.bf16.msra.mxu1 %v10722_v12  ;;  %v7506_v12 = vld [vmem:[#allocation4 + $0x260] sm:$0xff]  ;;  %v7511_v46 = vld [vmem:[#allocation4 + $0x288] sm:$0xff] }
 0x734   : > { %10724 = vmatprep.subr.bf16.mxu1 %v11784_v5 }
 0x736   : > { %7751 = vmatmul.mubr.f32.gmra.mrb[44].mxu1 %v7450_v25  ;;  %v7519_v25 = vld [vmem:[#allocation4 + $0x2c8] sm:$0xff] }
 0x737   : > { %7755 = vmatprep.mubr.f32.mxu1 %v7455_v52  ;;  %10726 = vmatpush1.bf16.msra.mxu1 %v10725_v54  ;;  %v7518_v54 = vld [vmem:[#allocation4 + $0x2c0] sm:$0xff]  ;;  %v7523_v52 = vld [vmem:[#allocation4 + $0x2e8] sm:$0xff] }
 0x738   : > { %10727 = vmatprep.subr.bf16.mxu1 %v11784_v5 }
 0x73a   : > { %7756 = vmatmul.mubr.f32.gmra.mrb[46].mxu1 %v7454_v61  ;;  %v7526_v61 = vld [vmem:[#allocation4 + $0x300] sm:$0xff] }
 0x73b   : > { %7760 = vmatprep.mubr.f32.mxu1 %v7459_v10  ;;  %10729 = vmatpush1.bf16.msra.mxu1 %v10728_v8  ;;  %v7531_v8 = vld [vmem:[#allocation4 + $0x328] sm:$0xff]  ;;  %v7530_v10 = vld [vmem:[#allocation4 + $0x320] sm:$0xff] }
 0x73c   : > { %10730 = vmatprep.subr.bf16.mxu1 %v11784_v5 }
 0x73e   : > { %7761 = vmatmul.mubr.f32.gmra.mrb[48].mxu1 %v7458_v30  ;;  %v7539_v30 = vld [vmem:[#allocation4 + $0x368] sm:$0xff] }
 0x73f   : > { %7765 = vmatprep.mubr.f32.mxu1 %v7463_v37  ;;  %10732 = vmatpush1.bf16.msra.mxu1 %v10731_v44  ;;  %v7538_v44 = vld [vmem:[#allocation4 + $0x360] sm:$0xff]  ;;  %v7543_v37 = vld [vmem:[#allocation4 + $0x388] sm:$0xff] }
 0x740   : > { %10733 = vmatprep.subr.bf16.mxu1 %v11784_v5 }
 0x742   : > { %7766 = vmatmul.mubr.f32.gmra.mrb[50].mxu1 %v7462_v17  ;;  %v7546_v17 = vld [vmem:[#allocation4 + $0x3a0] sm:$0xff] }
 0x743   : > { %7770 = vmatprep.mubr.f32.mxu1 %v7467_v59  ;;  %10735 = vmatpush1.bf16.msra.mxu1 %v10734_v48  ;;  %v7551_v48 = vld [vmem:[#allocation4 + $0x3c8] sm:$0xff]  ;;  %v7550_v59 = vld [vmem:[#allocation4 + $0x3c0] sm:$0xff] }
 0x744   : > { %10736 = vmatprep.subr.bf16.mxu1 %v11784_v5 }
 0x746   : > { %7771 = vmatmul.mubr.f32.gmra.mrb[52].mxu1 %v7466_v1  ;;  %v7433_v1 = vld [vmem:[#allocation4 + $0x18] sm:$0xff] }
 0x747   : > { %7775 = vmatprep.mubr.f32.mxu1 %v7471_v31  ;;  %10738 = vmatpush1.bf16.msra.mxu1 %v10737_v57  ;;  %v7432_v57 = vld [vmem:[#allocation4 + $0x10] sm:$0xff]  ;;  %v7437_v31 = vld [vmem:[#allocation4 + $0x38] sm:$0xff] }
 0x748   : > { %10739 = vmatprep.subr.bf16.mxu1 %v11784_v5 }
 0x74a   : > { %7776 = vmatmul.mubr.f32.gmra.mrb[54].mxu1 %v7470_v22  ;;  %v7440_v22 = vld [vmem:[#allocation4 + $0x50] sm:$0xff] }
 0x74b   : > { %7780 = vmatprep.mubr.f32.mxu1 %v7475_v62  ;;  %10741 = vmatpush1.bf16.msra.mxu1 %v10740_v33  ;;  %v7445_v33 = vld [vmem:[#allocation4 + $0x78] sm:$0xff]  ;;  %v7444_v62 = vld [vmem:[#allocation4 + $0x70] sm:$0xff] }
 0x74c   : > { %10742 = vmatprep.subr.bf16.mxu1 %v11784_v5 }
 0x74e   : > { %7781 = vmatmul.mubr.f32.gmra.mrb[56].mxu1 %v7474_v4  ;;  %v7453_v4 = vld [vmem:[#allocation4 + $0xb8] sm:$0xff] }
 0x74f   : > { %7785 = vmatprep.mubr.f32.mxu1 %v7479_v45  ;;  %10744 = vmatpush1.bf16.msra.mxu1 %v10743_v20  ;;  %v7452_v20 = vld [vmem:[#allocation4 + $0xb0] sm:$0xff]  ;;  %v7457_v45 = vld [vmem:[#allocation4 + $0xd8] sm:$0xff] }
 0x750   : > { %10745 = vmatprep.subr.bf16.mxu1 %v11784_v5 }
 0x752   : > { %7786 = vmatmul.mubr.f32.gmra.mrb[58].mxu1 %v7478_v58  ;;  %v7460_v58 = vld [vmem:[#allocation4 + $0xf0] sm:$0xff] }
 0x753   : > { %7790 = vmatprep.mubr.f32.mxu1 %v7483_v63  ;;  %10747 = vmatpush1.bf16.msra.mxu1 %v10746_v27  ;;  %v7465_v27 = vld [vmem:[#allocation4 + $0x118] sm:$0xff]  ;;  %v7464_v63 = vld [vmem:[#allocation4 + $0x110] sm:$0xff] }
 0x754   : > { %10748 = vmatprep.subr.bf16.mxu1 %v11784_v5 }
 0x756   : > { %7791 = vmatmul.mubr.f32.gmra.mrb[60].mxu1 %v7482_v16  ;;  %v7473_v16 = vld [vmem:[#allocation4 + $0x158] sm:$0xff] }
 0x757   : > { %7795 = vmatprep.mubr.f32.mxu1 %v7487_v38  ;;  %10750 = vmatpush1.bf16.msra.mxu1 %v10749_v11  ;;  %v7472_v11 = vld [vmem:[#allocation4 + $0x150] sm:$0xff]  ;;  %v7477_v38 = vld [vmem:[#allocation4 + $0x178] sm:$0xff] }
 0x758   : > { %10751 = vmatprep.subr.bf16.mxu1 %v11784_v5 }
 0x75a   : > { %7796 = vmatmul.mubr.f32.gmra.mrb[62].mxu1 %v7486_v49  ;;  %v7480_v49 = vld [vmem:[#allocation4 + $0x190] sm:$0xff] }
 0x75b   : > { %7800 = vmatprep.mubr.f32.mxu1 %v7491_v40  ;;  %10753 = vmatpush1.bf16.msra.mxu1 %v10752_v32  ;;  %v7485_v32 = vld [vmem:[#allocation4 + $0x1b8] sm:$0xff]  ;;  %v7484_v40 = vld [vmem:[#allocation4 + $0x1b0] sm:$0xff] }
 0x75c   : > { %10754 = vmatprep.subr.bf16.mxu1 %v11784_v5  ;;  %v7510_v5 = vld [vmem:[#allocation4 + $0x280] sm:$0xff] }
 0x75e   : > { %7801 = vmatmul.mubr.f32.gmra.mrb[64].mxu1 %v7490_v36  ;;  %v7493_v36 = vld [vmem:[#allocation4 + $0x1f8] sm:$0xff] }
 0x75f   : > { %7805 = vmatprep.mubr.f32.mxu1 %v7495_v13  ;;  %10756 = vmatpush1.bf16.msra.mxu1 %v10755_v6  ;;  %v7492_v6 = vld [vmem:[#allocation4 + $0x1f0] sm:$0xff]  ;;  %v7497_v13 = vld [vmem:[#allocation4 + $0x218] sm:$0xff] }
 0x762   : > { %7806 = vmatmul.mubr.f32.gmra.mrb[66].mxu1 %v7494_v34  ;;  %v7496_v34 = vld [vmem:[#allocation4 + $0x210] sm:$0xff] }
 0x763   : > { %7810 = vmatprep.mubr.f32.mxu1 %v7499_v18  ;;  %v7501_v18 = vld [vmem:[#allocation4 + $0x238] sm:$0xff] }
 0x766   : > { %7811 = vmatmul.mubr.f32.gmra.mrb[68].mxu1 %v7498_v14  ;;  %v7500_v14 = vld [vmem:[#allocation4 + $0x230] sm:$0xff] }
 0x767   : > { %7815 = vmatprep.mubr.f32.mxu1 %v7503_v53  ;;  %v7505_v53 = vld [vmem:[#allocation4 + $0x258] sm:$0xff] }
 0x76a   : > { %7816 = vmatmul.mubr.f32.gmra.mrb[70].mxu1 %v7502_v29  ;;  %v7504_v29 = vld [vmem:[#allocation4 + $0x250] sm:$0xff] }
 0x76b   : > { %7820 = vmatprep.mubr.f32.mxu1 %v7507_v51  ;;  %v7509_v51 = vld [vmem:[#allocation4 + $0x278] sm:$0xff] }
 0x76e   : > { %7821 = vmatmul.mubr.f32.gmra.mrb[72].mxu1 %v7506_v12  ;;  %v7508_v12 = vld [vmem:[#allocation4 + $0x270] sm:$0xff] }
 0x76f   : > { %7825 = vmatprep.mubr.f32.mxu1 %v7511_v46  ;;  %v7513_v46 = vld [vmem:[#allocation4 + $0x298] sm:$0xff] }
 0x772   : > { %7826 = vmatmul.mubr.f32.gmra.mrb[74].mxu1 %v7510_v5  ;;  %v7512_v5 = vld [vmem:[#allocation4 + $0x290] sm:$0xff] }
 0x773   : > { %7830 = vmatprep.mubr.f32.mxu1 %v7515_v21  ;;  %v7517_v21 = vld [vmem:[#allocation4 + $0x2b8] sm:$0xff] }
 0x776   : > { %7831 = vmatmul.mubr.f32.gmra.mrb[76].mxu1 %v7514_v39  ;;  %v7516_v39 = vld [vmem:[#allocation4 + $0x2b0] sm:$0xff] }
 0x777   : > { %7835 = vmatprep.mubr.f32.mxu1 %v7519_v25  ;;  %v8335_v25 = vld [vmem:[%s17268_s13] sm:$0xff] }
 0x77a   : > { %7836 = vmatmul.mubr.f32.gmra.mrb[78].mxu1 %v7518_v54  ;;  %v8336_v54 = vld [vmem:[%s17268_s13 + $0x8] sm:$0xff] }
 0x77b   : > { %7840 = vmatprep.mubr.f32.mxu1 %v7523_v52  ;;  %v7521_v52 = vld [vmem:[#allocation4 + $0x2d8] sm:$0xff] }
 0x77e   : > { %7841 = vmatmul.mubr.f32.gmra.mrb[80].mxu1 %v7522_v50  ;;  %v10757_v50 = vpack.c.bf16 %v8336_v54, %v8335_v25 }
 0x77f   : > { %7845 = vmatprep.mubr.f32.mxu1 %v7527_v19  ;;  %v7520_v19 = vld [vmem:[#allocation4 + $0x2d0] sm:$0xff] }
 0x780   : > { %10758 = vmatprep.subr.bf16.mxu0 %v10757_v50 }
 0x781   : > { %10760 = vmatpush3.bf16.msra.mxu0 %v10757_v50 }
 0x782   : > { %7846 = vmatmul.mubr.f32.gmra.mrb[82].mxu1 %v7526_v61  ;;  %v8337_v61 = vld [vmem:[%s17268_s13 + $0x10] sm:$0xff] }
 0x783   : > { %7850 = vmatprep.mubr.f32.mxu1 %v7531_v8  ;;  %v8338_v8 = vld [vmem:[%s17268_s13 + $0x18] sm:$0xff] }
 0x786   : > { %7851 = vmatmul.mubr.f32.gmra.mrb[84].mxu1 %v7530_v10  ;;  %v7525_v10 = vld [vmem:[#allocation4 + $0x2f8] sm:$0xff] }
 0x787   : > { %7855 = vmatprep.mubr.f32.mxu1 %v7535_v47  ;;  %v10761_v47 = vpack.c.bf16 %v8338_v8, %v8337_v61 }
 0x789   : > { %10762 = vmatprep.subr.bf16.mxu0 %v10761_v47 }
 0x78a   : > { %7856 = vmatmul.mubr.f32.gmra.mrb[86].mxu1 %v7534_v35  ;;  %v7524_v35 = vld [vmem:[#allocation4 + $0x2f0] sm:$0xff]  ;;  %10764 = vmatpush3.bf16.msra.mxu0 %v10761_v47 }
 0x78b   : > { %7860 = vmatprep.mubr.f32.mxu1 %v7539_v30  ;;  %v7529_v30 = vld [vmem:[#allocation4 + $0x318] sm:$0xff] }
 0x78e   : > { %7861 = vmatmul.mubr.f32.gmra.mrb[88].mxu1 %v7538_v44  ;;  %v7528_v44 = vld [vmem:[#allocation4 + $0x310] sm:$0xff] }
 0x78f   : > { %7865 = vmatprep.mubr.f32.mxu1 %v7543_v37  ;;  %v7533_v37 = vld [vmem:[#allocation4 + $0x338] sm:$0xff] }
 0x792   : > { %7866 = vmatmul.mubr.f32.gmra.mrb[90].mxu1 %v7542_v26  ;;  %v7532_v26 = vld [vmem:[#allocation4 + $0x330] sm:$0xff] }
 0x793   : > { %7870 = vmatprep.mubr.f32.mxu1 %v7547_v2  ;;  %v7537_v2 = vld [vmem:[#allocation4 + $0x358] sm:$0xff] }
 0x796   : > { %7871 = vmatmul.mubr.f32.gmra.mrb[92].mxu1 %v7546_v17  ;;  %v7536_v17 = vld [vmem:[#allocation4 + $0x350] sm:$0xff] }
 0x797   : > { %7875 = vmatprep.mubr.f32.mxu1 %v7551_v48  ;;  %v7541_v48 = vld [vmem:[#allocation4 + $0x378] sm:$0xff] }
 0x79a   : > { %7876 = vmatmul.mubr.f32.gmra.mrb[94].mxu1 %v7550_v59  ;;  %v7540_v59 = vld [vmem:[#allocation4 + $0x370] sm:$0xff] }
 0x79b   : > { %7880 = vmatprep.mubr.f32.mxu1 %v7555_v7  ;;  %v7545_v7 = vld [vmem:[#allocation4 + $0x398] sm:$0xff] }
 0x79e   : > { %7881 = vmatmul.mubr.f32.gmra.mrb[96].mxu1 %v7554_v9  ;;  %v7544_v9 = vld [vmem:[#allocation4 + $0x390] sm:$0xff] }
 0x79f   : > { %7950 = vmatprep.mubr.f32.mxu1 %v7433_v1  ;;  %v7549_v1 = vld [vmem:[#allocation4 + $0x3b8] sm:$0xff] }
 0x7a2   : > { %7951 = vmatmul.mubr.f32.vlgmr.msra.gmra.mrb[34].mxu1 %v7432_v57  ;;  %v7548_v57 = vld [vmem:[#allocation4 + $0x3b0] sm:$0xff] }
 0x7a3   : > { %7955 = vmatprep.mubr.f32.mxu1 %v7437_v31  ;;  %v7553_v31 = vld [vmem:[#allocation4 + $0x3d8] sm:$0xff] }
 0x7a6   : > { %7956 = vmatmul.mubr.f32.gmra.mrb[36].mxu1 %v7436_v0  ;;  %v7552_v0 = vld [vmem:[#allocation4 + $0x3d0] sm:$0xff] }
 0x7a7   : > { %7960 = vmatprep.mubr.f32.mxu1 %v7441_v23  ;;  %v7557_v23 = vld [vmem:[#allocation4 + $0x3f8] sm:$0xff] }
 0x7aa   : > { %7961 = vmatmul.mubr.f32.gmra.mrb[38].mxu1 %v7440_v22  ;;  %v7556_v22 = vld [vmem:[#allocation4 + $0x3f0] sm:$0xff] }
 0x7ab   : > { %7965 = vmatprep.mubr.f32.mxu1 %v7445_v33  ;;  %v18027_v33 = vld [vmem:[#allocation42_spill] sm:$0xff] }
 0x7ae   : > { %7966 = vmatmul.mubr.f32.gmra.mrb[40].mxu1 %v7444_v62  ;;  %v8111_v62 = vsub.f32 0.0, %v18027_v33 }
 0x7af   : > { %7970 = vmatprep.mubr.f32.mxu1 %v7449_v3  ;;  %v18028_v3 = vld [vmem:[#allocation41_spill] sm:$0xff] }
 0x7b2   : > { %7971 = vmatmul.mubr.f32.gmra.mrb[42].mxu1 %v7448_v60  ;;  %v8112_v60 = vsub.f32 0.0, %v18028_v3 }
 0x7b3   : > { %7975 = vmatprep.mubr.f32.mxu1 %v7453_v4  ;;  %v8143_v4 = vmul.f32 1.442695, %v8111_v62  ;;  %v18041_v62 = vld [vmem:[#allocation51_spill] sm:$0xff] }
 0x7b5   : > { %11543 = vpow2.f32 %v8143_v4 }
 0x7b6   : > { %7976 = vmatmul.mubr.f32.gmra.mrb[44].mxu1 %v7452_v20  ;;  %v8145_v20 = vmul.f32 1.442695, %v8112_v60  ;;  %v8122_v60 = vsub.f32 0.0, %v18041_v62 }
 0x7b7   : > { %7980 = vmatprep.mubr.f32.mxu1 %v7457_v45  ;;  %v18029_v45 = vld [vmem:[#allocation44_spill] sm:$0xff] }
 0x7b8   : > { %11545 = vpow2.f32 %v8145_v20 }
 0x7ba   : > { %7981 = vmatmul.mubr.f32.gmra.mrb[46].mxu1 %v7456_v43  ;;  %v8113_v43 = vsub.f32 0.0, %v18029_v45 }
 0x7bb   : > { %7985 = vmatprep.mubr.f32.mxu1 %v7461_v28 }
 0x7bc   : > { %v8147_v28 = vmul.f32 1.442695, %v8113_v43 }
 0x7be   : > { %7986 = vmatmul.mubr.f32.gmra.mrb[48].mxu1 %v7460_v58  ;;  %v18030_v58 = vld [vmem:[#allocation43_spill] sm:$0xff]  ;;  %11547 = vpow2.f32 %v8147_v28 }
 0x7bf   : > { %7990 = vmatprep.mubr.f32.mxu1 %v7465_v27  ;;  %v8114_v27 = vsub.f32 0.0, %v18030_v58 }
 0x7c2   : > { %7991 = vmatmul.mubr.f32.gmra.mrb[50].mxu1 %v7464_v63  ;;  %v8149_v63 = vmul.f32 1.442695, %v8114_v27 }
 0x7c3   : > { %7995 = vmatprep.mubr.f32.mxu1 %v7469_v55  ;;  %v18031_v55 = vld [vmem:[#allocation46_spill] sm:$0xff] }
 0x7c4   : > { %11549 = vpow2.f32 %v8149_v63  ;;  %v18042_v63 = vld [vmem:[#allocation55_spill] sm:$0xff] }
 0x7c6   : > { %7996 = vmatmul.mubr.f32.gmra.mrb[52].mxu1 %v7468_v56  ;;  %v8115_v56 = vsub.f32 0.0, %v18031_v55 }
 0x7c7   : > { %8000 = vmatprep.mubr.f32.mxu1 %v7473_v16  ;;  %v11544_v16 = vpop.eup %11543 }
 0x7ca   : > { %8001 = vmatmul.mubr.f32.gmra.mrb[54].mxu1 %v7472_v11  ;;  %v8151_v11 = vmul.f32 1.442695, %v8115_v56 }
 0x7cb   : > { %8005 = vmatprep.mubr.f32.mxu1 %v7477_v38  ;;  %v18032_v38 = vld [vmem:[#allocation45_spill] sm:$0xff] }
 0x7cc   : > { %11551 = vpow2.f32 %v8151_v11 }
 0x7ce   : > { %8006 = vmatmul.mubr.f32.gmra.mrb[56].mxu1 %v7476_v24  ;;  %v8116_v24 = vsub.f32 0.0, %v18032_v38 }
 0x7cf   : > { %8010 = vmatprep.mubr.f32.mxu1 %v7481_v15  ;;  %v8207_v15 = vadd.f32 1.0, %v11544_v16 }
 0x7d1   : > { %11553 = vrcp.f32 %v8207_v15  ;;  %v18043_v15 = vld [vmem:[#allocation57_spill] sm:$0xff] }
 0x7d2   : > { %8011 = vmatmul.mubr.f32.gmra.mrb[58].mxu1 %v7480_v49  ;;  %v11546_v49 = vpop.eup %11545 }
 0x7d3   : > { %8015 = vmatprep.mubr.f32.mxu1 %v7485_v32  ;;  %v8153_v32 = vmul.f32 1.442695, %v8116_v24  ;;  %v8165_v24 = vmul.f32 1.442695, %v8122_v60 }
 0x7d5   : > { %11555 = vpow2.f32 %v8153_v32 }
 0x7d6   : > { %8016 = vmatmul.mubr.f32.gmra.mrb[60].mxu1 %v7484_v40  ;;  %v18033_v40 = vld [vmem:[#allocation48_spill] sm:$0xff] }
 0x7d7   : > { %8020 = vmatprep.mubr.f32.mxu1 %v7489_v41  ;;  %v8117_v41 = vsub.f32 0.0, %v18033_v40 }
 0x7da   : > { %8021 = vmatmul.mubr.f32.gmra.mrb[62].mxu1 %v7488_v42  ;;  %v8208_v42 = vadd.f32 1.0, %v11546_v49  ;;  %v8123_v49 = vsub.f32 0.0, %v18043_v15 }
 0x7db   : > { %8025 = vmatprep.mubr.f32.mxu1 %v7493_v36  ;;  %v11548_v36 = vpop.eup %11547 }
 0x7dc   : > { %11557 = vrcp.f32 %v8208_v42 }
 0x7de   : > { %8026 = vmatmul.mubr.f32.gmra.mrb[64].mxu1 %v7492_v6  ;;  %v8155_v6 = vmul.f32 1.442695, %v8117_v41 }
 0x7df   : > { %8030 = vmatprep.mubr.f32.mxu1 %v7497_v13  ;;  %v18034_v13 = vld [vmem:[#allocation47_spill] sm:$0xff] }
 0x7e0   : > { %11559 = vpow2.f32 %v8155_v6 }
 0x7e2   : > { %8031 = vmatmul.mubr.f32.gmra.mrb[66].mxu1 %v7496_v34  ;;  %v8118_v34 = vsub.f32 0.0, %v18034_v13 }
 0x7e3   : > { %8035 = vmatprep.mubr.f32.mxu1 %v7501_v18  ;;  %v8209_v18 = vadd.f32 1.0, %v11548_v36 }
 0x7e5   : > { %11561 = vrcp.f32 %v8209_v18 }
 0x7e6   : > { %8036 = vmatmul.mubr.f32.gmra.mrb[68].mxu1 %v7500_v14  ;;  %v11550_v14 = vpop.eup %11549 }
 0x7e7   : > { %8040 = vmatprep.mubr.f32.mxu1 %v7505_v53  ;;  %v8157_v53 = vmul.f32 1.442695, %v8118_v34  ;;  %v18044_v34 = vld [vmem:[#allocation65_spill] sm:$0xff] }
 0x7e9   : > { %11563 = vpow2.f32 %v8157_v53 }
 0x7ea   : > { %8041 = vmatmul.mubr.f32.gmra.mrb[70].mxu1 %v7504_v29  ;;  %v18035_v29 = vld [vmem:[#allocation50_spill] sm:$0xff] }
 0x7eb   : > { %8045 = vmatprep.mubr.f32.mxu1 %v7509_v51  ;;  %v8119_v51 = vsub.f32 0.0, %v18035_v29 }
 0x7ed   : > { %v8159_v54 = vmul.f32 1.442695, %v8119_v51  ;;  %v8167_v51 = vmul.f32 1.442695, %v8123_v49 }
 0x7ee   : > { %8046 = vmatmul.mubr.f32.gmra.mrb[72].mxu1 %v7508_v12  ;;  %v16525_v12 = vld [vmem:[%s17267_s12] ss:$0 sm:$0xff] }
 0x7ef   : > { %8050 = vmatprep.mubr.f32.mxu1 %v7513_v46  ;;  %v8210_v46 = vadd.f32 1.0, %v11550_v14  ;;  %v7632_v56 = vmul.f32 %v16525_v12, %v18042_v63  ;;  %v7633_v18 = vmul.f32 %v16525_v12, %v18044_v34  ;;  %v18051_v63 = vld [vmem:[#allocation71_spill] sm:$0xff] }
 0x7f0   : > { %v18053_v34 = vld [vmem:[#allocation67_spill] sm:$0xff] }
 0x7f1   : > { %11565 = vrcp.f32 %v8210_v46  ;;  %v18045_v46 = vld [vmem:[#allocation54_spill] sm:$0xff] }
 0x7f2   : > { %8051 = vmatmul.mubr.f32.gmra.mrb[74].mxu1 %v7512_v5  ;;  %v11552_v5 = vpop.eup %11551  ;;  %11567 = vpow2.f32 %v8159_v54 }
 0x7f3   : > { %8055 = vmatprep.mubr.f32.mxu1 %v7517_v21  ;;  %v11554_v21 = vpop.eup %11553 }
 0x7f4   : > { %v11556_v61 = vpop.eup %11555  ;;  %v8271_v8 = vmul.f32 %v11554_v21, %v18027_v33 }
 0x7f6   : > { %8056 = vmatmul.mubr.f32.gmra.mrb[76].mxu1 %v7516_v39  ;;  %v18036_v39 = vld [vmem:[#allocation68_spill] sm:$0xff] }
 0x7f7   : > { %8060 = vmatprep.mubr.f32.mxu1 %v7521_v52  ;;  %v7629_v25 = vmul.f32 %v16525_v12, %v18036_v39  ;;  %v18037_v52 = vld [vmem:[#allocation49_spill] sm:$0xff] }
 0x7f8   : > { %v8120_v50 = vsub.f32 0.0, %v18037_v52 }
 0x7fa   : > { %8061 = vmatmul.mubr.f32.gmra.mrb[78].mxu1 %v7520_v19  ;;  %v8211_v19 = vadd.f32 1.0, %v11552_v5  ;;  %v8124_v5 = vsub.f32 0.0, %v18045_v46 }
 0x7fb   : > { %8065 = vmatprep.mubr.f32.mxu1 %v7525_v10  ;;  %v11558_v10 = vpop.eup %11557 }
 0x7fc   : > { %11569 = vrcp.f32 %v8211_v19  ;;  %v18046_v19 = vld [vmem:[#allocation63_spill] sm:$0xff] }
 0x7fe   : > { %8066 = vmatmul.mubr.f32.gmra.mrb[80].mxu1 %v7524_v35  ;;  %v18038_v35 = vld [vmem:[#allocation64_spill] sm:$0xff] }
 0x7ff   : > { %8070 = vmatprep.mubr.f32.mxu1 %v7529_v30  ;;  %v7630_v30 = vmul.f32 %v16525_v12, %v18038_v35  ;;  %v18047_v35 = vld [vmem:[#allocation62_spill] sm:$0xff] }
 0x802   : > { %8071 = vmatmul.mubr.f32.gmra.mrb[82].mxu1 %v7528_v44 }
 0x803   : > { %8075 = vmatprep.mubr.f32.mxu1 %v7533_v37 }
 0x806   : > { %8076 = vmatmul.mubr.f32.gmra.mrb[84].mxu1 %v7532_v26  ;;  %v8161_v26 = vmul.f32 1.442695, %v8120_v50 }
 0x807   : > { %8080 = vmatprep.mubr.f32.mxu1 %v7537_v2  ;;  %v18039_v2 = vld [vmem:[#allocation52_spill] sm:$0xff] }
 0x808   : > { %11571 = vpow2.f32 %v8161_v26 }
 0x80a   : > { %8081 = vmatmul.mubr.f32.gmra.mrb[86].mxu1 %v7536_v17  ;;  %v8121_v17 = vsub.f32 0.0, %v18039_v2 }
 0x80b   : > { %8085 = vmatprep.mubr.f32.mxu1 %v7541_v48  ;;  %v8212_v48 = vadd.f32 1.0, %v11556_v61  ;;  %v7634_v61 = vmul.f32 %v16525_v12, %v18046_v19  ;;  %v18055_v19 = vld [vmem:[#allocation80_spill] sm:$0xff] }
 0x80c   : > { %v8163_v33 = vmul.f32 1.442695, %v8121_v17 }
 0x80d   : > { %11573 = vrcp.f32 %v8212_v48 }
 0x80e   : > { %8086 = vmatmul.mubr.f32.gmra.mrb[88].mxu1 %v7540_v59  ;;  %v11560_v59 = vpop.eup %11559  ;;  %11575 = vpow2.f32 %v8163_v33 }
 0x80f   : > { %8090 = vmatprep.mubr.f32.mxu1 %v7545_v7  ;;  %v8272_v7 = vmul.f32 %v11558_v10, %v18028_v3  ;;  %v8213_v4 = vadd.f32 1.0, %v11560_v59  ;;  %v18048_v59 = vld [vmem:[#allocation53_spill] sm:$0xff] }
 0x811   : > { %11577 = vrcp.f32 %v8213_v4 }
 0x812   : > { %8091 = vmatmul.mubr.f32.gmra.mrb[90].mxu1 %v7544_v9  ;;  %11579 = vpow2.f32 %v8165_v24 }
 0x813   : > { %8095 = vmatprep.mubr.f32.mxu1 %v7549_v1  ;;  %v11562_v1 = vpop.eup %11561 }
 0x814   : > { %v11564_v20 = vpop.eup %11563  ;;  %v8273_v3 = vmul.f32 %v11562_v1, %v18029_v45 }
 0x815   : > { %v11566_v28 = vpop.eup %11565  ;;  %v8214_v32 = vadd.f32 1.0, %v11564_v20  ;;  %v18050_v20 = vld [vmem:[#allocation73_spill] sm:$0xff] }
 0x816   : > { %8096 = vmatmul.mubr.f32.gmra.mrb[92].mxu1 %v7548_v57  ;;  %v11568_v41 = vpop.eup %11567  ;;  %v8274_v36 = vmul.f32 %v11566_v28, %v18030_v58 }
 0x817   : > { %8100 = vmatprep.mubr.f32.mxu1 %v7553_v31  ;;  %v18040_v31 = vld [vmem:[#allocation56_spill] sm:$0xff]  ;;  %v11570_v45 = vpop.eup %11569  ;;  %11581 = vrcp.f32 %v8214_v32  ;;  %v8215_v21 = vadd.f32 1.0, %v11568_v41  ;;  %v18052_v41 = vld [vmem:[#allocation61_spill] sm:$0xff] }
 0x818   : > { %v11572_v39 = vpop.eup %11571  ;;  %v8275_v54 = vmul.f32 %v11570_v45, %v18031_v55  ;;  %11583 = vpow2.f32 %v8167_v51 }
 0x819   : > { %v11574_v58 = vpop.eup %11573  ;;  %11585 = vrcp.f32 %v8215_v21 }
 0x81a   : > { %8101 = vmatmul.mubr.f32.gmra.mrb[94].mxu1 %v7552_v0  ;;  %v7631_v0 = vmul.f32 %v16525_v12, %v18040_v31  ;;  %v8276_v17 = vmul.f32 %v11574_v58, %v18032_v38  ;;  %v18049_v31 = vld [vmem:[#allocation59_spill] sm:$0xff] }
 0x81b   : > { %8105 = vmatprep.mubr.f32.mxu1 %v7557_v23 }
 0x81e   : > { %8106 = vmatmul.mubr.f32.gmra.mrb[96].mxu1 %v7556_v22 }
 0x875   : > { %v7952_v47 = vpop.f32.mrb[34].mxu1 }
 0x876   : > { %v10817_v44 = vadd.f32 %v7952_v47, %v7629_v25  ;;  %v7954_v37 = vpop.f32.mrb[35].mxu1  ;;  %v8169_v47 = vmul.f32 1.442695, %v8124_v5 }
 0x877   : > { %v11576_v37 = vpop.eup %11575 }
 0x878   : > { %v8303_v9 = vmul.f32 %v10817_v44, %v8271_v8  ;;  %v8216_v44 = vadd.f32 1.0, %v11572_v39  ;;  %v11578_v55 = vpop.eup %11577  ;;  %11587 = vpow2.f32 %v8169_v47  ;;  %v18054_v39 = vld [vmem:[#allocation77_spill] sm:$0xff] }
 0x879   : > { %v7957_v57 = vpop.f32.mrb[36].mxu1  ;;  %v8277_v60 = vmul.f32 %v11578_v55, %v18033_v40 }
 0x87a   : > { %v10818_v23 = vadd.f32 %v7957_v57, %v7630_v30  ;;  %v7959_v22 = vpop.f32.mrb[37].mxu1  ;;  %10485 = vmatprep.mubr.msk.f32.mxu0 %vm2612_vm7, %v8303_v9  ;;  %v8125_v30 = vsub.f32 0.0, %v18047_v35  ;;  %11589 = vrcp.f32 %v8216_v44 }
 0x87b   : > { %v11580_v22 = vpop.eup %11579 }
 0x87c   : > { %v8304_v43 = vmul.f32 %v10818_v23, %v8272_v7  ;;  %v7635_v7 = vmul.f32 %v16525_v12, %v18048_v59  ;;  %v8171_v57 = vmul.f32 1.442695, %v8125_v30  ;;  %v8217_v23 = vadd.f32 1.0, %v11576_v37  ;;  %v11582_v38 = vpop.eup %11581  ;;  %v18056_v37 = vld [vmem:[#allocation60_spill] sm:$0xff] }
 0x87d   : > { %v7962_v27 = vpop.f32.mrb[38].mxu1  ;;  %v8278_v49 = vmul.f32 %v11582_v38, %v18034_v13  ;;  %v18057_v59 = vld [vmem:[#allocation76_spill] sm:$0xff] }
 0x87e   : > { %v10819_v16 = vadd.f32 %v7962_v27, %v7631_v0  ;;  %v7964_v11 = vpop.f32.mrb[39].mxu1  ;;  %10486 = vmatmul.mubr.msk.f32.vlgmr.msra.gmra.mrb[126].mxu0 %vm2612_vm7, %v8304_v43  ;;  %v8126_v0 = vsub.f32 0.0, %v18049_v31  ;;  %v7636_v43 = vmul.f32 %v16525_v12, %v18050_v20  ;;  %11591 = vpow2.f32 %v8171_v57  ;;  %v18059_v20 = vld [vmem:[#allocation88_spill] sm:$0xff] }
 0x87f   : > { %11593 = vrcp.f32 %v8217_v23  ;;  %v11584_v11 = vpop.eup %11583 }
 0x880   : > { %v8305_v42 = vmul.f32 %v10819_v16, %v8273_v3  ;;  %v8173_v27 = vmul.f32 1.442695, %v8126_v0  ;;  %v8218_v16 = vadd.f32 1.0, %v11580_v22  ;;  %v11586_v40 = vpop.eup %11585  ;;  %v18058_v22 = vld [vmem:[#allocation74_spill] sm:$0xff] }
 0x881   : > { %v7967_v6 = vpop.f32.mrb[40].mxu1  ;;  %v8279_v5 = vmul.f32 %v11586_v40, %v18035_v29 }
 0x882   : > { %v10820_v14 = vadd.f32 %v7967_v6, %v7632_v56  ;;  %v7969_v53 = vpop.f32.mrb[41].mxu1  ;;  %10488 = vmatprep.mubr.msk.f32.mxu0 %vm2612_vm7, %v8305_v42  ;;  %v8127_v56 = vsub.f32 0.0, %v18051_v63  ;;  %v7637_v42 = vmul.f32 %v16525_v12, %v18052_v41  ;;  %11595 = vpow2.f32 %v8173_v27  ;;  %v18061_v41 = vld [vmem:[#allocation85_spill] sm:$0xff] }
 0x883   : > { %11597 = vrcp.f32 %v8218_v16  ;;  %v11588_v53 = vpop.eup %11587 }
 0x884   : > { %v8306_v25 = vmul.f32 %v10820_v14, %v8274_v36  ;;  %v8175_v6 = vmul.f32 1.442695, %v8127_v56  ;;  %v8219_v14 = vadd.f32 1.0, %v11584_v11  ;;  %v11590_v13 = vpop.eup %11589  ;;  %v18060_v11 = vld [vmem:[#allocation72_spill] sm:$0xff] }
 0x885   : > { %v7972_v50 = vpop.f32.mrb[42].mxu1  ;;  %v8280_v30 = vmul.f32 %v11590_v13, %v18037_v52 }
 0x886   : > { %v10821_v8 = vadd.f32 %v7972_v50, %v7633_v18  ;;  %v7974_v10 = vpop.f32.mrb[43].mxu1  ;;  %10489 = vmatmul.mubr.msk.f32.gmra.mrb[128].mxu0 %vm2612_vm7, %v8306_v25  ;;  %v8128_v18 = vsub.f32 0.0, %v18053_v34  ;;  %v7638_v25 = vmul.f32 %v16525_v12, %v18054_v39  ;;  %11599 = vpow2.f32 %v8175_v6  ;;  %v18063_v39 = vld [vmem:[#allocation97_spill] sm:$0xff] }
 0x887   : > { %11601 = vrcp.f32 %v8219_v14 }
 0x888   : > { %v8307_v26 = vmul.f32 %v10821_v8, %v8275_v54  ;;  %v8177_v50 = vmul.f32 1.442695, %v8128_v18  ;;  %v8220_v8 = vadd.f32 1.0, %v11588_v53  ;;  %v11592_v10 = vpop.eup %11591  ;;  %v18062_v53 = vld [vmem:[#allocation58_spill] sm:$0xff] }
 0x889   : > { %v7977_v48 = vpop.f32.mrb[44].mxu1  ;;  %v11594_v29 = vpop.eup %11593 }
 0x88a   : > { %v10822_v9 = vadd.f32 %v7977_v48, %v7634_v61  ;;  %v7979_v1 = vpop.f32.mrb[45].mxu1  ;;  %10491 = vmatprep.mubr.msk.f32.mxu0 %vm2612_vm7, %v8307_v26  ;;  %v8129_v61 = vsub.f32 0.0, %v18055_v19  ;;  %v7639_v26 = vmul.f32 %v16525_v12, %v18056_v37  ;;  %11603 = vpow2.f32 %v8177_v50  ;;  %v18065_v37 = vld [vmem:[#allocation93_spill] sm:$0xff] }
 0x88b   : > { %11605 = vrcp.f32 %v8220_v8  ;;  %v8281_v0 = vmul.f32 %v11594_v29, %v18039_v2 }
 0x88c   : > { %v8308_v33 = vmul.f32 %v10822_v9, %v8276_v17  ;;  %v8179_v48 = vmul.f32 1.442695, %v8129_v61  ;;  %v8221_v9 = vadd.f32 1.0, %v11592_v10  ;;  %v11596_v1 = vpop.eup %11595  ;;  %v18064_v10 = vld [vmem:[#allocation82_spill] sm:$0xff] }
 0x88d   : > { %v7982_v4 = vpop.f32.mrb[46].mxu1  ;;  %v11598_v52 = vpop.eup %11597 }
 0x88e   : > { %v10823_v3 = vadd.f32 %v7982_v4, %v7635_v7  ;;  %v7984_v28 = vpop.f32.mrb[47].mxu1  ;;  %10492 = vmatmul.mubr.msk.f32.gmra.mrb[130].mxu0 %vm2612_vm7, %v8308_v33  ;;  %v8130_v7 = vsub.f32 0.0, %v18057_v59  ;;  %v7640_v33 = vmul.f32 %v16525_v12, %v18058_v22  ;;  %11607 = vpow2.f32 %v8179_v48  ;;  %v18067_v22 = vld [vmem:[#allocation106_spill] sm:$0xff] }
 0x88f   : > { %11609 = vrcp.f32 %v8221_v9  ;;  %v8282_v56 = vmul.f32 %v11598_v52, %v18041_v62 }
 0x890   : > { %v8309_v24 = vmul.f32 %v10823_v3, %v8277_v60  ;;  %v8181_v4 = vmul.f32 1.442695, %v8130_v7  ;;  %v8222_v3 = vadd.f32 1.0, %v11596_v1  ;;  %v11600_v28 = vpop.eup %11599  ;;  %v18066_v1 = vld [vmem:[#allocation70_spill] sm:$0xff] }
 0x891   : > { %v7987_v32 = vpop.f32.mrb[48].mxu1  ;;  %v11602_v2 = vpop.eup %11601 }
 0x892   : > { %v10824_v36 = vadd.f32 %v7987_v32, %v7636_v43  ;;  %v7989_v45 = vpop.f32.mrb[49].mxu1  ;;  %10494 = vmatprep.mubr.msk.f32.mxu0 %vm2612_vm7, %v8309_v24  ;;  %v8131_v43 = vsub.f32 0.0, %v18059_v20  ;;  %v7641_v24 = vmul.f32 %v16525_v12, %v18060_v11  ;;  %11611 = vpow2.f32 %v8181_v4  ;;  %v18069_v11 = vld [vmem:[#allocation102_spill] sm:$0xff] }
 0x893   : > { %11613 = vrcp.f32 %v8222_v3  ;;  %v8283_v18 = vmul.f32 %v11602_v2, %v18043_v15 }
 0x894   : > { %v8310_v51 = vmul.f32 %v10824_v36, %v8278_v49  ;;  %v8183_v32 = vmul.f32 1.442695, %v8131_v43  ;;  %v8223_v36 = vadd.f32 1.0, %v11600_v28  ;;  %v11604_v45 = vpop.eup %11603  ;;  %v18068_v28 = vld [vmem:[#allocation69_spill] sm:$0xff] }
 0x895   : > { %v7992_v21 = vpop.f32.mrb[50].mxu1  ;;  %v11606_v62 = vpop.eup %11605 }
 0x896   : > { %v10825_v54 = vadd.f32 %v7992_v21, %v7637_v42  ;;  %v7994_v58 = vpop.f32.mrb[51].mxu1  ;;  %10495 = vmatmul.mubr.msk.f32.gmra.mrb[132].mxu0 %vm2612_vm7, %v8310_v51  ;;  %v8132_v42 = vsub.f32 0.0, %v18061_v41  ;;  %v7642_v51 = vmul.f32 %v16525_v12, %v18062_v53  ;;  %11615 = vpow2.f32 %v8183_v32  ;;  %v18071_v53 = vld [vmem:[#allocation114_spill] sm:$0xff] }
 0x897   : > { %11617 = vrcp.f32 %v8223_v36  ;;  %v8284_v61 = vmul.f32 %v11606_v62, %v18045_v46 }
 0x898   : > { %v8311_v47 = vmul.f32 %v10825_v54, %v8279_v5  ;;  %v8185_v21 = vmul.f32 1.442695, %v8132_v42  ;;  %v8224_v54 = vadd.f32 1.0, %v11604_v45  ;;  %v11608_v58 = vpop.eup %11607  ;;  %v18070_v45 = vld [vmem:[#allocation83_spill] sm:$0xff] }
 0x899   : > { %v7997_v44 = vpop.f32.mrb[52].mxu1  ;;  %v11610_v15 = vpop.eup %11609 }
 0x89a   : > { %v10826_v17 = vadd.f32 %v7997_v44, %v7638_v25  ;;  %v7999_v55 = vpop.f32.mrb[53].mxu1  ;;  %10497 = vmatprep.mubr.msk.f32.mxu0 %vm2612_vm7, %v8311_v47  ;;  %v8133_v25 = vsub.f32 0.0, %v18063_v39  ;;  %v7643_v47 = vmul.f32 %v16525_v12, %v18064_v10  ;;  %11619 = vpow2.f32 %v8185_v21  ;;  %v18073_v10 = vld [vmem:[#allocation110_spill] sm:$0xff] }
 0x89b   : > { %11621 = vrcp.f32 %v8224_v54  ;;  %v8285_v7 = vmul.f32 %v11610_v15, %v18047_v35 }
 0x89c   : > { %v8312_v57 = vmul.f32 %v10826_v17, %v8280_v30  ;;  %v8187_v44 = vmul.f32 1.442695, %v8133_v25  ;;  %v8225_v17 = vadd.f32 1.0, %v11608_v58  ;;  %v11612_v55 = vpop.eup %11611  ;;  %v18072_v58 = vld [vmem:[#allocation81_spill] sm:$0xff] }
 0x89d   : > { %v8002_v23 = vpop.f32.mrb[54].mxu1  ;;  %v11614_v46 = vpop.eup %11613 }
 0x89e   : > { %v10827_v60 = vadd.f32 %v8002_v23, %v7639_v26  ;;  %v8004_v38 = vpop.f32.mrb[55].mxu1  ;;  %10498 = vmatmul.mubr.msk.f32.gmra.mrb[134].mxu0 %vm2612_vm7, %v8312_v57  ;;  %v8134_v26 = vsub.f32 0.0, %v18065_v37  ;;  %v7644_v57 = vmul.f32 %v16525_v12, %v18066_v1  ;;  %11623 = vpow2.f32 %v8187_v44  ;;  %v18075_v1 = vld [vmem:[#allocation123_spill] sm:$0xff] }
 0x89f   : > { %11625 = vrcp.f32 %v8225_v17  ;;  %v8286_v43 = vmul.f32 %v11614_v46, %v18049_v31 }
 0x8a0   : > { %v8313_v27 = vmul.f32 %v10827_v60, %v8281_v0  ;;  %v8189_v23 = vmul.f32 1.442695, %v8134_v26  ;;  %v8226_v60 = vadd.f32 1.0, %v11612_v55  ;;  %v11616_v38 = vpop.eup %11615  ;;  %v18074_v55 = vld [vmem:[#allocation66_spill] sm:$0xff] }
 0x8a1   : > { %v8007_v16 = vpop.f32.mrb[56].mxu1  ;;  %v11618_v35 = vpop.eup %11617 }
 0x8a2   : > { %v10828_v49 = vadd.f32 %v8007_v16, %v7640_v33  ;;  %v8009_v40 = vpop.f32.mrb[57].mxu1  ;;  %10500 = vmatprep.mubr.msk.f32.mxu0 %vm2612_vm7, %v8313_v27  ;;  %v8135_v33 = vsub.f32 0.0, %v18067_v22  ;;  %v7645_v27 = vmul.f32 %v16525_v12, %v18068_v28  ;;  %11627 = vpow2.f32 %v8189_v23  ;;  %v18077_v28 = vld [vmem:[#allocation119_spill] sm:$0xff] }
 0x8a3   : > { %11629 = vrcp.f32 %v8226_v60  ;;  %v8287_v42 = vmul.f32 %v11618_v35, %v18051_v63 }
 0x8a4   : > { %v8314_v6 = vmul.f32 %v10828_v49, %v8282_v56  ;;  %v8191_v16 = vmul.f32 1.442695, %v8135_v33  ;;  %v8227_v49 = vadd.f32 1.0, %v11616_v38  ;;  %v11620_v40 = vpop.eup %11619  ;;  %v18076_v38 = vld [vmem:[#allocation90_spill] sm:$0xff] }
 0x8a5   : > { %v8012_v14 = vpop.f32.mrb[58].mxu1  ;;  %v11622_v31 = vpop.eup %11621 }
 0x8a6   : > { %v10829_v5 = vadd.f32 %v8012_v14, %v7641_v24  ;;  %v8014_v13 = vpop.f32.mrb[59].mxu1  ;;  %10501 = vmatmul.mubr.msk.f32.gmra.mrb[136].mxu0 %vm2612_vm7, %v8314_v6  ;;  %v8136_v24 = vsub.f32 0.0, %v18069_v11  ;;  %v7646_v6 = vmul.f32 %v16525_v12, %v18070_v45  ;;  %11631 = vpow2.f32 %v8191_v16  ;;  %v18079_v45 = vld [vmem:[#allocation129_spill] sm:$0xff] }
 0x8a7   : > { %11633 = vrcp.f32 %v8227_v49  ;;  %v8288_v25 = vmul.f32 %v11622_v31, %v18053_v34 }
 0x8a8   : > { %v8315_v50 = vmul.f32 %v10829_v5, %v8283_v18  ;;  %v8193_v14 = vmul.f32 1.442695, %v8136_v24  ;;  %v8228_v5 = vadd.f32 1.0, %v11620_v40  ;;  %v11624_v13 = vpop.eup %11623  ;;  %v18078_v40 = vld [vmem:[#allocation79_spill] sm:$0xff] }
 0x8a9   : > { %v8017_v8 = vpop.f32.mrb[60].mxu1  ;;  %v11626_v63 = vpop.eup %11625 }
 0x8aa   : > { %v10830_v30 = vadd.f32 %v8017_v8, %v7642_v51  ;;  %v8019_v29 = vpop.f32.mrb[61].mxu1  ;;  %10503 = vmatprep.mubr.msk.f32.mxu0 %vm2612_vm7, %v8315_v50  ;;  %v8137_v51 = vsub.f32 0.0, %v18071_v53  ;;  %v7647_v50 = vmul.f32 %v16525_v12, %v18072_v58  ;;  %11635 = vpow2.f32 %v8193_v14  ;;  %v18081_v58 = vld [vmem:[#allocation127_spill] sm:$0xff] }
 0x8ab   : > { %11637 = vrcp.f32 %v8228_v5  ;;  %v8289_v26 = vmul.f32 %v11626_v63, %v18055_v19 }
 0x8ac   : > { %v8316_v48 = vmul.f32 %v10830_v30, %v8284_v61  ;;  %v8195_v8 = vmul.f32 1.442695, %v8137_v51  ;;  %v8229_v30 = vadd.f32 1.0, %v11624_v13  ;;  %v11628_v29 = vpop.eup %11627  ;;  %v18080_v13 = vld [vmem:[#allocation94_spill] sm:$0xff] }
 0x8ad   : > { %v8022_v9 = vpop.f32.mrb[62].mxu1  ;;  %v11630_v34 = vpop.eup %11629 }
 0x8ae   : > { %v10831_v0 = vadd.f32 %v8022_v9, %v7643_v47  ;;  %v8024_v52 = vpop.f32.mrb[63].mxu1  ;;  %10504 = vmatmul.mubr.msk.f32.gmra.mrb[138].mxu0 %vm2612_vm7, %v8316_v48  ;;  %v8138_v47 = vsub.f32 0.0, %v18073_v10  ;;  %v7648_v48 = vmul.f32 %v16525_v12, %v18074_v55  ;;  %11639 = vpow2.f32 %v8195_v8 }
 0x8af   : > { %11641 = vrcp.f32 %v8229_v30  ;;  %v8290_v33 = vmul.f32 %v11630_v34, %v18057_v59 }
 0x8b0   : > { %v8317_v4 = vmul.f32 %v10831_v0, %v8285_v7  ;;  %v8197_v9 = vmul.f32 1.442695, %v8138_v47  ;;  %v8230_v0 = vadd.f32 1.0, %v11628_v29  ;;  %v11632_v52 = vpop.eup %11631 }
 0x8b1   : > { %v8027_v3 = vpop.f32.mrb[64].mxu1  ;;  %v11634_v19 = vpop.eup %11633 }
 0x8b2   : > { %v10832_v56 = vadd.f32 %v8027_v3, %v7644_v57  ;;  %v8029_v2 = vpop.f32.mrb[65].mxu1  ;;  %10506 = vmatprep.mubr.msk.f32.mxu0 %vm2612_vm7, %v8317_v4  ;;  %v8139_v57 = vsub.f32 0.0, %v18075_v1  ;;  %v7649_v4 = vmul.f32 %v16525_v12, %v18076_v38  ;;  %11643 = vpow2.f32 %v8197_v9 }
 0x8b3   : > { %11645 = vrcp.f32 %v8230_v0  ;;  %v8291_v24 = vmul.f32 %v11634_v19, %v18059_v20 }
 0x8b4   : > { %v8318_v32 = vmul.f32 %v10832_v56, %v8286_v43  ;;  %v8199_v3 = vmul.f32 1.442695, %v8139_v57  ;;  %v8231_v56 = vadd.f32 1.0, %v11632_v52  ;;  %v11636_v2 = vpop.eup %11635  ;;  %v18083_v52 = vld [vmem:[#allocation91_spill] sm:$0xff] }
 0x8b5   : > { %v8032_v36 = vpop.f32.mrb[66].mxu1  ;;  %v11638_v59 = vpop.eup %11637 }
 0x8b6   : > { %v10833_v18 = vadd.f32 %v8032_v36, %v7645_v27  ;;  %v8034_v62 = vpop.f32.mrb[67].mxu1  ;;  %10507 = vmatmul.mubr.msk.f32.gmra.mrb[140].mxu0 %vm2612_vm7, %v8318_v32  ;;  %v8140_v27 = vsub.f32 0.0, %v18077_v28  ;;  %v7650_v32 = vmul.f32 %v16525_v12, %v18078_v40  ;;  %11647 = vpow2.f32 %v8199_v3  ;;  %v18084_v3 = vld [vmem:[#allocation89_spill] sm:$0xff] }
 0x8b7   : > { %11649 = vrcp.f32 %v8231_v56  ;;  %v8292_v51 = vmul.f32 %v11638_v59, %v18061_v41 }
 0x8b8   : > { %v8319_v21 = vmul.f32 %v10833_v18, %v8287_v42  ;;  %v8201_v36 = vmul.f32 1.442695, %v8140_v27  ;;  %v8232_v18 = vadd.f32 1.0, %v11636_v2  ;;  %v11640_v62 = vpop.eup %11639  ;;  %v7654_v27 = vmul.f32 %v16525_v12, %v18084_v3  ;;  %v18091_v3 = vld [vmem:[#allocation8_spill] sm:$0xff] }
 0x8b9   : > { %v8037_v54 = vpop.f32.mrb[68].mxu1  ;;  %v11642_v20 = vpop.eup %11641 }
 0x8ba   : > { %v10834_v61 = vadd.f32 %v8037_v54, %v7646_v6  ;;  %v8039_v15 = vpop.f32.mrb[69].mxu1  ;;  %10509 = vmatprep.mubr.msk.f32.mxu0 %vm2612_vm7, %v8319_v21  ;;  %v8141_v6 = vsub.f32 0.0, %v18079_v45  ;;  %v7651_v21 = vmul.f32 %v16525_v12, %v18080_v13  ;;  %11651 = vpow2.f32 %v8201_v36 }
 0x8bb   : > { %11653 = vrcp.f32 %v8232_v18  ;;  %v8293_v47 = vmul.f32 %v11642_v20, %v18063_v39 }
 0x8bc   : > { %v8320_v44 = vmul.f32 %v10834_v61, %v8288_v25  ;;  %v8203_v54 = vmul.f32 1.442695, %v8141_v6  ;;  %v8233_v61 = vadd.f32 1.0, %v11640_v62  ;;  %v11644_v15 = vpop.eup %11643 }
 0x8bd   : > { %v8042_v17 = vpop.f32.mrb[70].mxu1  ;;  %v11646_v41 = vpop.eup %11645  ;;  %v8234_v55 = vadd.f32 1.0, %v11644_v15 }
 0x8be   : > { %v10835_v7 = vadd.f32 %v8042_v17, %v7647_v50  ;;  %v8044_v46 = vpop.f32.mrb[71].mxu1  ;;  %10510 = vmatmul.mubr.msk.f32.gmra.mrb[142].mxu0 %vm2612_vm7, %v8320_v44  ;;  %v8142_v50 = vsub.f32 0.0, %v18081_v58  ;;  %11655 = vpow2.f32 %v8203_v54 }
 0x8bf   : > { %11657 = vrcp.f32 %v8233_v61  ;;  %v8294_v46 = vmul.f32 %v11646_v41, %v18065_v37 }
 0x8c0   : > { %v8321_v23 = vmul.f32 %v10835_v7, %v8289_v26  ;;  %v18082_v26 = vld [vmem:[#allocation78_spill] sm:$0xff]  ;;  %v8205_v17 = vmul.f32 1.442695, %v8142_v50 }
 0x8c1   : > { %v8047_v60 = vpop.f32.mrb[72].mxu1  ;;  %v7652_v34 = vmul.f32 %v16525_v12, %v18082_v26 }
 0x8c2   : > { %v10836_v43 = vadd.f32 %v8047_v60, %v7648_v48  ;;  %v8049_v35 = vpop.f32.mrb[73].mxu1  ;;  %10512 = vmatprep.mubr.msk.f32.mxu0 %vm2612_vm7, %v8321_v23  ;;  %v11648_v48 = vpop.eup %11647  ;;  %v7653_v23 = vmul.f32 %v16525_v12, %v18083_v52  ;;  %11659 = vpow2.f32 %v8205_v17 }
 0x8c3   : > { %v11650_v9 = vpop.eup %11649  ;;  %11661 = vrcp.f32 %v8234_v55 }
 0x8c4   : > { %v8322_v16 = vmul.f32 %v10836_v43, %v8290_v33  ;;  %v8235_v33 = vadd.f32 1.0, %v11648_v48  ;;  %v11652_v19 = vpop.eup %11651  ;;  %v8295_v38 = vmul.f32 %v11650_v9, %v18067_v22  ;;  %v18085_v22 = vld [vmem:[#allocation75_spill] sm:$0xff]  ;;  %v18089_v9 = vld [vmem:[#allocation86_spill] sm:$0xff] }
 0x8c5   : > { %v8052_v49 = vpop.f32.mrb[74].mxu1  ;;  %v8236_v56 = vadd.f32 1.0, %v11652_v19  ;;  %v18090_v19 = vld [vmem:[#allocation100_spill] sm:$0xff] }
 0x8c6   : > { %v10837_v42 = vadd.f32 %v8052_v49, %v7649_v4  ;;  %v8054_v31 = vpop.f32.mrb[75].mxu1  ;;  %10513 = vmatmul.mubr.msk.f32.gmra.mrb[144].mxu0 %vm2612_vm7, %v8322_v16  ;;  %v11654_v4 = vpop.eup %11653  ;;  %11663 = vrcp.f32 %v8235_v33 }
 0x8c7   : > { %11665 = vrcp.f32 %v8236_v56  ;;  %v18092_v56 = vld [vmem:[#allocation9_spill] sm:$0xff] }
 0x8c8   : > { %v8323_v14 = vmul.f32 %v10837_v42, %v8291_v24  ;;  %v11656_v2 = vpop.eup %11655  ;;  %v8296_v24 = vmul.f32 %v11654_v4, %v18069_v11  ;;  %v7655_v42 = vmul.f32 %v16525_v12, %v18085_v22  ;;  %v18086_v11 = vld [vmem:[#allocation99_spill] sm:$0xff] }
 0x8c9   : > { %v8057_v5 = vpop.f32.mrb[76].mxu1  ;;  %v11658_v59 = vpop.eup %11657  ;;  %v8237_v31 = vadd.f32 1.0, %v11656_v2 }
 0x8ca   : > { %v10838_v25 = vadd.f32 %v8057_v5, %v7650_v32  ;;  %v8059_v63 = vpop.f32.mrb[77].mxu1  ;;  %10515 = vmatprep.mubr.msk.f32.mxu0 %vm2612_vm7, %v8323_v14  ;;  %v8297_v18 = vmul.f32 %v11658_v59, %v18071_v53  ;;  %v7656_v5 = vmul.f32 %v16525_v12, %v18086_v11  ;;  %v18087_v53 = vld [vmem:[#allocation87_spill] sm:$0xff] }
 0x8cb   : > { %11667 = vrcp.f32 %v8237_v31  ;;  %v7657_v15 = vmul.f32 %v16525_v12, %v18087_v53 }
 0x8cc   : > { %v8324_v8 = vmul.f32 %v10838_v25, %v8292_v51  ;;  %v11660_v36 = vpop.eup %11659 }
 0x8cd   : > { %v8062_v30 = vpop.f32.mrb[78].mxu1  ;;  %v11662_v62 = vpop.eup %11661  ;;  %v8238_v13 = vadd.f32 1.0, %v11660_v36 }
 0x8ce   : > { %v10839_v29 = vadd.f32 %v8062_v30, %v7651_v21  ;;  %v8064_v44 = vpop.f32.mrb[79].mxu1  ;;  %10516 = vmatmul.mubr.msk.f32.gmra.mrb[146].mxu0 %vm2612_vm7, %v8324_v8  ;;  %v8298_v25 = vmul.f32 %v11662_v62, %v18073_v10  ;;  %v18088_v10 = vld [vmem:[#allocation103_spill] sm:$0xff] }
 0x8cf   : > { %11669 = vrcp.f32 %v8238_v13  ;;  %v7658_v26 = vmul.f32 %v16525_v12, %v18088_v10  ;;  %v18093_v13 = vld [vmem:[#allocation24_spill] sm:$0xff]  ;;  %v18098_v10 = vld [vmem:[#allocation10_spill] sm:$0xff] }
 0x8d0   : > { %v8325_v7 = vmul.f32 %v10839_v29, %v8293_v47  ;;  %v11664_v63 = vpop.eup %11663 }
 0x8d1   : > { %v8067_v57 = vpop.f32.mrb[80].mxu1  ;;  %v8299_v47 = vmul.f32 %v11664_v63, %v18075_v1  ;;  %v11666_v41 = vpop.eup %11665  ;;  %v7659_v1 = vmul.f32 %v16525_v12, %v18089_v9 }
 0x8d2   : > { %v10840_v39 = vadd.f32 %v8067_v57, %v7652_v34  ;;  %v8069_v0 = vpop.f32.mrb[81].mxu1  ;;  %10518 = vmatprep.mubr.msk.f32.mxu0 %vm2612_vm7, %v8325_v7  ;;  %v8300_v17 = vmul.f32 %v11666_v41, %v18077_v28  ;;  %v7660_v28 = vmul.f32 %v16525_v12, %v18090_v19  ;;  %v18096_v41 = vld [vmem:[#allocation26_spill] sm:$0xff] }
 0x8d4   : > { %v8326_v60 = vmul.f32 %v10840_v39, %v8294_v46 }
 0x8d5   : > { %v8072_v43 = vpop.f32.mrb[82].mxu1  ;;  %v11668_v55 = vpop.eup %11667 }
 0x8d6   : > { %v10841_v35 = vadd.f32 %v8072_v43, %v7653_v23  ;;  %v8074_v37 = vpop.f32.mrb[83].mxu1  ;;  %10519 = vmatmul.mubr.msk.f32.gmra.mrb[148].mxu0 %vm2612_vm7, %v8326_v60  ;;  %v8301_v39 = vmul.f32 %v11668_v55, %v18079_v45  ;;  %v16678_v45 = vstv %s8339_s1 }
 0x8d7   : > { %v8342_v12 = vmul.f32 %v16678_v45, %v18092_v56 }
 0x8d8   : > { %v8327_v16 = vmul.f32 %v10841_v35, %v8295_v38 }
 0x8d9   : > { %v8077_v49 = vpop.f32.mrb[84].mxu1  ;;  %v11670_v0 = vpop.eup %11669 }
 0x8da   : > { %v10842_v40 = vadd.f32 %v8077_v49, %v7654_v27  ;;  %v8079_v32 = vpop.f32.mrb[85].mxu1  ;;  %10521 = vmatprep.mubr.msk.f32.mxu0 %vm2612_vm7, %v8327_v16  ;;  %v8302_v38 = vmul.f32 %v11670_v0, %v18081_v58  ;;  %v8341_v27 = vmul.f32 %v16678_v45, %v18091_v3 }
 0x8dc   : > { %v8328_v6 = vmul.f32 %v10842_v40, %v8296_v24 }
 0x8dd   : > { %v8082_v14 = vpop.f32.mrb[86].mxu1 }
 0x8de   : > { %v10843_v51 = vadd.f32 %v8082_v14, %v7655_v42  ;;  %v8084_v20 = vpop.f32.mrb[87].mxu1  ;;  %10522 = vmatmul.mubr.msk.f32.gmra.mrb[150].mxu0 %vm2612_vm7, %v8328_v6 }
 0x8e0   : > { %v8329_v21 = vmul.f32 %v10843_v51, %v8297_v18 }
 0x8e1   : > { %v8087_v54 = vpop.f32.mrb[88].mxu1 }
 0x8e2   : > { %v10844_v50 = vadd.f32 %v8087_v54, %v7656_v5  ;;  %v8089_v61 = vpop.f32.mrb[89].mxu1  ;;  %10524 = vmatprep.mubr.msk.f32.mxu0 %vm2612_vm7, %v8329_v21  ;;  %v8357_v21 = vmul.f32 %v16678_v45, %v18093_v13 }
 0x8e4   : > { %v8330_v8 = vmul.f32 %v10844_v50, %v8298_v25  ;;  %v18094_v25 = vld [vmem:[#allocation25_spill] sm:$0xff] }
 0x8e5   : > { %v8092_v30 = vpop.f32.mrb[90].mxu1  ;;  %v8358_v63 = vmul.f32 %v16678_v45, %v18094_v25 }
 0x8e6   : > { %v10845_v29 = vadd.f32 %v8092_v30, %v7657_v15  ;;  %v8094_v44 = vpop.f32.mrb[91].mxu1  ;;  %10525 = vmatmul.mubr.msk.f32.gmra.mrb[152].mxu0 %vm2612_vm7, %v8330_v8  ;;  %v18095_v8 = vld [vmem:[#allocation27_spill] sm:$0xff]  ;;  %v8359_v30 = vmul.f32 %v16678_v45, %v18096_v41 }
 0x8e8   : > { %v8331_v34 = vmul.f32 %v10845_v29, %v8299_v47  ;;  %v8360_v47 = vmul.f32 %v16678_v45, %v18095_v8  ;;  %v18097_v29 = vld [vmem:[#allocation11_spill] sm:$0xff] }
 0x8e9   : > { %v8097_v48 = vpop.f32.mrb[92].mxu1  ;;  %v8344_v44 = vmul.f32 %v16678_v45, %v18097_v29  ;;  %v18107_v29 = vld [vmem:[#allocation33_spill] sm:$0xff] }
 0x8ea   : > { %v10846_v7 = vadd.f32 %v8097_v48, %v7658_v26  ;;  %v8099_v46 = vpop.f32.mrb[93].mxu1  ;;  %10527 = vmatprep.mubr.msk.f32.mxu0 %vm2612_vm7, %v8331_v34  ;;  %v8343_v26 = vmul.f32 %v16678_v45, %v18098_v10  ;;  %v18108_v10 = vld [vmem:[#allocation32_spill] sm:$0xff] }
 0x8ec   : > { %v8332_v57 = vmul.f32 %v10846_v7, %v8300_v17 }
 0x8ed   : > { %v8102_v52 = vpop.f32.mrb[94].mxu1 }
 0x8ee   : > { %v10847_v23 = vadd.f32 %v8102_v52, %v7659_v1  ;;  %v8104_v33 = vpop.f32.mrb[95].mxu1  ;;  %10528 = vmatmul.mubr.msk.f32.gmra.mrb[154].mxu0 %vm2612_vm7, %v8332_v57  ;;  %v18100_v52 = vld [vmem:[#allocation28_spill] sm:$0xff] }
 0x8ef   : > { %v18101_v33 = vld [vmem:[#allocation13_spill] sm:$0xff] }
 0x8f0   : > { %v8333_v60 = vmul.f32 %v10847_v23, %v8301_v39  ;;  %v18099_v39 = vld [vmem:[#allocation29_spill] sm:$0xff]  ;;  %v8361_v23 = vmul.f32 %v16678_v45, %v18100_v52  ;;  %v8346_v19 = vmul.f32 %v16678_v45, %v18101_v33 }
 0x8f1   : > { %v8107_v4 = vpop.f32.mrb[96].mxu1  ;;  %v8362_v0 = vmul.f32 %v16678_v45, %v18099_v39 }
 0x8f2   : > { %v10848_v43 = vadd.f32 %v8107_v4, %v7660_v28  ;;  %v8109_v35 = vpop.f32.mrb[97].mxu1  ;;  %10530 = vmatprep.mubr.msk.f32.mxu0 %vm2612_vm7, %v8333_v60  ;;  %v18102_v60 = vld [vmem:[#allocation12_spill] sm:$0xff] }
 0x8f4   : > { %v8334_v37 = vmul.f32 %v10848_v43, %v8302_v38  ;;  %v8345_v38 = vmul.f32 %v16678_v45, %v18102_v60  ;;  %v18111_v60 = vld [vmem:[#allocation35_spill] sm:$0xff] }
 0x8f6   : > { %10531 = vmatmul.mubr.msk.f32.gmra.mrb[156].mxu0 %vm2612_vm7, %v8334_v37 }
 0x951   : > { %v10487_v2 = vpop.f32.mrb[126].mxu0 }
 0x952   : > { %v8535_v16 = vpop.f32.mrb[127].mxu0  ;;  %v16686_v24 = vadd.f32 %v10487_v2, %v8342_v12 }
 0x953   : > { %v16684_v58 = vadd.f32 %v8535_v16, %v8341_v27  ;;  %v18103_v16 = vld [vmem:[#allocation31_spill] sm:$0xff] }
 0x954   : > { %v8697_v40 = vsel %vm665_vm0, %v16686_v24, 0.0 }
 0x955   : > { %v8694_v59 = vsel %vm665_vm0, %v16684_v58, 0.0 }
 0x956   : > { %8695 = vadd.xlane.f32.xlu1 %v8694_v59  ;;  %v8364_v59 = vmul.f32 %v16678_v45, %v18103_v16 }
 0x959   : > { %v10490_v49 = vpop.f32.mrb[128].mxu0 }
 0x95a   : > { %v8545_v32 = vpop.f32.mrb[129].mxu0  ;;  %8698 = vadd.xlane.f32.xlu1 %v8697_v40  ;;  %v16736_v46 = vadd.f32 %v10490_v49, %v8344_v44  ;;  %v18104_v49 = vld [vmem:[#allocation30_spill] sm:$0xff]  ;;  %v8366_v44 = vmul.f32 %v16678_v45, %v18107_v29 }
 0x95b   : > { %v16740_v1 = vadd.f32 %v8545_v32, %v8343_v26  ;;  %v8363_v40 = vmul.f32 %v16678_v45, %v18104_v49  ;;  %v18105_v32 = vld [vmem:[#allocation15_spill] sm:$0xff]  ;;  %v8365_v26 = vmul.f32 %v16678_v45, %v18108_v10 }
 0x95c   : > { %v8703_v28 = vsel %vm665_vm0, %v16736_v46, 0.0 }
 0x95d   : > { %v8700_v43 = vsel %vm665_vm0, %v16740_v1, 0.0 }
 0x961   : > { %v10493_v22 = vpop.f32.mrb[130].mxu0 }
 0x962   : > { %v8555_v42 = vpop.f32.mrb[131].mxu0  ;;  %v16760_v27 = vadd.f32 %v10493_v22, %v8346_v19  ;;  %v8348_v22 = vmul.f32 %v16678_v45, %v18105_v32 }
 0x963   : > { %v16764_v12 = vadd.f32 %v8555_v42, %v8345_v38  ;;  %v8368_v38 = vmul.f32 %v16678_v45, %v18111_v60 }
 0x964   : > { %v8709_v13 = vsel %vm665_vm0, %v16760_v27, 0.0 }
 0x969   : > { %v16692_v31 = vpop.f32.mrb[132].mxu0 }
 0x96a   : > { %v16694_v36 = vpop.f32.mrb[133].mxu0  ;;  %v16785_v8 = vadd.f32 %v16692_v31, %v8348_v22 }
 0x971   : > { %v16696_v6 = vpop.f32.mrb[134].mxu0 }
 0x972   : > { %v16698_v18 = vpop.f32.mrb[135].mxu0 }
 0x979   : > { %v16700_v62 = vpop.f32.mrb[136].mxu0 }
 0x97a   : > { %v16702_v14 = vpop.f32.mrb[137].mxu0 }
 0x981   : > { %v16704_v51 = vpop.f32.mrb[138].mxu0 }
 0x982   : > { %v16706_v20 = vpop.f32.mrb[139].mxu0 }
 0x989   : > { %v16708_v11 = vpop.f32.mrb[140].mxu0 }
 0x98a   : > { %v16710_v5 = vpop.f32.mrb[141].mxu0 }
 0x991   : > { %v10511_v54 = vpop.f32.mrb[142].mxu0 }
 0x992   : > { %v8615_v50 = vpop.f32.mrb[143].mxu0  ;;  %v16718_v53 = vadd.f32 %v10511_v54, %v8358_v63  ;;  %v8706_v63 = vsel %vm665_vm0, %v16764_v12, 0.0 }
 0x993   : > { %v16716_v61 = vadd.f32 %v8615_v50, %v8357_v21  ;;  %v18106_v21 = vld [vmem:[#allocation14_spill] sm:$0xff] }
 0x994   : > { %v8745_v17 = vsel %vm665_vm0, %v16718_v53, 0.0  ;;  %v8347_v42 = vmul.f32 %v16678_v45, %v18106_v21 }
 0x995   : > { %v8742_v15 = vsel %vm665_vm0, %v16716_v61, 0.0 }
 0x996   : > { %8743 = vadd.xlane.f32.xlu0 %v8742_v15  ;;  %v16790_v41 = vadd.f32 %v16694_v36, %v8347_v42 }
 0x999   : > { %v10514_v34 = vpop.f32.mrb[144].mxu0 }
 0x99a   : > { %v16732_v55 = vadd.f32 %v10514_v34, %v8360_v47  ;;  %v8625_v48 = vpop.f32.mrb[145].mxu0  ;;  %8746 = vadd.xlane.f32.xlu0 %v8745_v17  ;;  %v18109_v34 = vld [vmem:[#allocation17_spill] sm:$0xff]  ;;  %v8715_v17 = vsel %vm665_vm0, %v16785_v8, 0.0 }
 0x99b   : > { %v16734_v7 = vadd.f32 %v8625_v48, %v8359_v30  ;;  %v8350_v31 = vmul.f32 %v16678_v45, %v18109_v34  ;;  %v18110_v48 = vld [vmem:[#allocation16_spill] sm:$0xff] }
 0x99c   : > { %v8751_v9 = vsel %vm665_vm0, %v16732_v55, 0.0  ;;  %v8349_v36 = vmul.f32 %v16678_v45, %v18110_v48 }
 0x99d   : > { %8752 = vadd.xlane.f32.xlu1 %v8751_v9  ;;  %v8748_v57 = vsel %vm665_vm0, %v16734_v7, 0.0 }
 0x99e   : > { %8749 = vadd.xlane.f32.xlu0 %v8748_v57  ;;  %v8712_v57 = vsel %vm665_vm0, %v16790_v41, 0.0  ;;  %v16816_v19 = vadd.f32 %v16698_v18, %v8349_v36 }
 0x9a1   : > { %v10517_v4 = vpop.f32.mrb[146].mxu0  ;;  %8704 = vadd.xlane.f32.xlu1 %v8703_v28 }
 0x9a2   : > { %v16756_v35 = vadd.f32 %v10517_v4, %v8362_v0  ;;  %v8635_v37 = vpop.f32.mrb[147].mxu0  ;;  %8701 = vadd.xlane.f32.xlu0 %v8700_v43  ;;  %v18112_v4 = vld [vmem:[#allocation34_spill] sm:$0xff] }
 0x9a3   : > { %v16758_v3 = vadd.f32 %v8635_v37, %v8361_v23  ;;  %v16811_v23 = vadd.f32 %v16696_v6, %v8350_v31  ;;  %v8367_v43 = vmul.f32 %v16678_v45, %v18112_v4  ;;  %v18113_v37 = vld [vmem:[#allocation19_spill] sm:$0xff] }
 0x9a4   : > { %v8757_v56 = vsel %vm665_vm0, %v16756_v35, 0.0  ;;  %v8352_v6 = vmul.f32 %v16678_v45, %v18113_v37 }
 0x9a5   : > { %8758 = vadd.xlane.f32.xlu1 %v8757_v56  ;;  %v8754_v2 = vsel %vm665_vm0, %v16758_v3, 0.0  ;;  %v8721_v56 = vsel %vm665_vm0, %v16811_v23, 0.0 }
 0x9a6   : > { %8755 = vadd.xlane.f32.xlu0 %v8754_v2  ;;  %v18114_v2 = vld [vmem:[#allocation18_spill] sm:$0xff]  ;;  %v16837_v22 = vadd.f32 %v16700_v62, %v8352_v6 }
 0x9a7   : > { %v8351_v18 = vmul.f32 %v16678_v45, %v18114_v2 }
 0x9a8   : > { %v8727_v29 = vsel %vm665_vm0, %v16837_v22, 0.0 }
 0x9a9   : > { %v10520_v25 = vpop.f32.mrb[148].mxu0  ;;  %8710 = vadd.xlane.f32.xlu1 %v8709_v13  ;;  %v16842_v21 = vadd.f32 %v16702_v14, %v8351_v18 }
 0x9aa   : > { %v16780_v54 = vadd.f32 %v10520_v25, %v8364_v59  ;;  %v8645_v50 = vpop.f32.mrb[149].mxu0  ;;  %8707 = vadd.xlane.f32.xlu0 %v8706_v63  ;;  %v8718_v59 = vsel %vm665_vm0, %v16816_v19, 0.0  ;;  %v18115_v25 = vld [vmem:[#allocation37_spill] sm:$0xff] }
 0x9ab   : > { %v16782_v15 = vadd.f32 %v8645_v50, %v8363_v40  ;;  %v8370_v63 = vmul.f32 %v16678_v45, %v18115_v25  ;;  %v18116_v50 = vld [vmem:[#allocation36_spill] sm:$0xff] }
 0x9ac   : > { %v8763_v47 = vsel %vm665_vm0, %v16780_v54, 0.0 }
 0x9ad   : > { %8764 = vadd.xlane.f32.xlu1 %v8763_v47  ;;  %v8760_v30 = vsel %vm665_vm0, %v16782_v15, 0.0  ;;  %v8369_v47 = vmul.f32 %v16678_v45, %v18116_v50 }
 0x9ae   : > { %8761 = vadd.xlane.f32.xlu0 %v8760_v30  ;;  %v18117_v30 = vld [vmem:[#allocation21_spill] sm:$0xff] }
 0x9af   : > { %v8354_v62 = vmul.f32 %v16678_v45, %v18117_v30 }
 0x9b1   : > { %v10523_v9 = vpop.f32.mrb[150].mxu0  ;;  %8716 = vadd.xlane.f32.xlu1 %v8715_v17  ;;  %v16863_v48 = vadd.f32 %v16704_v51, %v8354_v62 }
 0x9b2   : > { %v16806_v39 = vadd.f32 %v10523_v9, %v8366_v44  ;;  %v8655_v0 = vpop.f32.mrb[151].mxu0  ;;  %8713 = vadd.xlane.f32.xlu0 %v8712_v57  ;;  %v18118_v44 = vld [vmem:[#allocation20_spill] sm:$0xff] }
 0x9b3   : > { %v16808_v52 = vadd.f32 %v8655_v0, %v8365_v26  ;;  %v8353_v14 = vmul.f32 %v16678_v45, %v18118_v44  ;;  %v8724_v26 = vsel %vm665_vm0, %v16842_v21, 0.0  ;;  %v18119_v0 = vld [vmem:[#allocation39_spill] sm:$0xff]  ;;  %v8733_v4 = vsel %vm665_vm0, %v16863_v48, 0.0 }
 0x9b4   : > { %v8769_v33 = vsel %vm665_vm0, %v16806_v39, 0.0 }
 0x9b5   : > { %8770 = vadd.xlane.f32.xlu1 %v8769_v33  ;;  %v8766_v28 = vsel %vm665_vm0, %v16808_v52, 0.0  ;;  %v16868_v9 = vadd.f32 %v16706_v20, %v8353_v14  ;;  %v8372_v33 = vmul.f32 %v16678_v45, %v18119_v0 }
 0x9b6   : > { %8767 = vadd.xlane.f32.xlu0 %v8766_v28  ;;  %v18120_v28 = vld [vmem:[#allocation38_spill] sm:$0xff] }
 0x9b7   : > { %v8371_v60 = vmul.f32 %v16678_v45, %v18120_v28  ;;  %v8730_v6 = vsel %vm665_vm0, %v16868_v9, 0.0 }
 0x9b9   : > { %v10526_v16 = vpop.f32.mrb[152].mxu0  ;;  %8722 = vadd.xlane.f32.xlu1 %v8721_v56 }
 0x9ba   : > { %v16832_v49 = vadd.f32 %v10526_v16, %v8368_v38  ;;  %v8665_v40 = vpop.f32.mrb[153].mxu0  ;;  %8719 = vadd.xlane.f32.xlu0 %v8718_v59  ;;  %v18121_v38 = vld [vmem:[#allocation23_spill] sm:$0xff] }
 0x9bb   : > { %v16834_v32 = vadd.f32 %v8665_v40, %v8367_v43  ;;  %v8356_v51 = vmul.f32 %v16678_v45, %v18121_v38  ;;  %v18122_v43 = vld [vmem:[#allocation22_spill] sm:$0xff] }
 0x9bc   : > { %v8775_v13 = vsel %vm665_vm0, %v16832_v49, 0.0  ;;  %v8355_v20 = vmul.f32 %v16678_v45, %v18122_v43 }
 0x9bd   : > { %8776 = vadd.xlane.f32.xlu1 %v8775_v13  ;;  %v8772_v42 = vsel %vm665_vm0, %v16834_v32, 0.0  ;;  %v16889_v16 = vadd.f32 %v16708_v11, %v8356_v51 }
 0x9be   : > { %8773 = vadd.xlane.f32.xlu0 %v8772_v42  ;;  %v16894_v40 = vadd.f32 %v16710_v5, %v8355_v20 }
 0x9bf   : > { %v8739_v13 = vsel %vm665_vm0, %v16889_v16, 0.0 }
 0x9c0   : > { %v8736_v42 = vsel %vm665_vm0, %v16894_v40, 0.0 }
 0x9c1   : > { %v10529_v10 = vpop.f32.mrb[154].mxu0  ;;  %8728 = vadd.xlane.f32.xlu1 %v8727_v29 }
 0x9c2   : > { %v16858_v34 = vadd.f32 %v10529_v10, %v8370_v63  ;;  %v8675_v31 = vpop.f32.mrb[155].mxu0  ;;  %8725 = vadd.xlane.f32.xlu0 %v8724_v26 }
 0x9c3   : > { %v16860_v17 = vadd.f32 %v8675_v31, %v8369_v47 }
 0x9c4   : > { %v8781_v36 = vsel %vm665_vm0, %v16858_v34, 0.0 }
 0x9c5   : > { %8782 = vadd.xlane.f32.xlu1 %v8781_v36  ;;  %v8778_v57 = vsel %vm665_vm0, %v16860_v17, 0.0 }
 0x9c6   : > { %8779 = vadd.xlane.f32.xlu0 %v8778_v57 }
 0x9c9   : > { %v10532_v37 = vpop.f32.mrb[156].mxu0  ;;  %8734 = vadd.xlane.f32.xlu1 %v8733_v4 }
 0x9ca   : > { %v16884_v56 = vadd.f32 %v10532_v37, %v8372_v33  ;;  %v8685_v2 = vpop.f32.mrb[157].mxu0  ;;  %8731 = vadd.xlane.f32.xlu0 %v8730_v6 }
 0x9cb   : > { %v16886_v18 = vadd.f32 %v8685_v2, %v8371_v60 }
 0x9cc   : > { %v8787_v59 = vsel %vm665_vm0, %v16884_v56, 0.0 }
 0x9cd   : > { %8788 = vadd.xlane.f32.xlu1 %v8787_v59  ;;  %v8784_v45 = vsel %vm665_vm0, %v16886_v18, 0.0 }
 0x9ce   : > { %8785 = vadd.xlane.f32.xlu0 %v8784_v45 }
 0x9d1   : > { %8740 = vadd.xlane.f32.xlu1 %v8739_v13 }
 0x9d2   : > { %8737 = vadd.xlane.f32.xlu0 %v8736_v42 }
 0x9e3   : > { %v8696_v11 = vpop.xlane.xlu1 %8695 }
 0x9e4   : > { %v8790_v25 = vmul.f32 0.0625, %v8696_v11 }
 0x9e6   : > { %v16903_v30 = vsub.f32 %v16684_v58, %v8790_v25 }
 0x9e7   : > { %v8699_v63 = vpop.xlane.xlu1 %8698 }
 0x9e8   : > { %v8791_v5 = vmul.f32 0.0625, %v8699_v63  ;;  %v8854_v58 = vmul.f32 %v16903_v30, %v16903_v30 }
 0x9ea   : > { %v16911_v10 = vsub.f32 %v16686_v24, %v8791_v5  ;;  %v8886_v51 = vsel %vm665_vm0, %v8854_v58, 0.0 }
 0x9ec   : > { %v8855_v24 = vmul.f32 %v16911_v10, %v16911_v10 }
 0x9ee   : > { %v8889_v6 = vsel %vm665_vm0, %v8855_v24, 0.0 }
 0xa23   : > { %v8744_v50 = vpop.xlane.xlu0 %8743 }
 0xa24   : > { %v8806_v47 = vmul.f32 0.0625, %v8744_v50 }
 0xa26   : > { %v16906_v62 = vsub.f32 %v16716_v61, %v8806_v47 }
 0xa27   : > { %v8747_v29 = vpop.xlane.xlu0 %8746 }
 0xa28   : > { %v8807_v44 = vmul.f32 0.0625, %v8747_v29  ;;  %v8870_v14 = vmul.f32 %v16906_v62, %v16906_v62 }
 0xa2a   : > { %v16914_v26 = vsub.f32 %v16718_v53, %v8807_v44  ;;  %v8753_v31 = vpop.xlane.xlu1 %8752  ;;  %v8934_v36 = vsel %vm665_vm0, %v8870_v14, 0.0 }
 0xa2b   : > { %v8809_v57 = vmul.f32 0.0625, %v8753_v31  ;;  %v8750_v61 = vpop.xlane.xlu0 %8749  ;;  %8935 = vadd.xlane.f32.xlu0 %v8934_v36 }
 0xa2c   : > { %v8808_v0 = vmul.f32 0.0625, %v8750_v61  ;;  %v8871_v33 = vmul.f32 %v16914_v26, %v16914_v26 }
 0xa2d   : > { %v16924_v28 = vsub.f32 %v16732_v55, %v8809_v57 }
 0xa2e   : > { %v16927_v53 = vsub.f32 %v16734_v7, %v8808_v0  ;;  %v8705_v60 = vpop.xlane.xlu1 %8704  ;;  %v8937_v38 = vsel %vm665_vm0, %v8871_v33, 0.0 }
 0xa2f   : > { %v8793_v4 = vmul.f32 0.0625, %v8705_v60  ;;  %v8702_v43 = vpop.xlane.xlu0 %8701  ;;  %8938 = vadd.xlane.f32.xlu1 %v8937_v38  ;;  %8887 = vadd.xlane.f32.xlu0 %v8886_v51  ;;  %v8873_v45 = vmul.f32 %v16924_v28, %v16924_v28 }
 0xa30   : > { %v8792_v20 = vmul.f32 0.0625, %v8702_v43  ;;  %v8872_v37 = vmul.f32 %v16927_v53, %v16927_v53 }
 0xa31   : > { %v16935_v55 = vsub.f32 %v16736_v46, %v8793_v4  ;;  %v8943_v47 = vsel %vm665_vm0, %v8873_v45, 0.0 }
 0xa32   : > { %v16938_v7 = vsub.f32 %v16740_v1, %v8792_v20  ;;  %v8759_v2 = vpop.xlane.xlu1 %8758  ;;  %v8940_v59 = vsel %vm665_vm0, %v8872_v37, 0.0 }
 0xa33   : > { %v8811_v13 = vmul.f32 0.0625, %v8759_v2  ;;  %v8756_v42 = vpop.xlane.xlu0 %8755  ;;  %8941 = vadd.xlane.f32.xlu0 %v8940_v59  ;;  %8890 = vadd.xlane.f32.xlu1 %v8889_v6  ;;  %v8857_v5 = vmul.f32 %v16935_v55, %v16935_v55 }
 0xa34   : > { %v8810_v11 = vmul.f32 0.0625, %v8756_v42  ;;  %v8856_v25 = vmul.f32 %v16938_v7, %v16938_v7 }
 0xa35   : > { %v16946_v46 = vsub.f32 %v16756_v35, %v8811_v13  ;;  %v8895_v61 = vsel %vm665_vm0, %v8857_v5, 0.0 }
 0xa36   : > { %v16949_v1 = vsub.f32 %v16758_v3, %v8810_v11  ;;  %v8711_v63 = vpop.xlane.xlu1 %8710  ;;  %v8892_v50 = vsel %vm665_vm0, %v8856_v25, 0.0 }
 0xa37   : > { %v8795_v29 = vmul.f32 0.0625, %v8711_v63  ;;  %v8708_v44 = vpop.xlane.xlu0 %8707  ;;  %8893 = vadd.xlane.f32.xlu0 %v8892_v50  ;;  %8944 = vadd.xlane.f32.xlu1 %v8943_v47  ;;  %v8875_v3 = vmul.f32 %v16946_v46, %v16946_v46 }
 0xa38   : > { %v8794_v14 = vmul.f32 0.0625, %v8708_v44  ;;  %v8874_v35 = vmul.f32 %v16949_v1, %v16949_v1 }
 0xa39   : > { %v16960_v31 = vsub.f32 %v16760_v27, %v8795_v29  ;;  %v8949_v38 = vsel %vm665_vm0, %v8875_v3, 0.0 }
 0xa3a   : > { %v16963_v36 = vsub.f32 %v16764_v12, %v8794_v14  ;;  %v8765_v58 = vpop.xlane.xlu1 %8764  ;;  %v8946_v57 = vsel %vm665_vm0, %v8874_v35, 0.0 }
 0xa3b   : > { %v8813_v0 = vmul.f32 0.0625, %v8765_v58  ;;  %v8762_v33 = vpop.xlane.xlu0 %8761  ;;  %8947 = vadd.xlane.f32.xlu0 %v8946_v57  ;;  %8896 = vadd.xlane.f32.xlu1 %v8895_v61  ;;  %v8859_v43 = vmul.f32 %v16960_v31, %v16960_v31 }
 0xa3c   : > { %v8812_v24 = vmul.f32 0.0625, %v8762_v33  ;;  %v8858_v60 = vmul.f32 %v16963_v36, %v16963_v36 }
 0xa3d   : > { %v16971_v27 = vsub.f32 %v16780_v54, %v8813_v0  ;;  %v8901_v13 = vsel %vm665_vm0, %v8859_v43, 0.0 }
 0xa3e   : > { %v16974_v12 = vsub.f32 %v16782_v15, %v8812_v24  ;;  %v8717_v51 = vpop.xlane.xlu1 %8716  ;;  %v8898_v4 = vsel %vm665_vm0, %v8858_v60, 0.0 }
 0xa3f   : > { %v8797_v20 = vmul.f32 0.0625, %v8717_v51  ;;  %v8714_v37 = vpop.xlane.xlu0 %8713  ;;  %8899 = vadd.xlane.f32.xlu0 %v8898_v4  ;;  %8950 = vadd.xlane.f32.xlu1 %v8949_v38  ;;  %v8877_v42 = vmul.f32 %v16971_v27, %v16971_v27 }
 0xa40   : > { %v8796_v6 = vmul.f32 0.0625, %v8714_v37  ;;  %v8876_v2 = vmul.f32 %v16974_v12, %v16974_v12 }
 0xa41   : > { %v16982_v54 = vsub.f32 %v16785_v8, %v8797_v20  ;;  %v8955_v44 = vsel %vm665_vm0, %v8877_v42, 0.0 }
 0xa42   : > { %v16985_v15 = vsub.f32 %v16790_v41, %v8796_v6  ;;  %v8771_v59 = vpop.xlane.xlu1 %8770  ;;  %v8952_v45 = vsel %vm665_vm0, %v8876_v2, 0.0 }
 0xa43   : > { %v8815_v11 = vmul.f32 0.0625, %v8771_v59  ;;  %v8768_v25 = vpop.xlane.xlu0 %8767  ;;  %8953 = vadd.xlane.f32.xlu0 %v8952_v45  ;;  %8902 = vadd.xlane.f32.xlu1 %v8901_v13  ;;  %v8861_v41 = vmul.f32 %v16982_v54, %v16982_v54 }
 0xa44   : > { %v8814_v63 = vmul.f32 0.0625, %v8768_v25  ;;  %v8860_v8 = vmul.f32 %v16985_v15, %v16985_v15 }
 0xa45   : > { %v16996_v50 = vsub.f32 %v16806_v39, %v8815_v11  ;;  %v8907_v57 = vsel %vm665_vm0, %v8861_v41, 0.0 }
 0xa46   : > { %v16999_v47 = vsub.f32 %v16808_v52, %v8814_v63  ;;  %v8723_v5 = vpop.xlane.xlu1 %8722  ;;  %v8904_v29 = vsel %vm665_vm0, %v8860_v8, 0.0 }
 0xa47   : > { %v8799_v14 = vmul.f32 0.0625, %v8723_v5  ;;  %v8720_v35 = vpop.xlane.xlu0 %8719  ;;  %8905 = vadd.xlane.f32.xlu0 %v8904_v29  ;;  %8956 = vadd.xlane.f32.xlu1 %v8955_v44  ;;  %v8879_v33 = vmul.f32 %v16996_v50, %v16996_v50 }
 0xa48   : > { %v8798_v3 = vmul.f32 0.0625, %v8720_v35  ;;  %v8878_v58 = vmul.f32 %v16999_v47, %v16999_v47 }
 0xa49   : > { %v17007_v39 = vsub.f32 %v16811_v23, %v8799_v14  ;;  %v8961_v20 = vsel %vm665_vm0, %v8879_v33, 0.0 }
 0xa4a   : > { %v17010_v52 = vsub.f32 %v16816_v19, %v8798_v3  ;;  %v8777_v61 = vpop.xlane.xlu1 %8776  ;;  %v8958_v0 = vsel %vm665_vm0, %v8878_v58, 0.0 }
 0xa4b   : > { %v8817_v24 = vmul.f32 0.0625, %v8777_v61  ;;  %v8774_v60 = vpop.xlane.xlu0 %8773  ;;  %8959 = vadd.xlane.f32.xlu0 %v8958_v0  ;;  %8908 = vadd.xlane.f32.xlu1 %v8907_v57  ;;  %v8863_v37 = vmul.f32 %v17007_v39, %v17007_v39 }
 0xa4c   : > { %v8816_v38 = vmul.f32 0.0625, %v8774_v60  ;;  %v8862_v51 = vmul.f32 %v17010_v52, %v17010_v52 }
 0xa4d   : > { %v17018_v23 = vsub.f32 %v16832_v49, %v8817_v24  ;;  %v8913_v25 = vsel %vm665_vm0, %v8863_v37, 0.0 }
 0xa4e   : > { %v17021_v19 = vsub.f32 %v16834_v32, %v8816_v38  ;;  %v8729_v4 = vpop.xlane.xlu1 %8728  ;;  %v8910_v43 = vsel %vm665_vm0, %v8862_v51, 0.0 }
 0xa4f   : > { %v8801_v6 = vmul.f32 0.0625, %v8729_v4  ;;  %v8726_v2 = vpop.xlane.xlu0 %8725  ;;  %8911 = vadd.xlane.f32.xlu0 %v8910_v43  ;;  %8962 = vadd.xlane.f32.xlu1 %v8961_v20  ;;  %v8881_v32 = vmul.f32 %v17018_v23, %v17018_v23 }
 0xa50   : > { %v8800_v59 = vmul.f32 0.0625, %v8726_v2  ;;  %v8880_v49 = vmul.f32 %v17021_v19, %v17021_v19 }
 0xa51   : > { %v17032_v45 = vsub.f32 %v16837_v22, %v8801_v6  ;;  %v8967_v29 = vsel %vm665_vm0, %v8881_v32, 0.0 }
 0xa52   : > { %v17035_v13 = vsub.f32 %v16842_v21, %v8800_v59  ;;  %v8783_v42 = vpop.xlane.xlu1 %8782  ;;  %v8964_v11 = vsel %vm665_vm0, %v8880_v49, 0.0 }
 0xa53   : > { %v8819_v63 = vmul.f32 0.0625, %v8783_v42  ;;  %v8780_v8 = vpop.xlane.xlu0 %8779  ;;  %8965 = vadd.xlane.f32.xlu0 %v8964_v11  ;;  %8914 = vadd.xlane.f32.xlu1 %v8913_v25  ;;  %v8865_v35 = vmul.f32 %v17032_v45, %v17032_v45 }
 0xa54   : > { %v8818_v41 = vmul.f32 0.0625, %v8780_v8  ;;  %v8864_v5 = vmul.f32 %v17035_v13, %v17035_v13 }
 0xa55   : > { %v17043_v22 = vsub.f32 %v16858_v34, %v8819_v63  ;;  %v8919_v24 = vsel %vm665_vm0, %v8865_v35, 0.0  ;;  %v11785_v35 = vmov 0  }
 0xa56   : > { %v17046_v21 = vsub.f32 %v16860_v17, %v8818_v41  ;;  %v8735_v44 = vpop.xlane.xlu1 %8734  ;;  %v8916_v14 = vsel %vm665_vm0, %v8864_v5, 0.0  ;;  %11541 = vset.pattern.permute.xlu0 %v11785_v35  ;;  %11542 = vset.pattern.permute.xlu1 %v11785_v35 }
 0xa57   : > { %v8803_v3 = vmul.f32 0.0625, %v8735_v44  ;;  %v8732_v58 = vpop.xlane.xlu0 %8731  ;;  %8917 = vadd.xlane.f32.xlu0 %v8916_v14  ;;  %8968 = vadd.xlane.f32.xlu1 %v8967_v29  ;;  %v8883_v60 = vmul.f32 %v17043_v22, %v17043_v22  ;;  %v17097_v29 = vld [vmem:[%s17269_s14] sm:$0xff]  ;;  %v9177_v14 = vld [vmem:[%s17270_s15 + $0x8] sm:$0xff] }
 0xa58   : > { %v8802_v57 = vmul.f32 0.0625, %v8732_v58  ;;  %v8882_v61 = vmul.f32 %v17046_v21, %v17046_v21  ;;  %10201 = vmatprep.mubr.msk.f32.mxu0 %vm665_vm0, %v17097_v29  ;;  %v9176_v44 = vld [vmem:[%s17270_s15] sm:$0xff] }
 0xa59   : > { %v17054_v34 = vsub.f32 %v16863_v48, %v8803_v3  ;;  %v8973_v2 = vsel %vm665_vm0, %v8883_v60, 0.0 }
 0xa5a   : > { %v17057_v17 = vsub.f32 %v16868_v9, %v8802_v57  ;;  %v8789_v0 = vpop.xlane.xlu1 %8788  ;;  %v8970_v33 = vsel %vm665_vm0, %v8882_v61, 0.0 }
 0xa5b   : > { %v8821_v38 = vmul.f32 0.0625, %v8789_v0  ;;  %v8786_v51 = vpop.xlane.xlu0 %8785  ;;  %8971 = vadd.xlane.f32.xlu0 %v8970_v33  ;;  %8920 = vadd.xlane.f32.xlu1 %v8919_v24  ;;  %v8867_v9 = vmul.f32 %v17054_v34, %v17054_v34 }
 0xa5c   : > { %v8820_v4 = vmul.f32 0.0625, %v8786_v51  ;;  %v8866_v48 = vmul.f32 %v17057_v17, %v17057_v17 }
 0xa5d   : > { %v17068_v43 = vsub.f32 %v16884_v56, %v8821_v38  ;;  %v8925_v11 = vsel %vm665_vm0, %v8867_v9, 0.0 }
 0xa5e   : > { %v17071_v20 = vsub.f32 %v16886_v18, %v8820_v4  ;;  %v8741_v37 = vpop.xlane.xlu1 %8740  ;;  %v8922_v6 = vsel %vm665_vm0, %v8866_v48, 0.0 }
 0xa5f   : > { %v8805_v59 = vmul.f32 0.0625, %v8741_v37  ;;  %v8738_v49 = vpop.xlane.xlu0 %8737  ;;  %8923 = vadd.xlane.f32.xlu0 %v8922_v6  ;;  %8974 = vadd.xlane.f32.xlu1 %v8973_v2  ;;  %v8885_v63 = vmul.f32 %v17068_v43, %v17068_v43 }
 0xa60   : > { %v8804_v32 = vmul.f32 0.0625, %v8738_v49  ;;  %v8884_v42 = vmul.f32 %v17071_v20, %v17071_v20 }
 0xa61   : > { %v17079_v56 = vsub.f32 %v16889_v16, %v8805_v59  ;;  %v8979_v5 = vsel %vm665_vm0, %v8885_v63, 0.0 }
 0xa62   : > { %v17082_v18 = vsub.f32 %v16894_v40, %v8804_v32  ;;  %v8976_v25 = vsel %vm665_vm0, %v8884_v42, 0.0 }
 0xa63   : > { %8977 = vadd.xlane.f32.xlu0 %v8976_v25  ;;  %8926 = vadd.xlane.f32.xlu1 %v8925_v11  ;;  %v8869_v16 = vmul.f32 %v17079_v56, %v17079_v56 }
 0xa64   : > { %v8868_v8 = vmul.f32 %v17082_v18, %v17082_v18 }
 0xa65   : > { %v8931_v40 = vsel %vm665_vm0, %v8869_v16, 0.0 }
 0xa66   : > { %v8928_v41 = vsel %vm665_vm0, %v8868_v8, 0.0 }
 0xa67   : > { %8929 = vadd.xlane.f32.xlu0 %v8928_v41  ;;  %8980 = vadd.xlane.f32.xlu1 %v8979_v5 }
 0xa6b   : > { %8932 = vadd.xlane.f32.xlu1 %v8931_v40 }
 0xa7c   : > { %9185 = vperm.xlu1 %11542, %v9177_v14  }
 0xa7d   : > { %9180 = vperm.xlu0 %11541, %v9176_v44  }
 0xab8   : > { %v8936_v3 = vpop.xlane.xlu0 %8935 }
 0xab9   : > { %v8998_v58 = vmul.f32 0.0625, %v8936_v3 }
 0xabb   : > { %v9030_v57 = vadd.f32 1e-05, %v8998_v58 }
 0xabc   : > { %v8888_v61 = vpop.xlane.xlu0 %8887  ;;  %v8939_v0 = vpop.xlane.xlu1 %8938 }
 0xabd   : > { %11671 = vrsqrt.f32 %v9030_v57  ;;  %v8982_v33 = vmul.f32 0.0625, %v8888_v61  ;;  %v8999_v24 = vmul.f32 0.0625, %v8939_v0 }
 0xabf   : > { %v9014_v60 = vadd.f32 1e-05, %v8982_v33  ;;  %v9031_v38 = vadd.f32 1e-05, %v8999_v24  ;;  %v18123_v24 = vld [vmem:[#allocation6_spill] sm:$0xff] }
 0xac0   : > { %v8942_v51 = vpop.xlane.xlu0 %8941  ;;  %v8891_v4 = vpop.xlane.xlu1 %8890 }
 0xac1   : > { %11673 = vrsqrt.f32 %v9014_v60  ;;  %v9000_v48 = vmul.f32 0.0625, %v8942_v51  ;;  %v8983_v9 = vmul.f32 0.0625, %v8891_v4 }
 0xac2   : > { %11675 = vrsqrt.f32 %v9031_v38 }
 0xac3   : > { %v9032_v37 = vadd.f32 1e-05, %v9000_v48  ;;  %v9015_v6 = vadd.f32 1e-05, %v8983_v9 }
 0xac4   : > { %v8894_v2 = vpop.xlane.xlu0 %8893  ;;  %v8945_v59 = vpop.xlane.xlu1 %8944 }
 0xac5   : > { %11677 = vrsqrt.f32 %v9032_v37  ;;  %v8984_v49 = vmul.f32 0.0625, %v8894_v2  ;;  %v9001_v32 = vmul.f32 0.0625, %v8945_v59 }
 0xac6   : > { %11679 = vrsqrt.f32 %v9015_v6 }
 0xac7   : > { %v11672_v42 = vpop.eup %11671  ;;  %v9016_v11 = vadd.f32 1e-05, %v8984_v49  ;;  %v9033_v25 = vadd.f32 1e-05, %v9001_v32 }
 0xac8   : > { %v8948_v63 = vpop.xlane.xlu0 %8947  ;;  %v8897_v8 = vpop.xlane.xlu1 %8896  ;;  %v9094_v16 = vmul.f32 %v11672_v42, %v16906_v62 }
 0xac9   : > { %11681 = vrsqrt.f32 %v9016_v11  ;;  %v9002_v41 = vmul.f32 0.0625, %v8948_v63  ;;  %v8985_v5 = vmul.f32 0.0625, %v8897_v8 }
 0xaca   : > { %11683 = vrsqrt.f32 %v9033_v25  ;;  %v9126_v60 = vmul.f32 %v18123_v24, %v9094_v16 }
 0xacb   : > { %v11674_v40 = vpop.eup %11673  ;;  %v9034_v44 = vadd.f32 1e-05, %v9002_v41  ;;  %v9017_v14 = vadd.f32 1e-05, %v8985_v5 }
 0xacc   : > { %v11676_v35 = vpop.eup %11675  ;;  %v9078_v3 = vmul.f32 %v11674_v40, %v16903_v30  ;;  %v8900_v58 = vpop.xlane.xlu0 %8899 }
 0xacd   : > { %v8951_v57 = vpop.xlane.xlu1 %8950  ;;  %11685 = vrsqrt.f32 %v9034_v44  ;;  %v8986_v61 = vmul.f32 0.0625, %v8900_v58  ;;  %v9095_v33 = vmul.f32 %v11676_v35, %v16914_v26  ;;  %v18124_v26 = vld [vmem:[#allocation7_spill] sm:$0xff] }
 0xace   : > { %v9003_v0 = vmul.f32 0.0625, %v8951_v57  ;;  %11687 = vrsqrt.f32 %v9017_v14  ;;  %v9110_v9 = vmul.f32 %v18123_v24, %v9078_v3  ;;  %v9158_v49 = vadd.f32 %v18124_v26, %v9126_v60 }
 0xacf   : > { %v11678_v38 = vpop.eup %11677  ;;  %v9018_v51 = vadd.f32 1e-05, %v8986_v61  ;;  %v9127_v62 = vmul.f32 %v18123_v24, %v9095_v33 }
 0xad0   : > { %v9035_v4 = vadd.f32 1e-05, %v9003_v0  ;;  %v11680_v48 = vpop.eup %11679  ;;  %v8954_v37 = vpop.xlane.xlu0 %8953  ;;  %v9096_v42 = vmul.f32 %v11678_v38, %v16927_v53  ;;  %v9142_v5 = vadd.f32 %v18124_v26, %v9110_v9 }
 0xad1   : > { %v8903_v30 = vpop.xlane.xlu1 %8902  ;;  %v9079_v6 = vmul.f32 %v11680_v48, %v16911_v10  ;;  %11689 = vrsqrt.f32 %v9018_v51  ;;  %v9004_v2 = vmul.f32 0.0625, %v8954_v37  ;;  %v9159_v32 = vadd.f32 %v18124_v26, %v9127_v62 }
 0xad2   : > { %v8987_v59 = vmul.f32 0.0625, %v8903_v30  ;;  %11691 = vrsqrt.f32 %v9035_v4  ;;  %v9128_v57 = vmul.f32 %v18123_v24, %v9096_v42 }
 0xad3   : > { %v11682_v11 = vpop.eup %11681  ;;  %v9111_v25 = vmul.f32 %v18123_v24, %v9079_v6  ;;  %v9036_v63 = vadd.f32 1e-05, %v9004_v2  ;;  %v10765_v44 = vpack.c.bf16 %v9159_v32, %v9158_v49 }
 0xad4   : > { %v9019_v8 = vadd.f32 1e-05, %v8987_v59  ;;  %v11684_v10 = vpop.eup %11683  ;;  %v9080_v16 = vmul.f32 %v11682_v11, %v16938_v7  ;;  %v8906_v40 = vpop.xlane.xlu0 %8905  ;;  %v9160_v37 = vadd.f32 %v18124_v26, %v9128_v57 }
 0xad5   : > { %v8957_v14 = vpop.xlane.xlu1 %8956  ;;  %v9143_v53 = vadd.f32 %v18124_v26, %v9111_v25  ;;  %11693 = vrsqrt.f32 %v9036_v63  ;;  %v8988_v35 = vmul.f32 0.0625, %v8906_v40  ;;  %10767 = vmatprep.subr.msk.bf16.mxu0 %vm17120_vm1, %v10765_v44  ;;  %v9097_v58 = vmul.f32 %v11684_v10, %v16924_v28 }
 0xad6   : > { %v9005_v3 = vmul.f32 0.0625, %v8957_v14  ;;  %11695 = vrsqrt.f32 %v9019_v8  ;;  %v9112_v38 = vmul.f32 %v18123_v24, %v9080_v16 }
 0xad7   : > { %v11686_v61 = vpop.eup %11685  ;;  %v9020_v0 = vadd.f32 1e-05, %v8988_v35  ;;  %v10768_v7 = vpack.c.bf16 %v9143_v53, %v9142_v5  ;;  %v9129_v62 = vmul.f32 %v18123_v24, %v9097_v58 }
 0xad8   : > { %v9037_v33 = vadd.f32 1e-05, %v9005_v3  ;;  %v11688_v60 = vpop.eup %11687  ;;  %v8960_v51 = vpop.xlane.xlu0 %8959  ;;  %v9098_v6 = vmul.f32 %v11686_v61, %v16949_v1 }
 0xad9   : > { %v8909_v4 = vpop.xlane.xlu1 %8908  ;;  %v9081_v48 = vmul.f32 %v11688_v60, %v16935_v55  ;;  %11697 = vrsqrt.f32 %v9020_v0  ;;  %v9006_v9 = vmul.f32 0.0625, %v8960_v51  ;;  %10770 = vmatpush3.bf16.xpose.msk.msra.mxu0 %vm17120_vm1, %v10768_v7  ;;  %v9161_v30 = vadd.f32 %v18124_v26, %v9129_v62 }
 0xada   : > { %v8989_v28 = vmul.f32 0.0625, %v8909_v4  ;;  %11699 = vrsqrt.f32 %v9037_v33  ;;  %v9144_v55 = vadd.f32 %v18124_v26, %v9112_v38  ;;  %v9130_v40 = vmul.f32 %v18123_v24, %v9098_v6 }
 0xadb   : > { %v11690_v2 = vpop.eup %11689  ;;  %v9113_v59 = vmul.f32 %v18123_v24, %v9081_v48  ;;  %v9038_v49 = vadd.f32 1e-05, %v9006_v9  ;;  %v10771_v63 = vpack.c.bf16 %v9161_v30, %v9160_v37 }
 0xadc   : > { %v9021_v32 = vadd.f32 1e-05, %v8989_v28  ;;  %v11692_v42 = vpop.eup %11691  ;;  %v9082_v11 = vmul.f32 %v11690_v2, %v16963_v36  ;;  %v8912_v25 = vpop.xlane.xlu0 %8911  ;;  %v9162_v7 = vadd.f32 %v18124_v26, %v9130_v40 }
 0xadd   : > { %v8963_v8 = vpop.xlane.xlu1 %8962  ;;  %v9145_v10 = vadd.f32 %v18124_v26, %v9113_v59  ;;  %11701 = vrsqrt.f32 %v9038_v49  ;;  %v8990_v5 = vmul.f32 0.0625, %v8912_v25  ;;  %10773 = vmatprep.subr.msk.bf16.mxu0 %vm17120_vm1, %v10771_v63  ;;  %v9099_v1 = vmul.f32 %v11692_v42, %v16946_v46 }
 0xade   : > { %v9007_v16 = vmul.f32 0.0625, %v8963_v8  ;;  %11703 = vrsqrt.f32 %v9021_v32  ;;  %v9114_v3 = vmul.f32 %v18123_v24, %v9082_v11 }
 0xadf   : > { %v11694_v44 = vpop.eup %11693  ;;  %v9022_v14 = vadd.f32 1e-05, %v8990_v5  ;;  %v10774_v36 = vpack.c.bf16 %v9145_v10, %v9144_v55  ;;  %v9131_v61 = vmul.f32 %v18123_v24, %v9099_v1 }
 0xae0   : > { %v9039_v53 = vadd.f32 1e-05, %v9007_v16  ;;  %v11696_v35 = vpop.eup %11695  ;;  %v8966_v58 = vpop.xlane.xlu0 %8965  ;;  %v9100_v38 = vmul.f32 %v11694_v44, %v16974_v12 }
 0xae1   : > { %v8915_v57 = vpop.xlane.xlu1 %8914  ;;  %v9083_v0 = vmul.f32 %v11696_v35, %v16960_v31  ;;  %11705 = vrsqrt.f32 %v9022_v14  ;;  %v9008_v33 = vmul.f32 0.0625, %v8966_v58  ;;  %10776 = vmatpush3.bf16.xpose.msk.msra.mxu0 %vm17120_vm1, %v10774_v36  ;;  %v9163_v60 = vadd.f32 %v18124_v26, %v9131_v61 }
 0xae2   : > { %v8991_v46 = vmul.f32 0.0625, %v8915_v57  ;;  %11707 = vrsqrt.f32 %v9039_v53  ;;  %v9146_v31 = vadd.f32 %v18124_v26, %v9114_v3  ;;  %v9132_v32 = vmul.f32 %v18123_v24, %v9100_v38 }
 0xae3   : > { %v11698_v51 = vpop.eup %11697  ;;  %v9115_v4 = vmul.f32 %v18123_v24, %v9083_v0  ;;  %v9040_v62 = vadd.f32 1e-05, %v9008_v33  ;;  %v10777_v30 = vpack.c.bf16 %v9163_v60, %v9162_v7 }
 0xae4   : > { %v9023_v48 = vadd.f32 1e-05, %v8991_v46  ;;  %v11700_v9 = vpop.eup %11699  ;;  %v9084_v28 = vmul.f32 %v11698_v51, %v16985_v15  ;;  %v8918_v37 = vpop.xlane.xlu0 %8917  ;;  %v9164_v40 = vadd.f32 %v18124_v26, %v9132_v32 }
 0xae5   : > { %v8969_v6 = vpop.xlane.xlu1 %8968  ;;  %v9147_v2 = vadd.f32 %v18124_v26, %v9115_v4  ;;  %11709 = vrsqrt.f32 %v9040_v62  ;;  %v8992_v59 = vmul.f32 0.0625, %v8918_v37  ;;  %10779 = vmatprep.subr.msk.bf16.mxu0 %vm17120_vm1, %v10777_v30  ;;  %v9101_v12 = vmul.f32 %v11700_v9, %v16971_v27 }
 0xae6   : > { %v9009_v49 = vmul.f32 0.0625, %v8969_v6  ;;  %11711 = vrsqrt.f32 %v9023_v48  ;;  %v9116_v63 = vmul.f32 %v18123_v24, %v9084_v28 }
 0xae7   : > { %v11702_v42 = vpop.eup %11701  ;;  %v9024_v55 = vadd.f32 1e-05, %v8992_v59  ;;  %v10780_v15 = vpack.c.bf16 %v9147_v2, %v9146_v31  ;;  %v9133_v5 = vmul.f32 %v18123_v24, %v9101_v12 }
 0xae8   : > { %v9041_v11 = vadd.f32 1e-05, %v9009_v49  ;;  %v11704_v25 = vpop.eup %11703  ;;  %v8972_v8 = vpop.xlane.xlu0 %8971  ;;  %v9102_v14 = vmul.f32 %v11702_v42, %v16999_v47 }
 0xae9   : > { %v8921_v10 = vpop.xlane.xlu1 %8920  ;;  %v9085_v16 = vmul.f32 %v11704_v25, %v16982_v54  ;;  %11713 = vrsqrt.f32 %v9024_v55  ;;  %v9010_v1 = vmul.f32 0.0625, %v8972_v8  ;;  %10782 = vmatpush3.bf16.xpose.msk.msra.mxu0 %vm17120_vm1, %v10780_v15  ;;  %v9165_v44 = vadd.f32 %v18124_v26, %v9133_v5 }
 0xaea   : > { %v8993_v27 = vmul.f32 0.0625, %v8921_v10  ;;  %11715 = vrsqrt.f32 %v9041_v11  ;;  %v9148_v54 = vadd.f32 %v18124_v26, %v9116_v63  ;;  %v9134_v38 = vmul.f32 %v18123_v24, %v9102_v14 }
 0xaeb   : > { %v11706_v53 = vpop.eup %11705  ;;  %v9117_v36 = vmul.f32 %v18123_v24, %v9085_v16  ;;  %v9042_v35 = vadd.f32 1e-05, %v9010_v1  ;;  %v10783_v0 = vpack.c.bf16 %v9165_v44, %v9164_v40 }
 0xaec   : > { %v9025_v3 = vadd.f32 1e-05, %v8993_v27  ;;  %v11708_v58 = vpop.eup %11707  ;;  %v9086_v57 = vmul.f32 %v11706_v53, %v17010_v52  ;;  %v8924_v61 = vpop.xlane.xlu0 %8923  ;;  %v9166_v2 = vadd.f32 %v18124_v26, %v9134_v38 }
 0xaed   : > { %v8975_v33 = vpop.xlane.xlu1 %8974  ;;  %v9149_v46 = vadd.f32 %v18124_v26, %v9117_v36  ;;  %11717 = vrsqrt.f32 %v9042_v35  ;;  %v8994_v7 = vmul.f32 0.0625, %v8924_v61  ;;  %10785 = vmatprep.subr.msk.bf16.mxu0 %vm17120_vm1, %v10783_v0  ;;  %v9103_v47 = vmul.f32 %v11708_v58, %v16996_v50 }
 0xaee   : > { %v9011_v60 = vmul.f32 0.0625, %v8975_v33  ;;  %11719 = vrsqrt.f32 %v9025_v3  ;;  %v9118_v9 = vmul.f32 %v18123_v24, %v9086_v57 }
 0xaef   : > { %v11710_v51 = vpop.eup %11709  ;;  %v9026_v4 = vadd.f32 1e-05, %v8994_v7  ;;  %v10786_v52 = vpack.c.bf16 %v9149_v46, %v9148_v54  ;;  %v9135_v37 = vmul.f32 %v18123_v24, %v9103_v47 }
 0xaf0   : > { %v9043_v62 = vadd.f32 1e-05, %v9011_v60  ;;  %v11712_v48 = vpop.eup %11711  ;;  %v8978_v31 = vpop.xlane.xlu0 %8977  ;;  %v9104_v49 = vmul.f32 %v11710_v51, %v17021_v19 }
 0xaf1   : > { %v8927_v28 = vpop.xlane.xlu1 %8926  ;;  %v9087_v30 = vmul.f32 %v11712_v48, %v17007_v39  ;;  %11721 = vrsqrt.f32 %v9026_v4  ;;  %v9012_v6 = vmul.f32 0.0625, %v8978_v31  ;;  %10788 = vmatpush3.bf16.xpose.msk.msra.mxu0 %vm17120_vm1, %v10786_v52  ;;  %v9167_v59 = vadd.f32 %v18124_v26, %v9135_v37 }
 0xaf2   : > { %v8995_v50 = vmul.f32 0.0625, %v8927_v28  ;;  %11723 = vrsqrt.f32 %v9043_v62  ;;  %v9150_v39 = vadd.f32 %v18124_v26, %v9118_v9  ;;  %v9136_v1 = vmul.f32 %v18123_v24, %v9104_v49 }
 0xaf3   : > { %v11714_v12 = vpop.eup %11713  ;;  %v9119_v32 = vmul.f32 %v18123_v24, %v9087_v30  ;;  %v9044_v42 = vadd.f32 1e-05, %v9012_v6  ;;  %v10789_v63 = vpack.c.bf16 %v9167_v59, %v9166_v2 }
 0xaf4   : > { %v9027_v55 = vadd.f32 1e-05, %v8995_v50  ;;  %v11716_v11 = vpop.eup %11715  ;;  %v9088_v15 = vmul.f32 %v11714_v12, %v17035_v13  ;;  %v8930_v25 = vpop.xlane.xlu0 %8929  ;;  %v9168_v54 = vadd.f32 %v18124_v26, %v9136_v1 }
 0xaf5   : > { %v8981_v8 = vpop.xlane.xlu1 %8980  ;;  %v9151_v10 = vadd.f32 %v18124_v26, %v9119_v32  ;;  %11725 = vrsqrt.f32 %v9044_v42  ;;  %v8996_v5 = vmul.f32 0.0625, %v8930_v25  ;;  %10791 = vmatprep.subr.msk.bf16.mxu0 %vm17120_vm1, %v10789_v63  ;;  %v9105_v19 = vmul.f32 %v11716_v11, %v17018_v23  ;;  %v9175_v63 = vld [vmem:[%s17269_s14 + $0x8] sm:$0xff] }
 0xaf6   : > { %v9013_v16 = vmul.f32 0.0625, %v8981_v8  ;;  %11727 = vrsqrt.f32 %v9027_v55  ;;  %v9120_v53 = vmul.f32 %v18123_v24, %v9088_v15 }
 0xaf7   : > { %v11718_v27 = vpop.eup %11717  ;;  %v9028_v40 = vadd.f32 1e-05, %v8996_v5  ;;  %v10792_v13 = vpack.c.bf16 %v9151_v10, %v9150_v39  ;;  %v9137_v35 = vmul.f32 %v18123_v24, %v9105_v19 }
 0xaf8   : > { %v9045_v44 = vadd.f32 1e-05, %v9013_v16  ;;  %v11720_v14 = vpop.eup %11719  ;;  %v9106_v3 = vmul.f32 %v11718_v27, %v17046_v21  ;;  %v9152_v7 = vadd.f32 %v18124_v26, %v9120_v53 }
 0xaf9   : > { %v8933_v36 = vpop.xlane.xlu1 %8932  ;;  %v9089_v58 = vmul.f32 %v11720_v14, %v17032_v45  ;;  %11729 = vrsqrt.f32 %v9028_v40  ;;  %10794 = vmatpush3.bf16.xpose.msk.msra.mxu0 %vm17120_vm1, %v10792_v13  ;;  %v9169_v57 = vadd.f32 %v18124_v26, %v9137_v35 }
 0xafa   : > { %v8997_v23 = vmul.f32 0.0625, %v8933_v36  ;;  %11731 = vrsqrt.f32 %v9045_v44  ;;  %v9138_v45 = vmul.f32 %v18123_v24, %v9106_v3 }
 0xafb   : > { %v11722_v61 = vpop.eup %11721  ;;  %v9121_v0 = vmul.f32 %v18123_v24, %v9089_v58  ;;  %v10795_v21 = vpack.c.bf16 %v9169_v57, %v9168_v54 }
 0xafc   : > { %v9029_v33 = vadd.f32 1e-05, %v8997_v23  ;;  %v11724_v46 = vpop.eup %11723  ;;  %v9090_v47 = vmul.f32 %v11722_v61, %v17057_v17  ;;  %v9170_v48 = vadd.f32 %v18124_v26, %v9138_v45 }
 0xafd   : > { %v9153_v60 = vadd.f32 %v18124_v26, %v9121_v0  ;;  %v9107_v38 = vmul.f32 %v11724_v46, %v17043_v22  ;;  %10797 = vmatprep.subr.msk.bf16.mxu0 %vm17120_vm1, %v10795_v21  ;;  %v9186_v41 = vpop.permute.xlu1 %9185 }
 0xafe   : > { %11733 = vrsqrt.f32 %v9029_v33  ;;  %v9122_v9 = vmul.f32 %v18123_v24, %v9090_v47 }
 0xaff   : > { %v11726_v51 = vpop.eup %11725  ;;  %v10798_v4 = vpack.c.bf16 %v9153_v60, %v9152_v7  ;;  %v9139_v62 = vmul.f32 %v18123_v24, %v9107_v38 }
 0xb00   : > { %v11728_v52 = vpop.eup %11727  ;;  %v9108_v22 = vmul.f32 %v11726_v51, %v17071_v20  ;;  %v9154_v2 = vadd.f32 %v18124_v26, %v9122_v9 }
 0xb01   : > { %v9091_v31 = vmul.f32 %v11728_v52, %v17054_v34  ;;  %10800 = vmatpush3.bf16.xpose.msk.msra.mxu0 %vm17120_vm1, %v10798_v4  ;;  %v9171_v17 = vadd.f32 %v18124_v26, %v9139_v62 }
 0xb02   : > { %v9140_v49 = vmul.f32 %v18123_v24, %v9108_v22 }
 0xb03   : > { %v11730_v28 = vpop.eup %11729  ;;  %v9123_v37 = vmul.f32 %v18123_v24, %v9091_v31  ;;  %v10801_v30 = vpack.c.bf16 %v9171_v17, %v9170_v48 }
 0xb04   : > { %v11732_v6 = vpop.eup %11731  ;;  %v9092_v50 = vmul.f32 %v11730_v28, %v17082_v18  ;;  %v9172_v18 = vadd.f32 %v18124_v26, %v9140_v49 }
 0xb05   : > { %v9155_v59 = vadd.f32 %v18124_v26, %v9123_v37  ;;  %10803 = vmatprep.subr.msk.bf16.mxu0 %vm17120_vm1, %v10801_v30  ;;  %v9109_v34 = vmul.f32 %v11732_v6, %v17068_v43 }
 0xb06   : > { %v9124_v42 = vmul.f32 %v18123_v24, %v9092_v50 }
 0xb07   : > { %v10804_v20 = vpack.c.bf16 %v9155_v59, %v9154_v2  ;;  %v9141_v32 = vmul.f32 %v18123_v24, %v9109_v34 }
 0xb08   : > { %v11734_v12 = vpop.eup %11733  ;;  %v9156_v15 = vadd.f32 %v18124_v26, %v9124_v42 }
 0xb09   : > { %v9093_v55 = vmul.f32 %v11734_v12, %v17079_v56  ;;  %10806 = vmatpush3.bf16.xpose.msk.msra.mxu0 %vm17120_vm1, %v10804_v20  ;;  %v9173_v11 = vadd.f32 %v18124_v26, %v9141_v32 }
 0xb0b   : > { %v9125_v39 = vmul.f32 %v18123_v24, %v9093_v55  ;;  %v10807_v43 = vpack.c.bf16 %v9173_v11, %v9172_v18  ;;  %v9181_v24 = vpop.permute.xlu0 %9180 }
 0xb0d   : > { %v9157_v25 = vadd.f32 %v18124_v26, %v9125_v39  ;;  %10809 = vmatprep.subr.msk.bf16.mxu0 %vm17120_vm1, %v10807_v43 }
 0xb0f   : > { %v10810_v56 = vpack.c.bf16 %v9157_v25, %v9156_v15 }
 0xb11   : > { %10812 = vmatpush3.bf16.xpose.msk.msra.mxu0 %vm17120_vm1, %v10810_v56 }
 0xb18   : > { %10202 = vmatmul.mubr.msk.f32.vlgmr.msra.gmra.mrb[158].mxu0 %vm665_vm0, %v17097_v29 }
 0xb19   : > { %10203 = vmatprep.mubr.msk.f32.mxu0 %vm665_vm0, %v9175_v63 }
 0xb1c   : > { %10204 = vmatmul.mubr.msk.f32.gmra.mrb[160].mxu0 %vm665_vm0, %v9175_v63 }
 0xbeb   : > { %v9356_v26 = vpop.f32.mrb[158].mxu0 }
 0xbec   : > { %v9357_v8 = vadd.f32 %v9356_v26, %v9181_v24  ;;  %v9358_v10 = vpop.f32.mrb[159].mxu0 }
 0xbed   : > { %v9359_v5 = vadd.f32 %v9358_v10, %v9181_v24 }
 0xbee   : > { %9367 = vst [vmem:[%s11910_s29] sm:$0xff] %v9357_v8 }
 0xbef   : > { %9368 = vst [vmem:[%s11910_s29 + $0x8] sm:$0xff] %v9359_v5  ;;  %v9362_v16 = vpop.f32.mrb[160].mxu0 }
 0xbf0   : > { %v9364_v19 = vpop.f32.mrb[161].mxu0  ;;  %v9363_v1 = vadd.f32 %v9362_v16, %v9186_v41 }
 0xbf1   : > { %v9365_v27 = vadd.f32 %v9364_v19, %v9186_v41 }
 0xbf2   : > { %9369 = vst [vmem:[%s11910_s29 + $0x10] sm:$0xff] %v9363_v1 }
 0xbf3   : > { %9370 = vst [vmem:[%s11910_s29 + $0x18] sm:$0xff] %v9365_v27 }
 0xbf4 PF: > { %s31_s23 = sadd.s32 1, %s11761_s23  }
 0xbf5   : > { %p28_p5 = scmp.ge.s32.totalorder %s31_s23, 4  }
 0xbf7   :  { %30 = sbr.rel (!%p28_p5) target bundleno = 7 (0x7), region = 151 }

</bundles_post_ra>
